<compile_context>
chip_gen: v6e
topology: v6e:2x2x1
jax: 0.10.0
libtpu: 0.0.40
codegen_flags: <defaults>
</compile_context>

<pallas_src>
import math
from functools import partial

import numpy as np
import jax
import jax.numpy as jnp
from jax.experimental import pallas as pl
from jax.experimental.pallas import tpu as pltpu

# Module hyper-parameters (from the PyTorch source).
NHEAD = 4
ATT_HIDDEN = 128
INPUT_SIZE = 10
LSTM_HIDDEN = 128
NUM_LAYERS = 2
OUTPUT_SIZE = 1


def _full_spec(shape):
    """BlockSpec covering the whole array (grid=(1,))."""
    shape = tuple(int(s) for s in shape)
    nd = len(shape)
    return pl.BlockSpec(shape, lambda i, _nd=nd: (0,) * _nd)


# ----------------------------------------------------------------------------
# Fused kernel: attention + 2-layer BiLSTM + FC.
# All row-major activations are time-major: row index = t * B + b.
# ----------------------------------------------------------------------------
def fused_kernel(B, S, F, E, H, nhead,
                 x_ref, mask_ref,
                 wq, bq, wk, bk, wv, bv, wo, bo,
                 wih0f, whh0f, b0f, wih0b, whh0b, b0b,
                 wih1f, whh1f, b1f, wih1b, b1b,
                 fcw, fcb,
                 out_ref,
                 xg_scr, buf_tm):
    hd = E // nhead

    # ---------------- Attention (q/k/v Linear folded into in-projection) ------
    x = x_ref[...]                                           # (S*B, F) time-major
    q = jnp.dot(x, wq[...], preferred_element_type=jnp.float32) + bq[...]
    k = jnp.dot(x, wk[...], preferred_element_type=jnp.float32) + bk[...]
    v = jnp.dot(x, wv[...], preferred_element_type=jnp.float32) + bv[...]
    mask = mask_ref[...]                                     # (S*B, S*B) additive

    heads = []
    for h in range(nhead):
        sl = slice(h * hd, (h + 1) * hd)
        qh = q[:, sl]                                        # scale folded in wq/bq
        kh = k[:, sl]
        vh = v[:, sl]
        # scores over ALL rows; the additive mask kills cross-batch pairs.
        s = jax.lax.dot_general(qh, kh, (((1,), (1,)), ((), ())),
                                preferred_element_type=jnp.float32) + mask
        s = s - jnp.max(s, axis=-1, keepdims=True)
        p = jnp.exp(s)
        p = p / jnp.sum(p, axis=-1, keepdims=True)
        heads.append(jnp.dot(p, vh, preferred_element_type=jnp.float32))
    att = (jnp.dot(jnp.concatenate(heads, axis=-1), wo[...],
                   preferred_element_type=jnp.float32) + bo[...])  # (S*B, E)

    # ---------------- LSTM gate helper ----------------------------------------
    def lstm_step(g, c):
        i_g = jax.nn.sigmoid(g[:, 0:H])
        f_g = jax.nn.sigmoid(g[:, H:2 * H])
        g_g = jnp.tanh(g[:, 2 * H:3 * H])
        o_g = jax.nn.sigmoid(g[:, 3 * H:4 * H])
        c_n = f_g * c + i_g * g_g
        h_n = o_g * jnp.tanh(c_n)
        return h_n, c_n

    # ---------------- Layer 1 (both directions, all timesteps kept) -----------
    # Input projection hoisted out of the recurrence; hidden states streamed
    # into the time-major buffer buf_tm[t*B:(t+1)*B, dir*H:(dir+1)*H].
    for (wih, whh, bias, reverse, col) in (
            (wih0f, whh0f, b0f, False, 0),
            (wih0b, whh0b, b0b, True, 1)):
        xg_scr[...] = (jnp.dot(att, wih[...], preferred_element_type=jnp.float32)
                       + bias[...])                          # (S*B, 4H)
        whh_v = whh[...]                                     # (H, 4H)
        h = jnp.zeros((B, H), jnp.float32)
        c = jnp.zeros((B, H), jnp.float32)
        order = range(S - 1, -1, -1) if reverse else range(S)
        for t in order:
            g = xg_scr[t * B:(t + 1) * B, :] + jnp.dot(
                h, whh_v, preferred_element_type=jnp.float32)
            h, c = lstm_step(g, c)
            buf_tm[t * B:(t + 1) * B, col * H:(col + 1) * H] = h

    # ---------------- Layer 2 forward: full recurrence, keep final h only -----
    l1 = buf_tm[...]                                         # (S*B, 2H) time-major
    xg_scr[...] = (jnp.dot(l1, wih1f[...], preferred_element_type=jnp.float32)
                   + b1f[...])
    whh_v = whh1f[...]
    h = jnp.zeros((B, H), jnp.float32)
    c = jnp.zeros((B, H), jnp.float32)
    for t in range(S):
        g = xg_scr[t * B:(t + 1) * B, :] + jnp.dot(
            h, whh_v, preferred_element_type=jnp.float32)
        h, c = lstm_step(g, c)
    h_fwd_last = h

    # ---------------- Layer 2 backward: only position S-1 reaches the FC, -----
    # and that is exactly the first reverse step from zero state (h0=c0=0, so
    # the h@Whh and f*c terms vanish; later reverse steps never feed the FC).
    g = (jnp.dot(l1[(S - 1) * B:S * B, :], wih1b[...],
                 preferred_element_type=jnp.float32) + b1b[...])
    h_bwd_last, _ = lstm_step(g, jnp.zeros((B, H), jnp.float32))

    # ---------------- FC on the last timestep's concatenated hidden state -----
    last = jnp.concatenate([h_fwd_last, h_bwd_last], axis=-1)   # (B, 2H)
    out_ref[...] = (jnp.sum(last * fcw[...], axis=-1, keepdims=True)
                    + fcb[...])


# ----------------------------------------------------------------------------
# Host-side weight fusion: fold q/k/v Linear into the MHA in-projection and
# fold the 1/sqrt(head_dim) scaling into the fused q weights.
# ----------------------------------------------------------------------------
def prepare_kernel_params(p):
    E = ATT_HIDDEN
    hd = E // NHEAD
    scale = 1.0 / math.sqrt(hd)
    kp = {}
    kp['wq'] = (p['wq_t'] @ p['wiq_t']) * scale              # (F, E)
    kp['bq'] = (p['bq'] @ p['wiq_t'] + p['biq']) * scale     # (1, E)
    kp['wk'] = p['wk_t'] @ p['wik_t']
    kp['bk'] = p['bk'] @ p['wik_t'] + p['bik']
    kp['wv'] = p['wv_t'] @ p['wiv_t']
    kp['bv'] = p['bv'] @ p['wiv_t'] + p['biv']
    kp['wo'] = p['wo_t']
    kp['bo'] = p['bo']
    for layer in range(NUM_LAYERS):
        for d in range(2):
            kp[f'wih_{layer}_{d}'] = p[f'wih_{layer}_{d}']
            kp[f'whh_{layer}_{d}'] = p[f'whh_{layer}_{d}']
            kp[f'b_{layer}_{d}'] = p[f'b_{layer}_{d}']
    kp['fc_w'] = p['fc_w']
    kp['fc_b'] = p['fc_b']
    return kp


def att_bilstm_forward(x, params):
    B, S, F = x.shape
    E, H = ATT_HIDDEN, LSTM_HIDDEN
    kp = prepare_kernel_params(params)

    # Time-major flat view: row index = t*B + b  (host-side transpose is free).
    x_tm = jnp.transpose(x, (1, 0, 2)).reshape(S * B, F)
    # Additive block mask: attend only within the same batch element.
    bid = np.arange(S * B) % B
    mask = np.where(bid[:, None] == bid[None, :], 0.0, -1e9).astype(np.float32)
    mask = jnp.asarray(mask)

    args = [x_tm, mask,
            kp['wq'], kp['bq'], kp['wk'], kp['bk'], kp['wv'], kp['bv'],
            kp['wo'], kp['bo'],
            kp['wih_0_0'], kp['whh_0_0'], kp['b_0_0'],
            kp['wih_0_1'], kp['whh_0_1'], kp['b_0_1'],
            kp['wih_1_0'], kp['whh_1_0'], kp['b_1_0'],
            kp['wih_1_1'], kp['b_1_1'],          # whh of layer-2 backward never reaches the FC
            kp['fc_w'], kp['fc_b']]

    out = pl.pallas_call(
        partial(fused_kernel, B, S, F, E, H, NHEAD),
        grid=(1,),
        in_specs=[_full_spec(a.shape) for a in args],
        out_specs=_full_spec((B, 1)),
        out_shape=jax.ShapeDtypeStruct((B, 1), jnp.float32),
        scratch_shapes=[pltpu.VMEM((S * B, 4 * H), jnp.float32),   # hoisted gate inputs
                        pltpu.VMEM((S * B, 2 * H), jnp.float32)],  # layer-1 outputs (time-major)
        compiler_params=pltpu.CompilerParams(
            dimension_semantics=("arbitrary",)),
    )(*args)
    return out[:, 0]                                               # squeeze(1)


# ----------------------------------------------------------------------------
# Deterministic parameter init (shapes match the PyTorch module __init__).
# ----------------------------------------------------------------------------
def init_params(key):
    keys = iter(jax.random.split(key, 64))
    scale = 0.1

    def lin(out_dim, in_dim):
        W = jax.random.normal(next(keys), (out_dim, in_dim), jnp.float32) * scale
        b = jax.random.normal(next(keys), (out_dim,), jnp.float32) * scale
        return W, b

    E, H = ATT_HIDDEN, LSTM_HIDDEN
    p = {}
    # Attention.query/key/value : Linear(INPUT_SIZE, E)
    for name in ('q', 'k', 'v'):
        W, b = lin(E, INPUT_SIZE)
        p[f'w{name}_t'] = W.T
        p[f'b{name}'] = b[None, :]
    # nn.MultiheadAttention: in_proj (3E, E) + bias, out_proj Linear(E, E)
    in_proj_w = jax.random.normal(next(keys), (3 * E, E), jnp.float32) * scale
    in_proj_b = jax.random.normal(next(keys), (3 * E,), jnp.float32) * scale
    p['wiq_t'] = in_proj_w[0:E].T
    p['wik_t'] = in_proj_w[E:2 * E].T
    p['wiv_t'] = in_proj_w[2 * E:3 * E].T
    p['biq'] = in_proj_b[0:E][None, :]
    p['bik'] = in_proj_b[E:2 * E][None, :]
    p['biv'] = in_proj_b[2 * E:3 * E][None, :]
    Wo, bo = lin(E, E)
    p['wo_t'] = Wo.T
    p['bo'] = bo[None, :]
    # LSTM: 2 layers x 2 directions, gate order (i, f, g, o).
    for layer in range(NUM_LAYERS):
        in_dim = E if layer == 0 else 2 * H
        for d in range(2):
            w_ih = jax.random.normal(next(keys), (4 * H, in_dim), jnp.float32) * scale
            w_hh = jax.random.normal(next(keys), (4 * H, H), jnp.float32) * scale
            b_ih = jax.random.normal(next(keys), (4 * H,), jnp.float32) * scale
            b_hh = jax.random.normal(next(keys), (4 * H,), jnp.float32) * scale
            p[f'wih_{layer}_{d}'] = w_ih.T
            p[f'whh_{layer}_{d}'] = w_hh.T
            p[f'b_{layer}_{d}'] = (b_ih + b_hh)[None, :]
    # fc: Linear(2H, 1)
    fc_w, fc_b = lin(OUTPUT_SIZE, 2 * H)
    p['fc_w'] = fc_w                       # (1, 2H)
    p['fc_b'] = fc_b[None, :]              # (1, 1)
    return p


# ----------------------------------------------------------------------------
# Pure-JAX reference (mirrors PyTorch semantics, unfused weights).
# ----------------------------------------------------------------------------
def reference_forward(x, p):
    B, S, F = x.shape
    E, H, nhead = ATT_HIDDEN, LSTM_HIDDEN, NHEAD
    hd = E // nhead
    x2 = x.reshape(B * S, F)
    q = x2 @ p['wq_t'] + p['bq']
    k = x2 @ p['wk_t'] + p['bk']
    v = x2 @ p['wv_t'] + p['bv']
    qq = (q @ p['wiq_t'] + p['biq']).reshape(B, S, nhead, hd)
    kk = (k @ p['wik_t'] + p['bik']).reshape(B, S, nhead, hd)
    vv = (v @ p['wiv_t'] + p['biv']).reshape(B, S, nhead, hd)
    s = jnp.einsum('bihd,bjhd->bhij', qq / math.sqrt(hd), kk)
    a = jax.nn.softmax(s, axis=-1)
    o = jnp.einsum('bhij,bjhd->bihd', a, vv).reshape(B * S, E)
    att = (o @ p['wo_t'] + p['bo']).reshape(B, S, E)

    x_val = att
    for layer in range(NUM_LAYERS):
        dir_outs = []
        for d in range(2):
            wih = p[f'wih_{layer}_{d}']
            whh = p[f'whh_{layer}_{d}']
            bias = p[f'b_{layer}_{d}']
            h = jnp.zeros((B, H), jnp.float32)
            c = jnp.zeros((B, H), jnp.float32)
            outs = [None] * S
            order = range(S) if d == 0 else range(S - 1, -1, -1)
            for t in order:
                xt = x_val[:, t, :]
                g = xt @ wih + h @ whh + bias
                i_g = jax.nn.sigmoid(g[:, 0:H])
                f_g = jax.nn.sigmoid(g[:, H:2 * H])
                g_g = jnp.tanh(g[:, 2 * H:3 * H])
                o_g = jax.nn.sigmoid(g[:, 3 * H:4 * H])
                c = f_g * c + i_g * g_g
                h = o_g * jnp.tanh(c)
                outs[t] = h
            dir_outs.append(jnp.stack(outs, axis=1))
        x_val = jnp.concatenate(dir_outs, axis=-1)
    last = x_val[:, -1, :]
    return jnp.sum(last * p['fc_w'], axis=-1) + p['fc_b'][0, 0]


if __name__ == "__main__":
    key = jax.random.PRNGKey(0)
    kx, kp = jax.random.split(key)
    B, S = 2, 8
    x = jax.random.normal(kx, (B, S, INPUT_SIZE), jnp.float32)
    params = init_params(kp)

    out = att_bilstm_forward(x, params)
    out = jax.block_until_ready(out)

    ref = reference_forward(x, params)
    np.testing.assert_allclose(np.asarray(out), np.asarray(ref),
                               rtol=1e-2, atol=1e-2)
    print("KERNEL_OK")
</pallas_src>

<mosaic_0001>
module attributes {stable_mosaic.version = 11 : i64} {
  func.func @fused_kernel(%arg0: i32, %arg1: memref<16x10xf32, #tpu.memory_space<vmem>>, %arg2: memref<16x16xf32, #tpu.memory_space<vmem>>, %arg3: memref<10x128xf32, #tpu.memory_space<vmem>>, %arg4: memref<1x128xf32, #tpu.memory_space<vmem>>, %arg5: memref<10x128xf32, #tpu.memory_space<vmem>>, %arg6: memref<1x128xf32, #tpu.memory_space<vmem>>, %arg7: memref<10x128xf32, #tpu.memory_space<vmem>>, %arg8: memref<1x128xf32, #tpu.memory_space<vmem>>, %arg9: memref<128x128xf32, #tpu.memory_space<vmem>>, %arg10: memref<1x128xf32, #tpu.memory_space<vmem>>, %arg11: memref<128x512xf32, #tpu.memory_space<vmem>>, %arg12: memref<128x512xf32, #tpu.memory_space<vmem>>, %arg13: memref<1x512xf32, #tpu.memory_space<vmem>>, %arg14: memref<128x512xf32, #tpu.memory_space<vmem>>, %arg15: memref<128x512xf32, #tpu.memory_space<vmem>>, %arg16: memref<1x512xf32, #tpu.memory_space<vmem>>, %arg17: memref<256x512xf32, #tpu.memory_space<vmem>>, %arg18: memref<128x512xf32, #tpu.memory_space<vmem>>, %arg19: memref<1x512xf32, #tpu.memory_space<vmem>>, %arg20: memref<256x512xf32, #tpu.memory_space<vmem>>, %arg21: memref<1x512xf32, #tpu.memory_space<vmem>>, %arg22: memref<1x256xf32, #tpu.memory_space<vmem>>, %arg23: memref<1x1xf32, #tpu.memory_space<vmem>>, %arg24: memref<2x1xf32, #tpu.memory_space<vmem>>, %arg25: memref<16x512xf32, #tpu.memory_space<vmem>>, %arg26: memref<16x256xf32, #tpu.memory_space<vmem>>) attributes {dimension_semantics = [#tpu.dimension_semantics<arbitrary>], iteration_bounds = array<i64: 1>, scalar_prefetch = 0 : i64, scratch_operands = 2 : i64, tpu.core_type = #tpu.core_type<tc>, window_params = [{pipeline_mode = #tpu.pipeline_mode<synchronous>, transform_indices = @transform_0, window_bounds = array<i64: 16, 10>}, {pipeline_mode = #tpu.pipeline_mode<synchronous>, transform_indices = @transform_1, window_bounds = array<i64: 16, 16>}, {pipeline_mode = #tpu.pipeline_mode<synchronous>, transform_indices = @transform_2, window_bounds = array<i64: 10, 128>}, {pipeline_mode = #tpu.pipeline_mode<synchronous>, transform_indices = @transform_3, window_bounds = array<i64: 1, 128>}, {pipeline_mode = #tpu.pipeline_mode<synchronous>, transform_indices = @transform_4, window_bounds = array<i64: 10, 128>}, {pipeline_mode = #tpu.pipeline_mode<synchronous>, transform_indices = @transform_5, window_bounds = array<i64: 1, 128>}, {pipeline_mode = #tpu.pipeline_mode<synchronous>, transform_indices = @transform_6, window_bounds = array<i64: 10, 128>}, {pipeline_mode = #tpu.pipeline_mode<synchronous>, transform_indices = @transform_7, window_bounds = array<i64: 1, 128>}, {pipeline_mode = #tpu.pipeline_mode<synchronous>, transform_indices = @transform_8, window_bounds = array<i64: 128, 128>}, {pipeline_mode = #tpu.pipeline_mode<synchronous>, transform_indices = @transform_9, window_bounds = array<i64: 1, 128>}, {pipeline_mode = #tpu.pipeline_mode<synchronous>, transform_indices = @transform_10, window_bounds = array<i64: 128, 512>}, {pipeline_mode = #tpu.pipeline_mode<synchronous>, transform_indices = @transform_11, window_bounds = array<i64: 128, 512>}, {pipeline_mode = #tpu.pipeline_mode<synchronous>, transform_indices = @transform_12, window_bounds = array<i64: 1, 512>}, {pipeline_mode = #tpu.pipeline_mode<synchronous>, transform_indices = @transform_13, window_bounds = array<i64: 128, 512>}, {pipeline_mode = #tpu.pipeline_mode<synchronous>, transform_indices = @transform_14, window_bounds = array<i64: 128, 512>}, {pipeline_mode = #tpu.pipeline_mode<synchronous>, transform_indices = @transform_15, window_bounds = array<i64: 1, 512>}, {pipeline_mode = #tpu.pipeline_mode<synchronous>, transform_indices = @transform_16, window_bounds = array<i64: 256, 512>}, {pipeline_mode = #tpu.pipeline_mode<synchronous>, transform_indices = @transform_17, window_bounds = array<i64: 128, 512>}, {pipeline_mode = #tpu.pipeline_mode<synchronous>, transform_indices = @transform_18, window_bounds = array<i64: 1, 512>}, {pipeline_mode = #tpu.pipeline_mode<synchronous>, transform_indices = @transform_19, window_bounds = array<i64: 256, 512>}, {pipeline_mode = #tpu.pipeline_mode<synchronous>, transform_indices = @transform_20, window_bounds = array<i64: 1, 512>}, {pipeline_mode = #tpu.pipeline_mode<synchronous>, transform_indices = @transform_21, window_bounds = array<i64: 1, 256>}, {pipeline_mode = #tpu.pipeline_mode<synchronous>, transform_indices = @transform_22, window_bounds = array<i64: 1, 1>}, {pipeline_mode = #tpu.pipeline_mode<synchronous>, transform_indices = @transform_23, window_bounds = array<i64: 2, 1>}]} {
    %c0 = arith.constant 0 : index
    %c0_0 = arith.constant 0 : index
    %0 = vector.load %arg1[%c0, %c0_0] : memref<16x10xf32, #tpu.memory_space<vmem>>, vector<16x10xf32>
    %c0_1 = arith.constant 0 : index
    %c0_2 = arith.constant 0 : index
    %1 = vector.load %arg3[%c0_1, %c0_2] : memref<10x128xf32, #tpu.memory_space<vmem>>, vector<10x128xf32>
    %cst = arith.constant dense<0.000000e+00> : vector<16x128xf32>
    %2 = tpu.matmul %0, %1, %cst {dimension_numbers = #tpu.dot_dimension_numbers<[1], [0], [0], [1], [0, 0, 1, 1], [], []>} : vector<16x10xf32>, vector<10x128xf32>, vector<16x128xf32> -> vector<16x128xf32>
    %c0_3 = arith.constant 0 : index
    %c0_4 = arith.constant 0 : index
    %3 = vector.load %arg4[%c0_3, %c0_4] : memref<1x128xf32, #tpu.memory_space<vmem>>, vector<1x128xf32>
    %4 = vector.broadcast %3 : vector<1x128xf32> to vector<16x128xf32>
    %5 = arith.addf %2, %4 : vector<16x128xf32>
    %c0_5 = arith.constant 0 : index
    %c0_6 = arith.constant 0 : index
    %6 = vector.load %arg5[%c0_5, %c0_6] : memref<10x128xf32, #tpu.memory_space<vmem>>, vector<10x128xf32>
    %cst_7 = arith.constant dense<0.000000e+00> : vector<16x128xf32>
    %7 = tpu.matmul %0, %6, %cst_7 {dimension_numbers = #tpu.dot_dimension_numbers<[1], [0], [0], [1], [0, 0, 1, 1], [], []>} : vector<16x10xf32>, vector<10x128xf32>, vector<16x128xf32> -> vector<16x128xf32>
    %c0_8 = arith.constant 0 : index
    %c0_9 = arith.constant 0 : index
    %8 = vector.load %arg6[%c0_8, %c0_9] : memref<1x128xf32, #tpu.memory_space<vmem>>, vector<1x128xf32>
    %9 = vector.broadcast %8 : vector<1x128xf32> to vector<16x128xf32>
    %10 = arith.addf %7, %9 : vector<16x128xf32>
    %c0_10 = arith.constant 0 : index
    %c0_11 = arith.constant 0 : index
    %11 = vector.load %arg7[%c0_10, %c0_11] : memref<10x128xf32, #tpu.memory_space<vmem>>, vector<10x128xf32>
    %cst_12 = arith.constant dense<0.000000e+00> : vector<16x128xf32>
    %12 = tpu.matmul %0, %11, %cst_12 {dimension_numbers = #tpu.dot_dimension_numbers<[1], [0], [0], [1], [0, 0, 1, 1], [], []>} : vector<16x10xf32>, vector<10x128xf32>, vector<16x128xf32> -> vector<16x128xf32>
    %c0_13 = arith.constant 0 : index
    %c0_14 = arith.constant 0 : index
    %13 = vector.load %arg8[%c0_13, %c0_14] : memref<1x128xf32, #tpu.memory_space<vmem>>, vector<1x128xf32>
    %14 = vector.broadcast %13 : vector<1x128xf32> to vector<16x128xf32>
    %15 = arith.addf %12, %14 : vector<16x128xf32>
    %c0_15 = arith.constant 0 : index
    %c0_16 = arith.constant 0 : index
    %16 = vector.load %arg2[%c0_15, %c0_16] : memref<16x16xf32, #tpu.memory_space<vmem>>, vector<16x16xf32>
    %17 = vector.extract_strided_slice %5 {offsets = [0, 0], sizes = [16, 32], strides = [1, 1]} : vector<16x128xf32> to vector<16x32xf32>
    %18 = vector.extract_strided_slice %10 {offsets = [0, 0], sizes = [16, 32], strides = [1, 1]} : vector<16x128xf32> to vector<16x32xf32>
    %19 = vector.extract_strided_slice %15 {offsets = [0, 0], sizes = [16, 32], strides = [1, 1]} : vector<16x128xf32> to vector<16x32xf32>
    %cst_17 = arith.constant dense<0.000000e+00> : vector<16x16xf32>
    %20 = tpu.matmul %17, %18, %cst_17 {dimension_numbers = #tpu.dot_dimension_numbers<[1], [1], [0], [0], [0, 0, 1, 0], [], []>} : vector<16x32xf32>, vector<16x32xf32>, vector<16x16xf32> -> vector<16x16xf32>
    %21 = arith.addf %20, %16 : vector<16x16xf32>
    %cst_18 = arith.constant dense<0xFF800000> : vector<16xf32>
    %22 = vector.multi_reduction <maximumf>, %21, %cst_18 [1] : vector<16x16xf32> to vector<16xf32>
    %23 = vector.shape_cast %22 : vector<16xf32> to vector<16x1xf32>
    %24 = vector.broadcast %23 : vector<16x1xf32> to vector<16x16xf32>
    %25 = arith.subf %21, %24 : vector<16x16xf32>
    %26 = math.exp %25 : vector<16x16xf32>
    %cst_19 = arith.constant dense<0.000000e+00> : vector<16xf32>
    %27 = vector.multi_reduction <add>, %26, %cst_19 [1] : vector<16x16xf32> to vector<16xf32>
    %28 = vector.shape_cast %27 : vector<16xf32> to vector<16x1xf32>
    %29 = vector.broadcast %28 : vector<16x1xf32> to vector<16x16xf32>
    %30 = arith.divf %26, %29 : vector<16x16xf32>
    %cst_20 = arith.constant dense<0.000000e+00> : vector<16x32xf32>
    %31 = tpu.matmul %30, %19, %cst_20 {dimension_numbers = #tpu.dot_dimension_numbers<[1], [0], [0], [1], [0, 0, 1, 1], [], []>} : vector<16x16xf32>, vector<16x32xf32>, vector<16x32xf32> -> vector<16x32xf32>
    %32 = vector.extract_strided_slice %5 {offsets = [0, 32], sizes = [16, 32], strides = [1, 1]} : vector<16x128xf32> to vector<16x32xf32>
    %33 = vector.extract_strided_slice %10 {offsets = [0, 32], sizes = [16, 32], strides = [1, 1]} : vector<16x128xf32> to vector<16x32xf32>
    %34 = vector.extract_strided_slice %15 {offsets = [0, 32], sizes = [16, 32], strides = [1, 1]} : vector<16x128xf32> to vector<16x32xf32>
    %cst_21 = arith.constant dense<0.000000e+00> : vector<16x16xf32>
    %35 = tpu.matmul %32, %33, %cst_21 {dimension_numbers = #tpu.dot_dimension_numbers<[1], [1], [0], [0], [0, 0, 1, 0], [], []>} : vector<16x32xf32>, vector<16x32xf32>, vector<16x16xf32> -> vector<16x16xf32>
    %36 = arith.addf %35, %16 : vector<16x16xf32>
    %cst_22 = arith.constant dense<0xFF800000> : vector<16xf32>
    %37 = vector.multi_reduction <maximumf>, %36, %cst_22 [1] : vector<16x16xf32> to vector<16xf32>
    %38 = vector.shape_cast %37 : vector<16xf32> to vector<16x1xf32>
    %39 = vector.broadcast %38 : vector<16x1xf32> to vector<16x16xf32>
    %40 = arith.subf %36, %39 : vector<16x16xf32>
    %41 = math.exp %40 : vector<16x16xf32>
    %cst_23 = arith.constant dense<0.000000e+00> : vector<16xf32>
    %42 = vector.multi_reduction <add>, %41, %cst_23 [1] : vector<16x16xf32> to vector<16xf32>
    %43 = vector.shape_cast %42 : vector<16xf32> to vector<16x1xf32>
    %44 = vector.broadcast %43 : vector<16x1xf32> to vector<16x16xf32>
    %45 = arith.divf %41, %44 : vector<16x16xf32>
    %cst_24 = arith.constant dense<0.000000e+00> : vector<16x32xf32>
    %46 = tpu.matmul %45, %34, %cst_24 {dimension_numbers = #tpu.dot_dimension_numbers<[1], [0], [0], [1], [0, 0, 1, 1], [], []>} : vector<16x16xf32>, vector<16x32xf32>, vector<16x32xf32> -> vector<16x32xf32>
    %47 = vector.extract_strided_slice %5 {offsets = [0, 64], sizes = [16, 32], strides = [1, 1]} : vector<16x128xf32> to vector<16x32xf32>
    %48 = vector.extract_strided_slice %10 {offsets = [0, 64], sizes = [16, 32], strides = [1, 1]} : vector<16x128xf32> to vector<16x32xf32>
    %49 = vector.extract_strided_slice %15 {offsets = [0, 64], sizes = [16, 32], strides = [1, 1]} : vector<16x128xf32> to vector<16x32xf32>
    %cst_25 = arith.constant dense<0.000000e+00> : vector<16x16xf32>
    %50 = tpu.matmul %47, %48, %cst_25 {dimension_numbers = #tpu.dot_dimension_numbers<[1], [1], [0], [0], [0, 0, 1, 0], [], []>} : vector<16x32xf32>, vector<16x32xf32>, vector<16x16xf32> -> vector<16x16xf32>
    %51 = arith.addf %50, %16 : vector<16x16xf32>
    %cst_26 = arith.constant dense<0xFF800000> : vector<16xf32>
    %52 = vector.multi_reduction <maximumf>, %51, %cst_26 [1] : vector<16x16xf32> to vector<16xf32>
    %53 = vector.shape_cast %52 : vector<16xf32> to vector<16x1xf32>
    %54 = vector.broadcast %53 : vector<16x1xf32> to vector<16x16xf32>
    %55 = arith.subf %51, %54 : vector<16x16xf32>
    %56 = math.exp %55 : vector<16x16xf32>
    %cst_27 = arith.constant dense<0.000000e+00> : vector<16xf32>
    %57 = vector.multi_reduction <add>, %56, %cst_27 [1] : vector<16x16xf32> to vector<16xf32>
    %58 = vector.shape_cast %57 : vector<16xf32> to vector<16x1xf32>
    %59 = vector.broadcast %58 : vector<16x1xf32> to vector<16x16xf32>
    %60 = arith.divf %56, %59 : vector<16x16xf32>
    %cst_28 = arith.constant dense<0.000000e+00> : vector<16x32xf32>
    %61 = tpu.matmul %60, %49, %cst_28 {dimension_numbers = #tpu.dot_dimension_numbers<[1], [0], [0], [1], [0, 0, 1, 1], [], []>} : vector<16x16xf32>, vector<16x32xf32>, vector<16x32xf32> -> vector<16x32xf32>
    %62 = vector.extract_strided_slice %5 {offsets = [0, 96], sizes = [16, 32], strides = [1, 1]} : vector<16x128xf32> to vector<16x32xf32>
    %63 = vector.extract_strided_slice %10 {offsets = [0, 96], sizes = [16, 32], strides = [1, 1]} : vector<16x128xf32> to vector<16x32xf32>
    %64 = vector.extract_strided_slice %15 {offsets = [0, 96], sizes = [16, 32], strides = [1, 1]} : vector<16x128xf32> to vector<16x32xf32>
    %cst_29 = arith.constant dense<0.000000e+00> : vector<16x16xf32>
    %65 = tpu.matmul %62, %63, %cst_29 {dimension_numbers = #tpu.dot_dimension_numbers<[1], [1], [0], [0], [0, 0, 1, 0], [], []>} : vector<16x32xf32>, vector<16x32xf32>, vector<16x16xf32> -> vector<16x16xf32>
    %66 = arith.addf %65, %16 : vector<16x16xf32>
    %cst_30 = arith.constant dense<0xFF800000> : vector<16xf32>
    %67 = vector.multi_reduction <maximumf>, %66, %cst_30 [1] : vector<16x16xf32> to vector<16xf32>
    %68 = vector.shape_cast %67 : vector<16xf32> to vector<16x1xf32>
    %69 = vector.broadcast %68 : vector<16x1xf32> to vector<16x16xf32>
    %70 = arith.subf %66, %69 : vector<16x16xf32>
    %71 = math.exp %70 : vector<16x16xf32>
    %cst_31 = arith.constant dense<0.000000e+00> : vector<16xf32>
    %72 = vector.multi_reduction <add>, %71, %cst_31 [1] : vector<16x16xf32> to vector<16xf32>
    %73 = vector.shape_cast %72 : vector<16xf32> to vector<16x1xf32>
    %74 = vector.broadcast %73 : vector<16x1xf32> to vector<16x16xf32>
    %75 = arith.divf %71, %74 : vector<16x16xf32>
    %cst_32 = arith.constant dense<0.000000e+00> : vector<16x32xf32>
    %76 = tpu.matmul %75, %64, %cst_32 {dimension_numbers = #tpu.dot_dimension_numbers<[1], [0], [0], [1], [0, 0, 1, 1], [], []>} : vector<16x16xf32>, vector<16x32xf32>, vector<16x32xf32> -> vector<16x32xf32>
    %77 = tpu.concatenate %31, %46, %61, %76 in 1 : vector<16x32xf32>, vector<16x32xf32>, vector<16x32xf32>, vector<16x32xf32> -> vector<16x128xf32>
    %c0_33 = arith.constant 0 : index
    %c0_34 = arith.constant 0 : index
    %78 = vector.load %arg9[%c0_33, %c0_34] : memref<128x128xf32, #tpu.memory_space<vmem>>, vector<128x128xf32>
    %cst_35 = arith.constant dense<0.000000e+00> : vector<16x128xf32>
    %79 = tpu.matmul %77, %78, %cst_35 {dimension_numbers = #tpu.dot_dimension_numbers<[1], [0], [0], [1], [0, 0, 1, 1], [], []>} : vector<16x128xf32>, vector<128x128xf32>, vector<16x128xf32> -> vector<16x128xf32>
    %c0_36 = arith.constant 0 : index
    %c0_37 = arith.constant 0 : index
    %80 = vector.load %arg10[%c0_36, %c0_37] : memref<1x128xf32, #tpu.memory_space<vmem>>, vector<1x128xf32>
    %81 = vector.broadcast %80 : vector<1x128xf32> to vector<16x128xf32>
    %82 = arith.addf %79, %81 : vector<16x128xf32>
    %c0_38 = arith.constant 0 : index
    %c0_39 = arith.constant 0 : index
    %83 = vector.load %arg11[%c0_38, %c0_39] : memref<128x512xf32, #tpu.memory_space<vmem>>, vector<128x512xf32>
    %cst_40 = arith.constant dense<0.000000e+00> : vector<16x512xf32>
    %84 = tpu.matmul %82, %83, %cst_40 {dimension_numbers = #tpu.dot_dimension_numbers<[1], [0], [0], [1], [0, 0, 1, 1], [], []>} : vector<16x128xf32>, vector<128x512xf32>, vector<16x512xf32> -> vector<16x512xf32>
    %c0_41 = arith.constant 0 : index
    %c0_42 = arith.constant 0 : index
    %85 = vector.load %arg13[%c0_41, %c0_42] : memref<1x512xf32, #tpu.memory_space<vmem>>, vector<1x512xf32>
    %86 = vector.broadcast %85 : vector<1x512xf32> to vector<16x512xf32>
    %87 = arith.addf %84, %86 : vector<16x512xf32>
    %c0_43 = arith.constant 0 : index
    %c0_44 = arith.constant 0 : index
    %88 = vector.load %arg25[%c0_43, %c0_44] : memref<16x512xf32, #tpu.memory_space<vmem>>, vector<16x512xf32>
    tpu.vector_store %arg25[%c0_43, %c0_44], %87 {strides = array<i32>} : memref<16x512xf32, #tpu.memory_space<vmem>>, vector<16x512xf32>,
    %c0_45 = arith.constant 0 : index
    %c0_46 = arith.constant 0 : index
    %89 = vector.load %arg12[%c0_45, %c0_46] : memref<128x512xf32, #tpu.memory_space<vmem>>, vector<128x512xf32>
    %cst_47 = arith.constant 0.000000e+00 : f32
    %90 = vector.broadcast %cst_47 : f32 to vector<2x128xf32>
    %cst_48 = arith.constant 0.000000e+00 : f32
    %91 = vector.broadcast %cst_48 : f32 to vector<2x128xf32>
    %c0_49 = arith.constant 0 : index
    %c0_50 = arith.constant 0 : index
    %92 = vector.load %arg25[%c0_49, %c0_50] : memref<16x512xf32, #tpu.memory_space<vmem>>, vector<2x512xf32>
    %cst_51 = arith.constant dense<0.000000e+00> : vector<2x512xf32>
    %93 = tpu.matmul %90, %89, %cst_51 {dimension_numbers = #tpu.dot_dimension_numbers<[1], [0], [0], [1], [0, 0, 1, 1], [], []>} : vector<2x128xf32>, vector<128x512xf32>, vector<2x512xf32> -> vector<2x512xf32>
    %94 = arith.addf %92, %93 : vector<2x512xf32>
    %95 = vector.extract_strided_slice %94 {offsets = [0, 0], sizes = [2, 128], strides = [1, 1]} : vector<2x512xf32> to vector<2x128xf32>
    %96 = arith.negf %95 : vector<2x128xf32>
    %97 = math.exp %96 : vector<2x128xf32>
    %cst_52 = arith.constant 1.000000e+00 : f32
    %98 = vector.broadcast %cst_52 : f32 to vector<2x128xf32>
    %99 = arith.addf %98, %97 : vector<2x128xf32>
    %100 = arith.divf %98, %99 : vector<2x128xf32>
    %101 = vector.extract_strided_slice %94 {offsets = [0, 128], sizes = [2, 128], strides = [1, 1]} : vector<2x512xf32> to vector<2x128xf32>
    %102 = arith.negf %101 : vector<2x128xf32>
    %103 = math.exp %102 : vector<2x128xf32>
    %cst_53 = arith.constant 1.000000e+00 : f32
    %104 = vector.broadcast %cst_53 : f32 to vector<2x128xf32>
    %105 = arith.addf %104, %103 : vector<2x128xf32>
    %106 = arith.divf %104, %105 : vector<2x128xf32>
    %107 = vector.extract_strided_slice %94 {offsets = [0, 256], sizes = [2, 128], strides = [1, 1]} : vector<2x512xf32> to vector<2x128xf32>
    %108 = math.tanh %107 : vector<2x128xf32>
    %109 = vector.extract_strided_slice %94 {offsets = [0, 384], sizes = [2, 128], strides = [1, 1]} : vector<2x512xf32> to vector<2x128xf32>
    %110 = arith.negf %109 : vector<2x128xf32>
    %111 = math.exp %110 : vector<2x128xf32>
    %cst_54 = arith.constant 1.000000e+00 : f32
    %112 = vector.broadcast %cst_54 : f32 to vector<2x128xf32>
    %113 = arith.addf %112, %111 : vector<2x128xf32>
    %114 = arith.divf %112, %113 : vector<2x128xf32>
    %115 = arith.mulf %106, %91 : vector<2x128xf32>
    %116 = arith.mulf %100, %108 : vector<2x128xf32>
    %117 = arith.addf %115, %116 : vector<2x128xf32>
    %118 = math.tanh %117 : vector<2x128xf32>
    %119 = arith.mulf %114, %118 : vector<2x128xf32>
    %c0_55 = arith.constant 0 : index
    %c0_56 = arith.constant 0 : index
    %120 = vector.load %arg26[%c0_55, %c0_56] : memref<16x256xf32, #tpu.memory_space<vmem>>, vector<2x128xf32>
    tpu.vector_store %arg26[%c0_55, %c0_56], %119 {strides = array<i32>} : memref<16x256xf32, #tpu.memory_space<vmem>>, vector<2x128xf32>,
    %c2 = arith.constant 2 : index
    %c0_57 = arith.constant 0 : index
    %121 = vector.load %arg25[%c2, %c0_57] : memref<16x512xf32, #tpu.memory_space<vmem>>, vector<2x512xf32>
    %cst_58 = arith.constant dense<0.000000e+00> : vector<2x512xf32>
    %122 = tpu.matmul %119, %89, %cst_58 {dimension_numbers = #tpu.dot_dimension_numbers<[1], [0], [0], [1], [0, 0, 1, 1], [], []>} : vector<2x128xf32>, vector<128x512xf32>, vector<2x512xf32> -> vector<2x512xf32>
    %123 = arith.addf %121, %122 : vector<2x512xf32>
    %124 = vector.extract_strided_slice %123 {offsets = [0, 0], sizes = [2, 128], strides = [1, 1]} : vector<2x512xf32> to vector<2x128xf32>
    %125 = arith.negf %124 : vector<2x128xf32>
    %126 = math.exp %125 : vector<2x128xf32>
    %cst_59 = arith.constant 1.000000e+00 : f32
    %127 = vector.broadcast %cst_59 : f32 to vector<2x128xf32>
    %128 = arith.addf %127, %126 : vector<2x128xf32>
    %129 = arith.divf %127, %128 : vector<2x128xf32>
    %130 = vector.extract_strided_slice %123 {offsets = [0, 128], sizes = [2, 128], strides = [1, 1]} : vector<2x512xf32> to vector<2x128xf32>
    %131 = arith.negf %130 : vector<2x128xf32>
    %132 = math.exp %131 : vector<2x128xf32>
    %cst_60 = arith.constant 1.000000e+00 : f32
    %133 = vector.broadcast %cst_60 : f32 to vector<2x128xf32>
    %134 = arith.addf %133, %132 : vector<2x128xf32>
    %135 = arith.divf %133, %134 : vector<2x128xf32>
    %136 = vector.extract_strided_slice %123 {offsets = [0, 256], sizes = [2, 128], strides = [1, 1]} : vector<2x512xf32> to vector<2x128xf32>
    %137 = math.tanh %136 : vector<2x128xf32>
    %138 = vector.extract_strided_slice %123 {offsets = [0, 384], sizes = [2, 128], strides = [1, 1]} : vector<2x512xf32> to vector<2x128xf32>
    %139 = arith.negf %138 : vector<2x128xf32>
    %140 = math.exp %139 : vector<2x128xf32>
    %cst_61 = arith.constant 1.000000e+00 : f32
    %141 = vector.broadcast %cst_61 : f32 to vector<2x128xf32>
    %142 = arith.addf %141, %140 : vector<2x128xf32>
    %143 = arith.divf %141, %142 : vector<2x128xf32>
    %144 = arith.mulf %135, %117 : vector<2x128xf32>
    %145 = arith.mulf %129, %137 : vector<2x128xf32>
    %146 = arith.addf %144, %145 : vector<2x128xf32>
    %147 = math.tanh %146 : vector<2x128xf32>
    %148 = arith.mulf %143, %147 : vector<2x128xf32>
    %c2_62 = arith.constant 2 : index
    %c0_63 = arith.constant 0 : index
    %149 = vector.load %arg26[%c2_62, %c0_63] : memref<16x256xf32, #tpu.memory_space<vmem>>, vector<2x128xf32>
    tpu.vector_store %arg26[%c2_62, %c0_63], %148 {strides = array<i32>} : memref<16x256xf32, #tpu.memory_space<vmem>>, vector<2x128xf32>,
    %c4 = arith.constant 4 : index
    %c0_64 = arith.constant 0 : index
    %150 = vector.load %arg25[%c4, %c0_64] : memref<16x512xf32, #tpu.memory_space<vmem>>, vector<2x512xf32>
    %cst_65 = arith.constant dense<0.000000e+00> : vector<2x512xf32>
    %151 = tpu.matmul %148, %89, %cst_65 {dimension_numbers = #tpu.dot_dimension_numbers<[1], [0], [0], [1], [0, 0, 1, 1], [], []>} : vector<2x128xf32>, vector<128x512xf32>, vector<2x512xf32> -> vector<2x512xf32>
    %152 = arith.addf %150, %151 : vector<2x512xf32>
    %153 = vector.extract_strided_slice %152 {offsets = [0, 0], sizes = [2, 128], strides = [1, 1]} : vector<2x512xf32> to vector<2x128xf32>
    %154 = arith.negf %153 : vector<2x128xf32>
    %155 = math.exp %154 : vector<2x128xf32>
    %cst_66 = arith.constant 1.000000e+00 : f32
    %156 = vector.broadcast %cst_66 : f32 to vector<2x128xf32>
    %157 = arith.addf %156, %155 : vector<2x128xf32>
    %158 = arith.divf %156, %157 : vector<2x128xf32>
    %159 = vector.extract_strided_slice %152 {offsets = [0, 128], sizes = [2, 128], strides = [1, 1]} : vector<2x512xf32> to vector<2x128xf32>
    %160 = arith.negf %159 : vector<2x128xf32>
    %161 = math.exp %160 : vector<2x128xf32>
    %cst_67 = arith.constant 1.000000e+00 : f32
    %162 = vector.broadcast %cst_67 : f32 to vector<2x128xf32>
    %163 = arith.addf %162, %161 : vector<2x128xf32>
    %164 = arith.divf %162, %163 : vector<2x128xf32>
    %165 = vector.extract_strided_slice %152 {offsets = [0, 256], sizes = [2, 128], strides = [1, 1]} : vector<2x512xf32> to vector<2x128xf32>
    %166 = math.tanh %165 : vector<2x128xf32>
    %167 = vector.extract_strided_slice %152 {offsets = [0, 384], sizes = [2, 128], strides = [1, 1]} : vector<2x512xf32> to vector<2x128xf32>
    %168 = arith.negf %167 : vector<2x128xf32>
    %169 = math.exp %168 : vector<2x128xf32>
    %cst_68 = arith.constant 1.000000e+00 : f32
    %170 = vector.broadcast %cst_68 : f32 to vector<2x128xf32>
    %171 = arith.addf %170, %169 : vector<2x128xf32>
    %172 = arith.divf %170, %171 : vector<2x128xf32>
    %173 = arith.mulf %164, %146 : vector<2x128xf32>
    %174 = arith.mulf %158, %166 : vector<2x128xf32>
    %175 = arith.addf %173, %174 : vector<2x128xf32>
    %176 = math.tanh %175 : vector<2x128xf32>
    %177 = arith.mulf %172, %176 : vector<2x128xf32>
    %c4_69 = arith.constant 4 : index
    %c0_70 = arith.constant 0 : index
    %178 = vector.load %arg26[%c4_69, %c0_70] : memref<16x256xf32, #tpu.memory_space<vmem>>, vector<2x128xf32>
    tpu.vector_store %arg26[%c4_69, %c0_70], %177 {strides = array<i32>} : memref<16x256xf32, #tpu.memory_space<vmem>>, vector<2x128xf32>,
    %c6 = arith.constant 6 : index
    %c0_71 = arith.constant 0 : index
    %179 = vector.load %arg25[%c6, %c0_71] : memref<16x512xf32, #tpu.memory_space<vmem>>, vector<2x512xf32>
    %cst_72 = arith.constant dense<0.000000e+00> : vector<2x512xf32>
    %180 = tpu.matmul %177, %89, %cst_72 {dimension_numbers = #tpu.dot_dimension_numbers<[1], [0], [0], [1], [0, 0, 1, 1], [], []>} : vector<2x128xf32>, vector<128x512xf32>, vector<2x512xf32> -> vector<2x512xf32>
    %181 = arith.addf %179, %180 : vector<2x512xf32>
    %182 = vector.extract_strided_slice %181 {offsets = [0, 0], sizes = [2, 128], strides = [1, 1]} : vector<2x512xf32> to vector<2x128xf32>
    %183 = arith.negf %182 : vector<2x128xf32>
    %184 = math.exp %183 : vector<2x128xf32>
    %cst_73 = arith.constant 1.000000e+00 : f32
    %185 = vector.broadcast %cst_73 : f32 to vector<2x128xf32>
    %186 = arith.addf %185, %184 : vector<2x128xf32>
    %187 = arith.divf %185, %186 : vector<2x128xf32>
    %188 = vector.extract_strided_slice %181 {offsets = [0, 128], sizes = [2, 128], strides = [1, 1]} : vector<2x512xf32> to vector<2x128xf32>
    %189 = arith.negf %188 : vector<2x128xf32>
    %190 = math.exp %189 : vector<2x128xf32>
    %cst_74 = arith.constant 1.000000e+00 : f32
    %191 = vector.broadcast %cst_74 : f32 to vector<2x128xf32>
    %192 = arith.addf %191, %190 : vector<2x128xf32>
    %193 = arith.divf %191, %192 : vector<2x128xf32>
    %194 = vector.extract_strided_slice %181 {offsets = [0, 256], sizes = [2, 128], strides = [1, 1]} : vector<2x512xf32> to vector<2x128xf32>
    %195 = math.tanh %194 : vector<2x128xf32>
    %196 = vector.extract_strided_slice %181 {offsets = [0, 384], sizes = [2, 128], strides = [1, 1]} : vector<2x512xf32> to vector<2x128xf32>
    %197 = arith.negf %196 : vector<2x128xf32>
    %198 = math.exp %197 : vector<2x128xf32>
    %cst_75 = arith.constant 1.000000e+00 : f32
    %199 = vector.broadcast %cst_75 : f32 to vector<2x128xf32>
    %200 = arith.addf %199, %198 : vector<2x128xf32>
    %201 = arith.divf %199, %200 : vector<2x128xf32>
    %202 = arith.mulf %193, %175 : vector<2x128xf32>
    %203 = arith.mulf %187, %195 : vector<2x128xf32>
    %204 = arith.addf %202, %203 : vector<2x128xf32>
    %205 = math.tanh %204 : vector<2x128xf32>
    %206 = arith.mulf %201, %205 : vector<2x128xf32>
    %c6_76 = arith.constant 6 : index
    %c0_77 = arith.constant 0 : index
    %207 = vector.load %arg26[%c6_76, %c0_77] : memref<16x256xf32, #tpu.memory_space<vmem>>, vector<2x128xf32>
    tpu.vector_store %arg26[%c6_76, %c0_77], %206 {strides = array<i32>} : memref<16x256xf32, #tpu.memory_space<vmem>>, vector<2x128xf32>,
    %c8 = arith.constant 8 : index
    %c0_78 = arith.constant 0 : index
    %208 = vector.load %arg25[%c8, %c0_78] : memref<16x512xf32, #tpu.memory_space<vmem>>, vector<2x512xf32>
    %cst_79 = arith.constant dense<0.000000e+00> : vector<2x512xf32>
    %209 = tpu.matmul %206, %89, %cst_79 {dimension_numbers = #tpu.dot_dimension_numbers<[1], [0], [0], [1], [0, 0, 1, 1], [], []>} : vector<2x128xf32>, vector<128x512xf32>, vector<2x512xf32> -> vector<2x512xf32>
    %210 = arith.addf %208, %209 : vector<2x512xf32>
    %211 = vector.extract_strided_slice %210 {offsets = [0, 0], sizes = [2, 128], strides = [1, 1]} : vector<2x512xf32> to vector<2x128xf32>
    %212 = arith.negf %211 : vector<2x128xf32>
    %213 = math.exp %212 : vector<2x128xf32>
    %cst_80 = arith.constant 1.000000e+00 : f32
    %214 = vector.broadcast %cst_80 : f32 to vector<2x128xf32>
    %215 = arith.addf %214, %213 : vector<2x128xf32>
    %216 = arith.divf %214, %215 : vector<2x128xf32>
    %217 = vector.extract_strided_slice %210 {offsets = [0, 128], sizes = [2, 128], strides = [1, 1]} : vector<2x512xf32> to vector<2x128xf32>
    %218 = arith.negf %217 : vector<2x128xf32>
    %219 = math.exp %218 : vector<2x128xf32>
    %cst_81 = arith.constant 1.000000e+00 : f32
    %220 = vector.broadcast %cst_81 : f32 to vector<2x128xf32>
    %221 = arith.addf %220, %219 : vector<2x128xf32>
    %222 = arith.divf %220, %221 : vector<2x128xf32>
    %223 = vector.extract_strided_slice %210 {offsets = [0, 256], sizes = [2, 128], strides = [1, 1]} : vector<2x512xf32> to vector<2x128xf32>
    %224 = math.tanh %223 : vector<2x128xf32>
    %225 = vector.extract_strided_slice %210 {offsets = [0, 384], sizes = [2, 128], strides = [1, 1]} : vector<2x512xf32> to vector<2x128xf32>
    %226 = arith.negf %225 : vector<2x128xf32>
    %227 = math.exp %226 : vector<2x128xf32>
    %cst_82 = arith.constant 1.000000e+00 : f32
    %228 = vector.broadcast %cst_82 : f32 to vector<2x128xf32>
    %229 = arith.addf %228, %227 : vector<2x128xf32>
    %230 = arith.divf %228, %229 : vector<2x128xf32>
    %231 = arith.mulf %222, %204 : vector<2x128xf32>
    %232 = arith.mulf %216, %224 : vector<2x128xf32>
    %233 = arith.addf %231, %232 : vector<2x128xf32>
    %234 = math.tanh %233 : vector<2x128xf32>
    %235 = arith.mulf %230, %234 : vector<2x128xf32>
    %c8_83 = arith.constant 8 : index
    %c0_84 = arith.constant 0 : index
    %236 = vector.load %arg26[%c8_83, %c0_84] : memref<16x256xf32, #tpu.memory_space<vmem>>, vector<2x128xf32>
    tpu.vector_store %arg26[%c8_83, %c0_84], %235 {strides = array<i32>} : memref<16x256xf32, #tpu.memory_space<vmem>>, vector<2x128xf32>,
    %c10 = arith.constant 10 : index
    %c0_85 = arith.constant 0 : index
    %237 = vector.load %arg25[%c10, %c0_85] : memref<16x512xf32, #tpu.memory_space<vmem>>, vector<2x512xf32>
    %cst_86 = arith.constant dense<0.000000e+00> : vector<2x512xf32>
    %238 = tpu.matmul %235, %89, %cst_86 {dimension_numbers = #tpu.dot_dimension_numbers<[1], [0], [0], [1], [0, 0, 1, 1], [], []>} : vector<2x128xf32>, vector<128x512xf32>, vector<2x512xf32> -> vector<2x512xf32>
    %239 = arith.addf %237, %238 : vector<2x512xf32>
    %240 = vector.extract_strided_slice %239 {offsets = [0, 0], sizes = [2, 128], strides = [1, 1]} : vector<2x512xf32> to vector<2x128xf32>
    %241 = arith.negf %240 : vector<2x128xf32>
    %242 = math.exp %241 : vector<2x128xf32>
    %cst_87 = arith.constant 1.000000e+00 : f32
    %243 = vector.broadcast %cst_87 : f32 to vector<2x128xf32>
    %244 = arith.addf %243, %242 : vector<2x128xf32>
    %245 = arith.divf %243, %244 : vector<2x128xf32>
    %246 = vector.extract_strided_slice %239 {offsets = [0, 128], sizes = [2, 128], strides = [1, 1]} : vector<2x512xf32> to vector<2x128xf32>
    %247 = arith.negf %246 : vector<2x128xf32>
    %248 = math.exp %247 : vector<2x128xf32>
    %cst_88 = arith.constant 1.000000e+00 : f32
    %249 = vector.broadcast %cst_88 : f32 to vector<2x128xf32>
    %250 = arith.addf %249, %248 : vector<2x128xf32>
    %251 = arith.divf %249, %250 : vector<2x128xf32>
    %252 = vector.extract_strided_slice %239 {offsets = [0, 256], sizes = [2, 128], strides = [1, 1]} : vector<2x512xf32> to vector<2x128xf32>
    %253 = math.tanh %252 : vector<2x128xf32>
    %254 = vector.extract_strided_slice %239 {offsets = [0, 384], sizes = [2, 128], strides = [1, 1]} : vector<2x512xf32> to vector<2x128xf32>
    %255 = arith.negf %254 : vector<2x128xf32>
    %256 = math.exp %255 : vector<2x128xf32>
    %cst_89 = arith.constant 1.000000e+00 : f32
    %257 = vector.broadcast %cst_89 : f32 to vector<2x128xf32>
    %258 = arith.addf %257, %256 : vector<2x128xf32>
    %259 = arith.divf %257, %258 : vector<2x128xf32>
    %260 = arith.mulf %251, %233 : vector<2x128xf32>
    %261 = arith.mulf %245, %253 : vector<2x128xf32>
    %262 = arith.addf %260, %261 : vector<2x128xf32>
    %263 = math.tanh %262 : vector<2x128xf32>
    %264 = arith.mulf %259, %263 : vector<2x128xf32>
    %c10_90 = arith.constant 10 : index
    %c0_91 = arith.constant 0 : index
    %265 = vector.load %arg26[%c10_90, %c0_91] : memref<16x256xf32, #tpu.memory_space<vmem>>, vector<2x128xf32>
    tpu.vector_store %arg26[%c10_90, %c0_91], %264 {strides = array<i32>} : memref<16x256xf32, #tpu.memory_space<vmem>>, vector<2x128xf32>,
    %c12 = arith.constant 12 : index
    %c0_92 = arith.constant 0 : index
    %266 = vector.load %arg25[%c12, %c0_92] : memref<16x512xf32, #tpu.memory_space<vmem>>, vector<2x512xf32>
    %cst_93 = arith.constant dense<0.000000e+00> : vector<2x512xf32>
    %267 = tpu.matmul %264, %89, %cst_93 {dimension_numbers = #tpu.dot_dimension_numbers<[1], [0], [0], [1], [0, 0, 1, 1], [], []>} : vector<2x128xf32>, vector<128x512xf32>, vector<2x512xf32> -> vector<2x512xf32>
    %268 = arith.addf %266, %267 : vector<2x512xf32>
    %269 = vector.extract_strided_slice %268 {offsets = [0, 0], sizes = [2, 128], strides = [1, 1]} : vector<2x512xf32> to vector<2x128xf32>
    %270 = arith.negf %269 : vector<2x128xf32>
    %271 = math.exp %270 : vector<2x128xf32>
    %cst_94 = arith.constant 1.000000e+00 : f32
    %272 = vector.broadcast %cst_94 : f32 to vector<2x128xf32>
    %273 = arith.addf %272, %271 : vector<2x128xf32>
    %274 = arith.divf %272, %273 : vector<2x128xf32>
    %275 = vector.extract_strided_slice %268 {offsets = [0, 128], sizes = [2, 128], strides = [1, 1]} : vector<2x512xf32> to vector<2x128xf32>
    %276 = arith.negf %275 : vector<2x128xf32>
    %277 = math.exp %276 : vector<2x128xf32>
    %cst_95 = arith.constant 1.000000e+00 : f32
    %278 = vector.broadcast %cst_95 : f32 to vector<2x128xf32>
    %279 = arith.addf %278, %277 : vector<2x128xf32>
    %280 = arith.divf %278, %279 : vector<2x128xf32>
    %281 = vector.extract_strided_slice %268 {offsets = [0, 256], sizes = [2, 128], strides = [1, 1]} : vector<2x512xf32> to vector<2x128xf32>
    %282 = math.tanh %281 : vector<2x128xf32>
    %283 = vector.extract_strided_slice %268 {offsets = [0, 384], sizes = [2, 128], strides = [1, 1]} : vector<2x512xf32> to vector<2x128xf32>
    %284 = arith.negf %283 : vector<2x128xf32>
    %285 = math.exp %284 : vector<2x128xf32>
    %cst_96 = arith.constant 1.000000e+00 : f32
    %286 = vector.broadcast %cst_96 : f32 to vector<2x128xf32>
    %287 = arith.addf %286, %285 : vector<2x128xf32>
    %288 = arith.divf %286, %287 : vector<2x128xf32>
    %289 = arith.mulf %280, %262 : vector<2x128xf32>
    %290 = arith.mulf %274, %282 : vector<2x128xf32>
    %291 = arith.addf %289, %290 : vector<2x128xf32>
    %292 = math.tanh %291 : vector<2x128xf32>
    %293 = arith.mulf %288, %292 : vector<2x128xf32>
    %c12_97 = arith.constant 12 : index
    %c0_98 = arith.constant 0 : index
    %294 = vector.load %arg26[%c12_97, %c0_98] : memref<16x256xf32, #tpu.memory_space<vmem>>, vector<2x128xf32>
    tpu.vector_store %arg26[%c12_97, %c0_98], %293 {strides = array<i32>} : memref<16x256xf32, #tpu.memory_space<vmem>>, vector<2x128xf32>,
    %c14 = arith.constant 14 : index
    %c0_99 = arith.constant 0 : index
    %295 = vector.load %arg25[%c14, %c0_99] : memref<16x512xf32, #tpu.memory_space<vmem>>, vector<2x512xf32>
    %cst_100 = arith.constant dense<0.000000e+00> : vector<2x512xf32>
    %296 = tpu.matmul %293, %89, %cst_100 {dimension_numbers = #tpu.dot_dimension_numbers<[1], [0], [0], [1], [0, 0, 1, 1], [], []>} : vector<2x128xf32>, vector<128x512xf32>, vector<2x512xf32> -> vector<2x512xf32>
    %297 = arith.addf %295, %296 : vector<2x512xf32>
    %298 = vector.extract_strided_slice %297 {offsets = [0, 0], sizes = [2, 128], strides = [1, 1]} : vector<2x512xf32> to vector<2x128xf32>
    %299 = arith.negf %298 : vector<2x128xf32>
    %300 = math.exp %299 : vector<2x128xf32>
    %cst_101 = arith.constant 1.000000e+00 : f32
    %301 = vector.broadcast %cst_101 : f32 to vector<2x128xf32>
    %302 = arith.addf %301, %300 : vector<2x128xf32>
    %303 = arith.divf %301, %302 : vector<2x128xf32>
    %304 = vector.extract_strided_slice %297 {offsets = [0, 128], sizes = [2, 128], strides = [1, 1]} : vector<2x512xf32> to vector<2x128xf32>
    %305 = arith.negf %304 : vector<2x128xf32>
    %306 = math.exp %305 : vector<2x128xf32>
    %cst_102 = arith.constant 1.000000e+00 : f32
    %307 = vector.broadcast %cst_102 : f32 to vector<2x128xf32>
    %308 = arith.addf %307, %306 : vector<2x128xf32>
    %309 = arith.divf %307, %308 : vector<2x128xf32>
    %310 = vector.extract_strided_slice %297 {offsets = [0, 256], sizes = [2, 128], strides = [1, 1]} : vector<2x512xf32> to vector<2x128xf32>
    %311 = math.tanh %310 : vector<2x128xf32>
    %312 = vector.extract_strided_slice %297 {offsets = [0, 384], sizes = [2, 128], strides = [1, 1]} : vector<2x512xf32> to vector<2x128xf32>
    %313 = arith.negf %312 : vector<2x128xf32>
    %314 = math.exp %313 : vector<2x128xf32>
    %cst_103 = arith.constant 1.000000e+00 : f32
    %315 = vector.broadcast %cst_103 : f32 to vector<2x128xf32>
    %316 = arith.addf %315, %314 : vector<2x128xf32>
    %317 = arith.divf %315, %316 : vector<2x128xf32>
    %318 = arith.mulf %309, %291 : vector<2x128xf32>
    %319 = arith.mulf %303, %311 : vector<2x128xf32>
    %320 = arith.addf %318, %319 : vector<2x128xf32>
    %321 = math.tanh %320 : vector<2x128xf32>
    %322 = arith.mulf %317, %321 : vector<2x128xf32>
    %c14_104 = arith.constant 14 : index
    %c0_105 = arith.constant 0 : index
    %323 = vector.load %arg26[%c14_104, %c0_105] : memref<16x256xf32, #tpu.memory_space<vmem>>, vector<2x128xf32>
    tpu.vector_store %arg26[%c14_104, %c0_105], %322 {strides = array<i32>} : memref<16x256xf32, #tpu.memory_space<vmem>>, vector<2x128xf32>,
    %c0_106 = arith.constant 0 : index
    %c0_107 = arith.constant 0 : index
    %324 = vector.load %arg14[%c0_106, %c0_107] : memref<128x512xf32, #tpu.memory_space<vmem>>, vector<128x512xf32>
    %cst_108 = arith.constant dense<0.000000e+00> : vector<16x512xf32>
    %325 = tpu.matmul %82, %324, %cst_108 {dimension_numbers = #tpu.dot_dimension_numbers<[1], [0], [0], [1], [0, 0, 1, 1], [], []>} : vector<16x128xf32>, vector<128x512xf32>, vector<16x512xf32> -> vector<16x512xf32>
    %c0_109 = arith.constant 0 : index
    %c0_110 = arith.constant 0 : index
    %326 = vector.load %arg16[%c0_109, %c0_110] : memref<1x512xf32, #tpu.memory_space<vmem>>, vector<1x512xf32>
    %327 = vector.broadcast %326 : vector<1x512xf32> to vector<16x512xf32>
    %328 = arith.addf %325, %327 : vector<16x512xf32>
    %c0_111 = arith.constant 0 : index
    %c0_112 = arith.constant 0 : index
    %329 = vector.load %arg25[%c0_111, %c0_112] : memref<16x512xf32, #tpu.memory_space<vmem>>, vector<16x512xf32>
    tpu.vector_store %arg25[%c0_111, %c0_112], %328 {strides = array<i32>} : memref<16x512xf32, #tpu.memory_space<vmem>>, vector<16x512xf32>,
    %c0_113 = arith.constant 0 : index
    %c0_114 = arith.constant 0 : index
    %330 = vector.load %arg15[%c0_113, %c0_114] : memref<128x512xf32, #tpu.memory_space<vmem>>, vector<128x512xf32>
    %cst_115 = arith.constant 0.000000e+00 : f32
    %331 = vector.broadcast %cst_115 : f32 to vector<2x128xf32>
    %cst_116 = arith.constant 0.000000e+00 : f32
    %332 = vector.broadcast %cst_116 : f32 to vector<2x128xf32>
    %c14_117 = arith.constant 14 : index
    %c0_118 = arith.constant 0 : index
    %333 = vector.load %arg25[%c14_117, %c0_118] : memref<16x512xf32, #tpu.memory_space<vmem>>, vector<2x512xf32>
    %cst_119 = arith.constant dense<0.000000e+00> : vector<2x512xf32>
    %334 = tpu.matmul %331, %330, %cst_119 {dimension_numbers = #tpu.dot_dimension_numbers<[1], [0], [0], [1], [0, 0, 1, 1], [], []>} : vector<2x128xf32>, vector<128x512xf32>, vector<2x512xf32> -> vector<2x512xf32>
    %335 = arith.addf %333, %334 : vector<2x512xf32>
    %336 = vector.extract_strided_slice %335 {offsets = [0, 0], sizes = [2, 128], strides = [1, 1]} : vector<2x512xf32> to vector<2x128xf32>
    %337 = arith.negf %336 : vector<2x128xf32>
    %338 = math.exp %337 : vector<2x128xf32>
    %cst_120 = arith.constant 1.000000e+00 : f32
    %339 = vector.broadcast %cst_120 : f32 to vector<2x128xf32>
    %340 = arith.addf %339, %338 : vector<2x128xf32>
    %341 = arith.divf %339, %340 : vector<2x128xf32>
    %342 = vector.extract_strided_slice %335 {offsets = [0, 128], sizes = [2, 128], strides = [1, 1]} : vector<2x512xf32> to vector<2x128xf32>
    %343 = arith.negf %342 : vector<2x128xf32>
    %344 = math.exp %343 : vector<2x128xf32>
    %cst_121 = arith.constant 1.000000e+00 : f32
    %345 = vector.broadcast %cst_121 : f32 to vector<2x128xf32>
    %346 = arith.addf %345, %344 : vector<2x128xf32>
    %347 = arith.divf %345, %346 : vector<2x128xf32>
    %348 = vector.extract_strided_slice %335 {offsets = [0, 256], sizes = [2, 128], strides = [1, 1]} : vector<2x512xf32> to vector<2x128xf32>
    %349 = math.tanh %348 : vector<2x128xf32>
    %350 = vector.extract_strided_slice %335 {offsets = [0, 384], sizes = [2, 128], strides = [1, 1]} : vector<2x512xf32> to vector<2x128xf32>
    %351 = arith.negf %350 : vector<2x128xf32>
    %352 = math.exp %351 : vector<2x128xf32>
    %cst_122 = arith.constant 1.000000e+00 : f32
    %353 = vector.broadcast %cst_122 : f32 to vector<2x128xf32>
    %354 = arith.addf %353, %352 : vector<2x128xf32>
    %355 = arith.divf %353, %354 : vector<2x128xf32>
    %356 = arith.mulf %347, %332 : vector<2x128xf32>
    %357 = arith.mulf %341, %349 : vector<2x128xf32>
    %358 = arith.addf %356, %357 : vector<2x128xf32>
    %359 = math.tanh %358 : vector<2x128xf32>
    %360 = arith.mulf %355, %359 : vector<2x128xf32>
    %c14_123 = arith.constant 14 : index
    %c128 = arith.constant 128 : index
    %361 = vector.load %arg26[%c14_123, %c128] : memref<16x256xf32, #tpu.memory_space<vmem>>, vector<2x128xf32>
    tpu.vector_store %arg26[%c14_123, %c128], %360 {strides = array<i32>} : memref<16x256xf32, #tpu.memory_space<vmem>>, vector<2x128xf32>,
    %c12_124 = arith.constant 12 : index
    %c0_125 = arith.constant 0 : index
    %362 = vector.load %arg25[%c12_124, %c0_125] : memref<16x512xf32, #tpu.memory_space<vmem>>, vector<2x512xf32>
    %cst_126 = arith.constant dense<0.000000e+00> : vector<2x512xf32>
    %363 = tpu.matmul %360, %330, %cst_126 {dimension_numbers = #tpu.dot_dimension_numbers<[1], [0], [0], [1], [0, 0, 1, 1], [], []>} : vector<2x128xf32>, vector<128x512xf32>, vector<2x512xf32> -> vector<2x512xf32>
    %364 = arith.addf %362, %363 : vector<2x512xf32>
    %365 = vector.extract_strided_slice %364 {offsets = [0, 0], sizes = [2, 128], strides = [1, 1]} : vector<2x512xf32> to vector<2x128xf32>
    %366 = arith.negf %365 : vector<2x128xf32>
    %367 = math.exp %366 : vector<2x128xf32>
    %cst_127 = arith.constant 1.000000e+00 : f32
    %368 = vector.broadcast %cst_127 : f32 to vector<2x128xf32>
    %369 = arith.addf %368, %367 : vector<2x128xf32>
    %370 = arith.divf %368, %369 : vector<2x128xf32>
    %371 = vector.extract_strided_slice %364 {offsets = [0, 128], sizes = [2, 128], strides = [1, 1]} : vector<2x512xf32> to vector<2x128xf32>
    %372 = arith.negf %371 : vector<2x128xf32>
    %373 = math.exp %372 : vector<2x128xf32>
    %cst_128 = arith.constant 1.000000e+00 : f32
    %374 = vector.broadcast %cst_128 : f32 to vector<2x128xf32>
    %375 = arith.addf %374, %373 : vector<2x128xf32>
    %376 = arith.divf %374, %375 : vector<2x128xf32>
    %377 = vector.extract_strided_slice %364 {offsets = [0, 256], sizes = [2, 128], strides = [1, 1]} : vector<2x512xf32> to vector<2x128xf32>
    %378 = math.tanh %377 : vector<2x128xf32>
    %379 = vector.extract_strided_slice %364 {offsets = [0, 384], sizes = [2, 128], strides = [1, 1]} : vector<2x512xf32> to vector<2x128xf32>
    %380 = arith.negf %379 : vector<2x128xf32>
    %381 = math.exp %380 : vector<2x128xf32>
    %cst_129 = arith.constant 1.000000e+00 : f32
    %382 = vector.broadcast %cst_129 : f32 to vector<2x128xf32>
    %383 = arith.addf %382, %381 : vector<2x128xf32>
    %384 = arith.divf %382, %383 : vector<2x128xf32>
    %385 = arith.mulf %376, %358 : vector<2x128xf32>
    %386 = arith.mulf %370, %378 : vector<2x128xf32>
    %387 = arith.addf %385, %386 : vector<2x128xf32>
    %388 = math.tanh %387 : vector<2x128xf32>
    %389 = arith.mulf %384, %388 : vector<2x128xf32>
    %c12_130 = arith.constant 12 : index
    %c128_131 = arith.constant 128 : index
    %390 = vector.load %arg26[%c12_130, %c128_131] : memref<16x256xf32, #tpu.memory_space<vmem>>, vector<2x128xf32>
    tpu.vector_store %arg26[%c12_130, %c128_131], %389 {strides = array<i32>} : memref<16x256xf32, #tpu.memory_space<vmem>>, vector<2x128xf32>,
    %c10_132 = arith.constant 10 : index
    %c0_133 = arith.constant 0 : index
    %391 = vector.load %arg25[%c10_132, %c0_133] : memref<16x512xf32, #tpu.memory_space<vmem>>, vector<2x512xf32>
    %cst_134 = arith.constant dense<0.000000e+00> : vector<2x512xf32>
    %392 = tpu.matmul %389, %330, %cst_134 {dimension_numbers = #tpu.dot_dimension_numbers<[1], [0], [0], [1], [0, 0, 1, 1], [], []>} : vector<2x128xf32>, vector<128x512xf32>, vector<2x512xf32> -> vector<2x512xf32>
    %393 = arith.addf %391, %392 : vector<2x512xf32>
    %394 = vector.extract_strided_slice %393 {offsets = [0, 0], sizes = [2, 128], strides = [1, 1]} : vector<2x512xf32> to vector<2x128xf32>
    %395 = arith.negf %394 : vector<2x128xf32>
    %396 = math.exp %395 : vector<2x128xf32>
    %cst_135 = arith.constant 1.000000e+00 : f32
    %397 = vector.broadcast %cst_135 : f32 to vector<2x128xf32>
    %398 = arith.addf %397, %396 : vector<2x128xf32>
    %399 = arith.divf %397, %398 : vector<2x128xf32>
    %400 = vector.extract_strided_slice %393 {offsets = [0, 128], sizes = [2, 128], strides = [1, 1]} : vector<2x512xf32> to vector<2x128xf32>
    %401 = arith.negf %400 : vector<2x128xf32>
    %402 = math.exp %401 : vector<2x128xf32>
    %cst_136 = arith.constant 1.000000e+00 : f32
    %403 = vector.broadcast %cst_136 : f32 to vector<2x128xf32>
    %404 = arith.addf %403, %402 : vector<2x128xf32>
    %405 = arith.divf %403, %404 : vector<2x128xf32>
    %406 = vector.extract_strided_slice %393 {offsets = [0, 256], sizes = [2, 128], strides = [1, 1]} : vector<2x512xf32> to vector<2x128xf32>
    %407 = math.tanh %406 : vector<2x128xf32>
    %408 = vector.extract_strided_slice %393 {offsets = [0, 384], sizes = [2, 128], strides = [1, 1]} : vector<2x512xf32> to vector<2x128xf32>
    %409 = arith.negf %408 : vector<2x128xf32>
    %410 = math.exp %409 : vector<2x128xf32>
    %cst_137 = arith.constant 1.000000e+00 : f32
    %411 = vector.broadcast %cst_137 : f32 to vector<2x128xf32>
    %412 = arith.addf %411, %410 : vector<2x128xf32>
    %413 = arith.divf %411, %412 : vector<2x128xf32>
    %414 = arith.mulf %405, %387 : vector<2x128xf32>
    %415 = arith.mulf %399, %407 : vector<2x128xf32>
    %416 = arith.addf %414, %415 : vector<2x128xf32>
    %417 = math.tanh %416 : vector<2x128xf32>
    %418 = arith.mulf %413, %417 : vector<2x128xf32>
    %c10_138 = arith.constant 10 : index
    %c128_139 = arith.constant 128 : index
    %419 = vector.load %arg26[%c10_138, %c128_139] : memref<16x256xf32, #tpu.memory_space<vmem>>, vector<2x128xf32>
    tpu.vector_store %arg26[%c10_138, %c128_139], %418 {strides = array<i32>} : memref<16x256xf32, #tpu.memory_space<vmem>>, vector<2x128xf32>,
    %c8_140 = arith.constant 8 : index
    %c0_141 = arith.constant 0 : index
    %420 = vector.load %arg25[%c8_140, %c0_141] : memref<16x512xf32, #tpu.memory_space<vmem>>, vector<2x512xf32>
    %cst_142 = arith.constant dense<0.000000e+00> : vector<2x512xf32>
    %421 = tpu.matmul %418, %330, %cst_142 {dimension_numbers = #tpu.dot_dimension_numbers<[1], [0], [0], [1], [0, 0, 1, 1], [], []>} : vector<2x128xf32>, vector<128x512xf32>, vector<2x512xf32> -> vector<2x512xf32>
    %422 = arith.addf %420, %421 : vector<2x512xf32>
    %423 = vector.extract_strided_slice %422 {offsets = [0, 0], sizes = [2, 128], strides = [1, 1]} : vector<2x512xf32> to vector<2x128xf32>
    %424 = arith.negf %423 : vector<2x128xf32>
    %425 = math.exp %424 : vector<2x128xf32>
    %cst_143 = arith.constant 1.000000e+00 : f32
    %426 = vector.broadcast %cst_143 : f32 to vector<2x128xf32>
    %427 = arith.addf %426, %425 : vector<2x128xf32>
    %428 = arith.divf %426, %427 : vector<2x128xf32>
    %429 = vector.extract_strided_slice %422 {offsets = [0, 128], sizes = [2, 128], strides = [1, 1]} : vector<2x512xf32> to vector<2x128xf32>
    %430 = arith.negf %429 : vector<2x128xf32>
    %431 = math.exp %430 : vector<2x128xf32>
    %cst_144 = arith.constant 1.000000e+00 : f32
    %432 = vector.broadcast %cst_144 : f32 to vector<2x128xf32>
    %433 = arith.addf %432, %431 : vector<2x128xf32>
    %434 = arith.divf %432, %433 : vector<2x128xf32>
    %435 = vector.extract_strided_slice %422 {offsets = [0, 256], sizes = [2, 128], strides = [1, 1]} : vector<2x512xf32> to vector<2x128xf32>
    %436 = math.tanh %435 : vector<2x128xf32>
    %437 = vector.extract_strided_slice %422 {offsets = [0, 384], sizes = [2, 128], strides = [1, 1]} : vector<2x512xf32> to vector<2x128xf32>
    %438 = arith.negf %437 : vector<2x128xf32>
    %439 = math.exp %438 : vector<2x128xf32>
    %cst_145 = arith.constant 1.000000e+00 : f32
    %440 = vector.broadcast %cst_145 : f32 to vector<2x128xf32>
    %441 = arith.addf %440, %439 : vector<2x128xf32>
    %442 = arith.divf %440, %441 : vector<2x128xf32>
    %443 = arith.mulf %434, %416 : vector<2x128xf32>
    %444 = arith.mulf %428, %436 : vector<2x128xf32>
    %445 = arith.addf %443, %444 : vector<2x128xf32>
    %446 = math.tanh %445 : vector<2x128xf32>
    %447 = arith.mulf %442, %446 : vector<2x128xf32>
    %c8_146 = arith.constant 8 : index
    %c128_147 = arith.constant 128 : index
    %448 = vector.load %arg26[%c8_146, %c128_147] : memref<16x256xf32, #tpu.memory_space<vmem>>, vector<2x128xf32>
    tpu.vector_store %arg26[%c8_146, %c128_147], %447 {strides = array<i32>} : memref<16x256xf32, #tpu.memory_space<vmem>>, vector<2x128xf32>,
    %c6_148 = arith.constant 6 : index
    %c0_149 = arith.constant 0 : index
    %449 = vector.load %arg25[%c6_148, %c0_149] : memref<16x512xf32, #tpu.memory_space<vmem>>, vector<2x512xf32>
    %cst_150 = arith.constant dense<0.000000e+00> : vector<2x512xf32>
    %450 = tpu.matmul %447, %330, %cst_150 {dimension_numbers = #tpu.dot_dimension_numbers<[1], [0], [0], [1], [0, 0, 1, 1], [], []>} : vector<2x128xf32>, vector<128x512xf32>, vector<2x512xf32> -> vector<2x512xf32>
    %451 = arith.addf %449, %450 : vector<2x512xf32>
    %452 = vector.extract_strided_slice %451 {offsets = [0, 0], sizes = [2, 128], strides = [1, 1]} : vector<2x512xf32> to vector<2x128xf32>
    %453 = arith.negf %452 : vector<2x128xf32>
    %454 = math.exp %453 : vector<2x128xf32>
    %cst_151 = arith.constant 1.000000e+00 : f32
    %455 = vector.broadcast %cst_151 : f32 to vector<2x128xf32>
    %456 = arith.addf %455, %454 : vector<2x128xf32>
    %457 = arith.divf %455, %456 : vector<2x128xf32>
    %458 = vector.extract_strided_slice %451 {offsets = [0, 128], sizes = [2, 128], strides = [1, 1]} : vector<2x512xf32> to vector<2x128xf32>
    %459 = arith.negf %458 : vector<2x128xf32>
    %460 = math.exp %459 : vector<2x128xf32>
    %cst_152 = arith.constant 1.000000e+00 : f32
    %461 = vector.broadcast %cst_152 : f32 to vector<2x128xf32>
    %462 = arith.addf %461, %460 : vector<2x128xf32>
    %463 = arith.divf %461, %462 : vector<2x128xf32>
    %464 = vector.extract_strided_slice %451 {offsets = [0, 256], sizes = [2, 128], strides = [1, 1]} : vector<2x512xf32> to vector<2x128xf32>
    %465 = math.tanh %464 : vector<2x128xf32>
    %466 = vector.extract_strided_slice %451 {offsets = [0, 384], sizes = [2, 128], strides = [1, 1]} : vector<2x512xf32> to vector<2x128xf32>
    %467 = arith.negf %466 : vector<2x128xf32>
    %468 = math.exp %467 : vector<2x128xf32>
    %cst_153 = arith.constant 1.000000e+00 : f32
    %469 = vector.broadcast %cst_153 : f32 to vector<2x128xf32>
    %470 = arith.addf %469, %468 : vector<2x128xf32>
    %471 = arith.divf %469, %470 : vector<2x128xf32>
    %472 = arith.mulf %463, %445 : vector<2x128xf32>
    %473 = arith.mulf %457, %465 : vector<2x128xf32>
    %474 = arith.addf %472, %473 : vector<2x128xf32>
    %475 = math.tanh %474 : vector<2x128xf32>
    %476 = arith.mulf %471, %475 : vector<2x128xf32>
    %c6_154 = arith.constant 6 : index
    %c128_155 = arith.constant 128 : index
    %477 = vector.load %arg26[%c6_154, %c128_155] : memref<16x256xf32, #tpu.memory_space<vmem>>, vector<2x128xf32>
    tpu.vector_store %arg26[%c6_154, %c128_155], %476 {strides = array<i32>} : memref<16x256xf32, #tpu.memory_space<vmem>>, vector<2x128xf32>,
    %c4_156 = arith.constant 4 : index
    %c0_157 = arith.constant 0 : index
    %478 = vector.load %arg25[%c4_156, %c0_157] : memref<16x512xf32, #tpu.memory_space<vmem>>, vector<2x512xf32>
    %cst_158 = arith.constant dense<0.000000e+00> : vector<2x512xf32>
    %479 = tpu.matmul %476, %330, %cst_158 {dimension_numbers = #tpu.dot_dimension_numbers<[1], [0], [0], [1], [0, 0, 1, 1], [], []>} : vector<2x128xf32>, vector<128x512xf32>, vector<2x512xf32> -> vector<2x512xf32>
    %480 = arith.addf %478, %479 : vector<2x512xf32>
    %481 = vector.extract_strided_slice %480 {offsets = [0, 0], sizes = [2, 128], strides = [1, 1]} : vector<2x512xf32> to vector<2x128xf32>
    %482 = arith.negf %481 : vector<2x128xf32>
    %483 = math.exp %482 : vector<2x128xf32>
    %cst_159 = arith.constant 1.000000e+00 : f32
    %484 = vector.broadcast %cst_159 : f32 to vector<2x128xf32>
    %485 = arith.addf %484, %483 : vector<2x128xf32>
    %486 = arith.divf %484, %485 : vector<2x128xf32>
    %487 = vector.extract_strided_slice %480 {offsets = [0, 128], sizes = [2, 128], strides = [1, 1]} : vector<2x512xf32> to vector<2x128xf32>
    %488 = arith.negf %487 : vector<2x128xf32>
    %489 = math.exp %488 : vector<2x128xf32>
    %cst_160 = arith.constant 1.000000e+00 : f32
    %490 = vector.broadcast %cst_160 : f32 to vector<2x128xf32>
    %491 = arith.addf %490, %489 : vector<2x128xf32>
    %492 = arith.divf %490, %491 : vector<2x128xf32>
    %493 = vector.extract_strided_slice %480 {offsets = [0, 256], sizes = [2, 128], strides = [1, 1]} : vector<2x512xf32> to vector<2x128xf32>
    %494 = math.tanh %493 : vector<2x128xf32>
    %495 = vector.extract_strided_slice %480 {offsets = [0, 384], sizes = [2, 128], strides = [1, 1]} : vector<2x512xf32> to vector<2x128xf32>
    %496 = arith.negf %495 : vector<2x128xf32>
    %497 = math.exp %496 : vector<2x128xf32>
    %cst_161 = arith.constant 1.000000e+00 : f32
    %498 = vector.broadcast %cst_161 : f32 to vector<2x128xf32>
    %499 = arith.addf %498, %497 : vector<2x128xf32>
    %500 = arith.divf %498, %499 : vector<2x128xf32>
    %501 = arith.mulf %492, %474 : vector<2x128xf32>
    %502 = arith.mulf %486, %494 : vector<2x128xf32>
    %503 = arith.addf %501, %502 : vector<2x128xf32>
    %504 = math.tanh %503 : vector<2x128xf32>
    %505 = arith.mulf %500, %504 : vector<2x128xf32>
    %c4_162 = arith.constant 4 : index
    %c128_163 = arith.constant 128 : index
    %506 = vector.load %arg26[%c4_162, %c128_163] : memref<16x256xf32, #tpu.memory_space<vmem>>, vector<2x128xf32>
    tpu.vector_store %arg26[%c4_162, %c128_163], %505 {strides = array<i32>} : memref<16x256xf32, #tpu.memory_space<vmem>>, vector<2x128xf32>,
    %c2_164 = arith.constant 2 : index
    %c0_165 = arith.constant 0 : index
    %507 = vector.load %arg25[%c2_164, %c0_165] : memref<16x512xf32, #tpu.memory_space<vmem>>, vector<2x512xf32>
    %cst_166 = arith.constant dense<0.000000e+00> : vector<2x512xf32>
    %508 = tpu.matmul %505, %330, %cst_166 {dimension_numbers = #tpu.dot_dimension_numbers<[1], [0], [0], [1], [0, 0, 1, 1], [], []>} : vector<2x128xf32>, vector<128x512xf32>, vector<2x512xf32> -> vector<2x512xf32>
    %509 = arith.addf %507, %508 : vector<2x512xf32>
    %510 = vector.extract_strided_slice %509 {offsets = [0, 0], sizes = [2, 128], strides = [1, 1]} : vector<2x512xf32> to vector<2x128xf32>
    %511 = arith.negf %510 : vector<2x128xf32>
    %512 = math.exp %511 : vector<2x128xf32>
    %cst_167 = arith.constant 1.000000e+00 : f32
    %513 = vector.broadcast %cst_167 : f32 to vector<2x128xf32>
    %514 = arith.addf %513, %512 : vector<2x128xf32>
    %515 = arith.divf %513, %514 : vector<2x128xf32>
    %516 = vector.extract_strided_slice %509 {offsets = [0, 128], sizes = [2, 128], strides = [1, 1]} : vector<2x512xf32> to vector<2x128xf32>
    %517 = arith.negf %516 : vector<2x128xf32>
    %518 = math.exp %517 : vector<2x128xf32>
    %cst_168 = arith.constant 1.000000e+00 : f32
    %519 = vector.broadcast %cst_168 : f32 to vector<2x128xf32>
    %520 = arith.addf %519, %518 : vector<2x128xf32>
    %521 = arith.divf %519, %520 : vector<2x128xf32>
    %522 = vector.extract_strided_slice %509 {offsets = [0, 256], sizes = [2, 128], strides = [1, 1]} : vector<2x512xf32> to vector<2x128xf32>
    %523 = math.tanh %522 : vector<2x128xf32>
    %524 = vector.extract_strided_slice %509 {offsets = [0, 384], sizes = [2, 128], strides = [1, 1]} : vector<2x512xf32> to vector<2x128xf32>
    %525 = arith.negf %524 : vector<2x128xf32>
    %526 = math.exp %525 : vector<2x128xf32>
    %cst_169 = arith.constant 1.000000e+00 : f32
    %527 = vector.broadcast %cst_169 : f32 to vector<2x128xf32>
    %528 = arith.addf %527, %526 : vector<2x128xf32>
    %529 = arith.divf %527, %528 : vector<2x128xf32>
    %530 = arith.mulf %521, %503 : vector<2x128xf32>
    %531 = arith.mulf %515, %523 : vector<2x128xf32>
    %532 = arith.addf %530, %531 : vector<2x128xf32>
    %533 = math.tanh %532 : vector<2x128xf32>
    %534 = arith.mulf %529, %533 : vector<2x128xf32>
    %c2_170 = arith.constant 2 : index
    %c128_171 = arith.constant 128 : index
    %535 = vector.load %arg26[%c2_170, %c128_171] : memref<16x256xf32, #tpu.memory_space<vmem>>, vector<2x128xf32>
    tpu.vector_store %arg26[%c2_170, %c128_171], %534 {strides = array<i32>} : memref<16x256xf32, #tpu.memory_space<vmem>>, vector<2x128xf32>,
    %c0_172 = arith.constant 0 : index
    %c0_173 = arith.constant 0 : index
    %536 = vector.load %arg25[%c0_172, %c0_173] : memref<16x512xf32, #tpu.memory_space<vmem>>, vector<2x512xf32>
    %cst_174 = arith.constant dense<0.000000e+00> : vector<2x512xf32>
    %537 = tpu.matmul %534, %330, %cst_174 {dimension_numbers = #tpu.dot_dimension_numbers<[1], [0], [0], [1], [0, 0, 1, 1], [], []>} : vector<2x128xf32>, vector<128x512xf32>, vector<2x512xf32> -> vector<2x512xf32>
    %538 = arith.addf %536, %537 : vector<2x512xf32>
    %539 = vector.extract_strided_slice %538 {offsets = [0, 0], sizes = [2, 128], strides = [1, 1]} : vector<2x512xf32> to vector<2x128xf32>
    %540 = arith.negf %539 : vector<2x128xf32>
    %541 = math.exp %540 : vector<2x128xf32>
    %cst_175 = arith.constant 1.000000e+00 : f32
    %542 = vector.broadcast %cst_175 : f32 to vector<2x128xf32>
    %543 = arith.addf %542, %541 : vector<2x128xf32>
    %544 = arith.divf %542, %543 : vector<2x128xf32>
    %545 = vector.extract_strided_slice %538 {offsets = [0, 128], sizes = [2, 128], strides = [1, 1]} : vector<2x512xf32> to vector<2x128xf32>
    %546 = arith.negf %545 : vector<2x128xf32>
    %547 = math.exp %546 : vector<2x128xf32>
    %cst_176 = arith.constant 1.000000e+00 : f32
    %548 = vector.broadcast %cst_176 : f32 to vector<2x128xf32>
    %549 = arith.addf %548, %547 : vector<2x128xf32>
    %550 = arith.divf %548, %549 : vector<2x128xf32>
    %551 = vector.extract_strided_slice %538 {offsets = [0, 256], sizes = [2, 128], strides = [1, 1]} : vector<2x512xf32> to vector<2x128xf32>
    %552 = math.tanh %551 : vector<2x128xf32>
    %553 = vector.extract_strided_slice %538 {offsets = [0, 384], sizes = [2, 128], strides = [1, 1]} : vector<2x512xf32> to vector<2x128xf32>
    %554 = arith.negf %553 : vector<2x128xf32>
    %555 = math.exp %554 : vector<2x128xf32>
    %cst_177 = arith.constant 1.000000e+00 : f32
    %556 = vector.broadcast %cst_177 : f32 to vector<2x128xf32>
    %557 = arith.addf %556, %555 : vector<2x128xf32>
    %558 = arith.divf %556, %557 : vector<2x128xf32>
    %559 = arith.mulf %550, %532 : vector<2x128xf32>
    %560 = arith.mulf %544, %552 : vector<2x128xf32>
    %561 = arith.addf %559, %560 : vector<2x128xf32>
    %562 = math.tanh %561 : vector<2x128xf32>
    %563 = arith.mulf %558, %562 : vector<2x128xf32>
    %c0_178 = arith.constant 0 : index
    %c128_179 = arith.constant 128 : index
    %564 = vector.load %arg26[%c0_178, %c128_179] : memref<16x256xf32, #tpu.memory_space<vmem>>, vector<2x128xf32>
    tpu.vector_store %arg26[%c0_178, %c128_179], %563 {strides = array<i32>} : memref<16x256xf32, #tpu.memory_space<vmem>>, vector<2x128xf32>,
    %c0_180 = arith.constant 0 : index
    %c0_181 = arith.constant 0 : index
    %565 = vector.load %arg26[%c0_180, %c0_181] : memref<16x256xf32, #tpu.memory_space<vmem>>, vector<16x256xf32>
    %c0_182 = arith.constant 0 : index
    %c0_183 = arith.constant 0 : index
    %566 = vector.load %arg17[%c0_182, %c0_183] : memref<256x512xf32, #tpu.memory_space<vmem>>, vector<256x512xf32>
    %cst_184 = arith.constant dense<0.000000e+00> : vector<16x512xf32>
    %567 = tpu.matmul %565, %566, %cst_184 {dimension_numbers = #tpu.dot_dimension_numbers<[1], [0], [0], [1], [0, 0, 1, 1], [], []>} : vector<16x256xf32>, vector<256x512xf32>, vector<16x512xf32> -> vector<16x512xf32>
    %c0_185 = arith.constant 0 : index
    %c0_186 = arith.constant 0 : index
    %568 = vector.load %arg19[%c0_185, %c0_186] : memref<1x512xf32, #tpu.memory_space<vmem>>, vector<1x512xf32>
    %569 = vector.broadcast %568 : vector<1x512xf32> to vector<16x512xf32>
    %570 = arith.addf %567, %569 : vector<16x512xf32>
    %c0_187 = arith.constant 0 : index
    %c0_188 = arith.constant 0 : index
    %571 = vector.load %arg25[%c0_187, %c0_188] : memref<16x512xf32, #tpu.memory_space<vmem>>, vector<16x512xf32>
    tpu.vector_store %arg25[%c0_187, %c0_188], %570 {strides = array<i32>} : memref<16x512xf32, #tpu.memory_space<vmem>>, vector<16x512xf32>,
    %c0_189 = arith.constant 0 : index
    %c0_190 = arith.constant 0 : index
    %572 = vector.load %arg18[%c0_189, %c0_190] : memref<128x512xf32, #tpu.memory_space<vmem>>, vector<128x512xf32>
    %cst_191 = arith.constant 0.000000e+00 : f32
    %573 = vector.broadcast %cst_191 : f32 to vector<2x128xf32>
    %cst_192 = arith.constant 0.000000e+00 : f32
    %574 = vector.broadcast %cst_192 : f32 to vector<2x128xf32>
    %c0_193 = arith.constant 0 : index
    %c0_194 = arith.constant 0 : index
    %575 = vector.load %arg25[%c0_193, %c0_194] : memref<16x512xf32, #tpu.memory_space<vmem>>, vector<2x512xf32>
    %cst_195 = arith.constant dense<0.000000e+00> : vector<2x512xf32>
    %576 = tpu.matmul %573, %572, %cst_195 {dimension_numbers = #tpu.dot_dimension_numbers<[1], [0], [0], [1], [0, 0, 1, 1], [], []>} : vector<2x128xf32>, vector<128x512xf32>, vector<2x512xf32> -> vector<2x512xf32>
    %577 = arith.addf %575, %576 : vector<2x512xf32>
    %578 = vector.extract_strided_slice %577 {offsets = [0, 0], sizes = [2, 128], strides = [1, 1]} : vector<2x512xf32> to vector<2x128xf32>
    %579 = arith.negf %578 : vector<2x128xf32>
    %580 = math.exp %579 : vector<2x128xf32>
    %cst_196 = arith.constant 1.000000e+00 : f32
    %581 = vector.broadcast %cst_196 : f32 to vector<2x128xf32>
    %582 = arith.addf %581, %580 : vector<2x128xf32>
    %583 = arith.divf %581, %582 : vector<2x128xf32>
    %584 = vector.extract_strided_slice %577 {offsets = [0, 128], sizes = [2, 128], strides = [1, 1]} : vector<2x512xf32> to vector<2x128xf32>
    %585 = arith.negf %584 : vector<2x128xf32>
    %586 = math.exp %585 : vector<2x128xf32>
    %cst_197 = arith.constant 1.000000e+00 : f32
    %587 = vector.broadcast %cst_197 : f32 to vector<2x128xf32>
    %588 = arith.addf %587, %586 : vector<2x128xf32>
    %589 = arith.divf %587, %588 : vector<2x128xf32>
    %590 = vector.extract_strided_slice %577 {offsets = [0, 256], sizes = [2, 128], strides = [1, 1]} : vector<2x512xf32> to vector<2x128xf32>
    %591 = math.tanh %590 : vector<2x128xf32>
    %592 = vector.extract_strided_slice %577 {offsets = [0, 384], sizes = [2, 128], strides = [1, 1]} : vector<2x512xf32> to vector<2x128xf32>
    %593 = arith.negf %592 : vector<2x128xf32>
    %594 = math.exp %593 : vector<2x128xf32>
    %cst_198 = arith.constant 1.000000e+00 : f32
    %595 = vector.broadcast %cst_198 : f32 to vector<2x128xf32>
    %596 = arith.addf %595, %594 : vector<2x128xf32>
    %597 = arith.divf %595, %596 : vector<2x128xf32>
    %598 = arith.mulf %589, %574 : vector<2x128xf32>
    %599 = arith.mulf %583, %591 : vector<2x128xf32>
    %600 = arith.addf %598, %599 : vector<2x128xf32>
    %601 = math.tanh %600 : vector<2x128xf32>
    %602 = arith.mulf %597, %601 : vector<2x128xf32>
    %c2_199 = arith.constant 2 : index
    %c0_200 = arith.constant 0 : index
    %603 = vector.load %arg25[%c2_199, %c0_200] : memref<16x512xf32, #tpu.memory_space<vmem>>, vector<2x512xf32>
    %cst_201 = arith.constant dense<0.000000e+00> : vector<2x512xf32>
    %604 = tpu.matmul %602, %572, %cst_201 {dimension_numbers = #tpu.dot_dimension_numbers<[1], [0], [0], [1], [0, 0, 1, 1], [], []>} : vector<2x128xf32>, vector<128x512xf32>, vector<2x512xf32> -> vector<2x512xf32>
    %605 = arith.addf %603, %604 : vector<2x512xf32>
    %606 = vector.extract_strided_slice %605 {offsets = [0, 0], sizes = [2, 128], strides = [1, 1]} : vector<2x512xf32> to vector<2x128xf32>
    %607 = arith.negf %606 : vector<2x128xf32>
    %608 = math.exp %607 : vector<2x128xf32>
    %cst_202 = arith.constant 1.000000e+00 : f32
    %609 = vector.broadcast %cst_202 : f32 to vector<2x128xf32>
    %610 = arith.addf %609, %608 : vector<2x128xf32>
    %611 = arith.divf %609, %610 : vector<2x128xf32>
    %612 = vector.extract_strided_slice %605 {offsets = [0, 128], sizes = [2, 128], strides = [1, 1]} : vector<2x512xf32> to vector<2x128xf32>
    %613 = arith.negf %612 : vector<2x128xf32>
    %614 = math.exp %613 : vector<2x128xf32>
    %cst_203 = arith.constant 1.000000e+00 : f32
    %615 = vector.broadcast %cst_203 : f32 to vector<2x128xf32>
    %616 = arith.addf %615, %614 : vector<2x128xf32>
    %617 = arith.divf %615, %616 : vector<2x128xf32>
    %618 = vector.extract_strided_slice %605 {offsets = [0, 256], sizes = [2, 128], strides = [1, 1]} : vector<2x512xf32> to vector<2x128xf32>
    %619 = math.tanh %618 : vector<2x128xf32>
    %620 = vector.extract_strided_slice %605 {offsets = [0, 384], sizes = [2, 128], strides = [1, 1]} : vector<2x512xf32> to vector<2x128xf32>
    %621 = arith.negf %620 : vector<2x128xf32>
    %622 = math.exp %621 : vector<2x128xf32>
    %cst_204 = arith.constant 1.000000e+00 : f32
    %623 = vector.broadcast %cst_204 : f32 to vector<2x128xf32>
    %624 = arith.addf %623, %622 : vector<2x128xf32>
    %625 = arith.divf %623, %624 : vector<2x128xf32>
    %626 = arith.mulf %617, %600 : vector<2x128xf32>
    %627 = arith.mulf %611, %619 : vector<2x128xf32>
    %628 = arith.addf %626, %627 : vector<2x128xf32>
    %629 = math.tanh %628 : vector<2x128xf32>
    %630 = arith.mulf %625, %629 : vector<2x128xf32>
    %c4_205 = arith.constant 4 : index
    %c0_206 = arith.constant 0 : index
    %631 = vector.load %arg25[%c4_205, %c0_206] : memref<16x512xf32, #tpu.memory_space<vmem>>, vector<2x512xf32>
    %cst_207 = arith.constant dense<0.000000e+00> : vector<2x512xf32>
    %632 = tpu.matmul %630, %572, %cst_207 {dimension_numbers = #tpu.dot_dimension_numbers<[1], [0], [0], [1], [0, 0, 1, 1], [], []>} : vector<2x128xf32>, vector<128x512xf32>, vector<2x512xf32> -> vector<2x512xf32>
    %633 = arith.addf %631, %632 : vector<2x512xf32>
    %634 = vector.extract_strided_slice %633 {offsets = [0, 0], sizes = [2, 128], strides = [1, 1]} : vector<2x512xf32> to vector<2x128xf32>
    %635 = arith.negf %634 : vector<2x128xf32>
    %636 = math.exp %635 : vector<2x128xf32>
    %cst_208 = arith.constant 1.000000e+00 : f32
    %637 = vector.broadcast %cst_208 : f32 to vector<2x128xf32>
    %638 = arith.addf %637, %636 : vector<2x128xf32>
    %639 = arith.divf %637, %638 : vector<2x128xf32>
    %640 = vector.extract_strided_slice %633 {offsets = [0, 128], sizes = [2, 128], strides = [1, 1]} : vector<2x512xf32> to vector<2x128xf32>
    %641 = arith.negf %640 : vector<2x128xf32>
    %642 = math.exp %641 : vector<2x128xf32>
    %cst_209 = arith.constant 1.000000e+00 : f32
    %643 = vector.broadcast %cst_209 : f32 to vector<2x128xf32>
    %644 = arith.addf %643, %642 : vector<2x128xf32>
    %645 = arith.divf %643, %644 : vector<2x128xf32>
    %646 = vector.extract_strided_slice %633 {offsets = [0, 256], sizes = [2, 128], strides = [1, 1]} : vector<2x512xf32> to vector<2x128xf32>
    %647 = math.tanh %646 : vector<2x128xf32>
    %648 = vector.extract_strided_slice %633 {offsets = [0, 384], sizes = [2, 128], strides = [1, 1]} : vector<2x512xf32> to vector<2x128xf32>
    %649 = arith.negf %648 : vector<2x128xf32>
    %650 = math.exp %649 : vector<2x128xf32>
    %cst_210 = arith.constant 1.000000e+00 : f32
    %651 = vector.broadcast %cst_210 : f32 to vector<2x128xf32>
    %652 = arith.addf %651, %650 : vector<2x128xf32>
    %653 = arith.divf %651, %652 : vector<2x128xf32>
    %654 = arith.mulf %645, %628 : vector<2x128xf32>
    %655 = arith.mulf %639, %647 : vector<2x128xf32>
    %656 = arith.addf %654, %655 : vector<2x128xf32>
    %657 = math.tanh %656 : vector<2x128xf32>
    %658 = arith.mulf %653, %657 : vector<2x128xf32>
    %c6_211 = arith.constant 6 : index
    %c0_212 = arith.constant 0 : index
    %659 = vector.load %arg25[%c6_211, %c0_212] : memref<16x512xf32, #tpu.memory_space<vmem>>, vector<2x512xf32>
    %cst_213 = arith.constant dense<0.000000e+00> : vector<2x512xf32>
    %660 = tpu.matmul %658, %572, %cst_213 {dimension_numbers = #tpu.dot_dimension_numbers<[1], [0], [0], [1], [0, 0, 1, 1], [], []>} : vector<2x128xf32>, vector<128x512xf32>, vector<2x512xf32> -> vector<2x512xf32>
    %661 = arith.addf %659, %660 : vector<2x512xf32>
    %662 = vector.extract_strided_slice %661 {offsets = [0, 0], sizes = [2, 128], strides = [1, 1]} : vector<2x512xf32> to vector<2x128xf32>
    %663 = arith.negf %662 : vector<2x128xf32>
    %664 = math.exp %663 : vector<2x128xf32>
    %cst_214 = arith.constant 1.000000e+00 : f32
    %665 = vector.broadcast %cst_214 : f32 to vector<2x128xf32>
    %666 = arith.addf %665, %664 : vector<2x128xf32>
    %667 = arith.divf %665, %666 : vector<2x128xf32>
    %668 = vector.extract_strided_slice %661 {offsets = [0, 128], sizes = [2, 128], strides = [1, 1]} : vector<2x512xf32> to vector<2x128xf32>
    %669 = arith.negf %668 : vector<2x128xf32>
    %670 = math.exp %669 : vector<2x128xf32>
    %cst_215 = arith.constant 1.000000e+00 : f32
    %671 = vector.broadcast %cst_215 : f32 to vector<2x128xf32>
    %672 = arith.addf %671, %670 : vector<2x128xf32>
    %673 = arith.divf %671, %672 : vector<2x128xf32>
    %674 = vector.extract_strided_slice %661 {offsets = [0, 256], sizes = [2, 128], strides = [1, 1]} : vector<2x512xf32> to vector<2x128xf32>
    %675 = math.tanh %674 : vector<2x128xf32>
    %676 = vector.extract_strided_slice %661 {offsets = [0, 384], sizes = [2, 128], strides = [1, 1]} : vector<2x512xf32> to vector<2x128xf32>
    %677 = arith.negf %676 : vector<2x128xf32>
    %678 = math.exp %677 : vector<2x128xf32>
    %cst_216 = arith.constant 1.000000e+00 : f32
    %679 = vector.broadcast %cst_216 : f32 to vector<2x128xf32>
    %680 = arith.addf %679, %678 : vector<2x128xf32>
    %681 = arith.divf %679, %680 : vector<2x128xf32>
    %682 = arith.mulf %673, %656 : vector<2x128xf32>
    %683 = arith.mulf %667, %675 : vector<2x128xf32>
    %684 = arith.addf %682, %683 : vector<2x128xf32>
    %685 = math.tanh %684 : vector<2x128xf32>
    %686 = arith.mulf %681, %685 : vector<2x128xf32>
    %c8_217 = arith.constant 8 : index
    %c0_218 = arith.constant 0 : index
    %687 = vector.load %arg25[%c8_217, %c0_218] : memref<16x512xf32, #tpu.memory_space<vmem>>, vector<2x512xf32>
    %cst_219 = arith.constant dense<0.000000e+00> : vector<2x512xf32>
    %688 = tpu.matmul %686, %572, %cst_219 {dimension_numbers = #tpu.dot_dimension_numbers<[1], [0], [0], [1], [0, 0, 1, 1], [], []>} : vector<2x128xf32>, vector<128x512xf32>, vector<2x512xf32> -> vector<2x512xf32>
    %689 = arith.addf %687, %688 : vector<2x512xf32>
    %690 = vector.extract_strided_slice %689 {offsets = [0, 0], sizes = [2, 128], strides = [1, 1]} : vector<2x512xf32> to vector<2x128xf32>
    %691 = arith.negf %690 : vector<2x128xf32>
    %692 = math.exp %691 : vector<2x128xf32>
    %cst_220 = arith.constant 1.000000e+00 : f32
    %693 = vector.broadcast %cst_220 : f32 to vector<2x128xf32>
    %694 = arith.addf %693, %692 : vector<2x128xf32>
    %695 = arith.divf %693, %694 : vector<2x128xf32>
    %696 = vector.extract_strided_slice %689 {offsets = [0, 128], sizes = [2, 128], strides = [1, 1]} : vector<2x512xf32> to vector<2x128xf32>
    %697 = arith.negf %696 : vector<2x128xf32>
    %698 = math.exp %697 : vector<2x128xf32>
    %cst_221 = arith.constant 1.000000e+00 : f32
    %699 = vector.broadcast %cst_221 : f32 to vector<2x128xf32>
    %700 = arith.addf %699, %698 : vector<2x128xf32>
    %701 = arith.divf %699, %700 : vector<2x128xf32>
    %702 = vector.extract_strided_slice %689 {offsets = [0, 256], sizes = [2, 128], strides = [1, 1]} : vector<2x512xf32> to vector<2x128xf32>
    %703 = math.tanh %702 : vector<2x128xf32>
    %704 = vector.extract_strided_slice %689 {offsets = [0, 384], sizes = [2, 128], strides = [1, 1]} : vector<2x512xf32> to vector<2x128xf32>
    %705 = arith.negf %704 : vector<2x128xf32>
    %706 = math.exp %705 : vector<2x128xf32>
    %cst_222 = arith.constant 1.000000e+00 : f32
    %707 = vector.broadcast %cst_222 : f32 to vector<2x128xf32>
    %708 = arith.addf %707, %706 : vector<2x128xf32>
    %709 = arith.divf %707, %708 : vector<2x128xf32>
    %710 = arith.mulf %701, %684 : vector<2x128xf32>
    %711 = arith.mulf %695, %703 : vector<2x128xf32>
    %712 = arith.addf %710, %711 : vector<2x128xf32>
    %713 = math.tanh %712 : vector<2x128xf32>
    %714 = arith.mulf %709, %713 : vector<2x128xf32>
    %c10_223 = arith.constant 10 : index
    %c0_224 = arith.constant 0 : index
    %715 = vector.load %arg25[%c10_223, %c0_224] : memref<16x512xf32, #tpu.memory_space<vmem>>, vector<2x512xf32>
    %cst_225 = arith.constant dense<0.000000e+00> : vector<2x512xf32>
    %716 = tpu.matmul %714, %572, %cst_225 {dimension_numbers = #tpu.dot_dimension_numbers<[1], [0], [0], [1], [0, 0, 1, 1], [], []>} : vector<2x128xf32>, vector<128x512xf32>, vector<2x512xf32> -> vector<2x512xf32>
    %717 = arith.addf %715, %716 : vector<2x512xf32>
    %718 = vector.extract_strided_slice %717 {offsets = [0, 0], sizes = [2, 128], strides = [1, 1]} : vector<2x512xf32> to vector<2x128xf32>
    %719 = arith.negf %718 : vector<2x128xf32>
    %720 = math.exp %719 : vector<2x128xf32>
    %cst_226 = arith.constant 1.000000e+00 : f32
    %721 = vector.broadcast %cst_226 : f32 to vector<2x128xf32>
    %722 = arith.addf %721, %720 : vector<2x128xf32>
    %723 = arith.divf %721, %722 : vector<2x128xf32>
    %724 = vector.extract_strided_slice %717 {offsets = [0, 128], sizes = [2, 128], strides = [1, 1]} : vector<2x512xf32> to vector<2x128xf32>
    %725 = arith.negf %724 : vector<2x128xf32>
    %726 = math.exp %725 : vector<2x128xf32>
    %cst_227 = arith.constant 1.000000e+00 : f32
    %727 = vector.broadcast %cst_227 : f32 to vector<2x128xf32>
    %728 = arith.addf %727, %726 : vector<2x128xf32>
    %729 = arith.divf %727, %728 : vector<2x128xf32>
    %730 = vector.extract_strided_slice %717 {offsets = [0, 256], sizes = [2, 128], strides = [1, 1]} : vector<2x512xf32> to vector<2x128xf32>
    %731 = math.tanh %730 : vector<2x128xf32>
    %732 = vector.extract_strided_slice %717 {offsets = [0, 384], sizes = [2, 128], strides = [1, 1]} : vector<2x512xf32> to vector<2x128xf32>
    %733 = arith.negf %732 : vector<2x128xf32>
    %734 = math.exp %733 : vector<2x128xf32>
    %cst_228 = arith.constant 1.000000e+00 : f32
    %735 = vector.broadcast %cst_228 : f32 to vector<2x128xf32>
    %736 = arith.addf %735, %734 : vector<2x128xf32>
    %737 = arith.divf %735, %736 : vector<2x128xf32>
    %738 = arith.mulf %729, %712 : vector<2x128xf32>
    %739 = arith.mulf %723, %731 : vector<2x128xf32>
    %740 = arith.addf %738, %739 : vector<2x128xf32>
    %741 = math.tanh %740 : vector<2x128xf32>
    %742 = arith.mulf %737, %741 : vector<2x128xf32>
    %c12_229 = arith.constant 12 : index
    %c0_230 = arith.constant 0 : index
    %743 = vector.load %arg25[%c12_229, %c0_230] : memref<16x512xf32, #tpu.memory_space<vmem>>, vector<2x512xf32>
    %cst_231 = arith.constant dense<0.000000e+00> : vector<2x512xf32>
    %744 = tpu.matmul %742, %572, %cst_231 {dimension_numbers = #tpu.dot_dimension_numbers<[1], [0], [0], [1], [0, 0, 1, 1], [], []>} : vector<2x128xf32>, vector<128x512xf32>, vector<2x512xf32> -> vector<2x512xf32>
    %745 = arith.addf %743, %744 : vector<2x512xf32>
    %746 = vector.extract_strided_slice %745 {offsets = [0, 0], sizes = [2, 128], strides = [1, 1]} : vector<2x512xf32> to vector<2x128xf32>
    %747 = arith.negf %746 : vector<2x128xf32>
    %748 = math.exp %747 : vector<2x128xf32>
    %cst_232 = arith.constant 1.000000e+00 : f32
    %749 = vector.broadcast %cst_232 : f32 to vector<2x128xf32>
    %750 = arith.addf %749, %748 : vector<2x128xf32>
    %751 = arith.divf %749, %750 : vector<2x128xf32>
    %752 = vector.extract_strided_slice %745 {offsets = [0, 128], sizes = [2, 128], strides = [1, 1]} : vector<2x512xf32> to vector<2x128xf32>
    %753 = arith.negf %752 : vector<2x128xf32>
    %754 = math.exp %753 : vector<2x128xf32>
    %cst_233 = arith.constant 1.000000e+00 : f32
    %755 = vector.broadcast %cst_233 : f32 to vector<2x128xf32>
    %756 = arith.addf %755, %754 : vector<2x128xf32>
    %757 = arith.divf %755, %756 : vector<2x128xf32>
    %758 = vector.extract_strided_slice %745 {offsets = [0, 256], sizes = [2, 128], strides = [1, 1]} : vector<2x512xf32> to vector<2x128xf32>
    %759 = math.tanh %758 : vector<2x128xf32>
    %760 = vector.extract_strided_slice %745 {offsets = [0, 384], sizes = [2, 128], strides = [1, 1]} : vector<2x512xf32> to vector<2x128xf32>
    %761 = arith.negf %760 : vector<2x128xf32>
    %762 = math.exp %761 : vector<2x128xf32>
    %cst_234 = arith.constant 1.000000e+00 : f32
    %763 = vector.broadcast %cst_234 : f32 to vector<2x128xf32>
    %764 = arith.addf %763, %762 : vector<2x128xf32>
    %765 = arith.divf %763, %764 : vector<2x128xf32>
    %766 = arith.mulf %757, %740 : vector<2x128xf32>
    %767 = arith.mulf %751, %759 : vector<2x128xf32>
    %768 = arith.addf %766, %767 : vector<2x128xf32>
    %769 = math.tanh %768 : vector<2x128xf32>
    %770 = arith.mulf %765, %769 : vector<2x128xf32>
    %c14_235 = arith.constant 14 : index
    %c0_236 = arith.constant 0 : index
    %771 = vector.load %arg25[%c14_235, %c0_236] : memref<16x512xf32, #tpu.memory_space<vmem>>, vector<2x512xf32>
    %cst_237 = arith.constant dense<0.000000e+00> : vector<2x512xf32>
    %772 = tpu.matmul %770, %572, %cst_237 {dimension_numbers = #tpu.dot_dimension_numbers<[1], [0], [0], [1], [0, 0, 1, 1], [], []>} : vector<2x128xf32>, vector<128x512xf32>, vector<2x512xf32> -> vector<2x512xf32>
    %773 = arith.addf %771, %772 : vector<2x512xf32>
    %774 = vector.extract_strided_slice %773 {offsets = [0, 0], sizes = [2, 128], strides = [1, 1]} : vector<2x512xf32> to vector<2x128xf32>
    %775 = arith.negf %774 : vector<2x128xf32>
    %776 = math.exp %775 : vector<2x128xf32>
    %cst_238 = arith.constant 1.000000e+00 : f32
    %777 = vector.broadcast %cst_238 : f32 to vector<2x128xf32>
    %778 = arith.addf %777, %776 : vector<2x128xf32>
    %779 = arith.divf %777, %778 : vector<2x128xf32>
    %780 = vector.extract_strided_slice %773 {offsets = [0, 128], sizes = [2, 128], strides = [1, 1]} : vector<2x512xf32> to vector<2x128xf32>
    %781 = arith.negf %780 : vector<2x128xf32>
    %782 = math.exp %781 : vector<2x128xf32>
    %cst_239 = arith.constant 1.000000e+00 : f32
    %783 = vector.broadcast %cst_239 : f32 to vector<2x128xf32>
    %784 = arith.addf %783, %782 : vector<2x128xf32>
    %785 = arith.divf %783, %784 : vector<2x128xf32>
    %786 = vector.extract_strided_slice %773 {offsets = [0, 256], sizes = [2, 128], strides = [1, 1]} : vector<2x512xf32> to vector<2x128xf32>
    %787 = math.tanh %786 : vector<2x128xf32>
    %788 = vector.extract_strided_slice %773 {offsets = [0, 384], sizes = [2, 128], strides = [1, 1]} : vector<2x512xf32> to vector<2x128xf32>
    %789 = arith.negf %788 : vector<2x128xf32>
    %790 = math.exp %789 : vector<2x128xf32>
    %cst_240 = arith.constant 1.000000e+00 : f32
    %791 = vector.broadcast %cst_240 : f32 to vector<2x128xf32>
    %792 = arith.addf %791, %790 : vector<2x128xf32>
    %793 = arith.divf %791, %792 : vector<2x128xf32>
    %794 = arith.mulf %785, %768 : vector<2x128xf32>
    %795 = arith.mulf %779, %787 : vector<2x128xf32>
    %796 = arith.addf %794, %795 : vector<2x128xf32>
    %797 = math.tanh %796 : vector<2x128xf32>
    %798 = arith.mulf %793, %797 : vector<2x128xf32>
    %799 = vector.extract_strided_slice %565 {offsets = [14, 0], sizes = [2, 256], strides = [1, 1]} : vector<16x256xf32> to vector<2x256xf32>
    %c0_241 = arith.constant 0 : index
    %c0_242 = arith.constant 0 : index
    %800 = vector.load %arg20[%c0_241, %c0_242] : memref<256x512xf32, #tpu.memory_space<vmem>>, vector<256x512xf32>
    %cst_243 = arith.constant dense<0.000000e+00> : vector<2x512xf32>
    %801 = tpu.matmul %799, %800, %cst_243 {dimension_numbers = #tpu.dot_dimension_numbers<[1], [0], [0], [1], [0, 0, 1, 1], [], []>} : vector<2x256xf32>, vector<256x512xf32>, vector<2x512xf32> -> vector<2x512xf32>
    %c0_244 = arith.constant 0 : index
    %c0_245 = arith.constant 0 : index
    %802 = vector.load %arg21[%c0_244, %c0_245] : memref<1x512xf32, #tpu.memory_space<vmem>>, vector<1x512xf32>
    %803 = vector.broadcast %802 : vector<1x512xf32> to vector<2x512xf32>
    %804 = arith.addf %801, %803 : vector<2x512xf32>
    %cst_246 = arith.constant 0.000000e+00 : f32
    %805 = vector.broadcast %cst_246 : f32 to vector<2x128xf32>
    %806 = vector.extract_strided_slice %804 {offsets = [0, 0], sizes = [2, 128], strides = [1, 1]} : vector<2x512xf32> to vector<2x128xf32>
    %807 = arith.negf %806 : vector<2x128xf32>
    %808 = math.exp %807 : vector<2x128xf32>
    %cst_247 = arith.constant 1.000000e+00 : f32
    %809 = vector.broadcast %cst_247 : f32 to vector<2x128xf32>
    %810 = arith.addf %809, %808 : vector<2x128xf32>
    %811 = arith.divf %809, %810 : vector<2x128xf32>
    %812 = vector.extract_strided_slice %804 {offsets = [0, 128], sizes = [2, 128], strides = [1, 1]} : vector<2x512xf32> to vector<2x128xf32>
    %813 = arith.negf %812 : vector<2x128xf32>
    %814 = math.exp %813 : vector<2x128xf32>
    %cst_248 = arith.constant 1.000000e+00 : f32
    %815 = vector.broadcast %cst_248 : f32 to vector<2x128xf32>
    %816 = arith.addf %815, %814 : vector<2x128xf32>
    %817 = arith.divf %815, %816 : vector<2x128xf32>
    %818 = vector.extract_strided_slice %804 {offsets = [0, 256], sizes = [2, 128], strides = [1, 1]} : vector<2x512xf32> to vector<2x128xf32>
    %819 = math.tanh %818 : vector<2x128xf32>
    %820 = vector.extract_strided_slice %804 {offsets = [0, 384], sizes = [2, 128], strides = [1, 1]} : vector<2x512xf32> to vector<2x128xf32>
    %821 = arith.negf %820 : vector<2x128xf32>
    %822 = math.exp %821 : vector<2x128xf32>
    %cst_249 = arith.constant 1.000000e+00 : f32
    %823 = vector.broadcast %cst_249 : f32 to vector<2x128xf32>
    %824 = arith.addf %823, %822 : vector<2x128xf32>
    %825 = arith.divf %823, %824 : vector<2x128xf32>
    %826 = arith.mulf %817, %805 : vector<2x128xf32>
    %827 = arith.mulf %811, %819 : vector<2x128xf32>
    %828 = arith.addf %826, %827 : vector<2x128xf32>
    %829 = math.tanh %828 : vector<2x128xf32>
    %830 = arith.mulf %825, %829 : vector<2x128xf32>
    %831 = tpu.concatenate %798, %830 in 1 : vector<2x128xf32>, vector<2x128xf32> -> vector<2x256xf32>
    %c0_250 = arith.constant 0 : index
    %c0_251 = arith.constant 0 : index
    %832 = vector.load %arg22[%c0_250, %c0_251] : memref<1x256xf32, #tpu.memory_space<vmem>>, vector<1x256xf32>
    %833 = vector.broadcast %832 : vector<1x256xf32> to vector<2x256xf32>
    %834 = arith.mulf %831, %833 : vector<2x256xf32>
    %cst_252 = arith.constant dense<0.000000e+00> : vector<2xf32>
    %835 = vector.multi_reduction <add>, %834, %cst_252 [1] : vector<2x256xf32> to vector<2xf32>
    %836 = vector.shape_cast %835 : vector<2xf32> to vector<2x1xf32>
    %c0_253 = arith.constant 0 : index
    %c0_254 = arith.constant 0 : index
    %837 = vector.load %arg23[%c0_253, %c0_254] : memref<1x1xf32, #tpu.memory_space<vmem>>, vector<1x1xf32>
    %838 = vector.broadcast %837 : vector<1x1xf32> to vector<2x1xf32>
    %839 = arith.addf %836, %838 : vector<2x1xf32>
    %c0_255 = arith.constant 0 : index
    %c0_256 = arith.constant 0 : index
    %840 = vector.load %arg24[%c0_255, %c0_256] : memref<2x1xf32, #tpu.memory_space<vmem>>, vector<2x1xf32>
    tpu.vector_store %arg24[%c0_255, %c0_256], %839 {strides = array<i32>} : memref<2x1xf32, #tpu.memory_space<vmem>>, vector<2x1xf32>,
    return
  }
  func.func @transform_0(%arg0: i32) -> (i32, i32) {
    %c0_i32 = arith.constant 0 : i32
    %c0_i32_0 = arith.constant 0 : i32
    %c0_i32_1 = arith.constant 0 : i32
    return %c0_i32, %c0_i32_0 : i32, i32
  }
  func.func @transform_1(%arg0: i32) -> (i32, i32) {
    %c0_i32 = arith.constant 0 : i32
    %c0_i32_0 = arith.constant 0 : i32
    %c0_i32_1 = arith.constant 0 : i32
    return %c0_i32, %c0_i32_0 : i32, i32
  }
  func.func @transform_2(%arg0: i32) -> (i32, i32) {
    %c0_i32 = arith.constant 0 : i32
    %c0_i32_0 = arith.constant 0 : i32
    %c0_i32_1 = arith.constant 0 : i32
    return %c0_i32, %c0_i32_0 : i32, i32
  }
  func.func @transform_3(%arg0: i32) -> (i32, i32) {
    %c0_i32 = arith.constant 0 : i32
    %c0_i32_0 = arith.constant 0 : i32
    %c0_i32_1 = arith.constant 0 : i32
    return %c0_i32, %c0_i32_0 : i32, i32
  }
  func.func @transform_4(%arg0: i32) -> (i32, i32) {
    %c0_i32 = arith.constant 0 : i32
    %c0_i32_0 = arith.constant 0 : i32
    %c0_i32_1 = arith.constant 0 : i32
    return %c0_i32, %c0_i32_0 : i32, i32
  }
  func.func @transform_5(%arg0: i32) -> (i32, i32) {
    %c0_i32 = arith.constant 0 : i32
    %c0_i32_0 = arith.constant 0 : i32
    %c0_i32_1 = arith.constant 0 : i32
    return %c0_i32, %c0_i32_0 : i32, i32
  }
  func.func @transform_6(%arg0: i32) -> (i32, i32) {
    %c0_i32 = arith.constant 0 : i32
    %c0_i32_0 = arith.constant 0 : i32
    %c0_i32_1 = arith.constant 0 : i32
    return %c0_i32, %c0_i32_0 : i32, i32
  }
  func.func @transform_7(%arg0: i32) -> (i32, i32) {
    %c0_i32 = arith.constant 0 : i32
    %c0_i32_0 = arith.constant 0 : i32
    %c0_i32_1 = arith.constant 0 : i32
    return %c0_i32, %c0_i32_0 : i32, i32
  }
  func.func @transform_8(%arg0: i32) -> (i32, i32) {
    %c0_i32 = arith.constant 0 : i32
    %c0_i32_0 = arith.constant 0 : i32
    %c0_i32_1 = arith.constant 0 : i32
    return %c0_i32, %c0_i32_0 : i32, i32
  }
  func.func @transform_9(%arg0: i32) -> (i32, i32) {
    %c0_i32 = arith.constant 0 : i32
    %c0_i32_0 = arith.constant 0 : i32
    %c0_i32_1 = arith.constant 0 : i32
    return %c0_i32, %c0_i32_0 : i32, i32
  }
  func.func @transform_10(%arg0: i32) -> (i32, i32) {
    %c0_i32 = arith.constant 0 : i32
    %c0_i32_0 = arith.constant 0 : i32
    %c0_i32_1 = arith.constant 0 : i32
    return %c0_i32, %c0_i32_0 : i32, i32
  }
  func.func @transform_11(%arg0: i32) -> (i32, i32) {
    %c0_i32 = arith.constant 0 : i32
    %c0_i32_0 = arith.constant 0 : i32
    %c0_i32_1 = arith.constant 0 : i32
    return %c0_i32, %c0_i32_0 : i32, i32
  }
  func.func @transform_12(%arg0: i32) -> (i32, i32) {
    %c0_i32 = arith.constant 0 : i32
    %c0_i32_0 = arith.constant 0 : i32
    %c0_i32_1 = arith.constant 0 : i32
    return %c0_i32, %c0_i32_0 : i32, i32
  }
  func.func @transform_13(%arg0: i32) -> (i32, i32) {
    %c0_i32 = arith.constant 0 : i32
    %c0_i32_0 = arith.constant 0 : i32
    %c0_i32_1 = arith.constant 0 : i32
    return %c0_i32, %c0_i32_0 : i32, i32
  }
  func.func @transform_14(%arg0: i32) -> (i32, i32) {
    %c0_i32 = arith.constant 0 : i32
    %c0_i32_0 = arith.constant 0 : i32
    %c0_i32_1 = arith.constant 0 : i32
    return %c0_i32, %c0_i32_0 : i32, i32
  }
  func.func @transform_15(%arg0: i32) -> (i32, i32) {
    %c0_i32 = arith.constant 0 : i32
    %c0_i32_0 = arith.constant 0 : i32
    %c0_i32_1 = arith.constant 0 : i32
    return %c0_i32, %c0_i32_0 : i32, i32
  }
  func.func @transform_16(%arg0: i32) -> (i32, i32) {
    %c0_i32 = arith.constant 0 : i32
    %c0_i32_0 = arith.constant 0 : i32
    %c0_i32_1 = arith.constant 0 : i32
    return %c0_i32, %c0_i32_0 : i32, i32
  }
  func.func @transform_17(%arg0: i32) -> (i32, i32) {
    %c0_i32 = arith.constant 0 : i32
    %c0_i32_0 = arith.constant 0 : i32
    %c0_i32_1 = arith.constant 0 : i32
    return %c0_i32, %c0_i32_0 : i32, i32
  }
  func.func @transform_18(%arg0: i32) -> (i32, i32) {
    %c0_i32 = arith.constant 0 : i32
    %c0_i32_0 = arith.constant 0 : i32
    %c0_i32_1 = arith.constant 0 : i32
    return %c0_i32, %c0_i32_0 : i32, i32
  }
  func.func @transform_19(%arg0: i32) -> (i32, i32) {
    %c0_i32 = arith.constant 0 : i32
    %c0_i32_0 = arith.constant 0 : i32
    %c0_i32_1 = arith.constant 0 : i32
    return %c0_i32, %c0_i32_0 : i32, i32
  }
  func.func @transform_20(%arg0: i32) -> (i32, i32) {
    %c0_i32 = arith.constant 0 : i32
    %c0_i32_0 = arith.constant 0 : i32
    %c0_i32_1 = arith.constant 0 : i32
    return %c0_i32, %c0_i32_0 : i32, i32
  }
  func.func @transform_21(%arg0: i32) -> (i32, i32) {
    %c0_i32 = arith.constant 0 : i32
    %c0_i32_0 = arith.constant 0 : i32
    %c0_i32_1 = arith.constant 0 : i32
    return %c0_i32, %c0_i32_0 : i32, i32
  }
  func.func @transform_22(%arg0: i32) -> (i32, i32) {
    %c0_i32 = arith.constant 0 : i32
    %c0_i32_0 = arith.constant 0 : i32
    %c0_i32_1 = arith.constant 0 : i32
    return %c0_i32, %c0_i32_0 : i32, i32
  }
  func.func @transform_23(%arg0: i32) -> (i32, i32) {
    %c0_i32 = arith.constant 0 : i32
    %c0_i32_0 = arith.constant 0 : i32
    %c0_i32_1 = arith.constant 0 : i32
    return %c0_i32, %c0_i32_0 : i32, i32
  }
}

</mosaic_0001>

<bundles_post_ra>
// kernel: tpu_custom_call.1
= control target key start
LH: loop header
LB: loop body
LE: loop exit
PB: predicated region body
PF: predicated region fallthrough
CT: control target
= control target key end

     0   :  { %s11589_s0 = inlined_call_operand.hbm [shape: f32[16,10], index: 0, kind: input, shape index: {}]   ;;  %s11590_s1 = inlined_call_operand.hbm [shape: f32[16,16], index: 1, kind: input, shape index: {}]   ;;  %s11591_s2 = inlined_call_operand.hbm [shape: f32[10,128], index: 2, kind: input, shape index: {}]   ;;  %s11592_s3 = inlined_call_operand.hbm [shape: f32[1,128], index: 3, kind: input, shape index: {}]   ;;  %s11593_s4 = inlined_call_operand.hbm [shape: f32[10,128], index: 4, kind: input, shape index: {}]   ;;  %s11594_s5 = inlined_call_operand.hbm [shape: f32[1,128], index: 5, kind: input, shape index: {}]   ;;  %s11595_s6 = inlined_call_operand.hbm [shape: f32[10,128], index: 6, kind: input, shape index: {}]   ;;  %s11596_s7 = inlined_call_operand.hbm [shape: f32[1,128], index: 7, kind: input, shape index: {}]   ;;  %s11597_s8 = inlined_call_operand.hbm [shape: f32[128,128], index: 8, kind: input, shape index: {}]   ;;  %s11598_s9 = inlined_call_operand.hbm [shape: f32[1,128], index: 9, kind: input, shape index: {}]   ;;  %s11599_s10 = inlined_call_operand.hbm [shape: f32[128,512], index: 10, kind: input, shape index: {}]   ;;  %s11600_s11 = inlined_call_operand.hbm [shape: f32[128,512], index: 11, kind: input, shape index: {}]   ;;  %s11601_s12 = inlined_call_operand.vmem [shape: f32[1,512], index: 12, kind: input, shape index: {}]   ;;  %s11602_s13 = inlined_call_operand.hbm [shape: f32[128,512], index: 13, kind: input, shape index: {}]   ;;  %s11603_s14 = inlined_call_operand.hbm [shape: f32[128,512], index: 14, kind: input, shape index: {}]   ;;  %s11604_s15 = inlined_call_operand.vmem [shape: f32[1,512], index: 15, kind: input, shape index: {}]   ;;  %s11605_s16 = inlined_call_operand.hbm [shape: f32[256,512], index: 16, kind: input, shape index: {}]   ;;  %s11606_s17 = inlined_call_operand.hbm [shape: f32[128,512], index: 17, kind: input, shape index: {}]   ;;  %s11607_s18 = inlined_call_operand.vmem [shape: f32[1,512], index: 18, kind: input, shape index: {}]   ;;  %s11608_s19 = inlined_call_operand.hbm [shape: f32[256,512], index: 19, kind: input, shape index: {}]   ;;  %s11609_s20 = inlined_call_operand.vmem [shape: f32[1,512], index: 20, kind: input, shape index: {}]   ;;  %s11610_s21 = inlined_call_operand.vmem [shape: f32[1,256], index: 21, kind: input, shape index: {}]   ;;  %s11611_s22 = inlined_call_operand.<no memory space> [shape: f32[1,1], index: 22, kind: input, shape index: {}]   ;;  %s11612_s23 = inlined_call_operand.vmem [shape: f32[2,1], index: 23, kind: output, shape index: {}]  }
   0x1   :  { %11904 = sst [smem:[#allocation71_spill]] %s11589_s0  ;;  %v28_v0 = vstv %s11611_s22 }
   0x2   :  { %11905 = sst [smem:[#allocation72_spill]] %s11590_s1  ;;  %29 = vst [vmem:[#allocation4] sm:$0x1] %v28_v0 }
   0x3   :  { %11906 = sst [smem:[#allocation73_spill]] %s11591_s2 }
   0x4   :  { %11907 = sst [smem:[#allocation74_spill]] %s11592_s3 }
   0x5   :  { %11908 = sst [smem:[#allocation75_spill]] %s11593_s4 }
   0x6   :  { %11909 = sst [smem:[#allocation76_spill]] %s11594_s5 }
   0x7   :  { %11910 = sst [smem:[#allocation77_spill]] %s11595_s6 }
   0x8   :  { %11911 = sst [smem:[#allocation78_spill]] %s11596_s7 }
   0x9   :  { %30 = vsyncpa [#allocation6], 0 }
   0xa   :  { %31 = vsyncpa [#allocation8], 0 }
   0xb   :  { %32 = vsyncpa [#allocation11], 0 }
   0xc   :  { %33 = vsyncpa [#allocation14], 0 }
   0xd   :  { %34 = vsyncpa [#allocation17], 0 }
   0xe   :  { %35 = vsyncpa [#allocation20], 0 }
   0xf   :  { %36 = vsyncpa [#allocation23], 0 }
  0x10   :  { %37 = vsyncpa [#allocation26], 0 }
  0x11   :  { %38 = vsyncpa [#allocation29], 0  ;;  %s8696_s24 = smov [#allocation7]   ;;  %s8697_s5 = smov [#allocation10]  }
  0x12   :  { %s56_s25 = sshll.u32 %s8696_s24, 4  ;;  %s81_s1 = sshll.u32 %s8697_s5, 4  ;;  %s57_s25 = int_to_ptr.vmem [resolvable:$true] %s56_s25  ;;  %s82_s1 = int_to_ptr.vmem [resolvable:$true] %s81_s1 }
  0x13   :  { %s8346_s26 = scalar_lea.vmem %s57_s25, 256  ;;  %p8351_p1 = scmp.lt.s32.totalorder %s57_s25, %s57_s25 }
  0x14   :  { %p8347_p0 = scmp.ne.s32.totalorder %s57_s25, %s8346_s26  ;;  %p8352_p2 = scmp.lt.s32.totalorder %s8346_s26, %s8346_s26 }
  0x16   :  { %p8353_p3 = por %p8352_p2, %p8351_p1 }
  0x18   :  { %p8354_p4 = pnand %p8353_p3, %p8347_p0 }
  0x1a   :  { %8357 = shalt.err (!%p8354_p4)
}
  0x1b   :  { %s8698_s22 = smov 128   ;;  %s8699_s2 = smov 8  }
  0x1c   :  { %s11912_s7 = sld [smem:[#allocation72_spill]]  ;;  %s8366_s28 = scalar_lea.vmem %s82_s1, 16 }
  0x1d   :  { %p8367_p5 = scmp.ne.s32.totalorder %s82_s1, %s8366_s28  ;;  %s8370_s29 = scalar_lea.vmem %s82_s1, 32 }
  0x1e   :  { %p8371_p6 = scmp.lt.s32.totalorder %s82_s1, %s82_s1  ;;  %p8372_p7 = scmp.lt.s32.totalorder %s8370_s29, %s8366_s28 }
  0x20   :  { %p8373_p8 = por %p8372_p7, %p8371_p6 }
  0x22   :  { %62 = dma.hbm_to_vmem [thread:$0]  %s11912_s7, 256, %s57_s25, [#allocation8], %s8698_s22, %s8698_s22, %s8699_s2  }
  0x23   :  { %p8374_p9 = pnand %p8373_p8, %p8367_p5 }
  0x25   :  { %8377 = shalt.err (!%p8374_p9)
}
  0x26   :  { %s11913_s4 = sld [smem:[#allocation74_spill]]  ;;  %s8700_s30 = smov [#allocation13]  }
  0x27   :  { %s103_s24 = sshll.u32 %s8700_s30, 4  ;;  %s8701_s5 = smov [#allocation16]   ;;  %s104_s24 = int_to_ptr.vmem [resolvable:$true] %s103_s24 }
  0x28   :  { %s125_s26 = sshll.u32 %s8701_s5, 4  ;;  %s8386_s6 = scalar_lea.vmem %s104_s24, 16  ;;  %s126_s26 = int_to_ptr.vmem [resolvable:$true] %s125_s26 }
  0x29   :  { %p8387_p10 = scmp.ne.s32.totalorder %s104_s24, %s8386_s6  ;;  %s8390_s25 = scalar_lea.vmem %s104_s24, 32 }
  0x2a   :  { %p8391_p11 = scmp.lt.s32.totalorder %s104_s24, %s104_s24  ;;  %p8392_p12 = scmp.lt.s32.totalorder %s8390_s25, %s8386_s6 }
  0x2c   :  { %84 = dma.hbm_to_vmem [thread:$0]  %s11913_s4, 16, %s82_s1, [#allocation11]  }
  0x2d   :  { %p8393_p13 = por %p8392_p12, %p8391_p11 }
  0x2f   :  { %p8394_p0 = pnand %p8393_p13, %p8387_p10 }
  0x31   :  { %8397 = shalt.err (!%p8394_p0)
}
  0x32   :  { %s11914_s28 = sld [smem:[#allocation76_spill]]  ;;  %s8406_s29 = scalar_lea.vmem %s126_s26, 16 }
  0x33   :  { %p8407_p1 = scmp.ne.s32.totalorder %s126_s26, %s8406_s29  ;;  %s8410_s1 = scalar_lea.vmem %s126_s26, 32 }
  0x34   :  { %p8411_p2 = scmp.lt.s32.totalorder %s126_s26, %s126_s26  ;;  %p8412_p3 = scmp.lt.s32.totalorder %s8410_s1, %s8406_s29 }
  0x36   :  { %p8413_p4 = por %p8412_p3, %p8411_p2 }
  0x38   :  { %106 = dma.hbm_to_vmem [thread:$0]  %s11914_s28, 16, %s104_s24, [#allocation14]  }
  0x39   :  { %p8414_p5 = pnand %p8413_p4, %p8407_p1 }
  0x3b   :  { %8417 = shalt.err (!%p8414_p5)
}
  0x3c   :  { %s11915_s4 = sld [smem:[#allocation78_spill]]  ;;  %s8702_s30 = smov [#allocation19]  }
  0x3d   :  { %s147_s5 = sshll.u32 %s8702_s30, 4  ;;  %s148_s5 = int_to_ptr.vmem [resolvable:$true] %s147_s5 }
  0x3e   :  { %s8426_s6 = scalar_lea.vmem %s148_s5, 16  ;;  %s8430_s25 = scalar_lea.vmem %s148_s5, 32 }
  0x3f   :  { %p8427_p6 = scmp.ne.s32.totalorder %s148_s5, %s8426_s6  ;;  %p8431_p7 = scmp.lt.s32.totalorder %s148_s5, %s148_s5 }
  0x40   :  { %p8432_p8 = scmp.lt.s32.totalorder %s8430_s25, %s8426_s6 }
  0x42   :  { %128 = dma.hbm_to_vmem [thread:$0]  %s11915_s4, 16, %s126_s26, [#allocation17]  }
  0x43   :  { %p8433_p9 = por %p8432_p8, %p8431_p7 }
  0x45   :  { %p8434_p10 = pnand %p8433_p9, %p8427_p6 }
  0x47   :  { %8437 = shalt.err (!%p8434_p10)
}
  0x48   :  { %150 = dma.hbm_to_vmem [thread:$0]  %s11598_s9, 16, %s148_s5, [#allocation20]  }
  0x49   :  { %s8703_s7 = smov [#allocation22]   ;;  %s8704_s29 = smov [#allocation25]  }
  0x4a   :  { %s168_s28 = sshll.u32 %s8703_s7, 4  ;;  %s194_s26 = sshll.u32 %s8704_s29, 4  ;;  %s169_s28 = int_to_ptr.vmem [resolvable:$true] %s168_s28  ;;  %s195_s26 = int_to_ptr.vmem [resolvable:$true] %s194_s26 }
  0x4b   :  { %s8446_s1 = scalar_lea.vmem %s169_s28, 8192  ;;  %p8451_p12 = scmp.lt.s32.totalorder %s169_s28, %s169_s28 }
  0x4c   :  { %p8447_p11 = scmp.ne.s32.totalorder %s169_s28, %s8446_s1  ;;  %p8452_p13 = scmp.lt.s32.totalorder %s8446_s1, %s8446_s1 }
  0x4e   :  { %p8453_p0 = por %p8452_p13, %p8451_p12 }
  0x50   :  { %p8454_p1 = pnand %p8453_p0, %p8447_p11 }
  0x52   :  { %8457 = shalt.err (!%p8454_p1)
}
  0x53   :  { %s8705_s3 = smov 512   ;;  %s8706_s0 = smov 32  }
  0x54   :  { %174 = dma.hbm_to_vmem [thread:$0]  %s11600_s11, 8192, %s169_s28, [#allocation23], %s8705_s3, %s8705_s3, %s8706_s0  }
  0x55   :  { %s8466_s9 = scalar_lea.vmem %s195_s26, 8192  ;;  %p8471_p3 = scmp.lt.s32.totalorder %s195_s26, %s195_s26 }
  0x56   :  { %p8467_p2 = scmp.ne.s32.totalorder %s195_s26, %s8466_s9  ;;  %p8472_p4 = scmp.lt.s32.totalorder %s8466_s9, %s8466_s9 }
  0x58   :  { %p8473_p5 = por %p8472_p4, %p8471_p3 }
  0x5a   :  { %p8474_p6 = pnand %p8473_p5, %p8467_p2 }
  0x5c   :  { %8477 = shalt.err (!%p8474_p6)
}
  0x5d   :  { %200 = dma.hbm_to_vmem [thread:$0]  %s11603_s14, 8192, %s195_s26, [#allocation26], %s8705_s3, %s8705_s3, %s8706_s0  }
  0x5e   :  { %s8707_s25 = smov [#allocation28]   ;;  %s8708_s27 = smov [#allocation5]  }
  0x5f   :  { %s220_s24 = sshll.u32 %s8707_s25, 4  ;;  %s44_s11 = sshll.u32 %s8708_s27, 4  ;;  %s221_s24 = int_to_ptr.vmem [resolvable:$true] %s220_s24  ;;  %s45_s11 = int_to_ptr.vmem [resolvable:$true] %s44_s11 }
  0x60   :  { %s8486_s7 = scalar_lea.vmem %s221_s24, 8192  ;;  %p8491_p8 = scmp.lt.s32.totalorder %s221_s24, %s221_s24 }
  0x61   :  { %p8487_p7 = scmp.ne.s32.totalorder %s221_s24, %s8486_s7  ;;  %p8492_p9 = scmp.lt.s32.totalorder %s8486_s7, %s8486_s7 }
  0x63   :  { %p8493_p10 = por %p8492_p9, %p8491_p8 }
  0x65   :  { %p8494_p11 = pnand %p8493_p10, %p8487_p7 }
  0x67   :  { %8497 = shalt.err (!%p8494_p11)
}
  0x68   :  { %226 = dma.hbm_to_vmem [thread:$0]  %s11606_s17, 8192, %s221_s24, [#allocation29], %s8705_s3, %s8705_s3, %s8706_s0  }
  0x69   :  { %s8506_s14 = scalar_lea.vmem %s45_s11, 256  ;;  %p8511_p13 = scmp.lt.s32.totalorder %s45_s11, %s45_s11 }
  0x6a   :  { %p8507_p12 = scmp.ne.s32.totalorder %s45_s11, %s8506_s14  ;;  %p8512_p0 = scmp.lt.s32.totalorder %s8506_s14, %s8506_s14 }
  0x6c   :  { %p8513_p1 = por %p8512_p0, %p8511_p13 }
  0x6e   :  { %p8514_p2 = pnand %p8513_p1, %p8507_p12 }
  0x70   :  { %8517 = shalt.err (!%p8514_p2)
}
  0x71   :  { %s11916_s4 = sld [smem:[#allocation71_spill]]  ;;  %s8709_s30 = smov [#allocation9]  }
  0x72   :  { %s68_s9 = sshll.u32 %s8709_s30, 4  ;;  %s8710_s5 = smov [#allocation12]   ;;  %s69_s9 = int_to_ptr.vmem [resolvable:$true] %s68_s9 }
  0x73   :  { %s90_s17 = sshll.u32 %s8710_s5, 4  ;;  %s8526_s6 = scalar_lea.vmem %s69_s9, 256  ;;  %s91_s17 = int_to_ptr.vmem [resolvable:$true] %s90_s17 }
  0x74   :  { %p8527_p3 = scmp.ne.s32.totalorder %s69_s9, %s8526_s6  ;;  %p8531_p4 = scmp.lt.s32.totalorder %s69_s9, %s69_s9 }
  0x75   :  { %p8532_p5 = scmp.lt.s32.totalorder %s8526_s6, %s8526_s6 }
  0x77   :  { %50 = dma.hbm_to_vmem [thread:$0]  %s11916_s4, 256, %s45_s11, [#allocation6], %s8698_s22, %s8698_s22, %s8699_s2  }
  0x78   :  { %p8533_p6 = por %p8532_p5, %p8531_p4 }
  0x7a   :  { %p8534_p7 = pnand %p8533_p6, %p8527_p3 }
  0x7c   :  { %8537 = shalt.err (!%p8534_p7)
}
  0x7d   :  { %s11917_s27 = sld [smem:[#allocation73_spill]]  ;;  %s8546_s11 = scalar_lea.vmem %s91_s17, 256 }
  0x7e   :  { %p8547_p8 = scmp.ne.s32.totalorder %s91_s17, %s8546_s11  ;;  %p8551_p9 = scmp.lt.s32.totalorder %s91_s17, %s91_s17 }
  0x7f   :  { %p8552_p10 = scmp.lt.s32.totalorder %s8546_s11, %s8546_s11 }
  0x81   :  { %p8553_p11 = por %p8552_p10, %p8551_p9 }
  0x83   :  { %74 = dma.hbm_to_vmem [thread:$0]  %s11917_s27, 256, %s69_s9, [#allocation8], %s8698_s22, %s8698_s22, %s8699_s2  }
  0x84   :  { %p8554_p12 = pnand %p8553_p11, %p8547_p8 }
  0x86   :  { %8557 = shalt.err (!%p8554_p12)
}
  0x87   :  { %s11918_s29 = sld [smem:[#allocation75_spill]]  ;;  %s8711_s14 = smov [#allocation15]  }
  0x88   :  { %s112_s26 = sshll.u32 %s8711_s14, 4  ;;  %s8712_s1 = smov [#allocation18]   ;;  %s113_s26 = int_to_ptr.vmem [resolvable:$true] %s112_s26 }
  0x89   :  { %s134_s4 = sshll.u32 %s8712_s1, 4  ;;  %s8566_s30 = scalar_lea.vmem %s113_s26, 256  ;;  %s135_s4 = int_to_ptr.vmem [resolvable:$true] %s134_s4 }
  0x8a   :  { %p8567_p13 = scmp.ne.s32.totalorder %s113_s26, %s8566_s30  ;;  %p8571_p0 = scmp.lt.s32.totalorder %s113_s26, %s113_s26 }
  0x8b   :  { %p8572_p1 = scmp.lt.s32.totalorder %s8566_s30, %s8566_s30 }
  0x8d   :  { %96 = dma.hbm_to_vmem [thread:$0]  %s11918_s29, 256, %s91_s17, [#allocation11], %s8698_s22, %s8698_s22, %s8699_s2  }
  0x8e   :  { %p8573_p2 = por %p8572_p1, %p8571_p0 }
  0x90   :  { %p8574_p3 = pnand %p8573_p2, %p8567_p13 }
  0x92   :  { %8577 = shalt.err (!%p8574_p3)
}
  0x93   :  { %s11919_s6 = sld [smem:[#allocation77_spill]]  ;;  %s8586_s17 = scalar_lea.vmem %s135_s4, 2048 }
  0x94   :  { %p8587_p4 = scmp.ne.s32.totalorder %s135_s4, %s8586_s17  ;;  %p8591_p5 = scmp.lt.s32.totalorder %s135_s4, %s135_s4 }
  0x95   :  { %p8592_p6 = scmp.lt.s32.totalorder %s8586_s17, %s8586_s17 }
  0x97   :  { %p8593_p7 = por %p8592_p6, %p8591_p5 }
  0x99   :  { %118 = dma.hbm_to_vmem [thread:$0]  %s11919_s6, 256, %s113_s26, [#allocation14], %s8698_s22, %s8698_s22, %s8699_s2  }
  0x9a   :  { %p8594_p8 = pnand %p8593_p7, %p8587_p4 }
  0x9c   :  { %8597 = shalt.err (!%p8594_p8)
}
  0x9d   :  { %140 = dma.hbm_to_vmem [thread:$0]  %s11597_s8, 2048, %s135_s4, [#allocation17], %s8698_s22, %s8698_s22, %s8699_s2  }
  0x9e   :  { %s8713_s27 = smov [#allocation21]   ;;  %s8714_s7 = smov [#allocation24]  }
  0x9f   :  { %s156_s11 = sshll.u32 %s8713_s27, 4  ;;  %s182_s28 = sshll.u32 %s8714_s7, 4  ;;  %s157_s11 = int_to_ptr.vmem [resolvable:$true] %s156_s11  ;;  %s183_s28 = int_to_ptr.vmem [resolvable:$true] %s182_s28 }
  0xa0   :  { %s8606_s29 = scalar_lea.vmem %s157_s11, 8192  ;;  %p8611_p10 = scmp.lt.s32.totalorder %s157_s11, %s157_s11 }
  0xa1   :  { %p8607_p9 = scmp.ne.s32.totalorder %s157_s11, %s8606_s29  ;;  %p8612_p11 = scmp.lt.s32.totalorder %s8606_s29, %s8606_s29 }
  0xa3   :  { %p8613_p12 = por %p8612_p11, %p8611_p10 }
  0xa5   :  { %p8614_p13 = pnand %p8613_p12, %p8607_p9 }
  0xa7   :  { %8617 = shalt.err (!%p8614_p13)
}
  0xa8   :  { %162 = dma.hbm_to_vmem [thread:$0]  %s11599_s10, 8192, %s157_s11, [#allocation20], %s8705_s3, %s8705_s3, %s8706_s0  }
  0xa9   :  { %s8626_s8 = scalar_lea.vmem %s183_s28, 8192  ;;  %p8631_p1 = scmp.lt.s32.totalorder %s183_s28, %s183_s28 }
  0xaa   :  { %p8627_p0 = scmp.ne.s32.totalorder %s183_s28, %s8626_s8  ;;  %p8632_p2 = scmp.lt.s32.totalorder %s8626_s8, %s8626_s8 }
  0xac   :  { %p8633_p3 = por %p8632_p2, %p8631_p1 }
  0xae   :  { %p8634_p4 = pnand %p8633_p3, %p8627_p0 }
  0xb0   :  { %8637 = shalt.err (!%p8634_p4)
}
  0xb1   :  { %188 = dma.hbm_to_vmem [thread:$0]  %s11602_s13, 8192, %s183_s28, [#allocation23], %s8705_s3, %s8705_s3, %s8706_s0  }
  0xb2   :  { %s8715_s1 = smov [#allocation27]   ;;  %s8716_s30 = smov [#allocation30]  }
  0xb3   :  { %s208_s4 = sshll.u32 %s8715_s1, 4  ;;  %s234_s10 = sshll.u32 %s8716_s30, 4  ;;  %s209_s4 = int_to_ptr.vmem [resolvable:$true] %s208_s4  ;;  %s235_s10 = int_to_ptr.vmem [resolvable:$true] %s234_s10 }
  0xb4   :  { %s8646_s9 = scalar_lea.vmem %s209_s4, 16384  ;;  %p8651_p6 = scmp.lt.s32.totalorder %s209_s4, %s209_s4 }
  0xb5   :  { %p8647_p5 = scmp.ne.s32.totalorder %s209_s4, %s8646_s9  ;;  %p8652_p7 = scmp.lt.s32.totalorder %s8646_s9, %s8646_s9 }
  0xb7   :  { %p8653_p8 = por %p8652_p7, %p8651_p6 }
  0xb9   :  { %p8654_p9 = pnand %p8653_p8, %p8647_p5 }
  0xbb   :  { %8657 = shalt.err (!%p8654_p9)
}
  0xbc   :  { %214 = dma.hbm_to_vmem [thread:$0]  %s11605_s16, 16384, %s209_s4, [#allocation26], %s8705_s3, %s8705_s3, %s8706_s0  }
  0xbd   :  { %s8666_s13 = scalar_lea.vmem %s235_s10, 16384  ;;  %p8671_p11 = scmp.lt.s32.totalorder %s235_s10, %s235_s10 }
  0xbe   :  { %p8667_p10 = scmp.ne.s32.totalorder %s235_s10, %s8666_s13  ;;  %p8672_p12 = scmp.lt.s32.totalorder %s8666_s13, %s8666_s13 }
  0xc0   :  { %p8673_p13 = por %p8672_p12, %p8671_p11 }
  0xc2   :  { %p8674_p0 = pnand %p8673_p13, %p8667_p10 }
  0xc4   :  { %8677 = shalt.err (!%p8674_p0)
}
  0xc5   :  { %240 = dma.hbm_to_vmem [thread:$0]  %s11608_s19, 16384, %s235_s10, [#allocation29], %s8705_s3, %s8705_s3, %s8706_s0  }
  0xc6   :  { %8678 = dma.done.wait [#allocation6], 256  }
  0xc7   :  { %8679 = vsyncadd [#allocation6], 4294967040 }
  0xc8   :  { %8680 = dma.done.wait [#allocation8], 512  }
  0xc9   :  { %8681 = vsyncadd [#allocation8], 4294966784 }
  0xca   :  { %8682 = dma.done.wait [#allocation11], 272  }
  0xcb   :  { %8683 = vsyncadd [#allocation11], 4294967024 }
  0xcc   :  { %8684 = dma.done.wait [#allocation14], 272  }
  0xcd   :  { %8685 = vsyncadd [#allocation14], 4294967024 }
  0xce   :  { %8686 = dma.done.wait [#allocation17], 2064  }
  0xcf   :  { %8687 = vsyncadd [#allocation17], 4294965232 }
  0xd0   :  { %8688 = dma.done.wait [#allocation20], 8208  }
  0xd1   :  { %8689 = vsyncadd [#allocation20], 4294959088 }
  0xd2   :  { %8690 = dma.done.wait [#allocation23], 16384  }
  0xd3   :  { %8691 = vsyncadd [#allocation23], 4294950912 }
  0xd4   :  { %8692 = dma.done.wait [#allocation26], 24576  }
  0xd5   :  { %8693 = vsyncadd [#allocation26], 4294942720 }
  0xd6   :  { %8694 = dma.done.wait [#allocation29], 24576  }
  0xd7   :  { %8695 = vsyncadd [#allocation29], 4294942720  ;;  %vm316_vm0 = vcmask 1041408   ;;  %vm309_vm1 = vcmask 80896   ;;  %v301_v1 = vld [vmem:[#allocation9 + $0x8] sm:$0x3] }
  0xd8   :  { %v300_v2 = vld [vmem:[#allocation9] sm:$0xff]  ;;  %7561 = vmatprep.subr.msk.mxu0 %vm316_vm0, %v301_v1  ;;  %v299_v4 = vld [vmem:[#allocation5 + $0x8] sm:$0xff]  ;;  %v396_v5 = vld [vmem:[#allocation12 + $0x8] sm:$0x3]  ;;  %vm571_vm2 = vcmask 261120   ;;  %s8717_s16 = smov 96  }
  0xd9   :  { %v298_v3 = vld [vmem:[#allocation5] sm:$0xff]  ;;  %7562 = vmatpush3.msk.msra.mxu0 %vm316_vm0, %v301_v1  ;;  %v395_v6 = vld [vmem:[#allocation12] sm:$0xff]  ;;  %v483_v7 = vld [vmem:[#allocation15 + $0x8] sm:$0x3]  ;;  %vm659_vm3 = vcmask 130048   ;;  %s8718_s19 = smov 64  }
  0xda   :  { %7565 = vmatprep.mubr.msk.f32.mxu0 %vm309_vm1, %v298_v3  ;;  %7563 = vmatprep.subr.mxu0 %v300_v2  ;;  %v482_v8 = vld [vmem:[#allocation15] sm:$0xff]  ;;  %v7386_v10 = vld [vmem:[#allocation10] ss:$0 sm:$0xff]  ;;  %v7390_v12 = vld [vmem:[#allocation13] ss:$0 sm:$0xff]  ;;  %vm1391_vm4 = vcmask 523264  }
  0xdb   :  { %7564 = vmatpush3.msra.mxu0 %v300_v2  ;;  %v7394_v19 = vld [vmem:[#allocation16] ss:$0 sm:$0xff]  ;;  %v8979_v26 = vld [vmem:[#allocation7 + $0x8] sm:$0xff]  ;;  %vm1394_vm5 = vcmask 785408   ;;  %vm7357_vm6 = vcmask 1047558   ;;  %vm7371_vm7 = vcmask 7174  }
  0xdc   :  { %7566 = vmatmul.mubr.msk.f32.vlgmr.msra.gmra.mxu0 %vm309_vm1, %v299_v4  ;;  %7568 = vmatprep.subr.msk.mxu0 %vm316_vm0, %v396_v5  ;;  %v8977_v25 = vld [vmem:[#allocation7] sm:$0xff] }
  0xdd   :  { %7569 = vmatpush3.msk.msra.mxu0 %vm316_vm0, %v396_v5  ;;  %7572 = vmatprep.mubr.msk.f32.mxu0 %vm309_vm1, %v298_v3 }
  0xde   :  { %7570 = vmatprep.subr.mxu0 %v395_v6 }
  0xdf   :  { %7571 = vmatpush3.msra.mxu0 %v395_v6 }
  0xe0   :  { %7573 = vmatmul.mubr.msk.f32.vlgmr.msra.gmra.mxu0 %vm309_vm1, %v299_v4  ;;  %7575 = vmatprep.subr.msk.mxu0 %vm316_vm0, %v483_v7 }
  0xe1   :  { %7579 = vmatprep.mubr.msk.f32.mxu0 %vm309_vm1, %v298_v3  ;;  %7576 = vmatpush3.msk.msra.mxu0 %vm316_vm0, %v483_v7 }
  0xe2   :  { %7577 = vmatprep.subr.mxu0 %v482_v8 }
  0xe3   :  { %7578 = vmatpush3.msra.mxu0 %v482_v8 }
  0xe4   :  { %7580 = vmatmul.mubr.msk.f32.vlgmr.msra.gmra.mxu0 %vm309_vm1, %v299_v4 }
 0x19c   :  { %v7567_v9 = vpop.f32.mrf.mxu0 }
 0x19d   :  { %v8963_v18 = vadd.f32 %v7567_v9, %v7386_v10 }
 0x19e   :  { %v386_v11 = vpop.f32.mrf.mxu0 }
 0x19f   :  { %v8945_v13 = vadd.f32 %v7386_v10, %v386_v11 }
 0x1a0   :  { %v7574_v14 = vpop.f32.mrf.mxu0 }
 0x1a1   :  { %v8947_v15 = vadd.f32 %v7574_v14, %v7390_v12  ;;  %7586 = vmatprep.mubr.msk.f32.mxu0 %vm571_vm2, %v8945_v13 }
 0x1a2   :  { %v473_v16 = vpop.f32.mrf.mxu0 }
 0x1a3   :  { %v8951_v17 = vadd.f32 %v7390_v12, %v473_v16  ;;  %7582 = vmatprep.subr.msk.mxu0 %vm571_vm2, %v8947_v15 }
 0x1a4   :  { %7583 = vmatpush3.xpose.msk.msra.mxu0 %vm571_vm2, %v8947_v15  ;;  %v7581_v20 = vpop.f32.mrf.mxu0 }
 0x1a5   :  { %767 = vrot.lane.b32.xlu1 %v8951_v17, %s8717_s16  ;;  %7584 = vmatprep.subr.msk.mxu0 %vm571_vm2, %v8951_v17  ;;  %v8969_v21 = vadd.f32 %v7581_v20, %v7394_v19 }
 0x1a6   :  { %v560_v22 = vpop.f32.mrf.mxu0 }
 0x1a7   :  { %v8971_v23 = vadd.f32 %v7394_v19, %v560_v22 }
 0x1a8   :  { %7585 = vmatpush3.xpose.msk.msra.mxu0 %vm571_vm2, %v8951_v17 }
 0x1a9   :  { %763 = vrot.lane.b32.xlu1 %v8945_v13, %s8717_s16  ;;  %7589 = vmatprep.subr.mxu0 %v8969_v21 }
 0x1ab   :  { %7587 = vmatmul.mubr.msk.f32.vlgmr.msra.gmra.mxu0 %vm571_vm2, %v8963_v18 }
 0x1ac   :  { %7590 = vmatpush3.msra.mxu0 %v8969_v21 }
 0x1ad   :  { %7591 = vmatprep.subr.mxu0 %v8971_v23 }
 0x1ae   :  { %7592 = vmatpush3.msra.mxu0 %v8971_v23 }
 0x217   :  { %v768_v43 = vpop.permute.xlu1 %767 }
 0x21b   :  { %v764_v44 = vpop.permute.xlu1 %763 }
 0x26b   :  { %v7588_v24 = vpop.f32.mrf.mxu0 }
 0x26c   :  { %v656_v29 = vadd.f32 %v7588_v24, %v8979_v26 }
 0x26d   :  { %v650_v27 = vpop.f32.mrf.mxu0 }
 0x26e   :  { %v651_v28 = vadd.f32 %v650_v27, %v8977_v25  ;;  %v663_v31 = vsel %vm659_vm3, %v656_v29, -inf }
 0x270   :  { %v660_v30 = vsel %vm659_vm3, %v651_v28, -inf }
 0x271   :  { %661 = vmax.xlane.f32.xlu0 %v660_v30 }
 0x275   :  { %664 = vmax.xlane.f32.xlu0 %v663_v31 }
 0x28b   :  { %769 = vrot.lane.b32.xlu0 %v8947_v15, %s8717_s16 }
 0x2fa   :  { %v662_v32 = vpop.xlane.xlu0 %661 }
 0x2fb   :  { %v666_v33 = vsub.f32 %v651_v28, %v662_v32 }
 0x2fd   :  { %v668_v36 = vmul.f32 1.442695, %v666_v33 }
 0x2fe   :  { %v665_v34 = vpop.xlane.xlu0 %664 }
 0x2ff   :  { %v667_v35 = vsub.f32 %v656_v29, %v665_v34 }
 0x301   :  { %v670_v37 = vmul.f32 1.442695, %v667_v35 }
 0x302   :  { %v770_v38 = vpop.permute.xlu0 %769 }
 0x303   :  { %7712 = vpow2.f32 %v670_v37  ;;  %7596 = vmatprep.subr.msk.mxu0 %vm571_vm2, %v770_v38 }
 0x304   :  { %7714 = vpow2.f32 %v668_v36 }
 0x310   :  { %v7713_v39 = vpop.eup %7712 }
 0x311   :  { %v675_v40 = vsel %vm659_vm3, %v7713_v39, 0.0  ;;  %v7715_v41 = vpop.eup %7714 }
 0x312   :  { %676 = vadd.xlane.f32.xlu1 %v675_v40  ;;  %v672_v42 = vsel %vm659_vm3, %v7715_v41, 0.0 }
 0x316   :  { %673 = vadd.xlane.f32.xlu1 %v672_v42 }
 0x327   :  { %765 = vrot.lane.b32.xlu1 %v8963_v18, %s8717_s16 }
 0x39b   :  { %v677_v45 = vpop.xlane.xlu1 %676 }
 0x39c   :  { %7716 = vrcp.f32 %v677_v45 }
 0x39f   :  { %v674_v46 = vpop.xlane.xlu1 %673 }
 0x3a0   :  { %7718 = vrcp.f32 %v674_v46 }
 0x3a3   :  { %v766_v51 = vpop.permute.xlu1 %765 }
 0x3a9   :  { %v7717_v47 = vpop.eup %7716 }
 0x3aa   :  { %v681_v50 = vmul.f32 %v7717_v47, %v7713_v39 }
 0x3ad   :  { %v7719_v48 = vpop.eup %7718 }
 0x3ae   :  { %v679_v49 = vmul.f32 %v7719_v48, %v7715_v41 }
 0x3b0   :  { %7593 = vmatprep.mubr.msk.f32.mxu0 %vm659_vm3, %v679_v49 }
 0x3b1   :  { %7594 = vmatmul.mubr.msk.f32.vlgmr.msra.gmra.mxu0 %vm659_vm3, %v681_v50 }
 0x3b2   :  { %7597 = vmatpush3.xpose.msk.msra.mxu0 %vm571_vm2, %v770_v38  ;;  %7600 = vmatprep.mubr.msk.f32.mxu0 %vm571_vm2, %v764_v44 }
 0x3b3   :  { %7598 = vmatprep.subr.msk.mxu0 %vm571_vm2, %v768_v43 }
 0x3b6   :  { %7599 = vmatpush3.xpose.msk.msra.mxu0 %vm571_vm2, %v768_v43 }
 0x3b9   :  { %7601 = vmatmul.mubr.msk.f32.vlgmr.msra.gmra.mxu0 %vm571_vm2, %v766_v51 }
 0x471   :  { %v8999_v52 = vpop.f32.mrf.mxu0 }
 0x473   :  { %v9001_v53 = vpop.f32.mrf.mxu0 }
 0x479   :  { %v7602_v54 = vpop.f32.mrf.mxu0 }
 0x47a   :  { %v851_v55 = vadd.f32 %v7602_v54, %v8979_v26 }
 0x47b   :  { %v845_v56 = vpop.f32.mrf.mxu0 }
 0x47c   :  { %v846_v57 = vadd.f32 %v845_v56, %v8977_v25  ;;  %v857_v58 = vsel %vm659_vm3, %v851_v55, -inf }
 0x47d   :  { %858 = vmax.xlane.f32.xlu1 %v857_v58 }
 0x47e   :  { %v854_v59 = vsel %vm659_vm3, %v846_v57, -inf }
 0x47f   :  { %855 = vmax.xlane.f32.xlu0 %v854_v59 }
 0x48e   :  { %878 = vrot.lane.b32.xlu1 %v8971_v23, %s8717_s16 }
 0x492   :  { %971 = vrot.lane.b32.xlu1 %v8947_v15, %s8718_s19 }
 0x496   :  { %969 = vrot.lane.b32.xlu1 %v8951_v17, %s8718_s19 }
 0x49a   :  { %967 = vrot.lane.b32.xlu1 %v8963_v18, %s8718_s19 }
 0x506   :  { %v859_v60 = vpop.xlane.xlu1 %858 }
 0x507   :  { %v861_v61 = vsub.f32 %v851_v55, %v859_v60 }
 0x508   :  { %v856_v62 = vpop.xlane.xlu0 %855 }
 0x509   :  { %v864_v63 = vmul.f32 1.442695, %v861_v61  ;;  %v860_v0 = vsub.f32 %v846_v57, %v856_v62 }
 0x50a   :  { %v879_v8 = vpop.permute.xlu1 %878 }
 0x50b   :  { %7720 = vpow2.f32 %v864_v63  ;;  %v862_v1 = vmul.f32 1.442695, %v860_v0 }
 0x50d   :  { %7722 = vpow2.f32 %v862_v1 }
 0x50e   :  { %v972_v10 = vpop.permute.xlu1 %971 }
 0x512   :  { %v970_v20 = vpop.permute.xlu1 %969 }
 0x516   :  { %v968_v22 = vpop.permute.xlu1 %967 }
 0x518   :  { %v7721_v2 = vpop.eup %7720 }
 0x519   :  { %v869_v3 = vsel %vm659_vm3, %v7721_v2, 0.0 }
 0x51a   :  { %v7723_v4 = vpop.eup %7722  ;;  %870 = vadd.xlane.f32.xlu0 %v869_v3 }
 0x51b   :  { %v866_v5 = vsel %vm659_vm3, %v7723_v4, 0.0 }
 0x51e   :  { %867 = vadd.xlane.f32.xlu0 %v866_v5 }
 0x534   :  { %880 = vrot.lane.b32.xlu0 %v8969_v21, %s8717_s16 }
 0x538   :  { %965 = vrot.lane.b32.xlu0 %v8945_v13, %s8718_s19 }
 0x5a3   :  { %v871_v6 = vpop.xlane.xlu0 %870 }
 0x5a4   :  { %7724 = vrcp.f32 %v871_v6 }
 0x5a7   :  { %v868_v7 = vpop.xlane.xlu0 %867 }
 0x5a8   :  { %7726 = vrcp.f32 %v868_v7 }
 0x5ab   :  { %v881_v9 = vpop.permute.xlu0 %880 }
 0x5ac   :  { %7603 = vmatprep.subr.mxu1 %v881_v9 }
 0x5ad   :  { %7604 = vmatpush3.msra.mxu1 %v881_v9 }
 0x5ae   :  { %7605 = vmatprep.subr.mxu1 %v879_v8 }
 0x5af   :  { %7606 = vmatpush3.msra.mxu1 %v879_v8  ;;  %v966_v19 = vpop.permute.xlu0 %965 }
 0x5b0   :  { %7610 = vmatprep.subr.msk.mxu1 %vm571_vm2, %v972_v10 }
 0x5b1   :  { %v7725_v11 = vpop.eup %7724 }
 0x5b2   :  { %v875_v16 = vmul.f32 %v7725_v11, %v7721_v2 }
 0x5b5   :  { %v7727_v12 = vpop.eup %7726 }
 0x5b6   :  { %v873_v14 = vmul.f32 %v7727_v12, %v7723_v4 }
 0x5b8   :  { %7607 = vmatprep.mubr.msk.f32.mxu1 %vm659_vm3, %v873_v14 }
 0x5b9   :  { %7608 = vmatmul.mubr.msk.f32.vlgmr.msra.gmra.mxu1 %vm659_vm3, %v875_v16 }
 0x5ba   :  { %7611 = vmatpush3.xpose.msk.msra.mxu1 %vm571_vm2, %v972_v10  ;;  %7614 = vmatprep.mubr.msk.f32.mxu1 %vm571_vm2, %v966_v19  ;;  %v1412_v19 = vld [vmem:[#allocation18 + $0x78] sm:$0xff] }
 0x5bb   :  { %7612 = vmatprep.subr.msk.mxu1 %vm571_vm2, %v970_v20 }
 0x5be   :  { %7613 = vmatpush3.xpose.msk.msra.mxu1 %vm571_vm2, %v970_v20  ;;  %v1410_v20 = vld [vmem:[#allocation18 + $0x68] sm:$0xff] }
 0x5c1   :  { %7615 = vmatmul.mubr.msk.f32.vlgmr.msra.gmra.mxu1 %vm571_vm2, %v968_v22  ;;  %v1409_v22 = vld [vmem:[#allocation18 + $0x60] sm:$0xff] }
 0x679   :  { %v9029_v24 = vpop.f32.mrf.mxu1 }
 0x67b   :  { %v9031_v27 = vpop.f32.mrf.mxu1 }
 0x67c   :  { %v7697_v28 = vpack.i.bf16 %v9029_v24, %v9031_v27  ;;  %v1408_v24 = vld [vmem:[#allocation18 + $0x58] sm:$0xff]  ;;  %v1407_v27 = vld [vmem:[#allocation18 + $0x50] sm:$0xff] }
 0x681   :  { %v7616_v29 = vpop.f32.mrf.mxu1 }
 0x682   :  { %v1053_v30 = vadd.f32 %v7616_v29, %v8979_v26  ;;  %v1405_v29 = vld [vmem:[#allocation18 + $0x40] sm:$0xff] }
 0x683   :  { %v1047_v31 = vpop.f32.mrf.mxu1 }
 0x684   :  { %v1048_v32 = vadd.f32 %v1047_v31, %v8977_v25  ;;  %v1059_v33 = vsel %vm659_vm3, %v1053_v30, -inf  ;;  %v1403_v31 = vld [vmem:[#allocation18 + $0x30] sm:$0xff] }
 0x685   :  { %1060 = vmax.xlane.f32.xlu1 %v1059_v33  ;;  %v1401_v33 = vld [vmem:[#allocation18 + $0x20] sm:$0xff] }
 0x686   :  { %v1056_v34 = vsel %vm659_vm3, %v1048_v32, -inf }
 0x687   :  { %1057 = vmax.xlane.f32.xlu0 %v1056_v34  ;;  %v1400_v34 = vld [vmem:[#allocation18 + $0x18] sm:$0xff] }
 0x696   :  { %1078 = vrot.lane.b32.xlu1 %v8971_v23, %s8718_s19 }
 0x69a   :  { %1171 = vrot.lane.b32.xlu1 %v8947_v15, %s8706_s0 }
 0x69e   :  { %1169 = vrot.lane.b32.xlu1 %v8951_v17, %s8706_s0 }
 0x6a2   :  { %1167 = vrot.lane.b32.xlu1 %v8963_v18, %s8706_s0 }
 0x70e   :  { %v1061_v35 = vpop.xlane.xlu1 %1060 }
 0x70f   :  { %v1063_v36 = vsub.f32 %v1053_v30, %v1061_v35  ;;  %v1404_v30 = vld [vmem:[#allocation18 + $0x38] sm:$0xff]  ;;  %v1399_v35 = vld [vmem:[#allocation18 + $0x10] sm:$0xff] }
 0x710   :  { %v1058_v37 = vpop.xlane.xlu0 %1057 }
 0x711   :  { %v1066_v38 = vmul.f32 1.442695, %v1063_v36  ;;  %v1062_v39 = vsub.f32 %v1048_v32, %v1058_v37  ;;  %v1402_v32 = vld [vmem:[#allocation18 + $0x28] sm:$0xff]  ;;  %v1397_v37 = vld [vmem:[#allocation18] sm:$0xff] }
 0x712   :  { %v1079_v44 = vpop.permute.xlu1 %1078  ;;  %v1398_v36 = vld [vmem:[#allocation18 + $0x8] sm:$0xff] }
 0x713   :  { %7728 = vpow2.f32 %v1066_v38  ;;  %v1064_v40 = vmul.f32 1.442695, %v1062_v39  ;;  %v1556_v38 = vld [vmem:[#allocation21 + $0x1e8] sm:$0xff]  ;;  %v1558_v39 = vld [vmem:[#allocation21 + $0x1f8] sm:$0xff] }
 0x715   :  { %7730 = vpow2.f32 %v1064_v40  ;;  %v1555_v40 = vld [vmem:[#allocation21 + $0x1e0] sm:$0xff] }
 0x716   :  { %v1172_v46 = vpop.permute.xlu1 %1171 }
 0x71a   :  { %v1170_v51 = vpop.permute.xlu1 %1169 }
 0x71e   :  { %v1168_v54 = vpop.permute.xlu1 %1167 }
 0x720   :  { %v7729_v41 = vpop.eup %7728 }
 0x721   :  { %v1071_v42 = vsel %vm659_vm3, %v7729_v41, 0.0 }
 0x722   :  { %v7731_v43 = vpop.eup %7730  ;;  %1072 = vadd.xlane.f32.xlu0 %v1071_v42  ;;  %v1551_v42 = vld [vmem:[#allocation21 + $0x1c0] sm:$0xff] }
 0x723   :  { %v1068_v15 = vsel %vm659_vm3, %v7731_v43, 0.0 }
 0x726   :  { %1069 = vadd.xlane.f32.xlu0 %v1068_v15 }
 0x73c   :  { %1080 = vrot.lane.b32.xlu0 %v8969_v21, %s8718_s19 }
 0x740   :  { %1165 = vrot.lane.b32.xlu0 %v8945_v13, %s8706_s0 }
 0x7ab   :  { %v1073_v17 = vpop.xlane.xlu0 %1072 }
 0x7ac   :  { %7732 = vrcp.f32 %v1073_v17  ;;  %v1547_v17 = vld [vmem:[#allocation21 + $0x1a0] sm:$0xff] }
 0x7af   :  { %v1070_v18 = vpop.xlane.xlu0 %1069 }
 0x7b0   :  { %7734 = vrcp.f32 %v1070_v18  ;;  %v1544_v18 = vld [vmem:[#allocation21 + $0x188] sm:$0xff] }
 0x7b3   :  { %v1081_v45 = vpop.permute.xlu0 %1080 }
 0x7b4   :  { %7617 = vmatprep.subr.mxu0 %v1081_v45 }
 0x7b5   :  { %7618 = vmatpush3.msra.mxu0 %v1081_v45  ;;  %v1543_v45 = vld [vmem:[#allocation21 + $0x180] sm:$0xff] }
 0x7b6   :  { %7619 = vmatprep.subr.mxu0 %v1079_v44 }
 0x7b7   :  { %7620 = vmatpush3.msra.mxu0 %v1079_v44  ;;  %v1166_v13 = vpop.permute.xlu0 %1165 }
 0x7b8   :  { %7624 = vmatprep.subr.msk.mxu0 %vm571_vm2, %v1172_v46 }
 0x7b9   :  { %v7733_v47 = vpop.eup %7732 }
 0x7ba   :  { %v1077_v50 = vmul.f32 %v7733_v47, %v7729_v41  ;;  %v1552_v41 = vld [vmem:[#allocation21 + $0x1c8] sm:$0xff] }
 0x7bb   :  { %v1540_v47 = vld [vmem:[#allocation21 + $0x168] sm:$0xff] }
 0x7bd   :  { %v7735_v48 = vpop.eup %7734 }
 0x7be   :  { %v1075_v49 = vmul.f32 %v7735_v48, %v7731_v43  ;;  %v1548_v43 = vld [vmem:[#allocation21 + $0x1a8] sm:$0xff]  ;;  %v1539_v48 = vld [vmem:[#allocation21 + $0x160] sm:$0xff] }
 0x7c0   :  { %7621 = vmatprep.mubr.msk.f32.mxu0 %vm659_vm3, %v1075_v49  ;;  %v1536_v49 = vld [vmem:[#allocation21 + $0x148] sm:$0xff] }
 0x7c1   :  { %7622 = vmatmul.mubr.msk.f32.vlgmr.msra.gmra.mxu0 %vm659_vm3, %v1077_v50  ;;  %v1535_v50 = vld [vmem:[#allocation21 + $0x140] sm:$0xff] }
 0x7c2   :  { %7625 = vmatpush3.xpose.msk.msra.mxu0 %vm571_vm2, %v1172_v46  ;;  %7628 = vmatprep.mubr.msk.f32.mxu0 %vm571_vm2, %v1166_v13  ;;  %v1532_v13 = vld [vmem:[#allocation21 + $0x128] sm:$0xff] }
 0x7c3   :  { %7626 = vmatprep.subr.msk.mxu0 %vm571_vm2, %v1170_v51 }
 0x7c6   :  { %7627 = vmatpush3.xpose.msk.msra.mxu0 %vm571_vm2, %v1170_v51  ;;  %v1531_v51 = vld [vmem:[#allocation21 + $0x120] sm:$0xff] }
 0x7c7   :  { %1581 = vmatprep.subr.mxu0 %v1556_v38  ;;  %v1522_v38 = vld [vmem:[#allocation21 + $0xd8] sm:$0xff] }
 0x7c9   :  { %7629 = vmatmul.mubr.msk.f32.vlgmr.msra.gmra.mxu0 %vm571_vm2, %v1168_v54  ;;  %v1528_v54 = vld [vmem:[#allocation21 + $0x108] sm:$0xff] }
 0x7ca   :  { %1582 = vmatpush1.msra.mxu0 %v1555_v40  ;;  %v1518_v40 = vld [vmem:[#allocation21 + $0xb8] sm:$0xff] }
 0x7cb   :  { %1583 = vmatprep.subr.mxu0 %v1552_v41  ;;  %v1517_v41 = vld [vmem:[#allocation21 + $0xb0] sm:$0xff] }
 0x7cc   :  { %1584 = vmatpush1.msra.mxu0 %v1551_v42  ;;  %v1514_v42 = vld [vmem:[#allocation21 + $0x98] sm:$0xff] }
 0x7cd   :  { %1585 = vmatprep.subr.mxu0 %v1548_v43  ;;  %v1513_v43 = vld [vmem:[#allocation21 + $0x90] sm:$0xff] }
 0x7ce   :  { %1586 = vmatpush1.msra.mxu0 %v1547_v17  ;;  %v1509_v17 = vld [vmem:[#allocation21 + $0x70] sm:$0xff] }
 0x7cf   :  { %1587 = vmatprep.subr.mxu0 %v1544_v18  ;;  %v1506_v18 = vld [vmem:[#allocation21 + $0x58] sm:$0xff] }
 0x7d0   :  { %1588 = vmatpush1.msra.mxu0 %v1543_v45  ;;  %v1500_v45 = vld [vmem:[#allocation21 + $0x28] sm:$0xff] }
 0x7d1   :  { %1589 = vmatprep.subr.mxu0 %v1540_v47  ;;  %v1499_v47 = vld [vmem:[#allocation21 + $0x20] sm:$0xff] }
 0x7d2   :  { %1590 = vmatpush1.msra.mxu0 %v1539_v48  ;;  %v1501_v48 = vld [vmem:[#allocation21 + $0x30] sm:$0xff] }
 0x7d3   :  { %1591 = vmatprep.subr.mxu0 %v1536_v49  ;;  %v1496_v49 = vld [vmem:[#allocation21 + $0x8] sm:$0xff] }
 0x7d4   :  { %1592 = vmatpush1.msra.mxu0 %v1535_v50  ;;  %v1498_v50 = vld [vmem:[#allocation21 + $0x18] sm:$0xff] }
 0x7d5   :  { %1593 = vmatprep.subr.mxu0 %v1532_v13  ;;  %v1495_v13 = vld [vmem:[#allocation21] sm:$0xff] }
 0x7d6   :  { %1594 = vmatpush1.msra.mxu0 %v1531_v51  ;;  %v1497_v51 = vld [vmem:[#allocation21 + $0x10] sm:$0xff] }
 0x7d7   :  { %1595 = vmatprep.subr.mxu0 %v1528_v54  ;;  %v9083_v54 = vld [vmem:[#allocation22 + $0x1e8] sm:$0xff] }
 0x7d8   :  { %11920 = vst [vmem:[#allocation40_spill] sm:$0xff] %v9083_v54 }
 0x881   :  { %v7623_v55 = vpop.f32.mrf.mxu0 }
 0x883   :  { %v1156_v56 = vpop.f32.mrf.mxu0 }
 0x884   :  { %v7702_v63 = vpack.i.bf16 %v7623_v55, %v1156_v56  ;;  %v1527_v55 = vld [vmem:[#allocation21 + $0x100] sm:$0xff]  ;;  %v1524_v56 = vld [vmem:[#allocation21 + $0xe8] sm:$0xff] }
 0x885   :  { %1596 = vmatpush1.msra.mxu0 %v1527_v55  ;;  %v9085_v55 = vld [vmem:[#allocation22 + $0x1f8] sm:$0xff] }
 0x886   :  { %1597 = vmatprep.subr.mxu0 %v1524_v56  ;;  %11921 = vst [vmem:[#allocation41_spill] sm:$0xff] %v9085_v55  ;;  %v11613_v56 = vmov 0.0  }
 0x887   :  { %1645 = vmatprep.mubr.f32.mxu0 %v11613_v56 }
 0x889   :  { %v7630_v57 = vpop.f32.mrf.mxu0 }
 0x88a   :  { %v1253_v58 = vadd.f32 %v7630_v57, %v8979_v26  ;;  %v1523_v57 = vld [vmem:[#allocation21 + $0xe0] sm:$0xff] }
 0x88b   :  { %v1247_v59 = vpop.f32.mrf.mxu0  ;;  %1598 = vmatpush1.msra.mxu0 %v1523_v57 }
 0x88c   :  { %v1248_v60 = vadd.f32 %v1247_v59, %v8977_v25  ;;  %v1259_v61 = vsel %vm659_vm3, %v1253_v58, -inf  ;;  %v1519_v59 = vld [vmem:[#allocation21 + $0xc0] sm:$0xff] }
 0x88d   :  { %1260 = vmax.xlane.f32.xlu1 %v1259_v61  ;;  %v1515_v61 = vld [vmem:[#allocation21 + $0xa0] sm:$0xff] }
 0x88e   :  { %v1256_v62 = vsel %vm659_vm3, %v1248_v60, -inf }
 0x88f   :  { %1257 = vmax.xlane.f32.xlu0 %v1256_v62  ;;  %v1512_v62 = vld [vmem:[#allocation21 + $0x88] sm:$0xff] }
 0x89e   :  { %1278 = vrot.lane.b32.xlu1 %v8971_v23, %s8706_s0 }
 0x8a2   :  { %7698 = vrot.lane.b32.xlu1 %v7697_v28, %s8706_s0  ;;  %v1406_v28 = vld [vmem:[#allocation18 + $0x48] sm:$0xff] }
 0x8a6   :  { %7703 = vrot.lane.b32.xlu1 %v7702_v63, %s8718_s19  ;;  %v1511_v63 = vld [vmem:[#allocation21 + $0x80] sm:$0xff] }
 0x916   :  { %v1261_v26 = vpop.xlane.xlu1 %1260 }
 0x917   :  { %v1263_v0 = vsub.f32 %v1253_v58, %v1261_v26  ;;  %v1520_v58 = vld [vmem:[#allocation21 + $0xc8] sm:$0xff] }
 0x918   :  { %v1258_v25 = vpop.xlane.xlu0 %1257  ;;  %1599 = vmatprep.subr.mxu0 %v1520_v58  ;;  %v1508_v26 = vld [vmem:[#allocation21 + $0x68] sm:$0xff]  ;;  %v7422_v58 = vld [vmem:[#allocation19] ss:$0 sm:$0xff] }
 0x919   :  { %v1266_v1 = vmul.f32 1.442695, %v1263_v0  ;;  %v1262_v2 = vsub.f32 %v1248_v60, %v1258_v25  ;;  %v1516_v60 = vld [vmem:[#allocation21 + $0xa8] sm:$0xff]  ;;  %1600 = vmatpush1.msra.mxu0 %v1519_v59  ;;  %v1507_v0 = vld [vmem:[#allocation21 + $0x60] sm:$0xff] }
 0x91a   :  { %v1279_v10 = vpop.permute.xlu1 %1278  ;;  %1601 = vmatprep.subr.mxu0 %v1516_v60  ;;  %v1504_v25 = vld [vmem:[#allocation21 + $0x48] sm:$0xff] }
 0x91b   :  { %7736 = vpow2.f32 %v1266_v1  ;;  %v1264_v3 = vmul.f32 1.442695, %v1262_v2  ;;  %1602 = vmatpush1.msra.mxu0 %v1515_v61  ;;  %v1503_v1 = vld [vmem:[#allocation21 + $0x40] sm:$0xff] }
 0x91c   :  { %1603 = vmatprep.subr.mxu0 %v1512_v62  ;;  %v9093_v61 = vld [vmem:[#allocation22 + $0x1e0] sm:$0xff]  ;;  %v9095_v62 = vld [vmem:[#allocation22 + $0x1f0] sm:$0xff] }
 0x91d   :  { %7738 = vpow2.f32 %v1264_v3  ;;  %1604 = vmatpush1.msra.mxu0 %v1511_v63  ;;  %v9097_v63 = vld [vmem:[#allocation22 + $0x1c8] sm:$0xff] }
 0x91e   :  { %1605 = vmatprep.subr.mxu0 %v1508_v26  ;;  %v7699_v2 = vpop.permute.xlu1 %7698  ;;  %v9099_v26 = vld [vmem:[#allocation22 + $0x1d8] sm:$0xff] }
 0x91f   :  { %1606 = vmatpush1.msra.mxu0 %v1507_v0  ;;  %v9103_v0 = vld [vmem:[#allocation22 + $0x1c0] sm:$0xff] }
 0x920   :  { %1607 = vmatprep.subr.mxu0 %v1504_v25  ;;  %v9105_v25 = vld [vmem:[#allocation22 + $0x1d0] sm:$0xff] }
 0x921   :  { %1608 = vmatpush1.msra.mxu0 %v1503_v1  ;;  %v9111_v1 = vld [vmem:[#allocation22 + $0x1a8] sm:$0xff] }
 0x922   :  { %v7704_v3 = vpop.permute.xlu1 %7703  ;;  %1609 = vmatprep.subr.mxu0 %v1500_v45  ;;  %v9241_v45 = vld [vmem:[#allocation22 + $0x60] sm:$0xff] }
 0x923   :  { %1610 = vmatpush1.msra.mxu0 %v1499_v47  ;;  %11930 = vst [vmem:[#allocation50_spill] sm:$0xff] %v9241_v45  ;;  %v9247_v47 = vld [vmem:[#allocation22 + $0x48] sm:$0xff] }
 0x924   :  { %1611 = vmatprep.subr.mxu0 %v1496_v49  ;;  %11932 = vst [vmem:[#allocation52_spill] sm:$0xff] %v9247_v47  ;;  %v9253_v49 = vld [vmem:[#allocation22 + $0x40] sm:$0xff] }
 0x925   :  { %1612 = vmatpush1.msra.mxu0 %v1495_v13  ;;  %11934 = vst [vmem:[#allocation54_spill] sm:$0xff] %v9253_v49  ;;  %v9259_v13 = vld [vmem:[#allocation22 + $0x28] sm:$0xff] }
 0x926   :  { %1811 = vmatprep.subr.mxu0 %v9083_v54  ;;  %11936 = vst [vmem:[#allocation56_spill] sm:$0xff] %v9259_v13 }
 0x928   :  { %v7737_v4 = vpop.eup %7736 }
 0x929   :  { %v1271_v5 = vsel %vm659_vm3, %v7737_v4, 0.0 }
 0x92a   :  { %v7739_v23 = vpop.eup %7738  ;;  %1272 = vadd.xlane.f32.xlu0 %v1271_v5  ;;  %v7700_v5 = vunpack.i.l.bf16 %v7699_v2 }
 0x92b   :  { %v1268_v6 = vsel %vm659_vm3, %v7739_v23, 0.0 }
 0x92e   :  { %1269 = vadd.xlane.f32.xlu0 %v1268_v6  ;;  %v7705_v6 = vunpack.i.l.bf16 %v7704_v3 }
 0x944   :  { %1280 = vrot.lane.b32.xlu0 %v8969_v21, %s8706_s0  ;;  %v1411_v21 = vld [vmem:[#allocation18 + $0x70] sm:$0xff] }
 0x9b3   :  { %v1273_v7 = vpop.xlane.xlu0 %1272 }
 0x9b4   :  { %7740 = vrcp.f32 %v1273_v7 }
 0x9b7   :  { %v1270_v8 = vpop.xlane.xlu0 %1269 }
 0x9b8   :  { %7742 = vrcp.f32 %v1270_v8 }
 0x9bb   :  { %v1281_v9 = vpop.permute.xlu0 %1280 }
 0x9bc   :  { %7631 = vmatprep.subr.mxu1 %v1281_v9 }
 0x9bd   :  { %7632 = vmatpush3.msra.mxu1 %v1281_v9 }
 0x9be   :  { %7633 = vmatprep.subr.mxu1 %v1279_v10 }
 0x9bf   :  { %7634 = vmatpush3.msra.mxu1 %v1279_v10 }
 0x9c0   :  { %7638 = vmatprep.subr.mxu1 %v1412_v19 }
 0x9c1   :  { %v7741_v11 = vpop.eup %7740 }
 0x9c2   :  { %v1277_v16 = vmul.f32 %v7741_v11, %v7737_v4  ;;  %v7701_v4 = vunpack.i.h.bf16 %v7699_v2  ;;  %v1389_v11 = vsel %vm571_vm2, %v9001_v53, %v7700_v5  ;;  %v1541_v53 = vld [vmem:[#allocation21 + $0x170] sm:$0xff]  ;;  %v9113_v2 = vld [vmem:[#allocation22 + $0x1b8] sm:$0xff] }
 0x9c3   :  { %v9123_v5 = vld [vmem:[#allocation22 + $0x1b0] sm:$0xff] }
 0x9c4   :  { %v1390_v8 = vsel %vm571_vm2, %v8999_v52, %v7701_v4  ;;  %v1546_v52 = vld [vmem:[#allocation21 + $0x198] sm:$0xff]  ;;  %v9121_v4 = vld [vmem:[#allocation22 + $0x1a0] sm:$0xff] }
 0x9c5   :  { %v7743_v12 = vpop.eup %7742 }
 0x9c6   :  { %v1275_v14 = vmul.f32 %v7743_v12, %v7739_v23  ;;  %v7706_v23 = vunpack.i.h.bf16 %v7704_v3  ;;  %v1392_v12 = vsel %vm1391_vm4, %v1389_v11, %v7705_v6  ;;  %v9129_v6 = vld [vmem:[#allocation22 + $0x198] sm:$0xff]  ;;  %v9145_v11 = vld [vmem:[#allocation22 + $0x160] sm:$0xff] }
 0x9c8   :  { %7635 = vmatprep.mubr.msk.f32.mxu1 %vm659_vm3, %v1275_v14  ;;  %v1393_v14 = vsel %vm1391_vm4, %v1390_v8, %v7706_v23  ;;  %v9127_v23 = vld [vmem:[#allocation22 + $0x188] sm:$0xff]  ;;  %v9135_v8 = vld [vmem:[#allocation22 + $0x190] sm:$0xff] }
 0x9c9   :  { %7636 = vmatmul.mubr.msk.f32.vlgmr.msra.gmra.mxu1 %vm659_vm3, %v1277_v16 }
 0x9ca   :  { %7639 = vmatpush3.msra.mxu1 %v1412_v19 }
 0x9cb   :  { %7640 = vmatprep.subr.mxu1 %v1411_v21 }
 0x9cc   :  { %7641 = vmatpush3.msra.mxu1 %v1411_v21  ;;  %v1557_v21 = vld [vmem:[#allocation21 + $0x1f0] sm:$0xff] }
 0x9cd   :  { %7642 = vmatprep.subr.mxu1 %v1410_v20 }
 0x9ce   :  { %7643 = vmatpush3.msra.mxu1 %v1410_v20  ;;  %v1554_v20 = vld [vmem:[#allocation21 + $0x1d8] sm:$0xff] }
 0x9cf   :  { %7644 = vmatprep.subr.mxu1 %v1409_v22 }
 0x9d0   :  { %7645 = vmatpush3.msra.mxu1 %v1409_v22  ;;  %v1553_v22 = vld [vmem:[#allocation21 + $0x1d0] sm:$0xff] }
 0x9d1   :  { %7646 = vmatprep.subr.mxu1 %v1408_v24 }
 0x9d2   :  { %7647 = vmatpush3.msra.mxu1 %v1408_v24  ;;  %v1550_v24 = vld [vmem:[#allocation21 + $0x1b8] sm:$0xff] }
 0x9d3   :  { %7648 = vmatprep.subr.mxu1 %v1407_v27 }
 0x9d4   :  { %7649 = vmatpush3.msra.mxu1 %v1407_v27  ;;  %v1549_v27 = vld [vmem:[#allocation21 + $0x1b0] sm:$0xff] }
 0x9d5   :  { %7650 = vmatprep.subr.mxu1 %v1406_v28 }
 0x9d6   :  { %7651 = vmatpush3.msra.mxu1 %v1406_v28  ;;  %v1545_v28 = vld [vmem:[#allocation21 + $0x190] sm:$0xff] }
 0x9d7   :  { %7652 = vmatprep.subr.mxu1 %v1405_v29 }
 0x9d8   :  { %7653 = vmatpush3.msra.mxu1 %v1405_v29  ;;  %v1542_v29 = vld [vmem:[#allocation21 + $0x178] sm:$0xff] }
 0x9d9   :  { %7654 = vmatprep.subr.mxu1 %v1404_v30 }
 0x9da   :  { %7655 = vmatpush3.msra.mxu1 %v1404_v30  ;;  %v1538_v30 = vld [vmem:[#allocation21 + $0x158] sm:$0xff] }
 0x9db   :  { %7656 = vmatprep.subr.mxu1 %v1403_v31 }
 0x9dc   :  { %7657 = vmatpush3.msra.mxu1 %v1403_v31  ;;  %v1537_v31 = vld [vmem:[#allocation21 + $0x150] sm:$0xff] }
 0x9dd   :  { %7658 = vmatprep.subr.mxu1 %v1402_v32 }
 0x9de   :  { %7659 = vmatpush3.msra.mxu1 %v1402_v32  ;;  %v1534_v32 = vld [vmem:[#allocation21 + $0x138] sm:$0xff] }
 0x9df   :  { %7660 = vmatprep.subr.mxu1 %v1401_v33 }
 0x9e0   :  { %7661 = vmatpush3.msra.mxu1 %v1401_v33  ;;  %v1533_v33 = vld [vmem:[#allocation21 + $0x130] sm:$0xff] }
 0x9e1   :  { %7662 = vmatprep.subr.mxu1 %v1400_v34 }
 0x9e2   :  { %7663 = vmatpush3.msra.mxu1 %v1400_v34  ;;  %v1530_v34 = vld [vmem:[#allocation21 + $0x118] sm:$0xff] }
 0x9e3   :  { %7664 = vmatprep.subr.mxu1 %v1399_v35 }
 0x9e4   :  { %7665 = vmatpush3.msra.mxu1 %v1399_v35  ;;  %v1529_v35 = vld [vmem:[#allocation21 + $0x110] sm:$0xff] }
 0x9e5   :  { %7666 = vmatprep.subr.mxu1 %v1398_v36 }
 0x9e6   :  { %7667 = vmatpush3.msra.mxu1 %v1398_v36  ;;  %v1526_v36 = vld [vmem:[#allocation21 + $0xf8] sm:$0xff] }
 0x9e7   :  { %7668 = vmatprep.subr.mxu1 %v1397_v37 }
 0x9e8   :  { %7669 = vmatpush3.msra.mxu1 %v1397_v37  ;;  %v1525_v37 = vld [vmem:[#allocation21 + $0xf0] sm:$0xff] }
 0x9e9   :  { %1658 = vmatprep.subr.mxu1 %v1558_v39  ;;  %v1521_v39 = vld [vmem:[#allocation21 + $0xd0] sm:$0xff] }
 0xa89   :  { %v7637_v15 = vpop.f32.mrf.mxu1 }
 0xa8b   :  { %v1356_v44 = vpop.f32.mrf.mxu1 }
 0xa8c   :  { %v7707_v46 = vpack.i.bf16 %v7637_v15, %v1356_v44  ;;  %v1510_v15 = vld [vmem:[#allocation21 + $0x78] sm:$0xff]  ;;  %v1505_v44 = vld [vmem:[#allocation21 + $0x50] sm:$0xff] }
 0xa8e   :  { %7708 = vrot.lane.b32.xlu0 %v7707_v46, %s8717_s16  ;;  %v1502_v46 = vld [vmem:[#allocation21 + $0x38] sm:$0xff] }
 0xb00   :  { %v7709_v7 = vpop.permute.xlu0 %7708 }
 0xb01   :  { %v7711_v9 = vunpack.i.h.bf16 %v7709_v7  ;;  %v7710_v10 = vunpack.i.l.bf16 %v7709_v7  ;;  %v9133_v7 = vld [vmem:[#allocation22 + $0x180] sm:$0xff] }
 0xb03   :  { %v1395_v16 = vsel %vm1394_vm5, %v1392_v12, %v7710_v10  ;;  %v1396_v19 = vsel %vm1394_vm5, %v1393_v14, %v7711_v9  ;;  %v9139_v9 = vld [vmem:[#allocation22 + $0x168] sm:$0xff]  ;;  %v9141_v10 = vld [vmem:[#allocation22 + $0x178] sm:$0xff]  ;;  %v9147_v12 = vld [vmem:[#allocation22 + $0x170] sm:$0xff] }
 0xb04   :  { %7670 = vmatprep.mubr.f32.mxu1 %v1395_v16  ;;  %v9151_v14 = vld [vmem:[#allocation22 + $0x148] sm:$0xff]  ;;  %v9153_v16 = vld [vmem:[#allocation22 + $0x158] sm:$0xff] }
 0xb05   :  { %7671 = vmatmul.mubr.f32.vlgmr.msra.gmra.mxu1 %v1396_v19  ;;  %v9157_v19 = vld [vmem:[#allocation22 + $0x140] sm:$0xff] }
 0xb06   :  { %1659 = vmatpush1.msra.mxu1 %v1557_v21  ;;  %1722 = vmatprep.mubr.f32.mxu1 %v11613_v56  ;;  %v9159_v21 = vld [vmem:[#allocation22 + $0x150] sm:$0xff] }
 0xb07   :  { %1660 = vmatprep.subr.mxu1 %v1554_v20  ;;  %v9163_v20 = vld [vmem:[#allocation22 + $0x128] sm:$0xff] }
 0xb08   :  { %1661 = vmatpush1.msra.mxu1 %v1553_v22  ;;  %v9165_v22 = vld [vmem:[#allocation22 + $0x138] sm:$0xff] }
 0xb09   :  { %1662 = vmatprep.subr.mxu1 %v1550_v24  ;;  %v9169_v24 = vld [vmem:[#allocation22 + $0x120] sm:$0xff] }
 0xb0a   :  { %1663 = vmatpush1.msra.mxu1 %v1549_v27  ;;  %v9171_v27 = vld [vmem:[#allocation22 + $0x130] sm:$0xff] }
 0xb0b   :  { %1664 = vmatprep.subr.mxu1 %v1546_v52  ;;  %v9175_v52 = vld [vmem:[#allocation22 + $0x108] sm:$0xff] }
 0xb0c   :  { %1665 = vmatpush1.msra.mxu1 %v1545_v28  ;;  %v9177_v28 = vld [vmem:[#allocation22 + $0x118] sm:$0xff] }
 0xb0d   :  { %1666 = vmatprep.subr.mxu1 %v1542_v29  ;;  %v9181_v29 = vld [vmem:[#allocation22 + $0x100] sm:$0xff] }
 0xb0e   :  { %1667 = vmatpush1.msra.mxu1 %v1541_v53  ;;  %v9183_v53 = vld [vmem:[#allocation22 + $0x110] sm:$0xff] }
 0xb0f   :  { %1668 = vmatprep.subr.mxu1 %v1538_v30  ;;  %v9187_v30 = vld [vmem:[#allocation22 + $0xe8] sm:$0xff] }
 0xb10   :  { %1669 = vmatpush1.msra.mxu1 %v1537_v31  ;;  %v9189_v31 = vld [vmem:[#allocation22 + $0xf8] sm:$0xff] }
 0xb11   :  { %1670 = vmatprep.subr.mxu1 %v1534_v32  ;;  %v9193_v32 = vld [vmem:[#allocation22 + $0xe0] sm:$0xff] }
 0xb12   :  { %1671 = vmatpush1.msra.mxu1 %v1533_v33  ;;  %v9195_v33 = vld [vmem:[#allocation22 + $0xf0] sm:$0xff] }
 0xb13   :  { %1672 = vmatprep.subr.mxu1 %v1530_v34  ;;  %v9199_v34 = vld [vmem:[#allocation22 + $0xc8] sm:$0xff] }
 0xb14   :  { %1673 = vmatpush1.msra.mxu1 %v1529_v35  ;;  %v9201_v35 = vld [vmem:[#allocation22 + $0xd8] sm:$0xff] }
 0xb15   :  { %1674 = vmatprep.subr.mxu1 %v1526_v36  ;;  %v9205_v36 = vld [vmem:[#allocation22 + $0xc0] sm:$0xff] }
 0xb16   :  { %1675 = vmatpush1.msra.mxu1 %v1525_v37  ;;  %v9207_v37 = vld [vmem:[#allocation22 + $0xd0] sm:$0xff] }
 0xb17   :  { %1676 = vmatprep.subr.mxu1 %v1522_v38  ;;  %v9211_v38 = vld [vmem:[#allocation22 + $0xa8] sm:$0xff] }
 0xb18   :  { %1677 = vmatpush1.msra.mxu1 %v1521_v39  ;;  %v9213_v39 = vld [vmem:[#allocation22 + $0xb8] sm:$0xff] }
 0xb19   :  { %1678 = vmatprep.subr.mxu1 %v1518_v40  ;;  %v9217_v40 = vld [vmem:[#allocation22 + $0xa0] sm:$0xff] }
 0xb1a   :  { %1679 = vmatpush1.msra.mxu1 %v1517_v41  ;;  %v9219_v41 = vld [vmem:[#allocation22 + $0xb0] sm:$0xff] }
 0xb1b   :  { %1680 = vmatprep.subr.mxu1 %v1514_v42  ;;  %v9223_v42 = vld [vmem:[#allocation22 + $0x88] sm:$0xff] }
 0xb1c   :  { %1681 = vmatpush1.msra.mxu1 %v1513_v43  ;;  %11924 = vst [vmem:[#allocation44_spill] sm:$0xff] %v9223_v42  ;;  %v9225_v43 = vld [vmem:[#allocation22 + $0x98] sm:$0xff] }
 0xb1d   :  { %1682 = vmatprep.subr.mxu1 %v1510_v15  ;;  %11925 = vst [vmem:[#allocation45_spill] sm:$0xff] %v9225_v43  ;;  %v9229_v15 = vld [vmem:[#allocation22 + $0x80] sm:$0xff] }
 0xb1e   :  { %1683 = vmatpush1.msra.mxu1 %v1509_v17  ;;  %11926 = vst [vmem:[#allocation46_spill] sm:$0xff] %v9229_v15  ;;  %v9231_v17 = vld [vmem:[#allocation22 + $0x90] sm:$0xff] }
 0xb1f   :  { %1684 = vmatprep.subr.mxu1 %v1506_v18  ;;  %11927 = vst [vmem:[#allocation47_spill] sm:$0xff] %v9231_v17  ;;  %v9235_v18 = vld [vmem:[#allocation22 + $0x68] sm:$0xff] }
 0xb20   :  { %1685 = vmatpush1.msra.mxu1 %v1505_v44  ;;  %11928 = vst [vmem:[#allocation48_spill] sm:$0xff] %v9235_v18  ;;  %v9237_v44 = vld [vmem:[#allocation22 + $0x78] sm:$0xff] }
 0xb21   :  { %1686 = vmatprep.subr.mxu1 %v1502_v46  ;;  %11929 = vst [vmem:[#allocation49_spill] sm:$0xff] %v9237_v44  ;;  %v9243_v46 = vld [vmem:[#allocation22 + $0x70] sm:$0xff] }
 0xb22   :  { %1687 = vmatpush1.msra.mxu1 %v1501_v48  ;;  %11931 = vst [vmem:[#allocation51_spill] sm:$0xff] %v9243_v46  ;;  %v9249_v48 = vld [vmem:[#allocation22 + $0x58] sm:$0xff] }
 0xb23   :  { %1688 = vmatprep.subr.mxu1 %v1498_v50  ;;  %11933 = vst [vmem:[#allocation53_spill] sm:$0xff] %v9249_v48  ;;  %v9255_v50 = vld [vmem:[#allocation22 + $0x50] sm:$0xff] }
 0xb24   :  { %1689 = vmatpush1.msra.mxu1 %v1497_v51  ;;  %11935 = vst [vmem:[#allocation55_spill] sm:$0xff] %v9255_v50  ;;  %v9261_v51 = vld [vmem:[#allocation22 + $0x38] sm:$0xff] }
 0xb25   :  { %1882 = vmatprep.subr.mxu1 %v9085_v55  ;;  %11937 = vst [vmem:[#allocation57_spill] sm:$0xff] %v9261_v51 }
 0xbc5   :  { %v7672_v57 = vpop.f32.mrf.mxu1 }
 0xbc6   :  { %v9117_v3 = vadd.f32 %v7672_v57, %v7422_v58  ;;  %v9265_v57 = vld [vmem:[#allocation22 + $0x20] sm:$0xff] }
 0xbc7   :  { %v1486_v59 = vpop.f32.mrf.mxu1  ;;  %11938 = vst [vmem:[#allocation58_spill] sm:$0xff] %v9265_v57 }
 0xbc8   :  { %v9091_v60 = vadd.f32 %v7422_v58, %v1486_v59  ;;  %11923 = vst [vmem:[#allocation43_spill] sm:$0xff] %v9117_v3  ;;  %v9267_v58 = vld [vmem:[#allocation22 + $0x30] sm:$0xff]  ;;  %v9271_v59 = vld [vmem:[#allocation22 + $0x8] sm:$0xff] }
 0xbc9   :  { %11939 = vst [vmem:[#allocation59_spill] sm:$0xff] %v9267_v58  ;;  %11940 = vst [vmem:[#allocation60_spill] sm:$0xff] %v9271_v59 }
 0xbca   :  { %11922 = vst [vmem:[#allocation42_spill] sm:$0xff] %v9091_v60  ;;  %1646 = vmatmul.mubr.f32.vlgmr.msra.gmra.mxu0 %v9091_v60  ;;  %1723 = vmatmul.mubr.f32.vlgmr.msra.gmra.mxu1 %v9091_v60  ;;  %v9281_v60 = vld [vmem:[#allocation22 + $0x10] sm:$0xff] }
 0xbcb   :  { %1812 = vmatpush1.msra.mxu0 %v9093_v61  ;;  %1883 = vmatpush1.msra.mxu1 %v9095_v62  ;;  %11943 = vst [vmem:[#allocation63_spill] sm:$0xff] %v9281_v60 }
 0xbcc   :  { %1813 = vmatprep.subr.mxu0 %v9097_v63  ;;  %1884 = vmatprep.subr.mxu1 %v9099_v26 }
 0xbcd   :  { %1814 = vmatpush1.msra.mxu0 %v9103_v0  ;;  %1885 = vmatpush1.msra.mxu1 %v9105_v25 }
 0xbce   :  { %1651 = vmatprep.mubr.f32.mxu0 %v11613_v56  ;;  %1728 = vmatprep.mubr.f32.mxu1 %v11613_v56  ;;  %v9273_v56 = vld [vmem:[#allocation22 + $0x18] sm:$0xff] }
 0xbcf   :  { %1815 = vmatprep.subr.mxu0 %v9111_v1  ;;  %1886 = vmatprep.subr.mxu1 %v9113_v2  ;;  %11941 = vst [vmem:[#allocation61_spill] sm:$0xff] %v9273_v56 }
 0xbd0   :  { %1652 = vmatmul.mubr.f32.gmra.mxu0 %v9117_v3  ;;  %1729 = vmatmul.mubr.f32.gmra.mxu1 %v9117_v3  ;;  %v9277_v3 = vld [vmem:[#allocation22] sm:$0xff] }
 0xbd1   :  { %1816 = vmatpush1.msra.mxu0 %v9121_v4  ;;  %1887 = vmatpush1.msra.mxu1 %v9123_v5  ;;  %11942 = vst [vmem:[#allocation62_spill] sm:$0xff] %v9277_v3 }
 0xbd2   :  { %1817 = vmatprep.subr.mxu0 %v9127_v23  ;;  %1888 = vmatprep.subr.mxu1 %v9129_v6 }
 0xbd3   :  { %1818 = vmatpush1.msra.mxu0 %v9133_v7  ;;  %1889 = vmatpush1.msra.mxu1 %v9135_v8 }
 0xbd4   :  { %1819 = vmatprep.subr.mxu0 %v9139_v9  ;;  %1890 = vmatprep.subr.mxu1 %v9141_v10 }
 0xbd5   :  { %1820 = vmatpush1.msra.mxu0 %v9145_v11  ;;  %1891 = vmatpush1.msra.mxu1 %v9147_v12 }
 0xbd6   :  { %1821 = vmatprep.subr.mxu0 %v9151_v14  ;;  %1892 = vmatprep.subr.mxu1 %v9153_v16 }
 0xbd7   :  { %1822 = vmatpush1.msra.mxu0 %v9157_v19  ;;  %1893 = vmatpush1.msra.mxu1 %v9159_v21 }
 0xbd8   :  { %1823 = vmatprep.subr.mxu0 %v9163_v20  ;;  %1894 = vmatprep.subr.mxu1 %v9165_v22 }
 0xbd9   :  { %1824 = vmatpush1.msra.mxu0 %v9169_v24  ;;  %1895 = vmatpush1.msra.mxu1 %v9171_v27 }
 0xbda   :  { %1825 = vmatprep.subr.mxu0 %v9175_v52  ;;  %1896 = vmatprep.subr.mxu1 %v9177_v28 }
 0xbdb   :  { %1826 = vmatpush1.msra.mxu0 %v9181_v29  ;;  %1897 = vmatpush1.msra.mxu1 %v9183_v53 }
 0xbdc   :  { %1827 = vmatprep.subr.mxu0 %v9187_v30  ;;  %1898 = vmatprep.subr.mxu1 %v9189_v31 }
 0xbdd   :  { %1828 = vmatpush1.msra.mxu0 %v9193_v32  ;;  %1899 = vmatpush1.msra.mxu1 %v9195_v33 }
 0xbde   :  { %1829 = vmatprep.subr.mxu0 %v9199_v34  ;;  %1900 = vmatprep.subr.mxu1 %v9201_v35 }
 0xbdf   :  { %1830 = vmatpush1.msra.mxu0 %v9205_v36  ;;  %1901 = vmatpush1.msra.mxu1 %v9207_v37 }
 0xbe0   :  { %1831 = vmatprep.subr.mxu0 %v9211_v38  ;;  %1902 = vmatprep.subr.mxu1 %v9213_v39 }
 0xbe1   :  { %1832 = vmatpush1.msra.mxu0 %v9217_v40  ;;  %1903 = vmatpush1.msra.mxu1 %v9219_v41 }
 0xbe2   :  { %1833 = vmatprep.subr.mxu0 %v9223_v42  ;;  %1904 = vmatprep.subr.mxu1 %v9225_v43 }
 0xbe3   :  { %1834 = vmatpush1.msra.mxu0 %v9229_v15  ;;  %1905 = vmatpush1.msra.mxu1 %v9231_v17 }
 0xbe4   :  { %1835 = vmatprep.subr.mxu0 %v9235_v18  ;;  %1906 = vmatprep.subr.mxu1 %v9237_v44 }
 0xbe5   :  { %1836 = vmatpush1.msra.mxu0 %v9241_v45  ;;  %1907 = vmatpush1.msra.mxu1 %v9243_v46 }
 0xbe6   :  { %1837 = vmatprep.subr.mxu0 %v9247_v47  ;;  %1908 = vmatprep.subr.mxu1 %v9249_v48 }
 0xbe7   :  { %1838 = vmatpush1.msra.mxu0 %v9253_v49  ;;  %1909 = vmatpush1.msra.mxu1 %v9255_v50  ;;  %v11944_v50 = vmov 0.0  }
 0xbe8   :  { %1839 = vmatprep.subr.mxu0 %v9259_v13  ;;  %1910 = vmatprep.subr.mxu1 %v9261_v51 }
 0xbe9   :  { %1840 = vmatpush1.msra.mxu0 %v9265_v57  ;;  %1911 = vmatpush1.msra.mxu1 %v9267_v58 }
 0xbea   :  { %1841 = vmatprep.subr.mxu0 %v9271_v59  ;;  %1912 = vmatprep.subr.mxu1 %v9273_v56 }
 0xbeb   :  { %1842 = vmatpush1.msra.mxu0 %v9277_v3  ;;  %1875 = vmatprep.mubr.f32.mxu0 %v11944_v50 }
 0xbec   :  { %1913 = vmatpush1.msra.mxu1 %v9281_v60  ;;  %1946 = vmatprep.mubr.f32.mxu1 %v11944_v50 }
 0xbed   :  { %1876 = vmatmul.mubr.f32.vlgmr.msra.gmra.mxu0 %v11944_v50  ;;  %1947 = vmatmul.mubr.f32.vlgmr.msra.gmra.mxu1 %v11944_v50 }
 0xbee   :  { %1986 = vmatprep.subr.mxu0 %v9083_v54  ;;  %2057 = vmatprep.subr.mxu1 %v9085_v55 }
 0xbef   :  { %1987 = vmatpush1.msra.mxu0 %v9093_v61  ;;  %2058 = vmatpush1.msra.mxu1 %v9095_v62 }
 0xbf0   :  { %1988 = vmatprep.subr.mxu0 %v9097_v63  ;;  %2059 = vmatprep.subr.mxu1 %v9099_v26 }
 0xbf1   :  { %1989 = vmatpush1.msra.mxu0 %v9103_v0  ;;  %2060 = vmatpush1.msra.mxu1 %v9105_v25 }
 0xbf2   :  { %1990 = vmatprep.subr.mxu0 %v9111_v1  ;;  %2061 = vmatprep.subr.mxu1 %v9113_v2 }
 0xbf3   :  { %1991 = vmatpush1.msra.mxu0 %v9121_v4  ;;  %2062 = vmatpush1.msra.mxu1 %v9123_v5 }
 0xbf4   :  { %1992 = vmatprep.subr.mxu0 %v9127_v23  ;;  %2063 = vmatprep.subr.mxu1 %v9129_v6 }
 0xbf5   :  { %1993 = vmatpush1.msra.mxu0 %v9133_v7  ;;  %2064 = vmatpush1.msra.mxu1 %v9135_v8 }
 0xbf6   :  { %1994 = vmatprep.subr.mxu0 %v9139_v9  ;;  %2065 = vmatprep.subr.mxu1 %v9141_v10 }
 0xbf7   :  { %1995 = vmatpush1.msra.mxu0 %v9145_v11  ;;  %2066 = vmatpush1.msra.mxu1 %v9147_v12 }
 0xbf8   :  { %1996 = vmatprep.subr.mxu0 %v9151_v14  ;;  %2067 = vmatprep.subr.mxu1 %v9153_v16 }
 0xbf9   :  { %1997 = vmatpush1.msra.mxu0 %v9157_v19  ;;  %2068 = vmatpush1.msra.mxu1 %v9159_v21 }
 0xbfa   :  { %1998 = vmatprep.subr.mxu0 %v9163_v20  ;;  %2069 = vmatprep.subr.mxu1 %v9165_v22 }
 0xbfb   :  { %1999 = vmatpush1.msra.mxu0 %v9169_v24  ;;  %2070 = vmatpush1.msra.mxu1 %v9171_v27 }
 0xbfc   :  { %2000 = vmatprep.subr.mxu0 %v9175_v52  ;;  %2071 = vmatprep.subr.mxu1 %v9177_v28 }
 0xbfd   :  { %2001 = vmatpush1.msra.mxu0 %v9181_v29  ;;  %2072 = vmatpush1.msra.mxu1 %v9183_v53 }
 0xbfe   :  { %2002 = vmatprep.subr.mxu0 %v9187_v30  ;;  %2073 = vmatprep.subr.mxu1 %v9189_v31 }
 0xbff   :  { %2003 = vmatpush1.msra.mxu0 %v9193_v32  ;;  %2074 = vmatpush1.msra.mxu1 %v9195_v33 }
 0xc00   :  { %2004 = vmatprep.subr.mxu0 %v9199_v34  ;;  %2075 = vmatprep.subr.mxu1 %v9201_v35 }
 0xc01   :  { %2005 = vmatpush1.msra.mxu0 %v9205_v36  ;;  %2076 = vmatpush1.msra.mxu1 %v9207_v37 }
 0xc02   :  { %2006 = vmatprep.subr.mxu0 %v9211_v38  ;;  %2077 = vmatprep.subr.mxu1 %v9213_v39 }
 0xc03   :  { %2007 = vmatpush1.msra.mxu0 %v9217_v40  ;;  %2078 = vmatpush1.msra.mxu1 %v9219_v41 }
 0xc04   :  { %2008 = vmatprep.subr.mxu0 %v9223_v42  ;;  %2079 = vmatprep.subr.mxu1 %v9225_v43  ;;  %v11945_v42 = vld [vmem:[#allocation55_spill] sm:$0xff] }
 0xc05   :  { %2009 = vmatpush1.msra.mxu0 %v9229_v15  ;;  %2080 = vmatpush1.msra.mxu1 %v9231_v17 }
 0xc06   :  { %2010 = vmatprep.subr.mxu0 %v9235_v18  ;;  %2081 = vmatprep.subr.mxu1 %v9237_v44 }
 0xc07   :  { %2011 = vmatpush1.msra.mxu0 %v9241_v45  ;;  %2082 = vmatpush1.msra.mxu1 %v9243_v46 }
 0xc08   :  { %2012 = vmatprep.subr.mxu0 %v9247_v47  ;;  %2083 = vmatprep.subr.mxu1 %v9249_v48 }
 0xc09   :  { %2013 = vmatpush1.msra.mxu0 %v9253_v49  ;;  %2084 = vmatpush1.msra.mxu1 %v11945_v42 }
 0xc0a   :  { %2014 = vmatprep.subr.mxu0 %v9259_v13  ;;  %2085 = vmatprep.subr.mxu1 %v9261_v51  ;;  %v1561_v51 = vlaneseq }
 0xc0b   :  { %2015 = vmatpush1.msra.mxu0 %v9265_v57  ;;  %2086 = vmatpush1.msra.mxu1 %v9267_v58 }
 0xc0c   :  { %2016 = vmatprep.subr.mxu0 %v9271_v59  ;;  %2087 = vmatprep.subr.mxu1 %v9273_v56  ;;  %v1562_v57 = vshrl.u32 %v1561_v51, 7 }
 0xc0d   :  { %2017 = vmatpush1.msra.mxu0 %v9277_v3  ;;  %2050 = vmatprep.mubr.f32.mxu0 %v11944_v50  ;;  %v1559_v3 = vld [vmem:[%s11601_s12] sm:$0xf] }
 0xc0e   :  { %2088 = vmatpush1.msra.mxu1 %v9281_v60  ;;  %2121 = vmatprep.mubr.f32.mxu1 %v11944_v50  ;;  %v9359_v13 = vsub.s32 0, %v1562_v57  ;;  %v9361_v58 = vsub.s32 2, %v1562_v57  ;;  %v9366_v56 = vsub.s32 1, %v1562_v57  ;;  %v9368_v59 = vsub.s32 3, %v1562_v57 }
 0xc0f   :  { %2179 = vmatprep.subr.mxu0 %v9083_v54  ;;  %2250 = vmatprep.subr.mxu1 %v9085_v55 }
 0xc10   :  { %11946 = vst [vmem:[#allocation64_spill] sm:$0xff] %v9359_v13  ;;  %11947 = vst [vmem:[#allocation65_spill] sm:$0xff] %v9361_v58  ;;  %v1564_v60 = vrot.slane %v1559_v3, %v9359_v13  ;;  %v1572_v54 = vrot.slane %v1559_v3, %v9361_v58  ;;  %v1568_v55 = vrot.slane %v1559_v3, %v9366_v56 }
 0xc11   :  { %11948 = vst [vmem:[#allocation66_spill] sm:$0xff] %v9366_v56  ;;  %11949 = vst [vmem:[#allocation67_spill] sm:$0xff] %v9368_v59  ;;  %v1576_v51 = vrot.slane %v1559_v3, %v9368_v59 }
 0xc8a   :  { %v1647_v50 = vpop.f32.mrf.mxu0  ;;  %v1724_v42 = vpop.f32.mrf.mxu1 }
 0xc8b   :  { %v1648_v49 = vadd.f32 %v1647_v50, %v1564_v60  ;;  %v1725_v48 = vadd.f32 %v1724_v42, %v1572_v54 }
 0xc8c   :  { %v1649_v47 = vpop.f32.mrf.mxu0  ;;  %v1726_v46 = vpop.f32.mrf.mxu1 }
 0xc8d   :  { %1735 = vst [vmem:[#allocation2 + $0x30] sm:$0xff] %v1648_v49  ;;  %1737 = vst [vmem:[#allocation2 + $0x18] sm:$0xff] %v1725_v48  ;;  %v1650_v45 = vadd.f32 %v1649_v47, %v1568_v55  ;;  %v1727_v44 = vadd.f32 %v1726_v46, %v1576_v51 }
 0xc8f   :  { %1736 = vst [vmem:[#allocation2] sm:$0xff] %v1650_v45  ;;  %1738 = vst [vmem:[#allocation2 + $0x10] sm:$0xff] %v1727_v44 }
 0xc90   :  { %v1653_v57 = vpop.f32.mrf.mxu0  ;;  %v1730_v13 = vpop.f32.mrf.mxu1 }
 0xc91   :  { %v1654_v18 = vadd.f32 %v1653_v57, %v1564_v60  ;;  %v1731_v58 = vadd.f32 %v1730_v13, %v1572_v54 }
 0xc92   :  { %v1655_v17 = vpop.f32.mrf.mxu0  ;;  %v1732_v56 = vpop.f32.mrf.mxu1 }
 0xc93   :  { %1739 = vst [vmem:[#allocation2 + $0x8] sm:$0xff] %v1654_v18  ;;  %1741 = vst [vmem:[#allocation2 + $0x28] sm:$0xff] %v1731_v58  ;;  %v1656_v3 = vadd.f32 %v1655_v17, %v1568_v55  ;;  %v1733_v59 = vadd.f32 %v1732_v56, %v1576_v51 }
 0xc94   :  { %v1807_v42 = vld [vmem:[#allocation2 + $0x30] sm:$0x3]  ;;  %v1809_v58 = vld [vmem:[#allocation2 + $0x18] sm:$0x3] }
 0xc95   :  { %1740 = vst [vmem:[#allocation2 + $0x20] sm:$0xff] %v1656_v3  ;;  %1742 = vst [vmem:[#allocation2 + $0x38] sm:$0xff] %v1733_v59 }
 0xc96   :  { %v1808_v48 = vld [vmem:[#allocation2] sm:$0x3]  ;;  %v1810_v60 = vld [vmem:[#allocation2 + $0x10] sm:$0x3] }
 0xcad   :  { %v1877_v50 = vpop.f32.mrf.mxu0  ;;  %v1948_v44 = vpop.f32.mrf.mxu1 }
 0xcae   :  { %v1953_v49 = vadd.f32 %v1877_v50, %v1807_v42  ;;  %v1955_v56 = vadd.f32 %v1948_v44, %v1809_v58  ;;  %v11954_v58 = vld [vmem:[#allocation49_spill] sm:$0xff] }
 0xcaf   :  { %v1879_v47 = vpop.f32.mrf.mxu0  ;;  %v1950_v54 = vpop.f32.mrf.mxu1 }
 0xcb0   :  { %v7423_v46 = vmul.f32 -1.442695, %v1953_v49  ;;  %v1954_v45 = vadd.f32 %v1879_v47, %v1808_v48  ;;  %v1956_v13 = vadd.f32 %v1950_v54, %v1810_v60  ;;  %v11950_v54 = vld [vmem:[#allocation44_spill] sm:$0xff]  ;;  %v11951_v60 = vld [vmem:[#allocation46_spill] sm:$0xff] }
 0xcb2   :  { %7744 = vpow2.f32 %v7423_v46  ;;  %v7424_v15 = vmul.f32 -1.442695, %v1954_v45  ;;  %v7425_v18 = vmul.f32 -1.442695, %v1956_v13  ;;  %v11952_v13 = vld [vmem:[#allocation47_spill] sm:$0xff] }
 0xcb4   :  { %7746 = vpow2.f32 %v7424_v15 }
 0xcb5   :  { %7748 = vpow2.f32 %v7425_v18  ;;  %v11953_v18 = vld [vmem:[#allocation48_spill] sm:$0xff] }
 0xcbf   :  { %v7745_v55 = vpop.eup %7744 }
 0xcc0   :  { %v1960_v17 = vadd.f32 1.0, %v7745_v55  ;;  %v11955_v55 = vld [vmem:[#allocation50_spill] sm:$0xff] }
 0xcc1   :  { %v7747_v59 = vpop.eup %7746 }
 0xcc2   :  { %7750 = vrcp.f32 %v1960_v17  ;;  %v1966_v51 = vadd.f32 1.0, %v7747_v59  ;;  %v7749_v57 = vpop.eup %7748  ;;  %v11957_v17 = vld [vmem:[#allocation52_spill] sm:$0xff]  ;;  %v11958_v59 = vld [vmem:[#allocation53_spill] sm:$0xff] }
 0xcc3   :  { %7752 = vtanh.f32 %v1955_v56  ;;  %v1973_v49 = vadd.f32 1.0, %v7749_v57  ;;  %v11956_v56 = vld [vmem:[#allocation51_spill] sm:$0xff] }
 0xcc4   :  { %7754 = vrcp.f32 %v1966_v51  ;;  %v11959_v51 = vld [vmem:[#allocation54_spill] sm:$0xff]  ;;  %v11960_v57 = vld [vmem:[#allocation55_spill] sm:$0xff] }
 0xcc5   :  { %7756 = vrcp.f32 %v1973_v49  ;;  %v11964_v49 = vld [vmem:[#allocation59_spill] sm:$0xff] }
 0xccf   :  { %v7751_v3 = vpop.eup %7750 }
 0xcd0   :  { %v7753_v42 = vpop.eup %7752 }
 0xcd1   :  { %v7755_v50 = vpop.eup %7754  ;;  %v1977_v48 = vmul.f32 %v7753_v42, %v7751_v3  ;;  %v11961_v3 = vld [vmem:[#allocation56_spill] sm:$0xff]  ;;  %v11962_v42 = vld [vmem:[#allocation57_spill] sm:$0xff] }
 0xcd2   :  { %v1976_v15 = vmul.f32 0.0, %v7755_v50  ;;  %v7757_v46 = vpop.eup %7756  ;;  %v11963_v50 = vld [vmem:[#allocation58_spill] sm:$0xff] }
 0xcd4   :  { %v9374_v47 = vadd.f32 %v1977_v48, %v1976_v15  ;;  %v11965_v15 = vld [vmem:[#allocation60_spill] sm:$0xff]  ;;  %v11966_v48 = vld [vmem:[#allocation61_spill] sm:$0xff] }
 0xcd6   :  { %7758 = vtanh.f32 %v9374_v47 }
 0xce3   :  { %v7759_v45 = vpop.eup %7758 }
 0xce4   :  { %v1980_v44 = vmul.f32 %v7759_v45, %v7757_v46  ;;  %v11967_v46 = vld [vmem:[#allocation62_spill] sm:$0xff]  ;;  %v11968_v45 = vmov 0.0  }
 0xce6   :  { %1981 = vst [vmem:[#allocation3] sm:$0x3] %v1980_v44  ;;  %2051 = vmatmul.mubr.f32.vlgmr.msra.gmra.mxu0 %v1980_v44  ;;  %2122 = vmatmul.mubr.f32.vlgmr.msra.gmra.mxu1 %v1980_v44  ;;  %v11969_v44 = vld [vmem:[#allocation63_spill] sm:$0xff] }
 0xce7   :  { %2180 = vmatpush1.msra.mxu0 %v9093_v61  ;;  %2251 = vmatpush1.msra.mxu1 %v9095_v62 }
 0xce8   :  { %2181 = vmatprep.subr.mxu0 %v9097_v63  ;;  %2252 = vmatprep.subr.mxu1 %v9099_v26 }
 0xce9   :  { %2182 = vmatpush1.msra.mxu0 %v9103_v0  ;;  %2253 = vmatpush1.msra.mxu1 %v9105_v25 }
 0xcea   :  { %2183 = vmatprep.subr.mxu0 %v9111_v1  ;;  %2254 = vmatprep.subr.mxu1 %v9113_v2 }
 0xceb   :  { %2184 = vmatpush1.msra.mxu0 %v9121_v4  ;;  %2255 = vmatpush1.msra.mxu1 %v9123_v5 }
 0xcec   :  { %2185 = vmatprep.subr.mxu0 %v9127_v23  ;;  %2256 = vmatprep.subr.mxu1 %v9129_v6 }
 0xced   :  { %2186 = vmatpush1.msra.mxu0 %v9133_v7  ;;  %2257 = vmatpush1.msra.mxu1 %v9135_v8 }
 0xcee   :  { %2187 = vmatprep.subr.mxu0 %v9139_v9  ;;  %2258 = vmatprep.subr.mxu1 %v9141_v10 }
 0xcef   :  { %2188 = vmatpush1.msra.mxu0 %v9145_v11  ;;  %2259 = vmatpush1.msra.mxu1 %v9147_v12 }
 0xcf0   :  { %2189 = vmatprep.subr.mxu0 %v9151_v14  ;;  %2260 = vmatprep.subr.mxu1 %v9153_v16 }
 0xcf1   :  { %2190 = vmatpush1.msra.mxu0 %v9157_v19  ;;  %2261 = vmatpush1.msra.mxu1 %v9159_v21 }
 0xcf2   :  { %2191 = vmatprep.subr.mxu0 %v9163_v20  ;;  %2262 = vmatprep.subr.mxu1 %v9165_v22 }
 0xcf3   :  { %2192 = vmatpush1.msra.mxu0 %v9169_v24  ;;  %2263 = vmatpush1.msra.mxu1 %v9171_v27 }
 0xcf4   :  { %2193 = vmatprep.subr.mxu0 %v9175_v52  ;;  %2264 = vmatprep.subr.mxu1 %v9177_v28 }
 0xcf5   :  { %2194 = vmatpush1.msra.mxu0 %v9181_v29  ;;  %2265 = vmatpush1.msra.mxu1 %v9183_v53 }
 0xcf6   :  { %2195 = vmatprep.subr.mxu0 %v9187_v30  ;;  %2266 = vmatprep.subr.mxu1 %v9189_v31 }
 0xcf7   :  { %2196 = vmatpush1.msra.mxu0 %v9193_v32  ;;  %2267 = vmatpush1.msra.mxu1 %v9195_v33 }
 0xcf8   :  { %2197 = vmatprep.subr.mxu0 %v9199_v34  ;;  %2268 = vmatprep.subr.mxu1 %v9201_v35 }
 0xcf9   :  { %2198 = vmatpush1.msra.mxu0 %v9205_v36  ;;  %2269 = vmatpush1.msra.mxu1 %v9207_v37 }
 0xcfa   :  { %2199 = vmatprep.subr.mxu0 %v9211_v38  ;;  %2270 = vmatprep.subr.mxu1 %v9213_v39 }
 0xcfb   :  { %2200 = vmatpush1.msra.mxu0 %v9217_v40  ;;  %2271 = vmatpush1.msra.mxu1 %v9219_v41 }
 0xcfc   :  { %2201 = vmatprep.subr.mxu0 %v11950_v54  ;;  %2272 = vmatprep.subr.mxu1 %v9225_v43 }
 0xcfd   :  { %2202 = vmatpush1.msra.mxu0 %v11951_v60  ;;  %2273 = vmatpush1.msra.mxu1 %v11952_v13 }
 0xcfe   :  { %2203 = vmatprep.subr.mxu0 %v11953_v18  ;;  %2274 = vmatprep.subr.mxu1 %v11954_v58 }
 0xcff   :  { %2204 = vmatpush1.msra.mxu0 %v11955_v55  ;;  %2275 = vmatpush1.msra.mxu1 %v11956_v56 }
 0xd00   :  { %2205 = vmatprep.subr.mxu0 %v11957_v17  ;;  %2276 = vmatprep.subr.mxu1 %v11958_v59 }
 0xd01   :  { %2206 = vmatpush1.msra.mxu0 %v11959_v51  ;;  %2277 = vmatpush1.msra.mxu1 %v11960_v57  ;;  %v11970_v57 = vld [vmem:[#allocation40_spill] sm:$0xff]  ;;  %v1982_v51 = vld [vmem:[#allocation2 + $0x30] sm:$0xc] }
 0xd02   :  { %2207 = vmatprep.subr.mxu0 %v11961_v3  ;;  %2278 = vmatprep.subr.mxu1 %v11962_v42  ;;  %v11971_v3 = vld [vmem:[#allocation41_spill] sm:$0xff] }
 0xd03   :  { %2208 = vmatpush1.msra.mxu0 %v11963_v50  ;;  %2279 = vmatpush1.msra.mxu1 %v11964_v49 }
 0xd04   :  { %2209 = vmatprep.subr.mxu0 %v11965_v15  ;;  %2280 = vmatprep.subr.mxu1 %v11966_v48  ;;  %v1983_v48 = vld [vmem:[#allocation2] sm:$0xc] }
 0xd05   :  { %2210 = vmatpush1.msra.mxu0 %v11967_v46  ;;  %2243 = vmatprep.mubr.f32.mxu0 %v11968_v45 }
 0xd06   :  { %2281 = vmatpush1.msra.mxu1 %v11969_v44  ;;  %2314 = vmatprep.mubr.f32.mxu1 %v11968_v45  ;;  %v1985_v45 = vld [vmem:[#allocation2 + $0x10] sm:$0xc] }
 0xd07   :  { %2372 = vmatprep.subr.mxu0 %v11970_v57  ;;  %2443 = vmatprep.subr.mxu1 %v11971_v3  ;;  %v1984_v3 = vld [vmem:[#allocation2 + $0x18] sm:$0xc] }
 0xda6   :  { %v2052_v42 = vpop.f32.mrf.mxu0  ;;  %v2123_v15 = vpop.f32.mrf.mxu1 }
 0xda7   :  { %v2132_v50 = vrot.slane %v2052_v42, 6  ;;  %v2134_v57 = vrot.slane %v2123_v15, 6 }
 0xda8   :  { %v2054_v49 = vpop.f32.mrf.mxu0  ;;  %v2125_v58 = vpop.f32.mrf.mxu1 }
 0xda9   :  { %v2140_v59 = vadd.f32 %v2132_v50, %v1982_v51  ;;  %v2133_v17 = vrot.slane %v2054_v49, 6  ;;  %v2135_v44 = vrot.slane %v2125_v58, 6  ;;  %v2142_v42 = vadd.f32 %v2134_v57, %v1984_v3  ;;  %v11973_v57 = vld [vmem:[#allocation45_spill] sm:$0xff]  ;;  %v11974_v3 = vld [vmem:[#allocation46_spill] sm:$0xff] }
 0xdab   :  { %v7426_v56 = vmul.f32 -1.442695, %v2140_v59  ;;  %v2141_v46 = vadd.f32 %v2133_v17, %v1983_v48  ;;  %v2143_v18 = vadd.f32 %v2135_v44, %v1985_v45  ;;  %v11975_v48 = vld [vmem:[#allocation47_spill] sm:$0xff]  ;;  %v11977_v45 = vld [vmem:[#allocation49_spill] sm:$0xff]  ;;  %v11978_v44 = vld [vmem:[#allocation50_spill] sm:$0xff] }
 0xdad   :  { %7760 = vpow2.f32 %v7426_v56  ;;  %v7427_v55 = vmul.f32 -1.442695, %v2141_v46  ;;  %v7428_v13 = vmul.f32 -1.442695, %v2143_v18  ;;  %v11976_v46 = vld [vmem:[#allocation48_spill] sm:$0xff] }
 0xdaf   :  { %7762 = vpow2.f32 %v7427_v55  ;;  %v2164_v55 = vrot.slane %v9374_v47, 6  ;;  %v11972_v47 = vld [vmem:[#allocation44_spill] sm:$0xff] }
 0xdb0   :  { %7764 = vpow2.f32 %v7428_v13 }
 0xdba   :  { %v7761_v60 = vpop.eup %7760 }
 0xdbb   :  { %v2147_v43 = vadd.f32 1.0, %v7761_v60 }
 0xdbc   :  { %v7763_v54 = vpop.eup %7762 }
 0xdbd   :  { %7766 = vrcp.f32 %v2147_v43  ;;  %v2153_v51 = vadd.f32 1.0, %v7763_v54  ;;  %v7765_v17 = vpop.eup %7764 }
 0xdbe   :  { %7768 = vtanh.f32 %v2142_v42  ;;  %v2160_v50 = vadd.f32 1.0, %v7765_v17  ;;  %v11979_v42 = vld [vmem:[#allocation51_spill] sm:$0xff]  ;;  %v11981_v17 = vld [vmem:[#allocation53_spill] sm:$0xff] }
 0xdbf   :  { %7770 = vrcp.f32 %v2153_v51  ;;  %v11980_v51 = vld [vmem:[#allocation52_spill] sm:$0xff] }
 0xdc0   :  { %7772 = vrcp.f32 %v2160_v50  ;;  %v11986_v50 = vld [vmem:[#allocation58_spill] sm:$0xff] }
 0xdca   :  { %v7767_v56 = vpop.eup %7766 }
 0xdcb   :  { %v7769_v59 = vpop.eup %7768 }
 0xdcc   :  { %v7771_v58 = vpop.eup %7770  ;;  %v2167_v49 = vmul.f32 %v7769_v59, %v7767_v56  ;;  %v11982_v56 = vld [vmem:[#allocation54_spill] sm:$0xff]  ;;  %v11983_v59 = vld [vmem:[#allocation55_spill] sm:$0xff] }
 0xdcd   :  { %v2166_v15 = vmul.f32 %v7771_v58, %v2164_v55  ;;  %v7773_v60 = vpop.eup %7772  ;;  %v11984_v55 = vld [vmem:[#allocation56_spill] sm:$0xff]  ;;  %v11985_v58 = vld [vmem:[#allocation57_spill] sm:$0xff] }
 0xdcf   :  { %v9444_v18 = vadd.f32 %v2167_v49, %v2166_v15  ;;  %v11987_v49 = vld [vmem:[#allocation59_spill] sm:$0xff]  ;;  %v11988_v15 = vld [vmem:[#allocation60_spill] sm:$0xff] }
 0xdd1   :  { %7774 = vtanh.f32 %v9444_v18 }
 0xdde   :  { %v7775_v13 = vpop.eup %7774 }
 0xddf   :  { %v2170_v43 = vmul.f32 %v7775_v13, %v7773_v60  ;;  %v11989_v60 = vld [vmem:[#allocation61_spill] sm:$0xff]  ;;  %v11990_v13 = vld [vmem:[#allocation62_spill] sm:$0xff] }
 0xde1   :  { %2171 = vst [vmem:[#allocation3] sm:$0xc] %v2170_v43  ;;  %v2177_v54 = vrot.slane %v2170_v43, 2  ;;  %v11991_v43 = vmov 0.0  }
 0xde3   :  { %2244 = vmatmul.mubr.f32.vlgmr.msra.gmra.mxu0 %v2177_v54  ;;  %2315 = vmatmul.mubr.f32.vlgmr.msra.gmra.mxu1 %v2177_v54  ;;  %v11992_v54 = vld [vmem:[#allocation63_spill] sm:$0xff] }
 0xde4   :  { %2373 = vmatpush1.msra.mxu0 %v9093_v61  ;;  %2444 = vmatpush1.msra.mxu1 %v9095_v62 }
 0xde5   :  { %2374 = vmatprep.subr.mxu0 %v9097_v63  ;;  %2445 = vmatprep.subr.mxu1 %v9099_v26 }
 0xde6   :  { %2375 = vmatpush1.msra.mxu0 %v9103_v0  ;;  %2446 = vmatpush1.msra.mxu1 %v9105_v25 }
 0xde7   :  { %2376 = vmatprep.subr.mxu0 %v9111_v1  ;;  %2447 = vmatprep.subr.mxu1 %v9113_v2 }
 0xde8   :  { %2377 = vmatpush1.msra.mxu0 %v9121_v4  ;;  %2448 = vmatpush1.msra.mxu1 %v9123_v5 }
 0xde9   :  { %2378 = vmatprep.subr.mxu0 %v9127_v23  ;;  %2449 = vmatprep.subr.mxu1 %v9129_v6 }
 0xdea   :  { %2379 = vmatpush1.msra.mxu0 %v9133_v7  ;;  %2450 = vmatpush1.msra.mxu1 %v9135_v8 }
 0xdeb   :  { %2380 = vmatprep.subr.mxu0 %v9139_v9  ;;  %2451 = vmatprep.subr.mxu1 %v9141_v10 }
 0xdec   :  { %2381 = vmatpush1.msra.mxu0 %v9145_v11  ;;  %2452 = vmatpush1.msra.mxu1 %v9147_v12 }
 0xded   :  { %2382 = vmatprep.subr.mxu0 %v9151_v14  ;;  %2453 = vmatprep.subr.mxu1 %v9153_v16 }
 0xdee   :  { %2383 = vmatpush1.msra.mxu0 %v9157_v19  ;;  %2454 = vmatpush1.msra.mxu1 %v9159_v21 }
 0xdef   :  { %2384 = vmatprep.subr.mxu0 %v9163_v20  ;;  %2455 = vmatprep.subr.mxu1 %v9165_v22 }
 0xdf0   :  { %2385 = vmatpush1.msra.mxu0 %v9169_v24  ;;  %2456 = vmatpush1.msra.mxu1 %v9171_v27 }
 0xdf1   :  { %2386 = vmatprep.subr.mxu0 %v9175_v52  ;;  %2457 = vmatprep.subr.mxu1 %v9177_v28 }
 0xdf2   :  { %2387 = vmatpush1.msra.mxu0 %v9181_v29  ;;  %2458 = vmatpush1.msra.mxu1 %v9183_v53 }
 0xdf3   :  { %2388 = vmatprep.subr.mxu0 %v9187_v30  ;;  %2459 = vmatprep.subr.mxu1 %v9189_v31 }
 0xdf4   :  { %2389 = vmatpush1.msra.mxu0 %v9193_v32  ;;  %2460 = vmatpush1.msra.mxu1 %v9195_v33 }
 0xdf5   :  { %2390 = vmatprep.subr.mxu0 %v9199_v34  ;;  %2461 = vmatprep.subr.mxu1 %v9201_v35 }
 0xdf6   :  { %2391 = vmatpush1.msra.mxu0 %v9205_v36  ;;  %2462 = vmatpush1.msra.mxu1 %v9207_v37 }
 0xdf7   :  { %2392 = vmatprep.subr.mxu0 %v9211_v38  ;;  %2463 = vmatprep.subr.mxu1 %v9213_v39 }
 0xdf8   :  { %2393 = vmatpush1.msra.mxu0 %v9217_v40  ;;  %2464 = vmatpush1.msra.mxu1 %v9219_v41 }
 0xdf9   :  { %2394 = vmatprep.subr.mxu0 %v11972_v47  ;;  %2465 = vmatprep.subr.mxu1 %v11973_v57 }
 0xdfa   :  { %2395 = vmatpush1.msra.mxu0 %v11974_v3  ;;  %2466 = vmatpush1.msra.mxu1 %v11975_v48 }
 0xdfb   :  { %2396 = vmatprep.subr.mxu0 %v11976_v46  ;;  %2467 = vmatprep.subr.mxu1 %v11977_v45 }
 0xdfc   :  { %2397 = vmatpush1.msra.mxu0 %v11978_v44  ;;  %2468 = vmatpush1.msra.mxu1 %v11979_v42 }
 0xdfd   :  { %2398 = vmatprep.subr.mxu0 %v11980_v51  ;;  %2469 = vmatprep.subr.mxu1 %v11981_v17 }
 0xdfe   :  { %2399 = vmatpush1.msra.mxu0 %v11982_v56  ;;  %2470 = vmatpush1.msra.mxu1 %v11983_v59  ;;  %v11993_v59 = vld [vmem:[#allocation40_spill] sm:$0xff]  ;;  %v2172_v56 = vld [vmem:[#allocation2 + $0x30] sm:$0x30] }
 0xdff   :  { %2400 = vmatprep.subr.mxu0 %v11984_v55  ;;  %2471 = vmatprep.subr.mxu1 %v11985_v58  ;;  %v11994_v55 = vld [vmem:[#allocation41_spill] sm:$0xff] }
 0xe00   :  { %2401 = vmatpush1.msra.mxu0 %v11986_v50  ;;  %2472 = vmatpush1.msra.mxu1 %v11987_v49 }
 0xe01   :  { %2402 = vmatprep.subr.mxu0 %v11988_v15  ;;  %2473 = vmatprep.subr.mxu1 %v11989_v60  ;;  %v2173_v60 = vld [vmem:[#allocation2] sm:$0x30] }
 0xe02   :  { %2403 = vmatpush1.msra.mxu0 %v11990_v13  ;;  %2436 = vmatprep.mubr.f32.mxu0 %v11991_v43 }
 0xe03   :  { %2474 = vmatpush1.msra.mxu1 %v11992_v54  ;;  %2507 = vmatprep.mubr.f32.mxu1 %v11991_v43  ;;  %v2175_v43 = vld [vmem:[#allocation2 + $0x10] sm:$0x30] }
 0xe04   :  { %2565 = vmatprep.subr.mxu0 %v11993_v59  ;;  %2636 = vmatprep.subr.mxu1 %v11994_v55  ;;  %v2174_v55 = vld [vmem:[#allocation2 + $0x18] sm:$0x30] }
 0xea3   :  { %v2245_v58 = vpop.f32.mrf.mxu0  ;;  %v2316_v15 = vpop.f32.mrf.mxu1 }
 0xea4   :  { %v2325_v50 = vrot.slane %v2245_v58, 4  ;;  %v2327_v59 = vrot.slane %v2316_v15, 4 }
 0xea5   :  { %v2247_v49 = vpop.f32.mrf.mxu0  ;;  %v2318_v45 = vpop.f32.mrf.mxu1 }
 0xea6   :  { %v2333_v17 = vadd.f32 %v2325_v50, %v2172_v56  ;;  %v2326_v51 = vrot.slane %v2247_v49, 4  ;;  %v2328_v54 = vrot.slane %v2318_v45, 4  ;;  %v2335_v58 = vadd.f32 %v2327_v59, %v2174_v55 }
 0xea8   :  { %v7429_v42 = vmul.f32 -1.442695, %v2333_v17  ;;  %v2334_v13 = vadd.f32 %v2326_v51, %v2173_v60  ;;  %v2336_v46 = vadd.f32 %v2328_v54, %v2175_v43 }
 0xeaa   :  { %7776 = vpow2.f32 %v7429_v42  ;;  %v7430_v44 = vmul.f32 -1.442695, %v2334_v13  ;;  %v7431_v48 = vmul.f32 -1.442695, %v2336_v46 }
 0xeac   :  { %7778 = vpow2.f32 %v7430_v44  ;;  %v2357_v44 = vrot.slane %v9444_v18, 6 }
 0xead   :  { %7780 = vpow2.f32 %v7431_v48 }
 0xeb7   :  { %v7777_v3 = vpop.eup %7776 }
 0xeb8   :  { %v2340_v57 = vadd.f32 1.0, %v7777_v3 }
 0xeb9   :  { %v7779_v47 = vpop.eup %7778 }
 0xeba   :  { %7782 = vrcp.f32 %v2340_v57  ;;  %v2346_v56 = vadd.f32 1.0, %v7779_v47  ;;  %v7781_v51 = vpop.eup %7780 }
 0xebb   :  { %7784 = vtanh.f32 %v2335_v58  ;;  %v2353_v50 = vadd.f32 1.0, %v7781_v51 }
 0xebc   :  { %7786 = vrcp.f32 %v2346_v56 }
 0xebd   :  { %7788 = vrcp.f32 %v2353_v50 }
 0xec7   :  { %v7783_v42 = vpop.eup %7782 }
 0xec8   :  { %v7785_v17 = vpop.eup %7784 }
 0xec9   :  { %v7787_v45 = vpop.eup %7786  ;;  %v2360_v49 = vmul.f32 %v7785_v17, %v7783_v42 }
 0xeca   :  { %v2359_v15 = vmul.f32 %v7787_v45, %v2357_v44  ;;  %v7789_v3 = vpop.eup %7788 }
 0xecc   :  { %v9514_v46 = vadd.f32 %v2360_v49, %v2359_v15 }
 0xece   :  { %7790 = vtanh.f32 %v9514_v46  ;;  %v2550_v58 = vrot.slane %v9514_v46, 6  ;;  %v9594_v46 = vld [vmem:[#allocation22 + $0x1f0] sm:$0xff] }
 0xedb   :  { %v7791_v48 = vpop.eup %7790 }
 0xedc   :  { %v2363_v57 = vmul.f32 %v7791_v48, %v7789_v3  ;;  %v9591_v3 = vld [vmem:[#allocation22 + $0x1e0] sm:$0xff]  ;;  %v9597_v48 = vld [vmem:[#allocation22 + $0x1c8] sm:$0xff] }
 0xede   :  { %2364 = vst [vmem:[#allocation3] sm:$0x30] %v2363_v57  ;;  %v2370_v47 = vrot.slane %v2363_v57, 4  ;;  %v9600_v57 = vld [vmem:[#allocation22 + $0x1d8] sm:$0xff] }
 0xee0   :  { %2437 = vmatmul.mubr.f32.vlgmr.msra.gmra.mxu0 %v2370_v47  ;;  %2508 = vmatmul.mubr.f32.vlgmr.msra.gmra.mxu1 %v2370_v47  ;;  %v9603_v47 = vld [vmem:[#allocation22 + $0x1c0] sm:$0xff] }
 0xee1   :  { %2566 = vmatpush1.msra.mxu0 %v9093_v61  ;;  %2637 = vmatpush1.msra.mxu1 %v9095_v62  ;;  %v11995_v61 = vld [vmem:[#allocation44_spill] sm:$0xff]  ;;  %v11996_v62 = vld [vmem:[#allocation45_spill] sm:$0xff] }
 0xee2   :  { %2567 = vmatprep.subr.mxu0 %v9097_v63  ;;  %2638 = vmatprep.subr.mxu1 %v9099_v26  ;;  %v11997_v63 = vld [vmem:[#allocation46_spill] sm:$0xff]  ;;  %v11998_v26 = vld [vmem:[#allocation47_spill] sm:$0xff] }
 0xee3   :  { %2568 = vmatpush1.msra.mxu0 %v9103_v0  ;;  %2639 = vmatpush1.msra.mxu1 %v9105_v25  ;;  %v11999_v0 = vld [vmem:[#allocation48_spill] sm:$0xff]  ;;  %v12000_v25 = vld [vmem:[#allocation49_spill] sm:$0xff] }
 0xee4   :  { %2569 = vmatprep.subr.mxu0 %v9111_v1  ;;  %2640 = vmatprep.subr.mxu1 %v9113_v2  ;;  %v12001_v1 = vld [vmem:[#allocation50_spill] sm:$0xff]  ;;  %v12002_v2 = vld [vmem:[#allocation51_spill] sm:$0xff] }
 0xee5   :  { %2570 = vmatpush1.msra.mxu0 %v9121_v4  ;;  %2641 = vmatpush1.msra.mxu1 %v9123_v5  ;;  %v12003_v4 = vld [vmem:[#allocation52_spill] sm:$0xff]  ;;  %v12004_v5 = vld [vmem:[#allocation53_spill] sm:$0xff] }
 0xee6   :  { %2571 = vmatprep.subr.mxu0 %v9127_v23  ;;  %2642 = vmatprep.subr.mxu1 %v9129_v6  ;;  %v12005_v23 = vld [vmem:[#allocation54_spill] sm:$0xff]  ;;  %v12006_v6 = vld [vmem:[#allocation55_spill] sm:$0xff] }
 0xee7   :  { %2572 = vmatpush1.msra.mxu0 %v9133_v7  ;;  %2643 = vmatpush1.msra.mxu1 %v9135_v8  ;;  %v12007_v7 = vld [vmem:[#allocation56_spill] sm:$0xff]  ;;  %v12008_v8 = vld [vmem:[#allocation57_spill] sm:$0xff] }
 0xee8   :  { %2573 = vmatprep.subr.mxu0 %v9139_v9  ;;  %2644 = vmatprep.subr.mxu1 %v9141_v10  ;;  %v12009_v9 = vld [vmem:[#allocation58_spill] sm:$0xff]  ;;  %v12010_v10 = vld [vmem:[#allocation59_spill] sm:$0xff] }
 0xee9   :  { %2574 = vmatpush1.msra.mxu0 %v9145_v11  ;;  %2645 = vmatpush1.msra.mxu1 %v9147_v12  ;;  %v12011_v11 = vld [vmem:[#allocation60_spill] sm:$0xff]  ;;  %v12012_v12 = vld [vmem:[#allocation61_spill] sm:$0xff] }
 0xeea   :  { %2575 = vmatprep.subr.mxu0 %v9151_v14  ;;  %2646 = vmatprep.subr.mxu1 %v9153_v16  ;;  %v12013_v14 = vld [vmem:[#allocation62_spill] sm:$0xff]  ;;  %v12014_v16 = vmov 0.0  }
 0xeeb   :  { %2576 = vmatpush1.msra.mxu0 %v9157_v19  ;;  %2647 = vmatpush1.msra.mxu1 %v9159_v21  ;;  %v12015_v19 = vld [vmem:[#allocation63_spill] sm:$0xff]  ;;  %v9581_v21 = vld [vmem:[#allocation22 + $0x1e8] sm:$0xff] }
 0xeec   :  { %2577 = vmatprep.subr.mxu0 %v9163_v20  ;;  %2648 = vmatprep.subr.mxu1 %v9165_v22  ;;  %12016 = vst [vmem:[#allocation40_spill] sm:$0xff] %v9581_v21  ;;  %v9584_v20 = vld [vmem:[#allocation22 + $0x1f8] sm:$0xff] }
 0xeed   :  { %2578 = vmatpush1.msra.mxu0 %v9169_v24  ;;  %2649 = vmatpush1.msra.mxu1 %v9171_v27  ;;  %12017 = vst [vmem:[#allocation41_spill] sm:$0xff] %v9584_v20  ;;  %v2365_v27 = vld [vmem:[#allocation2 + $0x30] sm:$0xc0] }
 0xeee   :  { %2579 = vmatprep.subr.mxu0 %v9175_v52  ;;  %2650 = vmatprep.subr.mxu1 %v9177_v28 }
 0xeef   :  { %2580 = vmatpush1.msra.mxu0 %v9181_v29  ;;  %2651 = vmatpush1.msra.mxu1 %v9183_v53 }
 0xef0   :  { %2581 = vmatprep.subr.mxu0 %v9187_v30  ;;  %2652 = vmatprep.subr.mxu1 %v9189_v31  ;;  %v2366_v30 = vld [vmem:[#allocation2] sm:$0xc0] }
 0xef1   :  { %2582 = vmatpush1.msra.mxu0 %v9193_v32  ;;  %2653 = vmatpush1.msra.mxu1 %v9195_v33 }
 0xef2   :  { %2583 = vmatprep.subr.mxu0 %v9199_v34  ;;  %2654 = vmatprep.subr.mxu1 %v9201_v35 }
 0xef3   :  { %2584 = vmatpush1.msra.mxu0 %v9205_v36  ;;  %2655 = vmatpush1.msra.mxu1 %v9207_v37  ;;  %v2368_v36 = vld [vmem:[#allocation2 + $0x10] sm:$0xc0] }
 0xef4   :  { %2585 = vmatprep.subr.mxu0 %v9211_v38  ;;  %2656 = vmatprep.subr.mxu1 %v9213_v39 }
 0xef5   :  { %2586 = vmatpush1.msra.mxu0 %v9217_v40  ;;  %2657 = vmatpush1.msra.mxu1 %v9219_v41  ;;  %v2367_v40 = vld [vmem:[#allocation2 + $0x18] sm:$0xc0] }
 0xef6   :  { %2587 = vmatprep.subr.mxu0 %v11995_v61  ;;  %2658 = vmatprep.subr.mxu1 %v11996_v62  ;;  %v9606_v61 = vld [vmem:[#allocation22 + $0x1d0] sm:$0xff]  ;;  %v9609_v62 = vld [vmem:[#allocation22 + $0x1a8] sm:$0xff] }
 0xef7   :  { %2588 = vmatpush1.msra.mxu0 %v11997_v63  ;;  %2659 = vmatpush1.msra.mxu1 %v11998_v26  ;;  %v9612_v63 = vld [vmem:[#allocation22 + $0x1b8] sm:$0xff]  ;;  %v9615_v26 = vld [vmem:[#allocation22 + $0x1a0] sm:$0xff] }
 0xef8   :  { %2589 = vmatprep.subr.mxu0 %v11999_v0  ;;  %2660 = vmatprep.subr.mxu1 %v12000_v25  ;;  %v9618_v0 = vld [vmem:[#allocation22 + $0x1b0] sm:$0xff]  ;;  %v9621_v25 = vld [vmem:[#allocation22 + $0x188] sm:$0xff] }
 0xef9   :  { %2590 = vmatpush1.msra.mxu0 %v12001_v1  ;;  %2661 = vmatpush1.msra.mxu1 %v12002_v2  ;;  %v9624_v1 = vld [vmem:[#allocation22 + $0x198] sm:$0xff]  ;;  %v9627_v2 = vld [vmem:[#allocation22 + $0x180] sm:$0xff] }
 0xefa   :  { %2591 = vmatprep.subr.mxu0 %v12003_v4  ;;  %2662 = vmatprep.subr.mxu1 %v12004_v5  ;;  %v9630_v4 = vld [vmem:[#allocation22 + $0x190] sm:$0xff]  ;;  %v9633_v5 = vld [vmem:[#allocation22 + $0x168] sm:$0xff] }
 0xefb   :  { %2592 = vmatpush1.msra.mxu0 %v12005_v23  ;;  %2663 = vmatpush1.msra.mxu1 %v12006_v6  ;;  %v9636_v23 = vld [vmem:[#allocation22 + $0x178] sm:$0xff]  ;;  %v9639_v6 = vld [vmem:[#allocation22 + $0x160] sm:$0xff] }
 0xefc   :  { %2593 = vmatprep.subr.mxu0 %v12007_v7  ;;  %2664 = vmatprep.subr.mxu1 %v12008_v8  ;;  %v9642_v7 = vld [vmem:[#allocation22 + $0x170] sm:$0xff]  ;;  %v9645_v8 = vld [vmem:[#allocation22 + $0x148] sm:$0xff] }
 0xefd   :  { %2594 = vmatpush1.msra.mxu0 %v12009_v9  ;;  %2665 = vmatpush1.msra.mxu1 %v12010_v10  ;;  %v9648_v9 = vld [vmem:[#allocation22 + $0x158] sm:$0xff]  ;;  %v9651_v10 = vld [vmem:[#allocation22 + $0x140] sm:$0xff] }
 0xefe   :  { %2595 = vmatprep.subr.mxu0 %v12011_v11  ;;  %2666 = vmatprep.subr.mxu1 %v12012_v12  ;;  %v9654_v11 = vld [vmem:[#allocation22 + $0x150] sm:$0xff]  ;;  %v9657_v12 = vld [vmem:[#allocation22 + $0x128] sm:$0xff] }
 0xeff   :  { %2596 = vmatpush1.msra.mxu0 %v12013_v14  ;;  %2629 = vmatprep.mubr.f32.mxu0 %v12014_v16  ;;  %v9660_v14 = vld [vmem:[#allocation22 + $0x138] sm:$0xff] }
 0xf00   :  { %2667 = vmatpush1.msra.mxu1 %v12015_v19  ;;  %2700 = vmatprep.mubr.f32.mxu1 %v12014_v16  ;;  %v9663_v19 = vld [vmem:[#allocation22 + $0x120] sm:$0xff] }
 0xf01   :  { %2743 = vmatprep.subr.mxu0 %v9581_v21  ;;  %2814 = vmatprep.subr.mxu1 %v9584_v20 }
 0xfa0   :  { %v2438_v22 = vpop.f32.mrf.mxu0  ;;  %v2509_v29 = vpop.f32.mrf.mxu1 }
 0xfa1   :  { %v2518_v24 = vrot.slane %v2438_v22, 2  ;;  %v2520_v38 = vrot.slane %v2509_v29, 2  ;;  %v9666_v22 = vld [vmem:[#allocation22 + $0x130] sm:$0xff]  ;;  %v9681_v29 = vld [vmem:[#allocation22 + $0xe8] sm:$0xff] }
 0xfa2   :  { %v2440_v52 = vpop.f32.mrf.mxu0  ;;  %v2511_v34 = vpop.f32.mrf.mxu1 }
 0xfa3   :  { %v2526_v28 = vadd.f32 %v2518_v24, %v2365_v27  ;;  %v2519_v53 = vrot.slane %v2440_v52, 2  ;;  %v2521_v35 = vrot.slane %v2511_v34, 2  ;;  %v2528_v18 = vadd.f32 %v2520_v38, %v2367_v40  ;;  %v9669_v24 = vld [vmem:[#allocation22 + $0x108] sm:$0xff]  ;;  %v9672_v27 = vld [vmem:[#allocation22 + $0x118] sm:$0xff]  ;;  %v9675_v52 = vld [vmem:[#allocation22 + $0x100] sm:$0xff] }
 0xfa4   :  { %v9699_v34 = vld [vmem:[#allocation22 + $0xc0] sm:$0xff]  ;;  %v9717_v40 = vld [vmem:[#allocation22 + $0x88] sm:$0xff] }
 0xfa5   :  { %v7432_v31 = vmul.f32 -1.442695, %v2526_v28  ;;  %v2527_v32 = vadd.f32 %v2519_v53, %v2366_v30  ;;  %v2529_v37 = vadd.f32 %v2521_v35, %v2368_v36  ;;  %v9678_v28 = vld [vmem:[#allocation22 + $0x110] sm:$0xff]  ;;  %v9684_v53 = vld [vmem:[#allocation22 + $0xf8] sm:$0xff]  ;;  %v9687_v30 = vld [vmem:[#allocation22 + $0xe0] sm:$0xff]  ;;  %12018 = vst [vmem:[#allocation44_spill] sm:$0xff] %v9717_v40 }
 0xfa6   :  { %v9702_v35 = vld [vmem:[#allocation22 + $0xd0] sm:$0xff]  ;;  %v9705_v36 = vld [vmem:[#allocation22 + $0xa8] sm:$0xff]  ;;  %v9711_v38 = vld [vmem:[#allocation22 + $0xa0] sm:$0xff] }
 0xfa7   :  { %7792 = vpow2.f32 %v7432_v31  ;;  %v7433_v33 = vmul.f32 -1.442695, %v2527_v32  ;;  %v7434_v39 = vmul.f32 -1.442695, %v2529_v37  ;;  %v9690_v31 = vld [vmem:[#allocation22 + $0xf0] sm:$0xff]  ;;  %v9693_v32 = vld [vmem:[#allocation22 + $0xc8] sm:$0xff] }
 0xfa8   :  { %v9708_v37 = vld [vmem:[#allocation22 + $0xb8] sm:$0xff] }
 0xfa9   :  { %7794 = vpow2.f32 %v7433_v33  ;;  %v9696_v33 = vld [vmem:[#allocation22 + $0xd8] sm:$0xff] }
 0xfaa   :  { %7796 = vpow2.f32 %v7434_v39  ;;  %v9714_v39 = vld [vmem:[#allocation22 + $0xb0] sm:$0xff] }
 0xfb4   :  { %v7793_v41 = vpop.eup %7792 }
 0xfb5   :  { %v2533_v60 = vadd.f32 1.0, %v7793_v41  ;;  %v9720_v41 = vld [vmem:[#allocation22 + $0x98] sm:$0xff] }
 0xfb6   :  { %v7795_v13 = vpop.eup %7794  ;;  %12019 = vst [vmem:[#allocation45_spill] sm:$0xff] %v9720_v41 }
 0xfb7   :  { %7798 = vrcp.f32 %v2533_v60  ;;  %v2539_v43 = vadd.f32 1.0, %v7795_v13  ;;  %v7797_v54 = vpop.eup %7796  ;;  %v9726_v60 = vld [vmem:[#allocation22 + $0x90] sm:$0xff]  ;;  %v9729_v13 = vld [vmem:[#allocation22 + $0x68] sm:$0xff] }
 0xfb8   :  { %7800 = vtanh.f32 %v2528_v18  ;;  %v2546_v51 = vadd.f32 1.0, %v7797_v54  ;;  %v9723_v18 = vld [vmem:[#allocation22 + $0x80] sm:$0xff]  ;;  %12021 = vst [vmem:[#allocation47_spill] sm:$0xff] %v9726_v60  ;;  %12022 = vst [vmem:[#allocation48_spill] sm:$0xff] %v9729_v13 }
 0xfb9   :  { %7802 = vrcp.f32 %v2539_v43  ;;  %12020 = vst [vmem:[#allocation46_spill] sm:$0xff] %v9723_v18  ;;  %v9732_v43 = vld [vmem:[#allocation22 + $0x78] sm:$0xff]  ;;  %v9735_v54 = vld [vmem:[#allocation22 + $0x60] sm:$0xff] }
 0xfba   :  { %7804 = vrcp.f32 %v2546_v51  ;;  %12023 = vst [vmem:[#allocation49_spill] sm:$0xff] %v9732_v43  ;;  %12024 = vst [vmem:[#allocation50_spill] sm:$0xff] %v9735_v54  ;;  %v9750_v51 = vld [vmem:[#allocation22 + $0x50] sm:$0xff] }
 0xfbb   :  { %12029 = vst [vmem:[#allocation55_spill] sm:$0xff] %v9750_v51 }
 0xfc4   :  { %v7799_v59 = vpop.eup %7798 }
 0xfc5   :  { %v7801_v55 = vpop.eup %7800 }
 0xfc6   :  { %v7803_v56 = vpop.eup %7802  ;;  %v2553_v42 = vmul.f32 %v7801_v55, %v7799_v59  ;;  %v9738_v59 = vld [vmem:[#allocation22 + $0x70] sm:$0xff]  ;;  %v9741_v55 = vld [vmem:[#allocation22 + $0x48] sm:$0xff] }
 0xfc7   :  { %v2552_v17 = vmul.f32 %v7803_v56, %v2550_v58  ;;  %v7805_v45 = vpop.eup %7804  ;;  %12025 = vst [vmem:[#allocation51_spill] sm:$0xff] %v9738_v59  ;;  %12026 = vst [vmem:[#allocation52_spill] sm:$0xff] %v9741_v55  ;;  %v9744_v58 = vld [vmem:[#allocation22 + $0x58] sm:$0xff]  ;;  %v9747_v56 = vld [vmem:[#allocation22 + $0x40] sm:$0xff] }
 0xfc8   :  { %12027 = vst [vmem:[#allocation53_spill] sm:$0xff] %v9744_v58  ;;  %12028 = vst [vmem:[#allocation54_spill] sm:$0xff] %v9747_v56 }
 0xfc9   :  { %v9588_v44 = vadd.f32 %v2553_v42, %v2552_v17  ;;  %v9753_v42 = vld [vmem:[#allocation22 + $0x28] sm:$0xff]  ;;  %v9756_v17 = vld [vmem:[#allocation22 + $0x38] sm:$0xff] }
 0xfca   :  { %12030 = vst [vmem:[#allocation56_spill] sm:$0xff] %v9753_v42  ;;  %12031 = vst [vmem:[#allocation57_spill] sm:$0xff] %v9756_v17 }
 0xfcb   :  { %7806 = vtanh.f32 %v9588_v44 }
 0xfd8   :  { %v7807_v50 = vpop.eup %7806 }
 0xfd9   :  { %v2556_v49 = vmul.f32 %v7807_v50, %v7805_v45  ;;  %v9759_v45 = vld [vmem:[#allocation22 + $0x20] sm:$0xff]  ;;  %v9762_v50 = vld [vmem:[#allocation22 + $0x30] sm:$0xff] }
 0xfda   :  { %12032 = vst [vmem:[#allocation58_spill] sm:$0xff] %v9759_v45  ;;  %12033 = vst [vmem:[#allocation59_spill] sm:$0xff] %v9762_v50 }
 0xfdb   :  { %2557 = vst [vmem:[#allocation3] sm:$0xc0] %v2556_v49  ;;  %v2563_v15 = vrot.slane %v2556_v49, 6  ;;  %v9765_v49 = vld [vmem:[#allocation22 + $0x8] sm:$0xff] }
 0xfdc   :  { %12034 = vst [vmem:[#allocation60_spill] sm:$0xff] %v9765_v49 }
 0xfdd   :  { %2630 = vmatmul.mubr.f32.vlgmr.msra.gmra.mxu0 %v2563_v15  ;;  %2701 = vmatmul.mubr.f32.vlgmr.msra.gmra.mxu1 %v2563_v15  ;;  %v9768_v15 = vld [vmem:[#allocation22 + $0x18] sm:$0xff] }
 0xfde   :  { %2744 = vmatpush1.msra.mxu0 %v9591_v3  ;;  %2815 = vmatpush1.msra.mxu1 %v9594_v46  ;;  %12035 = vst [vmem:[#allocation61_spill] sm:$0xff] %v9768_v15 }
 0xfdf   :  { %2745 = vmatprep.subr.mxu0 %v9597_v48  ;;  %2816 = vmatprep.subr.mxu1 %v9600_v57 }
 0xfe0   :  { %2746 = vmatpush1.msra.mxu0 %v9603_v47  ;;  %2817 = vmatpush1.msra.mxu1 %v9606_v61 }
 0xfe1   :  { %2747 = vmatprep.subr.mxu0 %v9609_v62  ;;  %2818 = vmatprep.subr.mxu1 %v9612_v63 }
 0xfe2   :  { %2748 = vmatpush1.msra.mxu0 %v9615_v26  ;;  %2819 = vmatpush1.msra.mxu1 %v9618_v0 }
 0xfe3   :  { %2749 = vmatprep.subr.mxu0 %v9621_v25  ;;  %2820 = vmatprep.subr.mxu1 %v9624_v1 }
 0xfe4   :  { %2750 = vmatpush1.msra.mxu0 %v9627_v2  ;;  %2821 = vmatpush1.msra.mxu1 %v9630_v4 }
 0xfe5   :  { %2751 = vmatprep.subr.mxu0 %v9633_v5  ;;  %2822 = vmatprep.subr.mxu1 %v9636_v23 }
 0xfe6   :  { %2752 = vmatpush1.msra.mxu0 %v9639_v6  ;;  %2823 = vmatpush1.msra.mxu1 %v9642_v7 }
 0xfe7   :  { %2753 = vmatprep.subr.mxu0 %v9645_v8  ;;  %2824 = vmatprep.subr.mxu1 %v9648_v9 }
 0xfe8   :  { %2754 = vmatpush1.msra.mxu0 %v9651_v10  ;;  %2825 = vmatpush1.msra.mxu1 %v9654_v11 }
 0xfe9   :  { %2755 = vmatprep.subr.mxu0 %v9657_v12  ;;  %2826 = vmatprep.subr.mxu1 %v9660_v14 }
 0xfea   :  { %2756 = vmatpush1.msra.mxu0 %v9663_v19  ;;  %2827 = vmatpush1.msra.mxu1 %v9666_v22 }
 0xfeb   :  { %2757 = vmatprep.subr.mxu0 %v9669_v24  ;;  %2828 = vmatprep.subr.mxu1 %v9672_v27 }
 0xfec   :  { %2758 = vmatpush1.msra.mxu0 %v9675_v52  ;;  %2829 = vmatpush1.msra.mxu1 %v9678_v28 }
 0xfed   :  { %2759 = vmatprep.subr.mxu0 %v9681_v29  ;;  %2830 = vmatprep.subr.mxu1 %v9684_v53 }
 0xfee   :  { %2760 = vmatpush1.msra.mxu0 %v9687_v30  ;;  %2831 = vmatpush1.msra.mxu1 %v9690_v31 }
 0xfef   :  { %2761 = vmatprep.subr.mxu0 %v9693_v32  ;;  %2832 = vmatprep.subr.mxu1 %v9696_v33 }
 0xff0   :  { %2762 = vmatpush1.msra.mxu0 %v9699_v34  ;;  %2833 = vmatpush1.msra.mxu1 %v9702_v35 }
 0xff1   :  { %2763 = vmatprep.subr.mxu0 %v9705_v36  ;;  %2834 = vmatprep.subr.mxu1 %v9708_v37 }
 0xff2   :  { %2764 = vmatpush1.msra.mxu0 %v9711_v38  ;;  %2835 = vmatpush1.msra.mxu1 %v9714_v39 }
 0xff3   :  { %2765 = vmatprep.subr.mxu0 %v9717_v40  ;;  %2836 = vmatprep.subr.mxu1 %v9720_v41 }
 0xff4   :  { %2766 = vmatpush1.msra.mxu0 %v9723_v18  ;;  %2837 = vmatpush1.msra.mxu1 %v9726_v60 }
 0xff5   :  { %2767 = vmatprep.subr.mxu0 %v9729_v13  ;;  %2838 = vmatprep.subr.mxu1 %v9732_v43 }
 0xff6   :  { %2768 = vmatpush1.msra.mxu0 %v9735_v54  ;;  %2839 = vmatpush1.msra.mxu1 %v9738_v59  ;;  %v2561_v54 = vld [vmem:[#allocation2 + $0x38] sm:$0x3] }
 0xff7   :  { %2769 = vmatprep.subr.mxu0 %v9741_v55  ;;  %2840 = vmatprep.subr.mxu1 %v9744_v58 }
 0xff8   :  { %2770 = vmatpush1.msra.mxu0 %v9747_v56  ;;  %2841 = vmatpush1.msra.mxu1 %v9750_v51 }
 0xff9   :  { %2771 = vmatprep.subr.mxu0 %v9753_v42  ;;  %2842 = vmatprep.subr.mxu1 %v9756_v17  ;;  %v9771_v42 = vld [vmem:[#allocation22] sm:$0xff]  ;;  %v9775_v17 = vld [vmem:[#allocation22 + $0x10] sm:$0xff] }
 0xffa   :  { %2772 = vmatpush1.msra.mxu0 %v9759_v45  ;;  %2843 = vmatpush1.msra.mxu1 %v9762_v50  ;;  %12036 = vst [vmem:[#allocation62_spill] sm:$0xff] %v9771_v42  ;;  %12037 = vst [vmem:[#allocation63_spill] sm:$0xff] %v9775_v17 }
 0xffb   :  { %2773 = vmatprep.subr.mxu0 %v9765_v49  ;;  %2844 = vmatprep.subr.mxu1 %v9768_v15  ;;  %v2558_v49 = vld [vmem:[#allocation2 + $0x8] sm:$0x3]  ;;  %v2559_v15 = vld [vmem:[#allocation2 + $0x20] sm:$0x3] }
 0xffc   :  { %2774 = vmatpush1.msra.mxu0 %v9771_v42  ;;  %2807 = vmatprep.mubr.f32.mxu0 %v12014_v16 }
 0xffd   :  { %2845 = vmatpush1.msra.mxu1 %v9775_v17  ;;  %2878 = vmatprep.mubr.f32.mxu1 %v12014_v16  ;;  %v2560_v16 = vld [vmem:[#allocation2 + $0x28] sm:$0x3] }
 0xffe   :  { %2936 = vmatprep.subr.mxu0 %v9581_v21  ;;  %3007 = vmatprep.subr.mxu1 %v9584_v20 }
0x109d   :  { %v2631_v50 = vpop.f32.mrf.mxu0  ;;  %v2702_v42 = vpop.f32.mrf.mxu1 }
0x109e   :  { %v2707_v45 = vadd.f32 %v2631_v50, %v2558_v49  ;;  %v2709_v21 = vadd.f32 %v2702_v42, %v2560_v16  ;;  %v12042_v42 = vld [vmem:[#allocation51_spill] sm:$0xff] }
0x109f   :  { %v2633_v51 = vpop.f32.mrf.mxu0  ;;  %v2704_v59 = vpop.f32.mrf.mxu1 }
0x10a0   :  { %v7435_v56 = vmul.f32 -1.442695, %v2707_v45  ;;  %v2708_v58 = vadd.f32 %v2633_v51, %v2559_v15  ;;  %v2710_v17 = vadd.f32 %v2704_v59, %v2561_v54 }
0x10a2   :  { %7808 = vpow2.f32 %v7435_v56  ;;  %v7436_v55 = vmul.f32 -1.442695, %v2708_v58  ;;  %v7437_v43 = vmul.f32 -1.442695, %v2710_v17  ;;  %v2731_v58 = vrot.slane %v9588_v44, 6  ;;  %v12040_v44 = vld [vmem:[#allocation49_spill] sm:$0xff] }
0x10a3   :  { %v12043_v17 = vld [vmem:[#allocation52_spill] sm:$0xff] }
0x10a4   :  { %7810 = vpow2.f32 %v7436_v55 }
0x10a5   :  { %7812 = vpow2.f32 %v7437_v43  ;;  %v12041_v43 = vld [vmem:[#allocation50_spill] sm:$0xff] }
0x10af   :  { %v7809_v13 = vpop.eup %7808 }
0x10b0   :  { %v2714_v60 = vadd.f32 1.0, %v7809_v13 }
0x10b1   :  { %v7811_v20 = vpop.eup %7810 }
0x10b2   :  { %7814 = vrcp.f32 %v2714_v60  ;;  %v2720_v50 = vadd.f32 1.0, %v7811_v20  ;;  %v7813_v45 = vpop.eup %7812  ;;  %v12039_v20 = vld [vmem:[#allocation48_spill] sm:$0xff] }
0x10b3   :  { %7816 = vtanh.f32 %v2709_v21  ;;  %v2727_v49 = vadd.f32 1.0, %v7813_v45  ;;  %v12038_v21 = vld [vmem:[#allocation47_spill] sm:$0xff]  ;;  %v12045_v45 = vld [vmem:[#allocation54_spill] sm:$0xff] }
0x10b4   :  { %7818 = vrcp.f32 %v2720_v50  ;;  %v12044_v50 = vld [vmem:[#allocation53_spill] sm:$0xff] }
0x10b5   :  { %7820 = vrcp.f32 %v2727_v49  ;;  %v12050_v49 = vld [vmem:[#allocation59_spill] sm:$0xff] }
0x10bf   :  { %v7815_v51 = vpop.eup %7814 }
0x10c0   :  { %v7817_v56 = vpop.eup %7816 }
0x10c1   :  { %v7819_v55 = vpop.eup %7818  ;;  %v2734_v15 = vmul.f32 %v7817_v56, %v7815_v51  ;;  %v12046_v51 = vld [vmem:[#allocation55_spill] sm:$0xff]  ;;  %v12047_v56 = vld [vmem:[#allocation56_spill] sm:$0xff] }
0x10c2   :  { %v2733_v54 = vmul.f32 %v7819_v55, %v2731_v58  ;;  %v7821_v16 = vpop.eup %7820  ;;  %v12048_v58 = vld [vmem:[#allocation57_spill] sm:$0xff]  ;;  %v12049_v55 = vld [vmem:[#allocation58_spill] sm:$0xff] }
0x10c4   :  { %v9782_v59 = vadd.f32 %v2734_v15, %v2733_v54  ;;  %v12051_v15 = vld [vmem:[#allocation60_spill] sm:$0xff]  ;;  %v12052_v54 = vld [vmem:[#allocation61_spill] sm:$0xff] }
0x10c6   :  { %7822 = vtanh.f32 %v9782_v59 }
0x10d3   :  { %v7823_v13 = vpop.eup %7822 }
0x10d4   :  { %v2737_v60 = vmul.f32 %v7823_v13, %v7821_v16  ;;  %v12053_v16 = vld [vmem:[#allocation62_spill] sm:$0xff]  ;;  %v12054_v13 = vmov 0.0  }
0x10d6   :  { %2738 = vst [vmem:[#allocation3 + $0x8] sm:$0x3] %v2737_v60  ;;  %2808 = vmatmul.mubr.f32.vlgmr.msra.gmra.mxu0 %v2737_v60  ;;  %2879 = vmatmul.mubr.f32.vlgmr.msra.gmra.mxu1 %v2737_v60  ;;  %v12055_v60 = vld [vmem:[#allocation63_spill] sm:$0xff] }
0x10d7   :  { %2937 = vmatpush1.msra.mxu0 %v9591_v3  ;;  %3008 = vmatpush1.msra.mxu1 %v9594_v46 }
0x10d8   :  { %2938 = vmatprep.subr.mxu0 %v9597_v48  ;;  %3009 = vmatprep.subr.mxu1 %v9600_v57 }
0x10d9   :  { %2939 = vmatpush1.msra.mxu0 %v9603_v47  ;;  %3010 = vmatpush1.msra.mxu1 %v9606_v61 }
0x10da   :  { %2940 = vmatprep.subr.mxu0 %v9609_v62  ;;  %3011 = vmatprep.subr.mxu1 %v9612_v63 }
0x10db   :  { %2941 = vmatpush1.msra.mxu0 %v9615_v26  ;;  %3012 = vmatpush1.msra.mxu1 %v9618_v0 }
0x10dc   :  { %2942 = vmatprep.subr.mxu0 %v9621_v25  ;;  %3013 = vmatprep.subr.mxu1 %v9624_v1 }
0x10dd   :  { %2943 = vmatpush1.msra.mxu0 %v9627_v2  ;;  %3014 = vmatpush1.msra.mxu1 %v9630_v4 }
0x10de   :  { %2944 = vmatprep.subr.mxu0 %v9633_v5  ;;  %3015 = vmatprep.subr.mxu1 %v9636_v23 }
0x10df   :  { %2945 = vmatpush1.msra.mxu0 %v9639_v6  ;;  %3016 = vmatpush1.msra.mxu1 %v9642_v7 }
0x10e0   :  { %2946 = vmatprep.subr.mxu0 %v9645_v8  ;;  %3017 = vmatprep.subr.mxu1 %v9648_v9 }
0x10e1   :  { %2947 = vmatpush1.msra.mxu0 %v9651_v10  ;;  %3018 = vmatpush1.msra.mxu1 %v9654_v11 }
0x10e2   :  { %2948 = vmatprep.subr.mxu0 %v9657_v12  ;;  %3019 = vmatprep.subr.mxu1 %v9660_v14 }
0x10e3   :  { %2949 = vmatpush1.msra.mxu0 %v9663_v19  ;;  %3020 = vmatpush1.msra.mxu1 %v9666_v22 }
0x10e4   :  { %2950 = vmatprep.subr.mxu0 %v9669_v24  ;;  %3021 = vmatprep.subr.mxu1 %v9672_v27 }
0x10e5   :  { %2951 = vmatpush1.msra.mxu0 %v9675_v52  ;;  %3022 = vmatpush1.msra.mxu1 %v9678_v28 }
0x10e6   :  { %2952 = vmatprep.subr.mxu0 %v9681_v29  ;;  %3023 = vmatprep.subr.mxu1 %v9684_v53 }
0x10e7   :  { %2953 = vmatpush1.msra.mxu0 %v9687_v30  ;;  %3024 = vmatpush1.msra.mxu1 %v9690_v31 }
0x10e8   :  { %2954 = vmatprep.subr.mxu0 %v9693_v32  ;;  %3025 = vmatprep.subr.mxu1 %v9696_v33 }
0x10e9   :  { %2955 = vmatpush1.msra.mxu0 %v9699_v34  ;;  %3026 = vmatpush1.msra.mxu1 %v9702_v35 }
0x10ea   :  { %2956 = vmatprep.subr.mxu0 %v9705_v36  ;;  %3027 = vmatprep.subr.mxu1 %v9708_v37 }
0x10eb   :  { %2957 = vmatpush1.msra.mxu0 %v9711_v38  ;;  %3028 = vmatpush1.msra.mxu1 %v9714_v39 }
0x10ec   :  { %2958 = vmatprep.subr.mxu0 %v9717_v40  ;;  %3029 = vmatprep.subr.mxu1 %v9720_v41 }
0x10ed   :  { %2959 = vmatpush1.msra.mxu0 %v9723_v18  ;;  %3030 = vmatpush1.msra.mxu1 %v12038_v21 }
0x10ee   :  { %2960 = vmatprep.subr.mxu0 %v12039_v20  ;;  %3031 = vmatprep.subr.mxu1 %v12040_v44 }
0x10ef   :  { %2961 = vmatpush1.msra.mxu0 %v12041_v43  ;;  %3032 = vmatpush1.msra.mxu1 %v12042_v42 }
0x10f0   :  { %2962 = vmatprep.subr.mxu0 %v12043_v17  ;;  %3033 = vmatprep.subr.mxu1 %v12044_v50 }
0x10f1   :  { %2963 = vmatpush1.msra.mxu0 %v12045_v45  ;;  %3034 = vmatpush1.msra.mxu1 %v12046_v51  ;;  %v12056_v51 = vld [vmem:[#allocation40_spill] sm:$0xff]  ;;  %v2739_v45 = vld [vmem:[#allocation2 + $0x8] sm:$0xc] }
0x10f2   :  { %2964 = vmatprep.subr.mxu0 %v12047_v56  ;;  %3035 = vmatprep.subr.mxu1 %v12048_v58  ;;  %v12057_v56 = vld [vmem:[#allocation41_spill] sm:$0xff] }
0x10f3   :  { %2965 = vmatpush1.msra.mxu0 %v12049_v55  ;;  %3036 = vmatpush1.msra.mxu1 %v12050_v49 }
0x10f4   :  { %2966 = vmatprep.subr.mxu0 %v12051_v15  ;;  %3037 = vmatprep.subr.mxu1 %v12052_v54  ;;  %v2740_v54 = vld [vmem:[#allocation2 + $0x20] sm:$0xc] }
0x10f5   :  { %2967 = vmatpush1.msra.mxu0 %v12053_v16  ;;  %3000 = vmatprep.mubr.f32.mxu0 %v12054_v13 }
0x10f6   :  { %3038 = vmatpush1.msra.mxu1 %v12055_v60  ;;  %3071 = vmatprep.mubr.f32.mxu1 %v12054_v13  ;;  %v2742_v13 = vld [vmem:[#allocation2 + $0x38] sm:$0xc] }
0x10f7   :  { %3129 = vmatprep.subr.mxu0 %v12056_v51  ;;  %3200 = vmatprep.subr.mxu1 %v12057_v56  ;;  %v2741_v56 = vld [vmem:[#allocation2 + $0x28] sm:$0xc] }
0x1196   :  { %v2809_v58 = vpop.f32.mrf.mxu0  ;;  %v2880_v15 = vpop.f32.mrf.mxu1 }
0x1197   :  { %v2889_v55 = vrot.slane %v2809_v58, 6  ;;  %v2891_v51 = vrot.slane %v2880_v15, 6 }
0x1198   :  { %v2811_v49 = vpop.f32.mrf.mxu0  ;;  %v2882_v44 = vpop.f32.mrf.mxu1 }
0x1199   :  { %v2897_v50 = vadd.f32 %v2889_v55, %v2739_v45  ;;  %v2890_v17 = vrot.slane %v2811_v49, 6  ;;  %v2892_v60 = vrot.slane %v2882_v44, 6  ;;  %v2899_v58 = vadd.f32 %v2891_v51, %v2741_v56 }
0x119b   :  { %v7438_v42 = vmul.f32 -1.442695, %v2897_v50  ;;  %v2898_v16 = vadd.f32 %v2890_v17, %v2740_v54  ;;  %v2900_v20 = vadd.f32 %v2892_v60, %v2742_v13 }
0x119d   :  { %7824 = vpow2.f32 %v7438_v42  ;;  %v7439_v43 = vmul.f32 -1.442695, %v2898_v16  ;;  %v7440_v21 = vmul.f32 -1.442695, %v2900_v20 }
0x119f   :  { %7826 = vpow2.f32 %v7439_v43  ;;  %v2921_v43 = vrot.slane %v9782_v59, 6 }
0x11a0   :  { %7828 = vpow2.f32 %v7440_v21 }
0x11aa   :  { %v7825_v18 = vpop.eup %7824 }
0x11ab   :  { %v2904_v41 = vadd.f32 1.0, %v7825_v18 }
0x11ac   :  { %v7827_v40 = vpop.eup %7826 }
0x11ad   :  { %7830 = vrcp.f32 %v2904_v41  ;;  %v2910_v45 = vadd.f32 1.0, %v7827_v40  ;;  %v7829_v17 = vpop.eup %7828 }
0x11ae   :  { %7832 = vtanh.f32 %v2899_v58  ;;  %v2917_v55 = vadd.f32 1.0, %v7829_v17 }
0x11af   :  { %7834 = vrcp.f32 %v2910_v45 }
0x11b0   :  { %7836 = vrcp.f32 %v2917_v55 }
0x11ba   :  { %v7831_v42 = vpop.eup %7830 }
0x11bb   :  { %v7833_v50 = vpop.eup %7832 }
0x11bc   :  { %v7835_v44 = vpop.eup %7834  ;;  %v2924_v49 = vmul.f32 %v7833_v50, %v7831_v42 }
0x11bd   :  { %v2923_v15 = vmul.f32 %v7835_v44, %v2921_v43  ;;  %v7837_v18 = vpop.eup %7836 }
0x11bf   :  { %v9852_v20 = vadd.f32 %v2924_v49, %v2923_v15 }
0x11c1   :  { %7838 = vtanh.f32 %v9852_v20  ;;  %v3114_v58 = vrot.slane %v9852_v20, 6  ;;  %v3371_v20 = vld [vmem:[#allocation24 + $0x1c0] sm:$0xff] }
0x11ce   :  { %v7839_v21 = vpop.eup %7838 }
0x11cf   :  { %v2927_v41 = vmul.f32 %v7839_v21, %v7837_v18  ;;  %v3375_v18 = vld [vmem:[#allocation24 + $0x1e0] sm:$0xff]  ;;  %v3377_v21 = vld [vmem:[#allocation24 + $0x1f0] sm:$0xff] }
0x11d1   :  { %2928 = vst [vmem:[#allocation3 + $0x8] sm:$0xc] %v2927_v41  ;;  %v2934_v40 = vrot.slane %v2927_v41, 2  ;;  %v3372_v41 = vld [vmem:[#allocation24 + $0x1c8] sm:$0xff] }
0x11d3   :  { %3001 = vmatmul.mubr.f32.vlgmr.msra.gmra.mxu0 %v2934_v40  ;;  %3072 = vmatmul.mubr.f32.vlgmr.msra.gmra.mxu1 %v2934_v40  ;;  %v3374_v40 = vld [vmem:[#allocation24 + $0x1d8] sm:$0xff] }
0x11d4   :  { %3130 = vmatpush1.msra.mxu0 %v9591_v3  ;;  %3201 = vmatpush1.msra.mxu1 %v9594_v46  ;;  %v12058_v3 = vld [vmem:[#allocation44_spill] sm:$0xff]  ;;  %v12059_v46 = vld [vmem:[#allocation45_spill] sm:$0xff] }
0x11d5   :  { %3131 = vmatprep.subr.mxu0 %v9597_v48  ;;  %3202 = vmatprep.subr.mxu1 %v9600_v57  ;;  %v12060_v48 = vld [vmem:[#allocation46_spill] sm:$0xff]  ;;  %v12061_v57 = vld [vmem:[#allocation47_spill] sm:$0xff] }
0x11d6   :  { %3132 = vmatpush1.msra.mxu0 %v9603_v47  ;;  %3203 = vmatpush1.msra.mxu1 %v9606_v61  ;;  %v12062_v47 = vld [vmem:[#allocation48_spill] sm:$0xff]  ;;  %v12063_v61 = vld [vmem:[#allocation49_spill] sm:$0xff] }
0x11d7   :  { %3133 = vmatprep.subr.mxu0 %v9609_v62  ;;  %3204 = vmatprep.subr.mxu1 %v9612_v63  ;;  %v12064_v62 = vld [vmem:[#allocation50_spill] sm:$0xff]  ;;  %v12065_v63 = vld [vmem:[#allocation51_spill] sm:$0xff] }
0x11d8   :  { %3134 = vmatpush1.msra.mxu0 %v9615_v26  ;;  %3205 = vmatpush1.msra.mxu1 %v9618_v0  ;;  %v12066_v26 = vld [vmem:[#allocation52_spill] sm:$0xff]  ;;  %v12067_v0 = vld [vmem:[#allocation53_spill] sm:$0xff] }
0x11d9   :  { %3135 = vmatprep.subr.mxu0 %v9621_v25  ;;  %3206 = vmatprep.subr.mxu1 %v9624_v1  ;;  %v12068_v25 = vld [vmem:[#allocation54_spill] sm:$0xff]  ;;  %v12069_v1 = vld [vmem:[#allocation55_spill] sm:$0xff] }
0x11da   :  { %3136 = vmatpush1.msra.mxu0 %v9627_v2  ;;  %3207 = vmatpush1.msra.mxu1 %v9630_v4  ;;  %v12070_v2 = vld [vmem:[#allocation56_spill] sm:$0xff]  ;;  %v12071_v4 = vld [vmem:[#allocation57_spill] sm:$0xff] }
0x11db   :  { %3137 = vmatprep.subr.mxu0 %v9633_v5  ;;  %3208 = vmatprep.subr.mxu1 %v9636_v23  ;;  %v12072_v5 = vld [vmem:[#allocation58_spill] sm:$0xff]  ;;  %v12073_v23 = vld [vmem:[#allocation59_spill] sm:$0xff] }
0x11dc   :  { %3138 = vmatpush1.msra.mxu0 %v9639_v6  ;;  %3209 = vmatpush1.msra.mxu1 %v9642_v7  ;;  %v12074_v6 = vld [vmem:[#allocation60_spill] sm:$0xff]  ;;  %v12075_v7 = vld [vmem:[#allocation61_spill] sm:$0xff] }
0x11dd   :  { %3139 = vmatprep.subr.mxu0 %v9645_v8  ;;  %3210 = vmatprep.subr.mxu1 %v9648_v9  ;;  %v12076_v8 = vld [vmem:[#allocation62_spill] sm:$0xff]  ;;  %v12077_v9 = vld [vmem:[#allocation63_spill] sm:$0xff] }
0x11de   :  { %3140 = vmatpush1.msra.mxu0 %v9651_v10  ;;  %3211 = vmatpush1.msra.mxu1 %v9654_v11  ;;  %v12078_v10 = vmov 0.0   ;;  %v3376_v11 = vld [vmem:[#allocation24 + $0x1e8] sm:$0xff] }
0x11df   :  { %3141 = vmatprep.subr.mxu0 %v9657_v12  ;;  %3212 = vmatprep.subr.mxu1 %v9660_v14  ;;  %v3378_v12 = vld [vmem:[#allocation24 + $0x1f8] sm:$0xff] }
0x11e0   :  { %3142 = vmatpush1.msra.mxu0 %v9663_v19  ;;  %3213 = vmatpush1.msra.mxu1 %v9666_v22  ;;  %v2929_v22 = vld [vmem:[#allocation2 + $0x8] sm:$0x30] }
0x11e1   :  { %3143 = vmatprep.subr.mxu0 %v9669_v24  ;;  %3214 = vmatprep.subr.mxu1 %v9672_v27 }
0x11e2   :  { %3144 = vmatpush1.msra.mxu0 %v9675_v52  ;;  %3215 = vmatpush1.msra.mxu1 %v9678_v28 }
0x11e3   :  { %3145 = vmatprep.subr.mxu0 %v9681_v29  ;;  %3216 = vmatprep.subr.mxu1 %v9684_v53  ;;  %v2930_v29 = vld [vmem:[#allocation2 + $0x20] sm:$0x30] }
0x11e4   :  { %3146 = vmatpush1.msra.mxu0 %v9687_v30  ;;  %3217 = vmatpush1.msra.mxu1 %v9690_v31 }
0x11e5   :  { %3147 = vmatprep.subr.mxu0 %v9693_v32  ;;  %3218 = vmatprep.subr.mxu1 %v9696_v33 }
0x11e6   :  { %3148 = vmatpush1.msra.mxu0 %v9699_v34  ;;  %3219 = vmatpush1.msra.mxu1 %v9702_v35  ;;  %v2932_v34 = vld [vmem:[#allocation2 + $0x38] sm:$0x30] }
0x11e7   :  { %3149 = vmatprep.subr.mxu0 %v9705_v36  ;;  %3220 = vmatprep.subr.mxu1 %v9708_v37 }
0x11e8   :  { %3150 = vmatpush1.msra.mxu0 %v9711_v38  ;;  %3221 = vmatpush1.msra.mxu1 %v9714_v39  ;;  %v2931_v38 = vld [vmem:[#allocation2 + $0x28] sm:$0x30] }
0x11e9   :  { %3151 = vmatprep.subr.mxu0 %v12058_v3  ;;  %3222 = vmatprep.subr.mxu1 %v12059_v46  ;;  %v3373_v3 = vld [vmem:[#allocation24 + $0x1d0] sm:$0xff]  ;;  %v3368_v46 = vld [vmem:[#allocation24 + $0x1a8] sm:$0xff] }
0x11ea   :  { %3152 = vmatpush1.msra.mxu0 %v12060_v48  ;;  %3223 = vmatpush1.msra.mxu1 %v12061_v57  ;;  %v3370_v48 = vld [vmem:[#allocation24 + $0x1b8] sm:$0xff]  ;;  %v3367_v57 = vld [vmem:[#allocation24 + $0x1a0] sm:$0xff] }
0x11eb   :  { %3153 = vmatprep.subr.mxu0 %v12062_v47  ;;  %3224 = vmatprep.subr.mxu1 %v12063_v61  ;;  %v3369_v47 = vld [vmem:[#allocation24 + $0x1b0] sm:$0xff]  ;;  %v3364_v61 = vld [vmem:[#allocation24 + $0x188] sm:$0xff] }
0x11ec   :  { %3154 = vmatpush1.msra.mxu0 %v12064_v62  ;;  %3225 = vmatpush1.msra.mxu1 %v12065_v63  ;;  %v3366_v62 = vld [vmem:[#allocation24 + $0x198] sm:$0xff]  ;;  %v3363_v63 = vld [vmem:[#allocation24 + $0x180] sm:$0xff] }
0x11ed   :  { %3155 = vmatprep.subr.mxu0 %v12066_v26  ;;  %3226 = vmatprep.subr.mxu1 %v12067_v0  ;;  %v3365_v26 = vld [vmem:[#allocation24 + $0x190] sm:$0xff]  ;;  %v3360_v0 = vld [vmem:[#allocation24 + $0x168] sm:$0xff] }
0x11ee   :  { %3156 = vmatpush1.msra.mxu0 %v12068_v25  ;;  %3227 = vmatpush1.msra.mxu1 %v12069_v1  ;;  %v3362_v25 = vld [vmem:[#allocation24 + $0x178] sm:$0xff]  ;;  %v3359_v1 = vld [vmem:[#allocation24 + $0x160] sm:$0xff] }
0x11ef   :  { %3157 = vmatprep.subr.mxu0 %v12070_v2  ;;  %3228 = vmatprep.subr.mxu1 %v12071_v4  ;;  %v3361_v2 = vld [vmem:[#allocation24 + $0x170] sm:$0xff]  ;;  %v3356_v4 = vld [vmem:[#allocation24 + $0x148] sm:$0xff] }
0x11f0   :  { %3158 = vmatpush1.msra.mxu0 %v12072_v5  ;;  %3229 = vmatpush1.msra.mxu1 %v12073_v23  ;;  %v3358_v5 = vld [vmem:[#allocation24 + $0x158] sm:$0xff]  ;;  %v3355_v23 = vld [vmem:[#allocation24 + $0x140] sm:$0xff] }
0x11f1   :  { %3159 = vmatprep.subr.mxu0 %v12074_v6  ;;  %3230 = vmatprep.subr.mxu1 %v12075_v7  ;;  %v3357_v6 = vld [vmem:[#allocation24 + $0x150] sm:$0xff]  ;;  %v3352_v7 = vld [vmem:[#allocation24 + $0x128] sm:$0xff] }
0x11f2   :  { %3160 = vmatpush1.msra.mxu0 %v12076_v8  ;;  %3231 = vmatpush1.msra.mxu1 %v12077_v9  ;;  %v3354_v8 = vld [vmem:[#allocation24 + $0x138] sm:$0xff]  ;;  %v3351_v9 = vld [vmem:[#allocation24 + $0x120] sm:$0xff] }
0x11f3   :  { %3193 = vmatprep.mubr.f32.mxu0 %v12078_v10  ;;  %3264 = vmatprep.mubr.f32.mxu1 %v12078_v10 }
0x11f4   :  { %3401 = vmatprep.subr.mxu0 %v3376_v11  ;;  %3478 = vmatprep.subr.mxu1 %v3378_v12  ;;  %v3353_v11 = vld [vmem:[#allocation24 + $0x130] sm:$0xff]  ;;  %v3348_v12 = vld [vmem:[#allocation24 + $0x108] sm:$0xff] }
0x1293   :  { %v3002_v14 = vpop.f32.mrf.mxu0  ;;  %v3073_v52 = vpop.f32.mrf.mxu1 }
0x1294   :  { %v3082_v19 = vrot.slane %v3002_v14, 4  ;;  %v3084_v36 = vrot.slane %v3073_v52, 4  ;;  %v3350_v14 = vld [vmem:[#allocation24 + $0x118] sm:$0xff]  ;;  %v3343_v52 = vld [vmem:[#allocation24 + $0xe0] sm:$0xff] }
0x1295   :  { %v3004_v24 = vpop.f32.mrf.mxu0  ;;  %v3075_v32 = vpop.f32.mrf.mxu1 }
0x1296   :  { %v3090_v27 = vadd.f32 %v3082_v19, %v2929_v22  ;;  %v3083_v28 = vrot.slane %v3004_v24, 4  ;;  %v3085_v33 = vrot.slane %v3075_v32, 4  ;;  %v3092_v59 = vadd.f32 %v3084_v36, %v2931_v38  ;;  %v3347_v19 = vld [vmem:[#allocation24 + $0x100] sm:$0xff]  ;;  %v3349_v22 = vld [vmem:[#allocation24 + $0x110] sm:$0xff]  ;;  %v3344_v24 = vld [vmem:[#allocation24 + $0xe8] sm:$0xff] }
0x1297   :  { %v3336_v32 = vld [vmem:[#allocation24 + $0xa8] sm:$0xff]  ;;  %v3331_v38 = vld [vmem:[#allocation24 + $0x80] sm:$0xff] }
0x1298   :  { %v7441_v53 = vmul.f32 -1.442695, %v3090_v27  ;;  %v3091_v30 = vadd.f32 %v3083_v28, %v2930_v29  ;;  %v3093_v35 = vadd.f32 %v3085_v33, %v2932_v34  ;;  %v3346_v27 = vld [vmem:[#allocation24 + $0xf8] sm:$0xff]  ;;  %v3345_v28 = vld [vmem:[#allocation24 + $0xf0] sm:$0xff]  ;;  %v3340_v29 = vld [vmem:[#allocation24 + $0xc8] sm:$0xff] }
0x1299   :  { %v3338_v33 = vld [vmem:[#allocation24 + $0xb8] sm:$0xff]  ;;  %v3335_v34 = vld [vmem:[#allocation24 + $0xa0] sm:$0xff]  ;;  %v3332_v36 = vld [vmem:[#allocation24 + $0x88] sm:$0xff] }
0x129a   :  { %7840 = vpow2.f32 %v7441_v53  ;;  %v7442_v31 = vmul.f32 -1.442695, %v3091_v30  ;;  %v7443_v37 = vmul.f32 -1.442695, %v3093_v35  ;;  %v3342_v53 = vld [vmem:[#allocation24 + $0xd8] sm:$0xff]  ;;  %v3339_v30 = vld [vmem:[#allocation24 + $0xc0] sm:$0xff] }
0x129b   :  { %v3337_v35 = vld [vmem:[#allocation24 + $0xb0] sm:$0xff] }
0x129c   :  { %7842 = vpow2.f32 %v7442_v31  ;;  %v3341_v31 = vld [vmem:[#allocation24 + $0xd0] sm:$0xff] }
0x129d   :  { %7844 = vpow2.f32 %v7443_v37  ;;  %v3334_v37 = vld [vmem:[#allocation24 + $0x98] sm:$0xff] }
0x12a7   :  { %v7841_v39 = vpop.eup %7840 }
0x12a8   :  { %v3097_v54 = vadd.f32 1.0, %v7841_v39  ;;  %v3333_v39 = vld [vmem:[#allocation24 + $0x90] sm:$0xff] }
0x12a9   :  { %v7843_v16 = vpop.eup %7842 }
0x12aa   :  { %7846 = vrcp.f32 %v3097_v54  ;;  %v3103_v13 = vadd.f32 1.0, %v7843_v16  ;;  %v7845_v60 = vpop.eup %7844  ;;  %v3330_v54 = vld [vmem:[#allocation24 + $0x78] sm:$0xff]  ;;  %v3327_v16 = vld [vmem:[#allocation24 + $0x60] sm:$0xff] }
0x12ab   :  { %7848 = vtanh.f32 %v3092_v59  ;;  %v3110_v17 = vadd.f32 1.0, %v7845_v60  ;;  %v3328_v59 = vld [vmem:[#allocation24 + $0x68] sm:$0xff] }
0x12ac   :  { %7850 = vrcp.f32 %v3103_v13  ;;  %v3329_v13 = vld [vmem:[#allocation24 + $0x70] sm:$0xff]  ;;  %v3324_v60 = vld [vmem:[#allocation24 + $0x48] sm:$0xff] }
0x12ad   :  { %7852 = vrcp.f32 %v3110_v17  ;;  %v3322_v17 = vld [vmem:[#allocation24 + $0x38] sm:$0xff] }
0x12b7   :  { %v7847_v51 = vpop.eup %7846 }
0x12b8   :  { %v7849_v56 = vpop.eup %7848 }
0x12b9   :  { %v7851_v45 = vpop.eup %7850  ;;  %v3117_v42 = vmul.f32 %v7849_v56, %v7847_v51  ;;  %v3326_v51 = vld [vmem:[#allocation24 + $0x58] sm:$0xff]  ;;  %v3323_v56 = vld [vmem:[#allocation24 + $0x40] sm:$0xff] }
0x12ba   :  { %v3116_v50 = vmul.f32 %v7851_v45, %v3114_v58  ;;  %v7853_v44 = vpop.eup %7852  ;;  %v3325_v58 = vld [vmem:[#allocation24 + $0x50] sm:$0xff]  ;;  %v3320_v45 = vld [vmem:[#allocation24 + $0x28] sm:$0xff] }
0x12bc   :  { %v9920_v43 = vadd.f32 %v3117_v42, %v3116_v50  ;;  %v3319_v42 = vld [vmem:[#allocation24 + $0x20] sm:$0xff]  ;;  %v3321_v50 = vld [vmem:[#allocation24 + $0x30] sm:$0xff] }
0x12be   :  { %12079 = vst [vmem:[#allocation40_spill] sm:$0xff] %v9920_v43  ;;  %7854 = vtanh.f32 %v9920_v43  ;;  %v10113_v43 = vld [vmem:[#allocation25] sm:$0xff] }
0x12bf   :  { %12106 = vst [vmem:[#allocation69_spill] sm:$0xff] %v10113_v43 }
0x12cb   :  { %v7855_v55 = vpop.eup %7854 }
0x12cc   :  { %v3120_v49 = vmul.f32 %v7855_v55, %v7853_v44  ;;  %v3316_v44 = vld [vmem:[#allocation24 + $0x8] sm:$0xff]  ;;  %v3318_v55 = vld [vmem:[#allocation24 + $0x18] sm:$0xff] }
0x12ce   :  { %3121 = vst [vmem:[#allocation3 + $0x8] sm:$0x30] %v3120_v49  ;;  %v3127_v15 = vrot.slane %v3120_v49, 4  ;;  %v3315_v49 = vld [vmem:[#allocation24] sm:$0xff] }
0x12d0   :  { %3194 = vmatmul.mubr.f32.vlgmr.msra.gmra.mxu0 %v3127_v15  ;;  %3265 = vmatmul.mubr.f32.vlgmr.msra.gmra.mxu1 %v3127_v15  ;;  %v3317_v15 = vld [vmem:[#allocation24 + $0x10] sm:$0xff] }
0x12d1   :  { %3402 = vmatpush1.msra.mxu0 %v3375_v18  ;;  %3479 = vmatpush1.msra.mxu1 %v3377_v21  ;;  %v9924_v18 = vld [vmem:[#allocation25 + $0x1e8] sm:$0xff]  ;;  %v9926_v21 = vld [vmem:[#allocation25 + $0x1f8] sm:$0xff] }
0x12d2   :  { %3403 = vmatprep.subr.mxu0 %v3372_v41  ;;  %3480 = vmatprep.subr.mxu1 %v3374_v40  ;;  %12080 = vst [vmem:[#allocation41_spill] sm:$0xff] %v9924_v18  ;;  %12081 = vst [vmem:[#allocation44_spill] sm:$0xff] %v9926_v21  ;;  %v9929_v41 = vld [vmem:[#allocation25 + $0x1e0] sm:$0xff]  ;;  %v9931_v40 = vld [vmem:[#allocation25 + $0x1f0] sm:$0xff] }
0x12d3   :  { %3404 = vmatpush1.msra.mxu0 %v3371_v20  ;;  %3481 = vmatpush1.msra.mxu1 %v3373_v3  ;;  %v12082_v20 = vld [vmem:[#allocation42_spill] sm:$0xff]  ;;  %v9935_v3 = vld [vmem:[#allocation25 + $0x1c8] sm:$0xff] }
0x12d4   :  { %3405 = vmatprep.subr.mxu0 %v3368_v46  ;;  %3482 = vmatprep.subr.mxu1 %v3370_v48  ;;  %v9937_v46 = vld [vmem:[#allocation25 + $0x1d8] sm:$0xff]  ;;  %v9943_v48 = vld [vmem:[#allocation25 + $0x1c0] sm:$0xff] }
0x12d5   :  { %3406 = vmatpush1.msra.mxu0 %v3367_v57  ;;  %3483 = vmatpush1.msra.mxu1 %v3369_v47  ;;  %v9945_v57 = vld [vmem:[#allocation25 + $0x1d0] sm:$0xff]  ;;  %v9951_v47 = vld [vmem:[#allocation25 + $0x1a8] sm:$0xff] }
0x12d6   :  { %3407 = vmatprep.subr.mxu0 %v3364_v61  ;;  %3484 = vmatprep.subr.mxu1 %v3366_v62  ;;  %v9953_v61 = vld [vmem:[#allocation25 + $0x1b8] sm:$0xff]  ;;  %v9957_v62 = vld [vmem:[#allocation25 + $0x1a0] sm:$0xff] }
0x12d7   :  { %3408 = vmatpush1.msra.mxu0 %v3363_v63  ;;  %3485 = vmatpush1.msra.mxu1 %v3365_v26  ;;  %v9959_v63 = vld [vmem:[#allocation25 + $0x1b0] sm:$0xff]  ;;  %v12083_v26 = vld [vmem:[#allocation43_spill] sm:$0xff] }
0x12d8   :  { %3409 = vmatprep.subr.mxu0 %v3360_v0  ;;  %3486 = vmatprep.subr.mxu1 %v3362_v25  ;;  %v9963_v0 = vld [vmem:[#allocation25 + $0x188] sm:$0xff]  ;;  %v9965_v25 = vld [vmem:[#allocation25 + $0x198] sm:$0xff] }
0x12d9   :  { %3410 = vmatpush1.msra.mxu0 %v3359_v1  ;;  %3487 = vmatpush1.msra.mxu1 %v3361_v2  ;;  %v9969_v1 = vld [vmem:[#allocation25 + $0x180] sm:$0xff]  ;;  %v9971_v2 = vld [vmem:[#allocation25 + $0x190] sm:$0xff] }
0x12da   :  { %3411 = vmatprep.subr.mxu0 %v3356_v4  ;;  %3488 = vmatprep.subr.mxu1 %v3358_v5  ;;  %v9975_v4 = vld [vmem:[#allocation25 + $0x168] sm:$0xff]  ;;  %v9977_v5 = vld [vmem:[#allocation25 + $0x178] sm:$0xff] }
0x12db   :  { %3412 = vmatpush1.msra.mxu0 %v3355_v23  ;;  %3489 = vmatpush1.msra.mxu1 %v3357_v6  ;;  %v9981_v23 = vld [vmem:[#allocation25 + $0x160] sm:$0xff]  ;;  %v9983_v6 = vld [vmem:[#allocation25 + $0x170] sm:$0xff] }
0x12dc   :  { %3413 = vmatprep.subr.mxu0 %v3352_v7  ;;  %3490 = vmatprep.subr.mxu1 %v3354_v8  ;;  %v9987_v7 = vld [vmem:[#allocation25 + $0x148] sm:$0xff]  ;;  %v9989_v8 = vld [vmem:[#allocation25 + $0x158] sm:$0xff] }
0x12dd   :  { %3414 = vmatpush1.msra.mxu0 %v3351_v9  ;;  %3491 = vmatpush1.msra.mxu1 %v3353_v11  ;;  %v9993_v9 = vld [vmem:[#allocation25 + $0x140] sm:$0xff]  ;;  %v9995_v11 = vld [vmem:[#allocation25 + $0x150] sm:$0xff] }
0x12de   :  { %3415 = vmatprep.subr.mxu0 %v3348_v12  ;;  %3492 = vmatprep.subr.mxu1 %v3350_v14  ;;  %v9999_v12 = vld [vmem:[#allocation25 + $0x128] sm:$0xff]  ;;  %v10001_v14 = vld [vmem:[#allocation25 + $0x138] sm:$0xff] }
0x12df   :  { %3416 = vmatpush1.msra.mxu0 %v3347_v19  ;;  %3493 = vmatpush1.msra.mxu1 %v3349_v22  ;;  %v10005_v19 = vld [vmem:[#allocation25 + $0x120] sm:$0xff]  ;;  %v10007_v22 = vld [vmem:[#allocation25 + $0x130] sm:$0xff] }
0x12e0   :  { %3417 = vmatprep.subr.mxu0 %v3344_v24  ;;  %3494 = vmatprep.subr.mxu1 %v3346_v27  ;;  %v10011_v24 = vld [vmem:[#allocation25 + $0x108] sm:$0xff]  ;;  %v10013_v27 = vld [vmem:[#allocation25 + $0x118] sm:$0xff] }
0x12e1   :  { %3418 = vmatpush1.msra.mxu0 %v3343_v52  ;;  %3495 = vmatpush1.msra.mxu1 %v3345_v28  ;;  %v10017_v52 = vld [vmem:[#allocation25 + $0x100] sm:$0xff]  ;;  %v10019_v28 = vld [vmem:[#allocation25 + $0x110] sm:$0xff] }
0x12e2   :  { %3419 = vmatprep.subr.mxu0 %v3340_v29  ;;  %3496 = vmatprep.subr.mxu1 %v3342_v53  ;;  %v10023_v29 = vld [vmem:[#allocation25 + $0xe8] sm:$0xff]  ;;  %v10025_v53 = vld [vmem:[#allocation25 + $0xf8] sm:$0xff] }
0x12e3   :  { %3420 = vmatpush1.msra.mxu0 %v3339_v30  ;;  %3497 = vmatpush1.msra.mxu1 %v3341_v31  ;;  %v10029_v30 = vld [vmem:[#allocation25 + $0xe0] sm:$0xff]  ;;  %v10031_v31 = vld [vmem:[#allocation25 + $0xf0] sm:$0xff] }
0x12e4   :  { %3421 = vmatprep.subr.mxu0 %v3336_v32  ;;  %3498 = vmatprep.subr.mxu1 %v3338_v33  ;;  %v10035_v32 = vld [vmem:[#allocation25 + $0xc8] sm:$0xff]  ;;  %v10037_v33 = vld [vmem:[#allocation25 + $0xd8] sm:$0xff] }
0x12e5   :  { %3422 = vmatpush1.msra.mxu0 %v3335_v34  ;;  %3499 = vmatpush1.msra.mxu1 %v3337_v35  ;;  %v10041_v34 = vld [vmem:[#allocation25 + $0xc0] sm:$0xff]  ;;  %v10043_v35 = vld [vmem:[#allocation25 + $0xd0] sm:$0xff] }
0x12e6   :  { %3423 = vmatprep.subr.mxu0 %v3332_v36  ;;  %3500 = vmatprep.subr.mxu1 %v3334_v37  ;;  %v10047_v36 = vld [vmem:[#allocation25 + $0xa8] sm:$0xff]  ;;  %v10049_v37 = vld [vmem:[#allocation25 + $0xb8] sm:$0xff] }
0x12e7   :  { %3424 = vmatpush1.msra.mxu0 %v3331_v38  ;;  %3501 = vmatpush1.msra.mxu1 %v3333_v39  ;;  %12084 = vst [vmem:[#allocation45_spill] sm:$0xff] %v10047_v36  ;;  %12085 = vst [vmem:[#allocation46_spill] sm:$0xff] %v10049_v37  ;;  %v10053_v38 = vld [vmem:[#allocation25 + $0xa0] sm:$0xff]  ;;  %v10055_v39 = vld [vmem:[#allocation25 + $0xb0] sm:$0xff] }
0x12e8   :  { %3425 = vmatprep.subr.mxu0 %v3328_v59  ;;  %3502 = vmatprep.subr.mxu1 %v3330_v54  ;;  %12086 = vst [vmem:[#allocation47_spill] sm:$0xff] %v10053_v38  ;;  %12087 = vst [vmem:[#allocation48_spill] sm:$0xff] %v10055_v39  ;;  %v10059_v59 = vld [vmem:[#allocation25 + $0x88] sm:$0xff]  ;;  %v10061_v54 = vld [vmem:[#allocation25 + $0x98] sm:$0xff] }
0x12e9   :  { %3426 = vmatpush1.msra.mxu0 %v3327_v16  ;;  %3503 = vmatpush1.msra.mxu1 %v3329_v13  ;;  %12088 = vst [vmem:[#allocation49_spill] sm:$0xff] %v10059_v59  ;;  %12089 = vst [vmem:[#allocation50_spill] sm:$0xff] %v10061_v54  ;;  %v10065_v16 = vld [vmem:[#allocation25 + $0x80] sm:$0xff]  ;;  %v10067_v13 = vld [vmem:[#allocation25 + $0x90] sm:$0xff] }
0x12ea   :  { %3427 = vmatprep.subr.mxu0 %v3324_v60  ;;  %3504 = vmatprep.subr.mxu1 %v3326_v51  ;;  %12090 = vst [vmem:[#allocation51_spill] sm:$0xff] %v10065_v16  ;;  %12091 = vst [vmem:[#allocation52_spill] sm:$0xff] %v10067_v13  ;;  %v10071_v60 = vld [vmem:[#allocation25 + $0x68] sm:$0xff]  ;;  %v10073_v51 = vld [vmem:[#allocation25 + $0x78] sm:$0xff] }
0x12eb   :  { %3428 = vmatpush1.msra.mxu0 %v3323_v56  ;;  %3505 = vmatpush1.msra.mxu1 %v3325_v58  ;;  %12092 = vst [vmem:[#allocation53_spill] sm:$0xff] %v10071_v60  ;;  %12093 = vst [vmem:[#allocation54_spill] sm:$0xff] %v10073_v51  ;;  %v10077_v56 = vld [vmem:[#allocation25 + $0x60] sm:$0xff]  ;;  %v10079_v58 = vld [vmem:[#allocation25 + $0x70] sm:$0xff] }
0x12ec   :  { %3429 = vmatprep.subr.mxu0 %v3320_v45  ;;  %3506 = vmatprep.subr.mxu1 %v3322_v17  ;;  %12094 = vst [vmem:[#allocation55_spill] sm:$0xff] %v10077_v56  ;;  %12095 = vst [vmem:[#allocation56_spill] sm:$0xff] %v10079_v58  ;;  %v10083_v45 = vld [vmem:[#allocation25 + $0x48] sm:$0xff]  ;;  %v10085_v17 = vld [vmem:[#allocation25 + $0x58] sm:$0xff] }
0x12ed   :  { %3430 = vmatpush1.msra.mxu0 %v3319_v42  ;;  %3507 = vmatpush1.msra.mxu1 %v3321_v50  ;;  %12096 = vst [vmem:[#allocation57_spill] sm:$0xff] %v10083_v45  ;;  %12097 = vst [vmem:[#allocation58_spill] sm:$0xff] %v10085_v17  ;;  %v10089_v42 = vld [vmem:[#allocation25 + $0x40] sm:$0xff]  ;;  %v10091_v50 = vld [vmem:[#allocation25 + $0x50] sm:$0xff] }
0x12ee   :  { %3431 = vmatprep.subr.mxu0 %v3316_v44  ;;  %3508 = vmatprep.subr.mxu1 %v3318_v55  ;;  %12098 = vst [vmem:[#allocation59_spill] sm:$0xff] %v10089_v42  ;;  %12099 = vst [vmem:[#allocation60_spill] sm:$0xff] %v10091_v50  ;;  %v10095_v44 = vld [vmem:[#allocation25 + $0x28] sm:$0xff]  ;;  %v10097_v55 = vld [vmem:[#allocation25 + $0x38] sm:$0xff] }
0x12ef   :  { %3432 = vmatpush1.msra.mxu0 %v3315_v49  ;;  %3465 = vmatprep.mubr.f32.mxu0 %v12078_v10  ;;  %12100 = vst [vmem:[#allocation61_spill] sm:$0xff] %v10095_v44  ;;  %12101 = vst [vmem:[#allocation62_spill] sm:$0xff] %v10097_v55  ;;  %v10101_v49 = vld [vmem:[#allocation25 + $0x20] sm:$0xff] }
0x12f0   :  { %3509 = vmatpush1.msra.mxu1 %v3317_v15  ;;  %3542 = vmatprep.mubr.f32.mxu1 %v12078_v10  ;;  %12102 = vst [vmem:[#allocation63_spill] sm:$0xff] %v10101_v49  ;;  %v10103_v15 = vld [vmem:[#allocation25 + $0x30] sm:$0xff] }
0x12f1   :  { %3466 = vmatmul.mubr.f32.vlgmr.msra.gmra.mxu0 %v12082_v20  ;;  %3543 = vmatmul.mubr.f32.vlgmr.msra.gmra.mxu1 %v12082_v20  ;;  %12103 = vst [vmem:[#allocation42_spill] sm:$0xff] %v10103_v15  ;;  %v10107_v20 = vld [vmem:[#allocation25 + $0x8] sm:$0xff] }
0x12f2   :  { %3631 = vmatprep.subr.mxu0 %v9924_v18  ;;  %3702 = vmatprep.subr.mxu1 %v9926_v21  ;;  %12104 = vst [vmem:[#allocation43_spill] sm:$0xff] %v10107_v20 }
0x12f3   :  { %3632 = vmatpush1.msra.mxu0 %v9929_v41  ;;  %3703 = vmatpush1.msra.mxu1 %v9931_v40 }
0x12f4   :  { %3633 = vmatprep.subr.mxu0 %v9935_v3  ;;  %3704 = vmatprep.subr.mxu1 %v9937_v46 }
0x12f5   :  { %3471 = vmatprep.mubr.f32.mxu0 %v12078_v10  ;;  %3548 = vmatprep.mubr.f32.mxu1 %v12078_v10 }
0x12f6   :  { %3634 = vmatpush1.msra.mxu0 %v9943_v48  ;;  %3705 = vmatpush1.msra.mxu1 %v9945_v57 }
0x12f7   :  { %3472 = vmatmul.mubr.f32.gmra.mxu0 %v12083_v26  ;;  %3549 = vmatmul.mubr.f32.gmra.mxu1 %v12083_v26  ;;  %v10109_v26 = vld [vmem:[#allocation25 + $0x18] sm:$0xff] }
0x12f8   :  { %3635 = vmatprep.subr.mxu0 %v9951_v47  ;;  %3706 = vmatprep.subr.mxu1 %v9953_v61  ;;  %12105 = vst [vmem:[#allocation68_spill] sm:$0xff] %v10109_v26 }
0x12f9   :  { %3636 = vmatpush1.msra.mxu0 %v9957_v62  ;;  %3707 = vmatpush1.msra.mxu1 %v9959_v63 }
0x12fa   :  { %3637 = vmatprep.subr.mxu0 %v9963_v0  ;;  %3708 = vmatprep.subr.mxu1 %v9965_v25 }
0x12fb   :  { %3638 = vmatpush1.msra.mxu0 %v9969_v1  ;;  %3709 = vmatpush1.msra.mxu1 %v9971_v2 }
0x12fc   :  { %3639 = vmatprep.subr.mxu0 %v9975_v4  ;;  %3710 = vmatprep.subr.mxu1 %v9977_v5 }
0x12fd   :  { %3640 = vmatpush1.msra.mxu0 %v9981_v23  ;;  %3711 = vmatpush1.msra.mxu1 %v9983_v6 }
0x12fe   :  { %3641 = vmatprep.subr.mxu0 %v9987_v7  ;;  %3712 = vmatprep.subr.mxu1 %v9989_v8 }
0x12ff   :  { %3642 = vmatpush1.msra.mxu0 %v9993_v9  ;;  %3713 = vmatpush1.msra.mxu1 %v9995_v11 }
0x1300   :  { %3643 = vmatprep.subr.mxu0 %v9999_v12  ;;  %3714 = vmatprep.subr.mxu1 %v10001_v14 }
0x1301   :  { %3644 = vmatpush1.msra.mxu0 %v10005_v19  ;;  %3715 = vmatpush1.msra.mxu1 %v10007_v22 }
0x1302   :  { %3645 = vmatprep.subr.mxu0 %v10011_v24  ;;  %3716 = vmatprep.subr.mxu1 %v10013_v27 }
0x1303   :  { %3646 = vmatpush1.msra.mxu0 %v10017_v52  ;;  %3717 = vmatpush1.msra.mxu1 %v10019_v28 }
0x1304   :  { %3647 = vmatprep.subr.mxu0 %v10023_v29  ;;  %3718 = vmatprep.subr.mxu1 %v10025_v53 }
0x1305   :  { %3648 = vmatpush1.msra.mxu0 %v10029_v30  ;;  %3719 = vmatpush1.msra.mxu1 %v10031_v31 }
0x1306   :  { %3649 = vmatprep.subr.mxu0 %v10035_v32  ;;  %3720 = vmatprep.subr.mxu1 %v10037_v33 }
0x1307   :  { %3650 = vmatpush1.msra.mxu0 %v10041_v34  ;;  %3721 = vmatpush1.msra.mxu1 %v10043_v35 }
0x1308   :  { %3651 = vmatprep.subr.mxu0 %v10047_v36  ;;  %3722 = vmatprep.subr.mxu1 %v10049_v37 }
0x1309   :  { %3652 = vmatpush1.msra.mxu0 %v10053_v38  ;;  %3723 = vmatpush1.msra.mxu1 %v10055_v39 }
0x130a   :  { %3653 = vmatprep.subr.mxu0 %v10059_v59  ;;  %3724 = vmatprep.subr.mxu1 %v10061_v54 }
0x130b   :  { %3654 = vmatpush1.msra.mxu0 %v10065_v16  ;;  %3725 = vmatpush1.msra.mxu1 %v10067_v13 }
0x130c   :  { %3655 = vmatprep.subr.mxu0 %v10071_v60  ;;  %3726 = vmatprep.subr.mxu1 %v10073_v51 }
0x130d   :  { %3656 = vmatpush1.msra.mxu0 %v10077_v56  ;;  %3727 = vmatpush1.msra.mxu1 %v10079_v58 }
0x130e   :  { %3657 = vmatprep.subr.mxu0 %v10083_v45  ;;  %3728 = vmatprep.subr.mxu1 %v10085_v17  ;;  %v10117_v17 = vld [vmem:[#allocation25 + $0x10] sm:$0xff] }
0x130f   :  { %3658 = vmatpush1.msra.mxu0 %v10089_v42  ;;  %3729 = vmatpush1.msra.mxu1 %v10091_v50  ;;  %12107 = vst [vmem:[#allocation70_spill] sm:$0xff] %v10117_v17 }
0x1310   :  { %3659 = vmatprep.subr.mxu0 %v10095_v44  ;;  %3730 = vmatprep.subr.mxu1 %v10097_v55 }
0x1311   :  { %3660 = vmatpush1.msra.mxu0 %v10101_v49  ;;  %3731 = vmatpush1.msra.mxu1 %v10103_v15 }
0x1312   :  { %3661 = vmatprep.subr.mxu0 %v10107_v20  ;;  %3732 = vmatprep.subr.mxu1 %v10109_v26 }
0x1313   :  { %3662 = vmatpush1.msra.mxu0 %v10113_v43  ;;  %3695 = vmatprep.mubr.f32.mxu0 %v12078_v10 }
0x1314   :  { %3733 = vmatpush1.msra.mxu1 %v10117_v17  ;;  %3766 = vmatprep.mubr.f32.mxu1 %v12078_v10 }
0x1315   :  { %3696 = vmatmul.mubr.f32.vlgmr.msra.gmra.mxu0 %v12078_v10  ;;  %3767 = vmatmul.mubr.f32.vlgmr.msra.gmra.mxu1 %v12078_v10 }
0x1316   :  { %3821 = vmatprep.subr.mxu0 %v9924_v18  ;;  %3892 = vmatprep.subr.mxu1 %v9926_v21 }
0x1317   :  { %3822 = vmatpush1.msra.mxu0 %v9929_v41  ;;  %3893 = vmatpush1.msra.mxu1 %v9931_v40 }
0x1318   :  { %3823 = vmatprep.subr.mxu0 %v9935_v3  ;;  %3894 = vmatprep.subr.mxu1 %v9937_v46 }
0x1319   :  { %3824 = vmatpush1.msra.mxu0 %v9943_v48  ;;  %3895 = vmatpush1.msra.mxu1 %v9945_v57 }
0x131a   :  { %3825 = vmatprep.subr.mxu0 %v9951_v47  ;;  %3896 = vmatprep.subr.mxu1 %v9953_v61 }
0x131b   :  { %3826 = vmatpush1.msra.mxu0 %v9957_v62  ;;  %3897 = vmatpush1.msra.mxu1 %v9959_v63 }
0x131c   :  { %3827 = vmatprep.subr.mxu0 %v9963_v0  ;;  %3898 = vmatprep.subr.mxu1 %v9965_v25 }
0x131d   :  { %3828 = vmatpush1.msra.mxu0 %v9969_v1  ;;  %3899 = vmatpush1.msra.mxu1 %v9971_v2 }
0x131e   :  { %3829 = vmatprep.subr.mxu0 %v9975_v4  ;;  %3900 = vmatprep.subr.mxu1 %v9977_v5 }
0x131f   :  { %3830 = vmatpush1.msra.mxu0 %v9981_v23  ;;  %3901 = vmatpush1.msra.mxu1 %v9983_v6 }
0x1320   :  { %3831 = vmatprep.subr.mxu0 %v9987_v7  ;;  %3902 = vmatprep.subr.mxu1 %v9989_v8 }
0x1321   :  { %3832 = vmatpush1.msra.mxu0 %v9993_v9  ;;  %3903 = vmatpush1.msra.mxu1 %v9995_v11 }
0x1322   :  { %3833 = vmatprep.subr.mxu0 %v9999_v12  ;;  %3904 = vmatprep.subr.mxu1 %v10001_v14 }
0x1323   :  { %3834 = vmatpush1.msra.mxu0 %v10005_v19  ;;  %3905 = vmatpush1.msra.mxu1 %v10007_v22 }
0x1324   :  { %3835 = vmatprep.subr.mxu0 %v10011_v24  ;;  %3906 = vmatprep.subr.mxu1 %v10013_v27 }
0x1325   :  { %3836 = vmatpush1.msra.mxu0 %v10017_v52  ;;  %3907 = vmatpush1.msra.mxu1 %v10019_v28 }
0x1326   :  { %3837 = vmatprep.subr.mxu0 %v10023_v29  ;;  %3908 = vmatprep.subr.mxu1 %v10025_v53 }
0x1327   :  { %3838 = vmatpush1.msra.mxu0 %v10029_v30  ;;  %3909 = vmatpush1.msra.mxu1 %v10031_v31 }
0x1328   :  { %3839 = vmatprep.subr.mxu0 %v10035_v32  ;;  %3910 = vmatprep.subr.mxu1 %v10037_v33 }
0x1329   :  { %3840 = vmatpush1.msra.mxu0 %v10041_v34  ;;  %3911 = vmatpush1.msra.mxu1 %v10043_v35 }
0x132a   :  { %3841 = vmatprep.subr.mxu0 %v10047_v36  ;;  %3912 = vmatprep.subr.mxu1 %v10049_v37 }
0x132b   :  { %3842 = vmatpush1.msra.mxu0 %v10053_v38  ;;  %3913 = vmatpush1.msra.mxu1 %v10055_v39  ;;  %v12108_v38 = vld [vmem:[#allocation58_spill] sm:$0xff] }
0x132c   :  { %3843 = vmatprep.subr.mxu0 %v10059_v59  ;;  %3914 = vmatprep.subr.mxu1 %v10061_v54 }
0x132d   :  { %3844 = vmatpush1.msra.mxu0 %v10065_v16  ;;  %3915 = vmatpush1.msra.mxu1 %v10067_v13 }
0x132e   :  { %3845 = vmatprep.subr.mxu0 %v10071_v60  ;;  %3916 = vmatprep.subr.mxu1 %v10073_v51 }
0x132f   :  { %3846 = vmatpush1.msra.mxu0 %v10077_v56  ;;  %3917 = vmatpush1.msra.mxu1 %v10079_v58 }
0x1330   :  { %3847 = vmatprep.subr.mxu0 %v10083_v45  ;;  %3918 = vmatprep.subr.mxu1 %v12108_v38 }
0x1331   :  { %3848 = vmatpush1.msra.mxu0 %v10089_v42  ;;  %3919 = vmatpush1.msra.mxu1 %v10091_v50 }
0x1332   :  { %3849 = vmatprep.subr.mxu0 %v10095_v44  ;;  %3920 = vmatprep.subr.mxu1 %v10097_v55  ;;  %v3122_v44 = vld [vmem:[#allocation2 + $0x8] sm:$0xc0] }
0x1333   :  { %3850 = vmatpush1.msra.mxu0 %v10101_v49  ;;  %3921 = vmatpush1.msra.mxu1 %v10103_v15 }
0x1334   :  { %3851 = vmatprep.subr.mxu0 %v10107_v20  ;;  %3922 = vmatprep.subr.mxu1 %v10109_v26  ;;  %v3123_v26 = vld [vmem:[#allocation2 + $0x20] sm:$0xc0] }
0x1335   :  { %3852 = vmatpush1.msra.mxu0 %v10113_v43  ;;  %3885 = vmatprep.mubr.f32.mxu0 %v12078_v10 }
0x1336   :  { %3923 = vmatpush1.msra.mxu1 %v10117_v17  ;;  %3956 = vmatprep.mubr.f32.mxu1 %v12078_v10  ;;  %v3125_v10 = vld [vmem:[#allocation2 + $0x38] sm:$0xc0] }
0x1337   :  { %4014 = vmatprep.subr.mxu0 %v9924_v18  ;;  %4085 = vmatprep.subr.mxu1 %v9926_v21  ;;  %v3124_v21 = vld [vmem:[#allocation2 + $0x28] sm:$0xc0] }
0x1390   :  { %v3195_v55 = vpop.f32.mrf.mxu0  ;;  %v3266_v20 = vpop.f32.mrf.mxu1 }
0x1391   :  { %v3275_v49 = vrot.slane %v3195_v55, 2  ;;  %v3277_v18 = vrot.slane %v3266_v20, 2 }
0x1392   :  { %v3197_v15 = vpop.f32.mrf.mxu0  ;;  %v3268_v58 = vpop.f32.mrf.mxu1 }
0x1393   :  { %v3283_v50 = vadd.f32 %v3275_v49, %v3122_v44  ;;  %v3276_v42 = vrot.slane %v3197_v15, 2  ;;  %v3278_v17 = vrot.slane %v3268_v58, 2  ;;  %v3285_v55 = vadd.f32 %v3277_v18, %v3124_v21 }
0x1395   :  { %v7444_v38 = vmul.f32 -1.442695, %v3283_v50  ;;  %v3284_v43 = vadd.f32 %v3276_v42, %v3123_v26  ;;  %v3286_v56 = vadd.f32 %v3278_v17, %v3125_v10  ;;  %v12111_v17 = vld [vmem:[#allocation66_spill] sm:$0xff]  ;;  %v12112_v42 = vld [vmem:[#allocation67_spill] sm:$0xff] }
0x1397   :  { %7856 = vpow2.f32 %v7444_v38  ;;  %v7445_v45 = vmul.f32 -1.442695, %v3284_v43  ;;  %v7446_v51 = vmul.f32 -1.442695, %v3286_v56  ;;  %v3379_v43 = vld [vmem:[%s11604_s15] sm:$0xf] }
0x1398   :  { %v12109_v38 = vld [vmem:[#allocation64_spill] sm:$0xff]  ;;  %v3388_v56 = vrot.slane %v3379_v43, %v12111_v17  ;;  %v3396_v50 = vrot.slane %v3379_v43, %v12112_v42 }
0x1399   :  { %7858 = vpow2.f32 %v7445_v45  ;;  %v3384_v58 = vrot.slane %v3379_v43, %v12109_v38  ;;  %v12110_v45 = vld [vmem:[#allocation65_spill] sm:$0xff] }
0x139a   :  { %7860 = vpow2.f32 %v7446_v51  ;;  %v3392_v10 = vrot.slane %v3379_v43, %v12110_v45 }
0x13a4   :  { %v7857_v60 = vpop.eup %7856 }
0x13a5   :  { %v3290_v13 = vadd.f32 1.0, %v7857_v60 }
0x13a6   :  { %v7859_v16 = vpop.eup %7858 }
0x13a7   :  { %7862 = vrcp.f32 %v3290_v13  ;;  %v3296_v44 = vadd.f32 1.0, %v7859_v16  ;;  %v7861_v13 = vpop.eup %7860 }
0x13a8   :  { %7864 = vtanh.f32 %v3285_v55  ;;  %v3303_v54 = vadd.f32 1.0, %v7861_v13 }
0x13a9   :  { %7866 = vrcp.f32 %v3296_v44  ;;  %v12113_v44 = vld [vmem:[#allocation40_spill] sm:$0xff] }
0x13aa   :  { %v3307_v38 = vrot.slane %v12113_v44, 6  ;;  %7868 = vrcp.f32 %v3303_v54 }
0x13b1   :  { %v3467_v18 = vpop.f32.mrf.mxu0  ;;  %v3544_v21 = vpop.f32.mrf.mxu1 }
0x13b2   :  { %v3468_v60 = vadd.f32 %v3467_v18, %v3384_v58  ;;  %v3545_v51 = vadd.f32 %v3544_v21, %v3392_v10 }
0x13b3   :  { %v3469_v16 = vpop.f32.mrf.mxu0  ;;  %v3546_v49 = vpop.f32.mrf.mxu1 }
0x13b4   :  { %v7863_v15 = vpop.eup %7862  ;;  %3555 = vst [vmem:[#allocation2 + $0x30] sm:$0xff] %v3468_v60  ;;  %3557 = vst [vmem:[#allocation2 + $0x18] sm:$0xff] %v3545_v51  ;;  %v3470_v20 = vadd.f32 %v3469_v16, %v3388_v56  ;;  %v3547_v26 = vadd.f32 %v3546_v49, %v3396_v50 }
0x13b5   :  { %v7865_v55 = vpop.eup %7864 }
0x13b6   :  { %v7867_v45 = vpop.eup %7866  ;;  %3556 = vst [vmem:[#allocation2] sm:$0xff] %v3470_v20  ;;  %3558 = vst [vmem:[#allocation2 + $0x10] sm:$0xff] %v3547_v26  ;;  %v3310_v43 = vmul.f32 %v7865_v55, %v7863_v15 }
0x13b7   :  { %v3309_v42 = vmul.f32 %v7867_v45, %v3307_v38  ;;  %v3473_v17 = vpop.f32.mrf.mxu0  ;;  %v3550_v18 = vpop.f32.mrf.mxu1 }
0x13b8   :  { %v3474_v21 = vadd.f32 %v3473_v17, %v3384_v58  ;;  %v3551_v59 = vadd.f32 %v3550_v18, %v3392_v10  ;;  %v7869_v13 = vpop.eup %7868 }
0x13b9   :  { %v3311_v39 = vadd.f32 %v3310_v43, %v3309_v42  ;;  %v3475_v37 = vpop.f32.mrf.mxu0  ;;  %v3552_v36 = vpop.f32.mrf.mxu1 }
0x13ba   :  { %3559 = vst [vmem:[#allocation2 + $0x8] sm:$0xff] %v3474_v21  ;;  %3561 = vst [vmem:[#allocation2 + $0x28] sm:$0xff] %v3551_v59  ;;  %v3476_v60 = vadd.f32 %v3475_v37, %v3388_v56  ;;  %v3553_v51 = vadd.f32 %v3552_v36, %v3396_v50 }
0x13bb   :  { %7870 = vtanh.f32 %v3311_v39 }
0x13bc   :  { %3560 = vst [vmem:[#allocation2 + $0x20] sm:$0xff] %v3476_v60  ;;  %3562 = vst [vmem:[#allocation2 + $0x38] sm:$0xff] %v3553_v51 }
0x13c1   :  { %v3627_v15 = vld [vmem:[#allocation2 + $0x8] sm:$0xc0] }
0x13c2   :  { %v3629_v44 = vld [vmem:[#allocation2 + $0x28] sm:$0xc0] }
0x13c3   :  { %v3628_v20 = vld [vmem:[#allocation2 + $0x20] sm:$0xc0]  ;;  %v3630_v59 = vld [vmem:[#allocation2 + $0x38] sm:$0xc0] }
0x13c8   :  { %v7871_v16 = vpop.eup %7870 }
0x13c9   :  { %v3313_v49 = vmul.f32 %v7871_v16, %v7869_v13 }
0x13cb   :  { %3314 = vst [vmem:[#allocation3 + $0x8] sm:$0xc0] %v3313_v49 }
0x13d5   :  { %v3697_v38 = vpop.f32.mrf.mxu0  ;;  %v3768_v17 = vpop.f32.mrf.mxu1 }
0x13d6   :  { %v3777_v45 = vrot.slane %v3697_v38, 2  ;;  %v3779_v50 = vrot.slane %v3768_v17, 2 }
0x13d7   :  { %v3699_v58 = vpop.f32.mrf.mxu0  ;;  %v3770_v36 = vpop.f32.mrf.mxu1 }
0x13d8   :  { %v3785_v10 = vadd.f32 %v3777_v45, %v3627_v15  ;;  %v3778_v42 = vrot.slane %v3699_v58, 2  ;;  %v3780_v39 = vrot.slane %v3770_v36, 2  ;;  %v3787_v18 = vadd.f32 %v3779_v50, %v3629_v44  ;;  %v12116_v36 = vld [vmem:[#allocation47_spill] sm:$0xff]  ;;  %v12122_v44 = vld [vmem:[#allocation53_spill] sm:$0xff] }
0x13d9   :  { %v12120_v50 = vld [vmem:[#allocation51_spill] sm:$0xff] }
0x13da   :  { %v7447_v54 = vmul.f32 -1.442695, %v3785_v10  ;;  %v3786_v26 = vadd.f32 %v3778_v42, %v3628_v20  ;;  %v3788_v56 = vadd.f32 %v3780_v39, %v3630_v59  ;;  %v12117_v39 = vld [vmem:[#allocation48_spill] sm:$0xff]  ;;  %v12118_v59 = vld [vmem:[#allocation49_spill] sm:$0xff] }
0x13dc   :  { %7872 = vpow2.f32 %v7447_v54  ;;  %v7448_v37 = vmul.f32 -1.442695, %v3786_v26  ;;  %v7449_v55 = vmul.f32 -1.442695, %v3788_v56  ;;  %v12114_v26 = vld [vmem:[#allocation45_spill] sm:$0xff]  ;;  %v12119_v56 = vld [vmem:[#allocation50_spill] sm:$0xff] }
0x13de   :  { %7874 = vpow2.f32 %v7448_v37  ;;  %v12115_v37 = vld [vmem:[#allocation46_spill] sm:$0xff] }
0x13df   :  { %7876 = vpow2.f32 %v7449_v55  ;;  %v12121_v55 = vld [vmem:[#allocation52_spill] sm:$0xff] }
0x13e9   :  { %v7873_v43 = vpop.eup %7872 }
0x13ea   :  { %v3792_v21 = vadd.f32 1.0, %v7873_v43  ;;  %v12123_v43 = vld [vmem:[#allocation54_spill] sm:$0xff] }
0x13eb   :  { %v7875_v60 = vpop.eup %7874 }
0x13ec   :  { %7878 = vrcp.f32 %v3792_v21  ;;  %v3798_v51 = vadd.f32 1.0, %v7875_v60  ;;  %v7877_v13 = vpop.eup %7876  ;;  %v12125_v21 = vld [vmem:[#allocation56_spill] sm:$0xff]  ;;  %v12126_v60 = vld [vmem:[#allocation57_spill] sm:$0xff] }
0x13ed   :  { %7880 = vtanh.f32 %v3787_v18  ;;  %v3805_v45 = vadd.f32 1.0, %v7877_v13  ;;  %v12124_v18 = vld [vmem:[#allocation55_spill] sm:$0xff] }
0x13ee   :  { %7882 = vrcp.f32 %v3798_v51  ;;  %v12127_v51 = vld [vmem:[#allocation58_spill] sm:$0xff]  ;;  %v12128_v13 = vld [vmem:[#allocation59_spill] sm:$0xff] }
0x13ef   :  { %7884 = vrcp.f32 %v3805_v45  ;;  %v12132_v45 = vld [vmem:[#allocation63_spill] sm:$0xff] }
0x13f9   :  { %v7879_v16 = vpop.eup %7878 }
0x13fa   :  { %v7881_v49 = vpop.eup %7880 }
0x13fb   :  { %v7883_v38 = vpop.eup %7882  ;;  %v3809_v58 = vmul.f32 %v7881_v49, %v7879_v16  ;;  %v12129_v16 = vld [vmem:[#allocation60_spill] sm:$0xff]  ;;  %v12130_v49 = vld [vmem:[#allocation61_spill] sm:$0xff] }
0x13fc   :  { %v3808_v15 = vmul.f32 0.0, %v7883_v38  ;;  %v7885_v17 = vpop.eup %7884  ;;  %v12131_v38 = vld [vmem:[#allocation62_spill] sm:$0xff] }
0x13fe   :  { %v10203_v10 = vadd.f32 %v3809_v58, %v3808_v15  ;;  %v12133_v15 = vld [vmem:[#allocation42_spill] sm:$0xff]  ;;  %v12134_v58 = vld [vmem:[#allocation43_spill] sm:$0xff] }
0x1400   :  { %7886 = vtanh.f32 %v10203_v10 }
0x140d   :  { %v7887_v42 = vpop.eup %7886 }
0x140e   :  { %v3812_v20 = vmul.f32 %v7887_v42, %v7885_v17  ;;  %v12135_v17 = vld [vmem:[#allocation68_spill] sm:$0xff]  ;;  %v12136_v42 = vld [vmem:[#allocation69_spill] sm:$0xff] }
0x1410   :  { %3813 = vst [vmem:[#allocation3 + $0x18] sm:$0xc0] %v3812_v20  ;;  %v3819_v54 = vrot.slane %v3812_v20, 6  ;;  %v12137_v20 = vmov 0.0  }
0x1412   :  { %3886 = vmatmul.mubr.f32.vlgmr.msra.gmra.mxu0 %v3819_v54  ;;  %3957 = vmatmul.mubr.f32.vlgmr.msra.gmra.mxu1 %v3819_v54  ;;  %v12138_v54 = vld [vmem:[#allocation70_spill] sm:$0xff] }
0x1413   :  { %4015 = vmatpush1.msra.mxu0 %v9929_v41  ;;  %4086 = vmatpush1.msra.mxu1 %v9931_v40 }
0x1414   :  { %4016 = vmatprep.subr.mxu0 %v9935_v3  ;;  %4087 = vmatprep.subr.mxu1 %v9937_v46 }
0x1415   :  { %4017 = vmatpush1.msra.mxu0 %v9943_v48  ;;  %4088 = vmatpush1.msra.mxu1 %v9945_v57 }
0x1416   :  { %4018 = vmatprep.subr.mxu0 %v9951_v47  ;;  %4089 = vmatprep.subr.mxu1 %v9953_v61 }
0x1417   :  { %4019 = vmatpush1.msra.mxu0 %v9957_v62  ;;  %4090 = vmatpush1.msra.mxu1 %v9959_v63 }
0x1418   :  { %4020 = vmatprep.subr.mxu0 %v9963_v0  ;;  %4091 = vmatprep.subr.mxu1 %v9965_v25 }
0x1419   :  { %4021 = vmatpush1.msra.mxu0 %v9969_v1  ;;  %4092 = vmatpush1.msra.mxu1 %v9971_v2 }
0x141a   :  { %4022 = vmatprep.subr.mxu0 %v9975_v4  ;;  %4093 = vmatprep.subr.mxu1 %v9977_v5 }
0x141b   :  { %4023 = vmatpush1.msra.mxu0 %v9981_v23  ;;  %4094 = vmatpush1.msra.mxu1 %v9983_v6 }
0x141c   :  { %4024 = vmatprep.subr.mxu0 %v9987_v7  ;;  %4095 = vmatprep.subr.mxu1 %v9989_v8 }
0x141d   :  { %4025 = vmatpush1.msra.mxu0 %v9993_v9  ;;  %4096 = vmatpush1.msra.mxu1 %v9995_v11 }
0x141e   :  { %4026 = vmatprep.subr.mxu0 %v9999_v12  ;;  %4097 = vmatprep.subr.mxu1 %v10001_v14 }
0x141f   :  { %4027 = vmatpush1.msra.mxu0 %v10005_v19  ;;  %4098 = vmatpush1.msra.mxu1 %v10007_v22 }
0x1420   :  { %4028 = vmatprep.subr.mxu0 %v10011_v24  ;;  %4099 = vmatprep.subr.mxu1 %v10013_v27 }
0x1421   :  { %4029 = vmatpush1.msra.mxu0 %v10017_v52  ;;  %4100 = vmatpush1.msra.mxu1 %v10019_v28 }
0x1422   :  { %4030 = vmatprep.subr.mxu0 %v10023_v29  ;;  %4101 = vmatprep.subr.mxu1 %v10025_v53 }
0x1423   :  { %4031 = vmatpush1.msra.mxu0 %v10029_v30  ;;  %4102 = vmatpush1.msra.mxu1 %v10031_v31 }
0x1424   :  { %4032 = vmatprep.subr.mxu0 %v10035_v32  ;;  %4103 = vmatprep.subr.mxu1 %v10037_v33 }
0x1425   :  { %4033 = vmatpush1.msra.mxu0 %v10041_v34  ;;  %4104 = vmatpush1.msra.mxu1 %v10043_v35 }
0x1426   :  { %4034 = vmatprep.subr.mxu0 %v12114_v26  ;;  %4105 = vmatprep.subr.mxu1 %v12115_v37 }
0x1427   :  { %4035 = vmatpush1.msra.mxu0 %v12116_v36  ;;  %4106 = vmatpush1.msra.mxu1 %v12117_v39 }
0x1428   :  { %4036 = vmatprep.subr.mxu0 %v12118_v59  ;;  %4107 = vmatprep.subr.mxu1 %v12119_v56 }
0x1429   :  { %4037 = vmatpush1.msra.mxu0 %v12120_v50  ;;  %4108 = vmatpush1.msra.mxu1 %v12121_v55 }
0x142a   :  { %4038 = vmatprep.subr.mxu0 %v12122_v44  ;;  %4109 = vmatprep.subr.mxu1 %v12123_v43 }
0x142b   :  { %4039 = vmatpush1.msra.mxu0 %v12124_v18  ;;  %4110 = vmatpush1.msra.mxu1 %v12125_v21 }
0x142c   :  { %4040 = vmatprep.subr.mxu0 %v12126_v60  ;;  %4111 = vmatprep.subr.mxu1 %v12127_v51 }
0x142d   :  { %4041 = vmatpush1.msra.mxu0 %v12128_v13  ;;  %4112 = vmatpush1.msra.mxu1 %v12129_v16  ;;  %v12139_v16 = vld [vmem:[#allocation41_spill] sm:$0xff]  ;;  %v3814_v13 = vld [vmem:[#allocation2 + $0x8] sm:$0x30] }
0x142e   :  { %4042 = vmatprep.subr.mxu0 %v12130_v49  ;;  %4113 = vmatprep.subr.mxu1 %v12131_v38  ;;  %v12140_v49 = vld [vmem:[#allocation44_spill] sm:$0xff] }
0x142f   :  { %4043 = vmatpush1.msra.mxu0 %v12132_v45  ;;  %4114 = vmatpush1.msra.mxu1 %v12133_v15 }
0x1430   :  { %4044 = vmatprep.subr.mxu0 %v12134_v58  ;;  %4115 = vmatprep.subr.mxu1 %v12135_v17  ;;  %v3815_v17 = vld [vmem:[#allocation2 + $0x20] sm:$0x30] }
0x1431   :  { %4045 = vmatpush1.msra.mxu0 %v12136_v42  ;;  %4078 = vmatprep.mubr.f32.mxu0 %v12137_v20 }
0x1432   :  { %4116 = vmatpush1.msra.mxu1 %v12138_v54  ;;  %4149 = vmatprep.mubr.f32.mxu1 %v12137_v20  ;;  %v3817_v20 = vld [vmem:[#allocation2 + $0x38] sm:$0x30] }
0x1433   :  { %4207 = vmatprep.subr.mxu0 %v12139_v16  ;;  %4278 = vmatprep.subr.mxu1 %v12140_v49  ;;  %v3816_v49 = vld [vmem:[#allocation2 + $0x28] sm:$0x30] }
0x14d2   :  { %v3887_v38 = vpop.f32.mrf.mxu0  ;;  %v3958_v58 = vpop.f32.mrf.mxu1 }
0x14d3   :  { %v3967_v45 = vrot.slane %v3887_v38, 4  ;;  %v3969_v16 = vrot.slane %v3958_v58, 4 }
0x14d4   :  { %v3889_v15 = vpop.f32.mrf.mxu0  ;;  %v3960_v43 = vpop.f32.mrf.mxu1 }
0x14d5   :  { %v3975_v51 = vadd.f32 %v3967_v45, %v3814_v13  ;;  %v3968_v60 = vrot.slane %v3889_v15, 4  ;;  %v3970_v54 = vrot.slane %v3960_v43, 4  ;;  %v3977_v38 = vadd.f32 %v3969_v16, %v3816_v49  ;;  %v4010_v49 = vld [vmem:[#allocation2 + $0x38] sm:$0xc] }
0x14d7   :  { %v7450_v21 = vmul.f32 -1.442695, %v3975_v51  ;;  %v3976_v42 = vadd.f32 %v3968_v60, %v3815_v17  ;;  %v3978_v44 = vadd.f32 %v3970_v54, %v3817_v20  ;;  %v4009_v54 = vld [vmem:[#allocation2 + $0x28] sm:$0xc] }
0x14d9   :  { %7888 = vpow2.f32 %v7450_v21  ;;  %v7451_v18 = vmul.f32 -1.442695, %v3976_v42  ;;  %v7452_v55 = vmul.f32 -1.442695, %v3978_v44 }
0x14db   :  { %7890 = vpow2.f32 %v7451_v18  ;;  %v3999_v18 = vrot.slane %v10203_v10, 2 }
0x14dc   :  { %7892 = vpow2.f32 %v7452_v55 }
0x14e6   :  { %v7889_v50 = vpop.eup %7888 }
0x14e7   :  { %v3982_v56 = vadd.f32 1.0, %v7889_v50 }
0x14e8   :  { %v7891_v59 = vpop.eup %7890 }
0x14e9   :  { %7894 = vrcp.f32 %v3982_v56  ;;  %v3988_v13 = vadd.f32 1.0, %v7891_v59  ;;  %v7893_v60 = vpop.eup %7892 }
0x14ea   :  { %7896 = vtanh.f32 %v3977_v38  ;;  %v3995_v45 = vadd.f32 1.0, %v7893_v60 }
0x14eb   :  { %7898 = vrcp.f32 %v3988_v13 }
0x14ec   :  { %7900 = vrcp.f32 %v3995_v45 }
0x14f6   :  { %v7895_v21 = vpop.eup %7894 }
0x14f7   :  { %v7897_v51 = vpop.eup %7896 }
0x14f8   :  { %v7899_v43 = vpop.eup %7898  ;;  %v4002_v15 = vmul.f32 %v7897_v51, %v7895_v21 }
0x14f9   :  { %v4001_v58 = vmul.f32 %v7899_v43, %v3999_v18  ;;  %v7901_v50 = vpop.eup %7900 }
0x14fb   :  { %v10273_v44 = vadd.f32 %v4002_v15, %v4001_v58 }
0x14fd   :  { %7902 = vtanh.f32 %v10273_v44  ;;  %v4192_v15 = vrot.slane %v10273_v44, 2  ;;  %v10349_v44 = vld [vmem:[#allocation25 + $0x1f0] sm:$0xff] }
0x150a   :  { %v7903_v55 = vpop.eup %7902 }
0x150b   :  { %v4005_v56 = vmul.f32 %v7903_v55, %v7901_v50 }
0x150d   :  { %4006 = vst [vmem:[#allocation3 + $0x18] sm:$0x30] %v4005_v56  ;;  %v4012_v59 = vrot.slane %v4005_v56, 4 }
0x150f   :  { %4079 = vmatmul.mubr.f32.vlgmr.msra.gmra.mxu0 %v4012_v59  ;;  %4150 = vmatmul.mubr.f32.vlgmr.msra.gmra.mxu1 %v4012_v59 }
0x1510   :  { %4208 = vmatpush1.msra.mxu0 %v9929_v41  ;;  %4279 = vmatpush1.msra.mxu1 %v9931_v40  ;;  %v12141_v41 = vld [vmem:[#allocation49_spill] sm:$0xff]  ;;  %v12142_v40 = vld [vmem:[#allocation50_spill] sm:$0xff] }
0x1511   :  { %4209 = vmatprep.subr.mxu0 %v9935_v3  ;;  %4280 = vmatprep.subr.mxu1 %v9937_v46  ;;  %v12143_v3 = vld [vmem:[#allocation51_spill] sm:$0xff]  ;;  %v12144_v46 = vld [vmem:[#allocation52_spill] sm:$0xff] }
0x1512   :  { %4210 = vmatpush1.msra.mxu0 %v9943_v48  ;;  %4281 = vmatpush1.msra.mxu1 %v9945_v57  ;;  %v12145_v48 = vld [vmem:[#allocation53_spill] sm:$0xff]  ;;  %v12146_v57 = vld [vmem:[#allocation54_spill] sm:$0xff] }
0x1513   :  { %4211 = vmatprep.subr.mxu0 %v9951_v47  ;;  %4282 = vmatprep.subr.mxu1 %v9953_v61  ;;  %v12147_v47 = vld [vmem:[#allocation55_spill] sm:$0xff]  ;;  %v12148_v61 = vld [vmem:[#allocation56_spill] sm:$0xff] }
0x1514   :  { %4212 = vmatpush1.msra.mxu0 %v9957_v62  ;;  %4283 = vmatpush1.msra.mxu1 %v9959_v63  ;;  %v12149_v62 = vld [vmem:[#allocation57_spill] sm:$0xff]  ;;  %v12150_v63 = vld [vmem:[#allocation58_spill] sm:$0xff] }
0x1515   :  { %4213 = vmatprep.subr.mxu0 %v9963_v0  ;;  %4284 = vmatprep.subr.mxu1 %v9965_v25  ;;  %v12151_v0 = vld [vmem:[#allocation59_spill] sm:$0xff]  ;;  %v12152_v25 = vld [vmem:[#allocation60_spill] sm:$0xff] }
0x1516   :  { %4214 = vmatpush1.msra.mxu0 %v9969_v1  ;;  %4285 = vmatpush1.msra.mxu1 %v9971_v2  ;;  %v12153_v1 = vld [vmem:[#allocation61_spill] sm:$0xff]  ;;  %v12154_v2 = vld [vmem:[#allocation62_spill] sm:$0xff] }
0x1517   :  { %4215 = vmatprep.subr.mxu0 %v9975_v4  ;;  %4286 = vmatprep.subr.mxu1 %v9977_v5  ;;  %v12155_v4 = vld [vmem:[#allocation63_spill] sm:$0xff]  ;;  %v12156_v5 = vld [vmem:[#allocation42_spill] sm:$0xff] }
0x1518   :  { %4216 = vmatpush1.msra.mxu0 %v9981_v23  ;;  %4287 = vmatpush1.msra.mxu1 %v9983_v6  ;;  %v12157_v23 = vld [vmem:[#allocation43_spill] sm:$0xff]  ;;  %v12158_v6 = vld [vmem:[#allocation68_spill] sm:$0xff] }
0x1519   :  { %4217 = vmatprep.subr.mxu0 %v9987_v7  ;;  %4288 = vmatprep.subr.mxu1 %v9989_v8  ;;  %v12159_v7 = vld [vmem:[#allocation69_spill] sm:$0xff]  ;;  %v12160_v8 = vmov 0.0  }
0x151a   :  { %4218 = vmatpush1.msra.mxu0 %v9993_v9  ;;  %4289 = vmatpush1.msra.mxu1 %v9995_v11  ;;  %v12161_v9 = vld [vmem:[#allocation70_spill] sm:$0xff]  ;;  %v12162_v11 = vld [vmem:[#allocation41_spill] sm:$0xff] }
0x151b   :  { %4219 = vmatprep.subr.mxu0 %v9999_v12  ;;  %4290 = vmatprep.subr.mxu1 %v10001_v14  ;;  %v12163_v12 = vld [vmem:[#allocation44_spill] sm:$0xff] }
0x151c   :  { %4220 = vmatpush1.msra.mxu0 %v10005_v19  ;;  %4291 = vmatpush1.msra.mxu1 %v10007_v22  ;;  %v4007_v22 = vld [vmem:[#allocation2 + $0x8] sm:$0xc] }
0x151d   :  { %4221 = vmatprep.subr.mxu0 %v10011_v24  ;;  %4292 = vmatprep.subr.mxu1 %v10013_v27 }
0x151e   :  { %4222 = vmatpush1.msra.mxu0 %v10017_v52  ;;  %4293 = vmatpush1.msra.mxu1 %v10019_v28 }
0x151f   :  { %4223 = vmatprep.subr.mxu0 %v10023_v29  ;;  %4294 = vmatprep.subr.mxu1 %v10025_v53  ;;  %v4008_v29 = vld [vmem:[#allocation2 + $0x20] sm:$0xc] }
0x1520   :  { %4224 = vmatpush1.msra.mxu0 %v10029_v30  ;;  %4295 = vmatpush1.msra.mxu1 %v10031_v31 }
0x1521   :  { %4225 = vmatprep.subr.mxu0 %v10035_v32  ;;  %4296 = vmatprep.subr.mxu1 %v10037_v33 }
0x1522   :  { %4226 = vmatpush1.msra.mxu0 %v10041_v34  ;;  %4297 = vmatpush1.msra.mxu1 %v10043_v35 }
0x1523   :  { %4227 = vmatprep.subr.mxu0 %v12114_v26  ;;  %4298 = vmatprep.subr.mxu1 %v12115_v37 }
0x1524   :  { %4228 = vmatpush1.msra.mxu0 %v12116_v36  ;;  %4299 = vmatpush1.msra.mxu1 %v12117_v39 }
0x1525   :  { %4229 = vmatprep.subr.mxu0 %v12141_v41  ;;  %4300 = vmatprep.subr.mxu1 %v12142_v40 }
0x1526   :  { %4230 = vmatpush1.msra.mxu0 %v12143_v3  ;;  %4301 = vmatpush1.msra.mxu1 %v12144_v46 }
0x1527   :  { %4231 = vmatprep.subr.mxu0 %v12145_v48  ;;  %4302 = vmatprep.subr.mxu1 %v12146_v57 }
0x1528   :  { %4232 = vmatpush1.msra.mxu0 %v12147_v47  ;;  %4303 = vmatpush1.msra.mxu1 %v12148_v61 }
0x1529   :  { %4233 = vmatprep.subr.mxu0 %v12149_v62  ;;  %4304 = vmatprep.subr.mxu1 %v12150_v63 }
0x152a   :  { %4234 = vmatpush1.msra.mxu0 %v12151_v0  ;;  %4305 = vmatpush1.msra.mxu1 %v12152_v25 }
0x152b   :  { %4235 = vmatprep.subr.mxu0 %v12153_v1  ;;  %4306 = vmatprep.subr.mxu1 %v12154_v2 }
0x152c   :  { %4236 = vmatpush1.msra.mxu0 %v12155_v4  ;;  %4307 = vmatpush1.msra.mxu1 %v12156_v5 }
0x152d   :  { %4237 = vmatprep.subr.mxu0 %v12157_v23  ;;  %4308 = vmatprep.subr.mxu1 %v12158_v6 }
0x152e   :  { %4238 = vmatpush1.msra.mxu0 %v12159_v7  ;;  %4271 = vmatprep.mubr.f32.mxu0 %v12160_v8 }
0x152f   :  { %4309 = vmatpush1.msra.mxu1 %v12161_v9  ;;  %4342 = vmatprep.mubr.f32.mxu1 %v12160_v8 }
0x1530   :  { %4385 = vmatprep.subr.mxu0 %v12162_v11  ;;  %4456 = vmatprep.subr.mxu1 %v12163_v12 }
0x15cf   :  { %v4080_v14 = vpop.f32.mrf.mxu0  ;;  %v4151_v52 = vpop.f32.mrf.mxu1 }
0x15d0   :  { %v4160_v19 = vrot.slane %v4080_v14, 6  ;;  %v4162_v42 = vrot.slane %v4151_v52, 6  ;;  %v10358_v52 = vld [vmem:[#allocation25 + $0x1c0] sm:$0xff] }
0x15d1   :  { %v4082_v24 = vpop.f32.mrf.mxu0  ;;  %v4153_v10 = vpop.f32.mrf.mxu1 }
0x15d2   :  { %v4168_v27 = vadd.f32 %v4160_v19, %v4007_v22  ;;  %v4161_v28 = vrot.slane %v4082_v24, 6  ;;  %v4163_v16 = vrot.slane %v4153_v10, 6  ;;  %v4170_v13 = vadd.f32 %v4162_v42, %v4009_v54  ;;  %v10346_v22 = vld [vmem:[#allocation25 + $0x1e0] sm:$0xff]  ;;  %v10352_v24 = vld [vmem:[#allocation25 + $0x1c8] sm:$0xff] }
0x15d3   :  { %v10376_v10 = vld [vmem:[#allocation25 + $0x188] sm:$0xff]  ;;  %v10394_v54 = vld [vmem:[#allocation25 + $0x160] sm:$0xff] }
0x15d4   :  { %v7453_v53 = vmul.f32 -1.442695, %v4168_v27  ;;  %v4169_v30 = vadd.f32 %v4161_v28, %v4008_v29  ;;  %v4171_v17 = vadd.f32 %v4163_v16, %v4010_v49  ;;  %v10355_v27 = vld [vmem:[#allocation25 + $0x1d8] sm:$0xff]  ;;  %v10361_v28 = vld [vmem:[#allocation25 + $0x1d0] sm:$0xff]  ;;  %v10364_v29 = vld [vmem:[#allocation25 + $0x1a8] sm:$0xff] }
0x15d5   :  { %v10379_v16 = vld [vmem:[#allocation25 + $0x198] sm:$0xff]  ;;  %v10382_v49 = vld [vmem:[#allocation25 + $0x180] sm:$0xff]  ;;  %v10388_v42 = vld [vmem:[#allocation25 + $0x168] sm:$0xff] }
0x15d6   :  { %7904 = vpow2.f32 %v7453_v53  ;;  %v7454_v31 = vmul.f32 -1.442695, %v4169_v30  ;;  %v7455_v20 = vmul.f32 -1.442695, %v4171_v17  ;;  %v10367_v53 = vld [vmem:[#allocation25 + $0x1b8] sm:$0xff]  ;;  %v10370_v30 = vld [vmem:[#allocation25 + $0x1a0] sm:$0xff] }
0x15d7   :  { %v10385_v17 = vld [vmem:[#allocation25 + $0x190] sm:$0xff] }
0x15d8   :  { %7906 = vpow2.f32 %v7454_v31  ;;  %v10373_v31 = vld [vmem:[#allocation25 + $0x1b0] sm:$0xff] }
0x15d9   :  { %7908 = vpow2.f32 %v7455_v20  ;;  %v10391_v20 = vld [vmem:[#allocation25 + $0x178] sm:$0xff] }
0x15e3   :  { %v7905_v38 = vpop.eup %7904 }
0x15e4   :  { %v4175_v60 = vadd.f32 1.0, %v7905_v38  ;;  %v10397_v38 = vld [vmem:[#allocation25 + $0x170] sm:$0xff] }
0x15e5   :  { %v7907_v21 = vpop.eup %7906 }
0x15e6   :  { %7910 = vrcp.f32 %v4175_v60  ;;  %v4181_v51 = vadd.f32 1.0, %v7907_v21  ;;  %v7909_v18 = vpop.eup %7908  ;;  %v10403_v60 = vld [vmem:[#allocation25 + $0x158] sm:$0xff]  ;;  %v10406_v21 = vld [vmem:[#allocation25 + $0x140] sm:$0xff] }
0x15e7   :  { %7912 = vtanh.f32 %v4170_v13  ;;  %v4188_v50 = vadd.f32 1.0, %v7909_v18  ;;  %v10400_v13 = vld [vmem:[#allocation25 + $0x148] sm:$0xff] }
0x15e8   :  { %7914 = vrcp.f32 %v4181_v51  ;;  %v10409_v51 = vld [vmem:[#allocation25 + $0x150] sm:$0xff]  ;;  %v10412_v18 = vld [vmem:[#allocation25 + $0x128] sm:$0xff] }
0x15e9   :  { %7916 = vrcp.f32 %v4188_v50  ;;  %v10427_v50 = vld [vmem:[#allocation25 + $0x118] sm:$0xff] }
0x15f3   :  { %v7911_v43 = vpop.eup %7910 }
0x15f4   :  { %v7913_v45 = vpop.eup %7912 }
0x15f5   :  { %v7915_v58 = vpop.eup %7914  ;;  %v4195_v55 = vmul.f32 %v7913_v45, %v7911_v43  ;;  %v10415_v43 = vld [vmem:[#allocation25 + $0x138] sm:$0xff]  ;;  %v10418_v45 = vld [vmem:[#allocation25 + $0x120] sm:$0xff] }
0x15f6   :  { %v4194_v56 = vmul.f32 %v7915_v58, %v4192_v15  ;;  %v7917_v11 = vpop.eup %7916  ;;  %v10421_v15 = vld [vmem:[#allocation25 + $0x130] sm:$0xff]  ;;  %v10424_v58 = vld [vmem:[#allocation25 + $0x108] sm:$0xff] }
0x15f8   :  { %v10343_v59 = vadd.f32 %v4195_v55, %v4194_v56  ;;  %v10430_v55 = vld [vmem:[#allocation25 + $0x100] sm:$0xff]  ;;  %v10433_v56 = vld [vmem:[#allocation25 + $0x110] sm:$0xff] }
0x15fa   :  { %7918 = vtanh.f32 %v10343_v59 }
0x1607   :  { %v7919_v12 = vpop.eup %7918 }
0x1608   :  { %v4198_v14 = vmul.f32 %v7919_v12, %v7917_v11  ;;  %v10436_v11 = vld [vmem:[#allocation25 + $0xe8] sm:$0xff]  ;;  %v10439_v12 = vld [vmem:[#allocation25 + $0xf8] sm:$0xff] }
0x160a   :  { %4199 = vst [vmem:[#allocation3 + $0x18] sm:$0xc] %v4198_v14  ;;  %v4205_v19 = vrot.slane %v4198_v14, 2  ;;  %v10442_v14 = vld [vmem:[#allocation25 + $0xe0] sm:$0xff] }
0x160c   :  { %4272 = vmatmul.mubr.f32.vlgmr.msra.gmra.mxu0 %v4205_v19  ;;  %4343 = vmatmul.mubr.f32.vlgmr.msra.gmra.mxu1 %v4205_v19  ;;  %v10445_v19 = vld [vmem:[#allocation25 + $0xf0] sm:$0xff] }
0x160d   :  { %4386 = vmatpush1.msra.mxu0 %v10346_v22  ;;  %4457 = vmatpush1.msra.mxu1 %v10349_v44 }
0x160e   :  { %4387 = vmatprep.subr.mxu0 %v10352_v24  ;;  %4458 = vmatprep.subr.mxu1 %v10355_v27 }
0x160f   :  { %4388 = vmatpush1.msra.mxu0 %v10358_v52  ;;  %4459 = vmatpush1.msra.mxu1 %v10361_v28 }
0x1610   :  { %4389 = vmatprep.subr.mxu0 %v10364_v29  ;;  %4460 = vmatprep.subr.mxu1 %v10367_v53 }
0x1611   :  { %4390 = vmatpush1.msra.mxu0 %v10370_v30  ;;  %4461 = vmatpush1.msra.mxu1 %v10373_v31 }
0x1612   :  { %4391 = vmatprep.subr.mxu0 %v10376_v10  ;;  %4462 = vmatprep.subr.mxu1 %v10379_v16 }
0x1613   :  { %4392 = vmatpush1.msra.mxu0 %v10382_v49  ;;  %4463 = vmatpush1.msra.mxu1 %v10385_v17 }
0x1614   :  { %4393 = vmatprep.subr.mxu0 %v10388_v42  ;;  %4464 = vmatprep.subr.mxu1 %v10391_v20 }
0x1615   :  { %4394 = vmatpush1.msra.mxu0 %v10394_v54  ;;  %4465 = vmatpush1.msra.mxu1 %v10397_v38 }
0x1616   :  { %4395 = vmatprep.subr.mxu0 %v10400_v13  ;;  %4466 = vmatprep.subr.mxu1 %v10403_v60 }
0x1617   :  { %4396 = vmatpush1.msra.mxu0 %v10406_v21  ;;  %4467 = vmatpush1.msra.mxu1 %v10409_v51 }
0x1618   :  { %4397 = vmatprep.subr.mxu0 %v10412_v18  ;;  %4468 = vmatprep.subr.mxu1 %v10415_v43 }
0x1619   :  { %4398 = vmatpush1.msra.mxu0 %v10418_v45  ;;  %4469 = vmatpush1.msra.mxu1 %v10421_v15 }
0x161a   :  { %4399 = vmatprep.subr.mxu0 %v10424_v58  ;;  %4470 = vmatprep.subr.mxu1 %v10427_v50 }
0x161b   :  { %4400 = vmatpush1.msra.mxu0 %v10430_v55  ;;  %4471 = vmatpush1.msra.mxu1 %v10433_v56 }
0x161c   :  { %4401 = vmatprep.subr.mxu0 %v10436_v11  ;;  %4472 = vmatprep.subr.mxu1 %v10439_v12 }
0x161d   :  { %4402 = vmatpush1.msra.mxu0 %v10442_v14  ;;  %4473 = vmatpush1.msra.mxu1 %v10445_v19 }
0x161e   :  { %4403 = vmatprep.subr.mxu0 %v10035_v32  ;;  %4474 = vmatprep.subr.mxu1 %v10037_v33  ;;  %v10478_v32 = vld [vmem:[#allocation25 + $0x1e8] sm:$0xff]  ;;  %v10481_v33 = vld [vmem:[#allocation25 + $0x1f8] sm:$0xff] }
0x161f   :  { %4404 = vmatpush1.msra.mxu0 %v10041_v34  ;;  %4475 = vmatpush1.msra.mxu1 %v10043_v35  ;;  %12164 = vst [vmem:[#allocation40_spill] sm:$0xff] %v10478_v32  ;;  %12165 = vst [vmem:[#allocation45_spill] sm:$0xff] %v10481_v33  ;;  %v4200_v34 = vld [vmem:[#allocation2 + $0x8] sm:$0x3] }
0x1620   :  { %4405 = vmatprep.subr.mxu0 %v12114_v26  ;;  %4476 = vmatprep.subr.mxu1 %v12115_v37  ;;  %v4201_v37 = vld [vmem:[#allocation2 + $0x20] sm:$0x3] }
0x1621   :  { %4406 = vmatpush1.msra.mxu0 %v12116_v36  ;;  %4477 = vmatpush1.msra.mxu1 %v12117_v39 }
0x1622   :  { %4407 = vmatprep.subr.mxu0 %v12141_v41  ;;  %4478 = vmatprep.subr.mxu1 %v12142_v40 }
0x1623   :  { %4408 = vmatpush1.msra.mxu0 %v12143_v3  ;;  %4479 = vmatpush1.msra.mxu1 %v12144_v46 }
0x1624   :  { %4409 = vmatprep.subr.mxu0 %v12145_v48  ;;  %4480 = vmatprep.subr.mxu1 %v12146_v57  ;;  %v4203_v48 = vld [vmem:[#allocation2 + $0x38] sm:$0x3] }
0x1625   :  { %4410 = vmatpush1.msra.mxu0 %v12147_v47  ;;  %4481 = vmatpush1.msra.mxu1 %v12148_v61  ;;  %v4202_v61 = vld [vmem:[#allocation2 + $0x28] sm:$0x3] }
0x1626   :  { %4411 = vmatprep.subr.mxu0 %v12149_v62  ;;  %4482 = vmatprep.subr.mxu1 %v12150_v63 }
0x1627   :  { %4412 = vmatpush1.msra.mxu0 %v12151_v0  ;;  %4483 = vmatpush1.msra.mxu1 %v12152_v25 }
0x1628   :  { %4413 = vmatprep.subr.mxu0 %v12153_v1  ;;  %4484 = vmatprep.subr.mxu1 %v12154_v2 }
0x1629   :  { %4414 = vmatpush1.msra.mxu0 %v12155_v4  ;;  %4485 = vmatpush1.msra.mxu1 %v12156_v5 }
0x162a   :  { %4415 = vmatprep.subr.mxu0 %v12157_v23  ;;  %4486 = vmatprep.subr.mxu1 %v12158_v6  ;;  %v4373_v23 = vrot.slane %v10343_v59, 2  ;;  %v10522_v59 = vld [vmem:[#allocation25 + $0xc8] sm:$0xff] }
0x162b   :  { %4416 = vmatpush1.msra.mxu0 %v12159_v7  ;;  %4449 = vmatprep.mubr.f32.mxu0 %v12160_v8 }
0x162c   :  { %4487 = vmatpush1.msra.mxu1 %v12161_v9  ;;  %4520 = vmatprep.mubr.f32.mxu1 %v12160_v8 }
0x162d   :  { %4578 = vmatprep.subr.mxu0 %v10478_v32  ;;  %4649 = vmatprep.subr.mxu1 %v10481_v33 }
0x16cc   :  { %v4273_v35 = vpop.f32.mrf.mxu0  ;;  %v4344_v40 = vpop.f32.mrf.mxu1 }
0x16cd   :  { %v4349_v26 = vadd.f32 %v4273_v35, %v4200_v34  ;;  %v4351_v63 = vadd.f32 %v4344_v40, %v4202_v61  ;;  %v10531_v40 = vld [vmem:[#allocation25 + $0xd0] sm:$0xff]  ;;  %v10549_v61 = vld [vmem:[#allocation25 + $0x98] sm:$0xff] }
0x16ce   :  { %v4275_v36 = vpop.f32.mrf.mxu0  ;;  %v4346_v46 = vpop.f32.mrf.mxu1  ;;  %12167 = vst [vmem:[#allocation47_spill] sm:$0xff] %v10549_v61 }
0x16cf   :  { %v7456_v39 = vmul.f32 -1.442695, %v4349_v26  ;;  %v4350_v41 = vadd.f32 %v4275_v36, %v4201_v37  ;;  %v4352_v57 = vadd.f32 %v4346_v46, %v4203_v48  ;;  %v10537_v46 = vld [vmem:[#allocation25 + $0xb8] sm:$0xff]  ;;  %v10540_v48 = vld [vmem:[#allocation25 + $0xa0] sm:$0xff] }
0x16d1   :  { %7920 = vpow2.f32 %v7456_v39  ;;  %v7457_v3 = vmul.f32 -1.442695, %v4350_v41  ;;  %v7458_v47 = vmul.f32 -1.442695, %v4352_v57  ;;  %v10525_v39 = vld [vmem:[#allocation25 + $0xd8] sm:$0xff]  ;;  %v10528_v41 = vld [vmem:[#allocation25 + $0xc0] sm:$0xff] }
0x16d2   :  { %v10543_v57 = vld [vmem:[#allocation25 + $0xb0] sm:$0xff] }
0x16d3   :  { %7922 = vpow2.f32 %v7457_v3  ;;  %v10534_v3 = vld [vmem:[#allocation25 + $0xa8] sm:$0xff] }
0x16d4   :  { %7924 = vpow2.f32 %v7458_v47  ;;  %v10546_v47 = vld [vmem:[#allocation25 + $0x88] sm:$0xff] }
0x16d5   :  { %12166 = vst [vmem:[#allocation46_spill] sm:$0xff] %v10546_v47 }
0x16de   :  { %v7921_v62 = vpop.eup %7920 }
0x16df   :  { %v4356_v0 = vadd.f32 1.0, %v7921_v62  ;;  %v10552_v62 = vld [vmem:[#allocation25 + $0x80] sm:$0xff] }
0x16e0   :  { %v7923_v25 = vpop.eup %7922  ;;  %12168 = vst [vmem:[#allocation48_spill] sm:$0xff] %v10552_v62 }
0x16e1   :  { %7926 = vrcp.f32 %v4356_v0  ;;  %v4362_v1 = vadd.f32 1.0, %v7923_v25  ;;  %v7925_v2 = vpop.eup %7924  ;;  %v10558_v0 = vld [vmem:[#allocation25 + $0x68] sm:$0xff]  ;;  %v10561_v25 = vld [vmem:[#allocation25 + $0x78] sm:$0xff] }
0x16e2   :  { %7928 = vtanh.f32 %v4351_v63  ;;  %v4369_v7 = vadd.f32 1.0, %v7925_v2  ;;  %v10555_v63 = vld [vmem:[#allocation25 + $0x90] sm:$0xff]  ;;  %12170 = vst [vmem:[#allocation50_spill] sm:$0xff] %v10558_v0  ;;  %12171 = vst [vmem:[#allocation51_spill] sm:$0xff] %v10561_v25 }
0x16e3   :  { %7930 = vrcp.f32 %v4362_v1  ;;  %12169 = vst [vmem:[#allocation49_spill] sm:$0xff] %v10555_v63  ;;  %v10564_v1 = vld [vmem:[#allocation25 + $0x60] sm:$0xff]  ;;  %v10567_v2 = vld [vmem:[#allocation25 + $0x70] sm:$0xff] }
0x16e4   :  { %7932 = vrcp.f32 %v4369_v7  ;;  %12172 = vst [vmem:[#allocation52_spill] sm:$0xff] %v10564_v1  ;;  %12173 = vst [vmem:[#allocation53_spill] sm:$0xff] %v10567_v2  ;;  %v10582_v7 = vld [vmem:[#allocation25 + $0x28] sm:$0xff] }
0x16e5   :  { %12178 = vst [vmem:[#allocation58_spill] sm:$0xff] %v10582_v7 }
0x16ee   :  { %v7927_v4 = vpop.eup %7926 }
0x16ef   :  { %v7929_v5 = vpop.eup %7928 }
0x16f0   :  { %v7931_v6 = vpop.eup %7930  ;;  %v4376_v9 = vmul.f32 %v7929_v5, %v7927_v4  ;;  %v10570_v4 = vld [vmem:[#allocation25 + $0x48] sm:$0xff]  ;;  %v10573_v5 = vld [vmem:[#allocation25 + $0x58] sm:$0xff] }
0x16f1   :  { %v4375_v34 = vmul.f32 %v7931_v6, %v4373_v23  ;;  %v7933_v26 = vpop.eup %7932  ;;  %12174 = vst [vmem:[#allocation54_spill] sm:$0xff] %v10570_v4  ;;  %12175 = vst [vmem:[#allocation55_spill] sm:$0xff] %v10573_v5  ;;  %v10576_v23 = vld [vmem:[#allocation25 + $0x40] sm:$0xff]  ;;  %v10579_v6 = vld [vmem:[#allocation25 + $0x50] sm:$0xff] }
0x16f2   :  { %12176 = vst [vmem:[#allocation56_spill] sm:$0xff] %v10576_v23  ;;  %12177 = vst [vmem:[#allocation57_spill] sm:$0xff] %v10579_v6 }
0x16f3   :  { %v10485_v35 = vadd.f32 %v4376_v9, %v4375_v34  ;;  %v10585_v9 = vld [vmem:[#allocation25 + $0x38] sm:$0xff]  ;;  %v10588_v34 = vld [vmem:[#allocation25 + $0x20] sm:$0xff] }
0x16f4   :  { %12179 = vst [vmem:[#allocation59_spill] sm:$0xff] %v10585_v9  ;;  %12180 = vst [vmem:[#allocation60_spill] sm:$0xff] %v10588_v34 }
0x16f5   :  { %7934 = vtanh.f32 %v10485_v35 }
0x1702   :  { %v7935_v37 = vpop.eup %7934 }
0x1703   :  { %v4379_v36 = vmul.f32 %v7935_v37, %v7933_v26  ;;  %v10591_v26 = vld [vmem:[#allocation25 + $0x30] sm:$0xff]  ;;  %v10594_v37 = vld [vmem:[#allocation25 + $0x8] sm:$0xff] }
0x1704   :  { %12181 = vst [vmem:[#allocation61_spill] sm:$0xff] %v10591_v26  ;;  %12182 = vst [vmem:[#allocation62_spill] sm:$0xff] %v10594_v37 }
0x1705   :  { %4380 = vst [vmem:[#allocation3 + $0x18] sm:$0x3] %v4379_v36  ;;  %4450 = vmatmul.mubr.f32.vlgmr.msra.gmra.mxu0 %v4379_v36  ;;  %4521 = vmatmul.mubr.f32.vlgmr.msra.gmra.mxu1 %v4379_v36  ;;  %v10597_v36 = vld [vmem:[#allocation25 + $0x18] sm:$0xff] }
0x1706   :  { %4579 = vmatpush1.msra.mxu0 %v10346_v22  ;;  %4650 = vmatpush1.msra.mxu1 %v10349_v44  ;;  %12183 = vst [vmem:[#allocation63_spill] sm:$0xff] %v10597_v36 }
0x1707   :  { %4580 = vmatprep.subr.mxu0 %v10352_v24  ;;  %4651 = vmatprep.subr.mxu1 %v10355_v27 }
0x1708   :  { %4581 = vmatpush1.msra.mxu0 %v10358_v52  ;;  %4652 = vmatpush1.msra.mxu1 %v10361_v28 }
0x1709   :  { %4582 = vmatprep.subr.mxu0 %v10364_v29  ;;  %4653 = vmatprep.subr.mxu1 %v10367_v53 }
0x170a   :  { %4583 = vmatpush1.msra.mxu0 %v10370_v30  ;;  %4654 = vmatpush1.msra.mxu1 %v10373_v31 }
0x170b   :  { %4584 = vmatprep.subr.mxu0 %v10376_v10  ;;  %4655 = vmatprep.subr.mxu1 %v10379_v16 }
0x170c   :  { %4585 = vmatpush1.msra.mxu0 %v10382_v49  ;;  %4656 = vmatpush1.msra.mxu1 %v10385_v17 }
0x170d   :  { %4586 = vmatprep.subr.mxu0 %v10388_v42  ;;  %4657 = vmatprep.subr.mxu1 %v10391_v20 }
0x170e   :  { %4587 = vmatpush1.msra.mxu0 %v10394_v54  ;;  %4658 = vmatpush1.msra.mxu1 %v10397_v38 }
0x170f   :  { %4588 = vmatprep.subr.mxu0 %v10400_v13  ;;  %4659 = vmatprep.subr.mxu1 %v10403_v60 }
0x1710   :  { %4589 = vmatpush1.msra.mxu0 %v10406_v21  ;;  %4660 = vmatpush1.msra.mxu1 %v10409_v51 }
0x1711   :  { %4590 = vmatprep.subr.mxu0 %v10412_v18  ;;  %4661 = vmatprep.subr.mxu1 %v10415_v43 }
0x1712   :  { %4591 = vmatpush1.msra.mxu0 %v10418_v45  ;;  %4662 = vmatpush1.msra.mxu1 %v10421_v15 }
0x1713   :  { %4592 = vmatprep.subr.mxu0 %v10424_v58  ;;  %4663 = vmatprep.subr.mxu1 %v10427_v50 }
0x1714   :  { %4593 = vmatpush1.msra.mxu0 %v10430_v55  ;;  %4664 = vmatpush1.msra.mxu1 %v10433_v56 }
0x1715   :  { %4594 = vmatprep.subr.mxu0 %v10436_v11  ;;  %4665 = vmatprep.subr.mxu1 %v10439_v12 }
0x1716   :  { %4595 = vmatpush1.msra.mxu0 %v10442_v14  ;;  %4666 = vmatpush1.msra.mxu1 %v10445_v19 }
0x1717   :  { %4596 = vmatprep.subr.mxu0 %v10522_v59  ;;  %4667 = vmatprep.subr.mxu1 %v10525_v39 }
0x1718   :  { %4597 = vmatpush1.msra.mxu0 %v10528_v41  ;;  %4668 = vmatpush1.msra.mxu1 %v10531_v40 }
0x1719   :  { %4598 = vmatprep.subr.mxu0 %v10534_v3  ;;  %4669 = vmatprep.subr.mxu1 %v10537_v46 }
0x171a   :  { %4599 = vmatpush1.msra.mxu0 %v10540_v48  ;;  %4670 = vmatpush1.msra.mxu1 %v10543_v57 }
0x171b   :  { %4600 = vmatprep.subr.mxu0 %v10546_v47  ;;  %4671 = vmatprep.subr.mxu1 %v10549_v61 }
0x171c   :  { %4601 = vmatpush1.msra.mxu0 %v10552_v62  ;;  %4672 = vmatpush1.msra.mxu1 %v10555_v63 }
0x171d   :  { %4602 = vmatprep.subr.mxu0 %v10558_v0  ;;  %4673 = vmatprep.subr.mxu1 %v10561_v25 }
0x171e   :  { %4603 = vmatpush1.msra.mxu0 %v10564_v1  ;;  %4674 = vmatpush1.msra.mxu1 %v10567_v2 }
0x171f   :  { %4604 = vmatprep.subr.mxu0 %v10570_v4  ;;  %4675 = vmatprep.subr.mxu1 %v10573_v5 }
0x1720   :  { %4605 = vmatpush1.msra.mxu0 %v10576_v23  ;;  %4676 = vmatpush1.msra.mxu1 %v10579_v6 }
0x1721   :  { %4606 = vmatprep.subr.mxu0 %v10582_v7  ;;  %4677 = vmatprep.subr.mxu1 %v10585_v9  ;;  %v10600_v7 = vld [vmem:[#allocation25] sm:$0xff]  ;;  %v10604_v9 = vld [vmem:[#allocation25 + $0x10] sm:$0xff] }
0x1722   :  { %4607 = vmatpush1.msra.mxu0 %v10588_v34  ;;  %4678 = vmatpush1.msra.mxu1 %v10591_v26  ;;  %12184 = vst [vmem:[#allocation42_spill] sm:$0xff] %v10600_v7  ;;  %12185 = vst [vmem:[#allocation43_spill] sm:$0xff] %v10604_v9  ;;  %v4381_v34 = vld [vmem:[#allocation2 + $0x30] sm:$0xc0] }
0x1723   :  { %4608 = vmatprep.subr.mxu0 %v10594_v37  ;;  %4679 = vmatprep.subr.mxu1 %v10597_v36 }
0x1724   :  { %4609 = vmatpush1.msra.mxu0 %v10600_v7  ;;  %4642 = vmatprep.mubr.f32.mxu0 %v12160_v8  ;;  %v4382_v7 = vld [vmem:[#allocation2] sm:$0xc0] }
0x1725   :  { %4680 = vmatpush1.msra.mxu1 %v10604_v9  ;;  %4713 = vmatprep.mubr.f32.mxu1 %v12160_v8  ;;  %v4384_v8 = vld [vmem:[#allocation2 + $0x10] sm:$0xc0] }
0x1726   :  { %4771 = vmatprep.subr.mxu0 %v10478_v32  ;;  %4842 = vmatprep.subr.mxu1 %v10481_v33  ;;  %v4383_v33 = vld [vmem:[#allocation2 + $0x18] sm:$0xc0] }
0x17c5   :  { %v4451_v37 = vpop.f32.mrf.mxu0  ;;  %v4522_v23 = vpop.f32.mrf.mxu1 }
0x17c6   :  { %v4531_v26 = vrot.slane %v4451_v37, 2  ;;  %v4533_v32 = vrot.slane %v4522_v23, 2 }
0x17c7   :  { %v4453_v36 = vpop.f32.mrf.mxu0  ;;  %v4524_v25 = vpop.f32.mrf.mxu1 }
0x17c8   :  { %v4539_v6 = vadd.f32 %v4531_v26, %v4381_v34  ;;  %v4532_v5 = vrot.slane %v4453_v36, 2  ;;  %v4534_v9 = vrot.slane %v4524_v25, 2  ;;  %v4541_v37 = vadd.f32 %v4533_v32, %v4383_v33  ;;  %v12191_v26 = vld [vmem:[#allocation51_spill] sm:$0xff]  ;;  %v12192_v36 = vld [vmem:[#allocation52_spill] sm:$0xff] }
0x17ca   :  { %v7459_v4 = vmul.f32 -1.442695, %v4539_v6  ;;  %v4540_v2 = vadd.f32 %v4532_v5, %v4382_v7  ;;  %v4542_v0 = vadd.f32 %v4534_v9, %v4384_v8  ;;  %v12189_v7 = vld [vmem:[#allocation49_spill] sm:$0xff]  ;;  %v12190_v9 = vld [vmem:[#allocation50_spill] sm:$0xff] }
0x17cc   :  { %7936 = vpow2.f32 %v7459_v4  ;;  %v7460_v1 = vmul.f32 -1.442695, %v4540_v2  ;;  %v7461_v63 = vmul.f32 -1.442695, %v4542_v0 }
0x17ce   :  { %7938 = vpow2.f32 %v7460_v1  ;;  %v4563_v1 = vrot.slane %v10485_v35, 2  ;;  %v12186_v35 = vld [vmem:[#allocation46_spill] sm:$0xff] }
0x17cf   :  { %7940 = vpow2.f32 %v7461_v63  ;;  %v12188_v63 = vld [vmem:[#allocation48_spill] sm:$0xff] }
0x17d9   :  { %v7937_v62 = vpop.eup %7936 }
0x17da   :  { %v4546_v61 = vadd.f32 1.0, %v7937_v62  ;;  %v12187_v62 = vld [vmem:[#allocation47_spill] sm:$0xff] }
0x17db   :  { %v7939_v47 = vpop.eup %7938 }
0x17dc   :  { %7942 = vrcp.f32 %v4546_v61  ;;  %v4552_v34 = vadd.f32 1.0, %v7939_v47  ;;  %v7941_v5 = vpop.eup %7940 }
0x17dd   :  { %7944 = vtanh.f32 %v4541_v37  ;;  %v4559_v6 = vadd.f32 1.0, %v7941_v5  ;;  %v12193_v37 = vld [vmem:[#allocation53_spill] sm:$0xff]  ;;  %v12195_v5 = vld [vmem:[#allocation55_spill] sm:$0xff] }
0x17de   :  { %7946 = vrcp.f32 %v4552_v34  ;;  %v12194_v34 = vld [vmem:[#allocation54_spill] sm:$0xff] }
0x17df   :  { %7948 = vrcp.f32 %v4559_v6  ;;  %v12200_v6 = vld [vmem:[#allocation60_spill] sm:$0xff] }
0x17e9   :  { %v7943_v4 = vpop.eup %7942 }
0x17ea   :  { %v7945_v2 = vpop.eup %7944 }
0x17eb   :  { %v7947_v25 = vpop.eup %7946  ;;  %v4566_v8 = vmul.f32 %v7945_v2, %v7943_v4  ;;  %v12196_v4 = vld [vmem:[#allocation56_spill] sm:$0xff]  ;;  %v12197_v2 = vld [vmem:[#allocation57_spill] sm:$0xff] }
0x17ec   :  { %v4565_v23 = vmul.f32 %v7947_v25, %v4563_v1  ;;  %v7949_v32 = vpop.eup %7948  ;;  %v12198_v1 = vld [vmem:[#allocation58_spill] sm:$0xff]  ;;  %v12199_v25 = vld [vmem:[#allocation59_spill] sm:$0xff] }
0x17ee   :  { %v10611_v0 = vadd.f32 %v4566_v8, %v4565_v23  ;;  %v12201_v8 = vld [vmem:[#allocation61_spill] sm:$0xff]  ;;  %v12202_v23 = vld [vmem:[#allocation62_spill] sm:$0xff] }
0x17f0   :  { %7950 = vtanh.f32 %v10611_v0 }
0x17fd   :  { %v7951_v33 = vpop.eup %7950 }
0x17fe   :  { %v4569_v61 = vmul.f32 %v7951_v33, %v7949_v32  ;;  %v12203_v32 = vld [vmem:[#allocation63_spill] sm:$0xff]  ;;  %v12204_v33 = vld [vmem:[#allocation42_spill] sm:$0xff] }
0x1800   :  { %4570 = vst [vmem:[#allocation3 + $0x10] sm:$0xc0] %v4569_v61  ;;  %v4576_v47 = vrot.slane %v4569_v61, 6  ;;  %v12205_v61 = vmov 0.0  }
0x1802   :  { %4643 = vmatmul.mubr.f32.vlgmr.msra.gmra.mxu0 %v4576_v47  ;;  %4714 = vmatmul.mubr.f32.vlgmr.msra.gmra.mxu1 %v4576_v47  ;;  %v12206_v47 = vld [vmem:[#allocation43_spill] sm:$0xff] }
0x1803   :  { %4772 = vmatpush1.msra.mxu0 %v10346_v22  ;;  %4843 = vmatpush1.msra.mxu1 %v10349_v44 }
0x1804   :  { %4773 = vmatprep.subr.mxu0 %v10352_v24  ;;  %4844 = vmatprep.subr.mxu1 %v10355_v27 }
0x1805   :  { %4774 = vmatpush1.msra.mxu0 %v10358_v52  ;;  %4845 = vmatpush1.msra.mxu1 %v10361_v28 }
0x1806   :  { %4775 = vmatprep.subr.mxu0 %v10364_v29  ;;  %4846 = vmatprep.subr.mxu1 %v10367_v53 }
0x1807   :  { %4776 = vmatpush1.msra.mxu0 %v10370_v30  ;;  %4847 = vmatpush1.msra.mxu1 %v10373_v31 }
0x1808   :  { %4777 = vmatprep.subr.mxu0 %v10376_v10  ;;  %4848 = vmatprep.subr.mxu1 %v10379_v16 }
0x1809   :  { %4778 = vmatpush1.msra.mxu0 %v10382_v49  ;;  %4849 = vmatpush1.msra.mxu1 %v10385_v17 }
0x180a   :  { %4779 = vmatprep.subr.mxu0 %v10388_v42  ;;  %4850 = vmatprep.subr.mxu1 %v10391_v20 }
0x180b   :  { %4780 = vmatpush1.msra.mxu0 %v10394_v54  ;;  %4851 = vmatpush1.msra.mxu1 %v10397_v38 }
0x180c   :  { %4781 = vmatprep.subr.mxu0 %v10400_v13  ;;  %4852 = vmatprep.subr.mxu1 %v10403_v60 }
0x180d   :  { %4782 = vmatpush1.msra.mxu0 %v10406_v21  ;;  %4853 = vmatpush1.msra.mxu1 %v10409_v51 }
0x180e   :  { %4783 = vmatprep.subr.mxu0 %v10412_v18  ;;  %4854 = vmatprep.subr.mxu1 %v10415_v43 }
0x180f   :  { %4784 = vmatpush1.msra.mxu0 %v10418_v45  ;;  %4855 = vmatpush1.msra.mxu1 %v10421_v15 }
0x1810   :  { %4785 = vmatprep.subr.mxu0 %v10424_v58  ;;  %4856 = vmatprep.subr.mxu1 %v10427_v50 }
0x1811   :  { %4786 = vmatpush1.msra.mxu0 %v10430_v55  ;;  %4857 = vmatpush1.msra.mxu1 %v10433_v56 }
0x1812   :  { %4787 = vmatprep.subr.mxu0 %v10436_v11  ;;  %4858 = vmatprep.subr.mxu1 %v10439_v12 }
0x1813   :  { %4788 = vmatpush1.msra.mxu0 %v10442_v14  ;;  %4859 = vmatpush1.msra.mxu1 %v10445_v19 }
0x1814   :  { %4789 = vmatprep.subr.mxu0 %v10522_v59  ;;  %4860 = vmatprep.subr.mxu1 %v10525_v39 }
0x1815   :  { %4790 = vmatpush1.msra.mxu0 %v10528_v41  ;;  %4861 = vmatpush1.msra.mxu1 %v10531_v40 }
0x1816   :  { %4791 = vmatprep.subr.mxu0 %v10534_v3  ;;  %4862 = vmatprep.subr.mxu1 %v10537_v46 }
0x1817   :  { %4792 = vmatpush1.msra.mxu0 %v10540_v48  ;;  %4863 = vmatpush1.msra.mxu1 %v10543_v57 }
0x1818   :  { %4793 = vmatprep.subr.mxu0 %v12186_v35  ;;  %4864 = vmatprep.subr.mxu1 %v12187_v62 }
0x1819   :  { %4794 = vmatpush1.msra.mxu0 %v12188_v63  ;;  %4865 = vmatpush1.msra.mxu1 %v12189_v7 }
0x181a   :  { %4795 = vmatprep.subr.mxu0 %v12190_v9  ;;  %4866 = vmatprep.subr.mxu1 %v12191_v26 }
0x181b   :  { %4796 = vmatpush1.msra.mxu0 %v12192_v36  ;;  %4867 = vmatpush1.msra.mxu1 %v12193_v37 }
0x181c   :  { %4797 = vmatprep.subr.mxu0 %v12194_v34  ;;  %4868 = vmatprep.subr.mxu1 %v12195_v5 }
0x181d   :  { %4798 = vmatpush1.msra.mxu0 %v12196_v4  ;;  %4869 = vmatpush1.msra.mxu1 %v12197_v2  ;;  %v12207_v2 = vld [vmem:[#allocation40_spill] sm:$0xff]  ;;  %v4571_v4 = vld [vmem:[#allocation2 + $0x30] sm:$0x30] }
0x181e   :  { %4799 = vmatprep.subr.mxu0 %v12198_v1  ;;  %4870 = vmatprep.subr.mxu1 %v12199_v25  ;;  %v12208_v1 = vld [vmem:[#allocation45_spill] sm:$0xff] }
0x181f   :  { %4800 = vmatpush1.msra.mxu0 %v12200_v6  ;;  %4871 = vmatpush1.msra.mxu1 %v12201_v8 }
0x1820   :  { %4801 = vmatprep.subr.mxu0 %v12202_v23  ;;  %4872 = vmatprep.subr.mxu1 %v12203_v32  ;;  %v4572_v32 = vld [vmem:[#allocation2] sm:$0x30] }
0x1821   :  { %4802 = vmatpush1.msra.mxu0 %v12204_v33  ;;  %4835 = vmatprep.mubr.f32.mxu0 %v12205_v61 }
0x1822   :  { %4873 = vmatpush1.msra.mxu1 %v12206_v47  ;;  %4906 = vmatprep.mubr.f32.mxu1 %v12205_v61  ;;  %v4574_v61 = vld [vmem:[#allocation2 + $0x10] sm:$0x30] }
0x1823   :  { %4964 = vmatprep.subr.mxu0 %v12207_v2  ;;  %5035 = vmatprep.subr.mxu1 %v12208_v1  ;;  %v4573_v1 = vld [vmem:[#allocation2 + $0x18] sm:$0x30] }
0x18c2   :  { %v4644_v25 = vpop.f32.mrf.mxu0  ;;  %v4715_v23 = vpop.f32.mrf.mxu1 }
0x18c3   :  { %v4724_v6 = vrot.slane %v4644_v25, 4  ;;  %v4726_v2 = vrot.slane %v4715_v23, 4 }
0x18c4   :  { %v4646_v8 = vpop.f32.mrf.mxu0  ;;  %v4717_v26 = vpop.f32.mrf.mxu1 }
0x18c5   :  { %v4732_v5 = vadd.f32 %v4724_v6, %v4571_v4  ;;  %v4725_v34 = vrot.slane %v4646_v8, 4  ;;  %v4727_v47 = vrot.slane %v4717_v26, 4  ;;  %v4734_v25 = vadd.f32 %v4726_v2, %v4573_v1 }
0x18c7   :  { %v7462_v37 = vmul.f32 -1.442695, %v4732_v5  ;;  %v4733_v33 = vadd.f32 %v4725_v34, %v4572_v32  ;;  %v4735_v9 = vadd.f32 %v4727_v47, %v4574_v61 }
0x18c9   :  { %7952 = vpow2.f32 %v7462_v37  ;;  %v7463_v36 = vmul.f32 -1.442695, %v4733_v33  ;;  %v7464_v7 = vmul.f32 -1.442695, %v4735_v9 }
0x18cb   :  { %7954 = vpow2.f32 %v7463_v36  ;;  %v4756_v36 = vrot.slane %v10611_v0, 2 }
0x18cc   :  { %7956 = vpow2.f32 %v7464_v7 }
0x18d6   :  { %v7953_v63 = vpop.eup %7952 }
0x18d7   :  { %v4739_v62 = vadd.f32 1.0, %v7953_v63 }
0x18d8   :  { %v7955_v35 = vpop.eup %7954 }
0x18d9   :  { %7958 = vrcp.f32 %v4739_v62  ;;  %v4745_v4 = vadd.f32 1.0, %v7955_v35  ;;  %v7957_v34 = vpop.eup %7956 }
0x18da   :  { %7960 = vtanh.f32 %v4734_v25  ;;  %v4752_v6 = vadd.f32 1.0, %v7957_v34 }
0x18db   :  { %7962 = vrcp.f32 %v4745_v4 }
0x18dc   :  { %7964 = vrcp.f32 %v4752_v6 }
0x18e6   :  { %v7959_v37 = vpop.eup %7958 }
0x18e7   :  { %v7961_v5 = vpop.eup %7960 }
0x18e8   :  { %v7963_v26 = vpop.eup %7962  ;;  %v4759_v8 = vmul.f32 %v7961_v5, %v7959_v37 }
0x18e9   :  { %v4758_v23 = vmul.f32 %v7963_v26, %v4756_v36  ;;  %v7965_v63 = vpop.eup %7964 }
0x18eb   :  { %v10681_v9 = vadd.f32 %v4759_v8, %v4758_v23  ;;  %v5203_v8 = vld [vmem:[#allocation27 + $0x1e8] sm:$0xff]  ;;  %v5205_v23 = vld [vmem:[#allocation27 + $0x1f8] sm:$0xff] }
0x18ed   :  { %7966 = vtanh.f32 %v10681_v9  ;;  %v4949_v2 = vrot.slane %v10681_v9, 2  ;;  %v5202_v9 = vld [vmem:[#allocation27 + $0x1e0] sm:$0xff] }
0x18fa   :  { %v7967_v7 = vpop.eup %7966 }
0x18fb   :  { %v4762_v62 = vmul.f32 %v7967_v7, %v7965_v63  ;;  %v5204_v63 = vld [vmem:[#allocation27 + $0x1f0] sm:$0xff]  ;;  %v5199_v7 = vld [vmem:[#allocation27 + $0x1c8] sm:$0xff] }
0x18fd   :  { %4763 = vst [vmem:[#allocation3 + $0x10] sm:$0x30] %v4762_v62  ;;  %v4769_v35 = vrot.slane %v4762_v62, 4  ;;  %v5201_v62 = vld [vmem:[#allocation27 + $0x1d8] sm:$0xff] }
0x18ff   :  { %4836 = vmatmul.mubr.f32.vlgmr.msra.gmra.mxu0 %v4769_v35  ;;  %4907 = vmatmul.mubr.f32.vlgmr.msra.gmra.mxu1 %v4769_v35  ;;  %v5198_v35 = vld [vmem:[#allocation27 + $0x1c0] sm:$0xff] }
0x1900   :  { %4965 = vmatpush1.msra.mxu0 %v10346_v22  ;;  %5036 = vmatpush1.msra.mxu1 %v10349_v44  ;;  %v12209_v22 = vld [vmem:[#allocation46_spill] sm:$0xff]  ;;  %v12210_v44 = vld [vmem:[#allocation47_spill] sm:$0xff] }
0x1901   :  { %4966 = vmatprep.subr.mxu0 %v10352_v24  ;;  %5037 = vmatprep.subr.mxu1 %v10355_v27  ;;  %v12211_v24 = vld [vmem:[#allocation48_spill] sm:$0xff]  ;;  %v12212_v27 = vld [vmem:[#allocation49_spill] sm:$0xff] }
0x1902   :  { %4967 = vmatpush1.msra.mxu0 %v10358_v52  ;;  %5038 = vmatpush1.msra.mxu1 %v10361_v28  ;;  %v12213_v52 = vld [vmem:[#allocation50_spill] sm:$0xff]  ;;  %v12214_v28 = vld [vmem:[#allocation51_spill] sm:$0xff] }
0x1903   :  { %4968 = vmatprep.subr.mxu0 %v10364_v29  ;;  %5039 = vmatprep.subr.mxu1 %v10367_v53  ;;  %v12215_v29 = vld [vmem:[#allocation52_spill] sm:$0xff]  ;;  %v12216_v53 = vld [vmem:[#allocation53_spill] sm:$0xff] }
0x1904   :  { %4969 = vmatpush1.msra.mxu0 %v10370_v30  ;;  %5040 = vmatpush1.msra.mxu1 %v10373_v31  ;;  %v12217_v30 = vld [vmem:[#allocation54_spill] sm:$0xff]  ;;  %v12218_v31 = vld [vmem:[#allocation55_spill] sm:$0xff] }
0x1905   :  { %4970 = vmatprep.subr.mxu0 %v10376_v10  ;;  %5041 = vmatprep.subr.mxu1 %v10379_v16  ;;  %v12219_v10 = vld [vmem:[#allocation56_spill] sm:$0xff]  ;;  %v12220_v16 = vld [vmem:[#allocation57_spill] sm:$0xff] }
0x1906   :  { %4971 = vmatpush1.msra.mxu0 %v10382_v49  ;;  %5042 = vmatpush1.msra.mxu1 %v10385_v17  ;;  %v12221_v49 = vld [vmem:[#allocation58_spill] sm:$0xff]  ;;  %v12222_v17 = vld [vmem:[#allocation59_spill] sm:$0xff] }
0x1907   :  { %4972 = vmatprep.subr.mxu0 %v10388_v42  ;;  %5043 = vmatprep.subr.mxu1 %v10391_v20  ;;  %v12223_v42 = vld [vmem:[#allocation60_spill] sm:$0xff]  ;;  %v12224_v20 = vld [vmem:[#allocation61_spill] sm:$0xff] }
0x1908   :  { %4973 = vmatpush1.msra.mxu0 %v10394_v54  ;;  %5044 = vmatpush1.msra.mxu1 %v10397_v38  ;;  %v12225_v54 = vld [vmem:[#allocation62_spill] sm:$0xff]  ;;  %v12226_v38 = vld [vmem:[#allocation63_spill] sm:$0xff] }
0x1909   :  { %4974 = vmatprep.subr.mxu0 %v10400_v13  ;;  %5045 = vmatprep.subr.mxu1 %v10403_v60  ;;  %v12227_v13 = vld [vmem:[#allocation42_spill] sm:$0xff]  ;;  %v12228_v60 = vmov 0.0  }
0x190a   :  { %4975 = vmatpush1.msra.mxu0 %v10406_v21  ;;  %5046 = vmatpush1.msra.mxu1 %v10409_v51  ;;  %v12229_v21 = vld [vmem:[#allocation43_spill] sm:$0xff] }
0x190b   :  { %4976 = vmatprep.subr.mxu0 %v10412_v18  ;;  %5047 = vmatprep.subr.mxu1 %v10415_v43  ;;  %v4764_v43 = vld [vmem:[#allocation2 + $0x30] sm:$0xc] }
0x190c   :  { %4977 = vmatpush1.msra.mxu0 %v10418_v45  ;;  %5048 = vmatpush1.msra.mxu1 %v10421_v15 }
0x190d   :  { %4978 = vmatprep.subr.mxu0 %v10424_v58  ;;  %5049 = vmatprep.subr.mxu1 %v10427_v50 }
0x190e   :  { %4979 = vmatpush1.msra.mxu0 %v10430_v55  ;;  %5050 = vmatpush1.msra.mxu1 %v10433_v56  ;;  %v4765_v55 = vld [vmem:[#allocation2] sm:$0xc] }
0x190f   :  { %4980 = vmatprep.subr.mxu0 %v10436_v11  ;;  %5051 = vmatprep.subr.mxu1 %v10439_v12 }
0x1910   :  { %4981 = vmatpush1.msra.mxu0 %v10442_v14  ;;  %5052 = vmatpush1.msra.mxu1 %v10445_v19 }
0x1911   :  { %4982 = vmatprep.subr.mxu0 %v10522_v59  ;;  %5053 = vmatprep.subr.mxu1 %v10525_v39  ;;  %v4767_v59 = vld [vmem:[#allocation2 + $0x10] sm:$0xc] }
0x1912   :  { %4983 = vmatpush1.msra.mxu0 %v10528_v41  ;;  %5054 = vmatpush1.msra.mxu1 %v10531_v40 }
0x1913   :  { %4984 = vmatprep.subr.mxu0 %v10534_v3  ;;  %5055 = vmatprep.subr.mxu1 %v10537_v46  ;;  %v4766_v3 = vld [vmem:[#allocation2 + $0x18] sm:$0xc] }
0x1914   :  { %4985 = vmatpush1.msra.mxu0 %v10540_v48  ;;  %5056 = vmatpush1.msra.mxu1 %v10543_v57 }
0x1915   :  { %4986 = vmatprep.subr.mxu0 %v12209_v22  ;;  %5057 = vmatprep.subr.mxu1 %v12210_v44  ;;  %v5200_v22 = vld [vmem:[#allocation27 + $0x1d0] sm:$0xff]  ;;  %v5195_v44 = vld [vmem:[#allocation27 + $0x1a8] sm:$0xff] }
0x1916   :  { %4987 = vmatpush1.msra.mxu0 %v12211_v24  ;;  %5058 = vmatpush1.msra.mxu1 %v12212_v27  ;;  %v5197_v24 = vld [vmem:[#allocation27 + $0x1b8] sm:$0xff]  ;;  %v5194_v27 = vld [vmem:[#allocation27 + $0x1a0] sm:$0xff] }
0x1917   :  { %4988 = vmatprep.subr.mxu0 %v12213_v52  ;;  %5059 = vmatprep.subr.mxu1 %v12214_v28  ;;  %v5196_v52 = vld [vmem:[#allocation27 + $0x1b0] sm:$0xff]  ;;  %v5191_v28 = vld [vmem:[#allocation27 + $0x188] sm:$0xff] }
0x1918   :  { %4989 = vmatpush1.msra.mxu0 %v12215_v29  ;;  %5060 = vmatpush1.msra.mxu1 %v12216_v53  ;;  %v5193_v29 = vld [vmem:[#allocation27 + $0x198] sm:$0xff]  ;;  %v5190_v53 = vld [vmem:[#allocation27 + $0x180] sm:$0xff] }
0x1919   :  { %4990 = vmatprep.subr.mxu0 %v12217_v30  ;;  %5061 = vmatprep.subr.mxu1 %v12218_v31  ;;  %v5192_v30 = vld [vmem:[#allocation27 + $0x190] sm:$0xff]  ;;  %v5187_v31 = vld [vmem:[#allocation27 + $0x168] sm:$0xff] }
0x191a   :  { %4991 = vmatpush1.msra.mxu0 %v12219_v10  ;;  %5062 = vmatpush1.msra.mxu1 %v12220_v16  ;;  %v5189_v10 = vld [vmem:[#allocation27 + $0x178] sm:$0xff]  ;;  %v5186_v16 = vld [vmem:[#allocation27 + $0x160] sm:$0xff] }
0x191b   :  { %4992 = vmatprep.subr.mxu0 %v12221_v49  ;;  %5063 = vmatprep.subr.mxu1 %v12222_v17  ;;  %v5188_v49 = vld [vmem:[#allocation27 + $0x170] sm:$0xff]  ;;  %v5183_v17 = vld [vmem:[#allocation27 + $0x148] sm:$0xff] }
0x191c   :  { %4993 = vmatpush1.msra.mxu0 %v12223_v42  ;;  %5064 = vmatpush1.msra.mxu1 %v12224_v20  ;;  %v5185_v42 = vld [vmem:[#allocation27 + $0x158] sm:$0xff]  ;;  %v5182_v20 = vld [vmem:[#allocation27 + $0x140] sm:$0xff] }
0x191d   :  { %4994 = vmatprep.subr.mxu0 %v12225_v54  ;;  %5065 = vmatprep.subr.mxu1 %v12226_v38  ;;  %v5184_v54 = vld [vmem:[#allocation27 + $0x150] sm:$0xff]  ;;  %v5179_v38 = vld [vmem:[#allocation27 + $0x128] sm:$0xff] }
0x191e   :  { %4995 = vmatpush1.msra.mxu0 %v12227_v13  ;;  %5028 = vmatprep.mubr.f32.mxu0 %v12228_v60  ;;  %v5181_v13 = vld [vmem:[#allocation27 + $0x138] sm:$0xff] }
0x191f   :  { %5066 = vmatpush1.msra.mxu1 %v12229_v21  ;;  %5099 = vmatprep.mubr.f32.mxu1 %v12228_v60  ;;  %v5178_v21 = vld [vmem:[#allocation27 + $0x120] sm:$0xff] }
0x1920   :  { %5292 = vmatprep.subr.mxu0 %v5203_v8  ;;  %5369 = vmatprep.subr.mxu1 %v5205_v23  ;;  %v5142_v8 = vld [vmem:[#allocation27] sm:$0xff]  ;;  %v5144_v23 = vld [vmem:[#allocation27 + $0x10] sm:$0xff] }
0x19bf   :  { %v4837_v51 = vpop.f32.mrf.mxu0  ;;  %v4908_v58 = vpop.f32.mrf.mxu1 }
0x19c0   :  { %v4917_v18 = vrot.slane %v4837_v51, 6  ;;  %v4919_v41 = vrot.slane %v4908_v58, 6  ;;  %v5180_v51 = vld [vmem:[#allocation27 + $0x130] sm:$0xff]  ;;  %v5171_v58 = vld [vmem:[#allocation27 + $0xe8] sm:$0xff] }
0x19c1   :  { %v4839_v45 = vpop.f32.mrf.mxu0  ;;  %v4910_v14 = vpop.f32.mrf.mxu1 }
0x19c2   :  { %v4925_v15 = vadd.f32 %v4917_v18, %v4764_v43  ;;  %v4918_v50 = vrot.slane %v4839_v45, 6  ;;  %v4920_v19 = vrot.slane %v4910_v14, 6  ;;  %v4927_v48 = vadd.f32 %v4919_v41, %v4766_v3  ;;  %v5175_v18 = vld [vmem:[#allocation27 + $0x108] sm:$0xff]  ;;  %v5177_v43 = vld [vmem:[#allocation27 + $0x118] sm:$0xff]  ;;  %v5174_v45 = vld [vmem:[#allocation27 + $0x100] sm:$0xff] }
0x19c3   :  { %v5166_v14 = vld [vmem:[#allocation27 + $0xc0] sm:$0xff]  ;;  %v5159_v3 = vld [vmem:[#allocation27 + $0x88] sm:$0xff] }
0x19c4   :  { %v7465_v56 = vmul.f32 -1.442695, %v4925_v15  ;;  %v4926_v11 = vadd.f32 %v4918_v50, %v4765_v55  ;;  %v4928_v39 = vadd.f32 %v4920_v19, %v4767_v59  ;;  %v5176_v15 = vld [vmem:[#allocation27 + $0x110] sm:$0xff]  ;;  %v5173_v50 = vld [vmem:[#allocation27 + $0xf8] sm:$0xff]  ;;  %v5170_v55 = vld [vmem:[#allocation27 + $0xe0] sm:$0xff] }
0x19c5   :  { %v5168_v19 = vld [vmem:[#allocation27 + $0xd0] sm:$0xff]  ;;  %v5163_v59 = vld [vmem:[#allocation27 + $0xa8] sm:$0xff]  ;;  %v5162_v41 = vld [vmem:[#allocation27 + $0xa0] sm:$0xff] }
0x19c6   :  { %7968 = vpow2.f32 %v7465_v56  ;;  %v7466_v12 = vmul.f32 -1.442695, %v4926_v11  ;;  %v7467_v40 = vmul.f32 -1.442695, %v4928_v39  ;;  %v5172_v56 = vld [vmem:[#allocation27 + $0xf0] sm:$0xff]  ;;  %v5167_v11 = vld [vmem:[#allocation27 + $0xc8] sm:$0xff] }
0x19c7   :  { %v5165_v39 = vld [vmem:[#allocation27 + $0xb8] sm:$0xff] }
0x19c8   :  { %7970 = vpow2.f32 %v7466_v12  ;;  %v5169_v12 = vld [vmem:[#allocation27 + $0xd8] sm:$0xff] }
0x19c9   :  { %7972 = vpow2.f32 %v7467_v40  ;;  %v5164_v40 = vld [vmem:[#allocation27 + $0xb0] sm:$0xff] }
0x19d3   :  { %v7969_v46 = vpop.eup %7968 }
0x19d4   :  { %v4932_v57 = vadd.f32 1.0, %v7969_v46  ;;  %v5161_v46 = vld [vmem:[#allocation27 + $0x98] sm:$0xff] }
0x19d5   :  { %v7971_v0 = vpop.eup %7970 }
0x19d6   :  { %7974 = vrcp.f32 %v4932_v57  ;;  %v4938_v32 = vadd.f32 1.0, %v7971_v0  ;;  %v7973_v33 = vpop.eup %7972  ;;  %v5160_v57 = vld [vmem:[#allocation27 + $0x90] sm:$0xff]  ;;  %v5155_v0 = vld [vmem:[#allocation27 + $0x68] sm:$0xff] }
0x19d7   :  { %7976 = vtanh.f32 %v4927_v48  ;;  %v4945_v25 = vadd.f32 1.0, %v7973_v33  ;;  %v5158_v48 = vld [vmem:[#allocation27 + $0x80] sm:$0xff] }
0x19d8   :  { %7978 = vrcp.f32 %v4938_v32  ;;  %v5157_v32 = vld [vmem:[#allocation27 + $0x78] sm:$0xff]  ;;  %v5154_v33 = vld [vmem:[#allocation27 + $0x60] sm:$0xff] }
0x19d9   :  { %7980 = vrcp.f32 %v4945_v25  ;;  %v5152_v25 = vld [vmem:[#allocation27 + $0x50] sm:$0xff] }
0x19e3   :  { %v7975_v61 = vpop.eup %7974 }
0x19e4   :  { %v7977_v47 = vpop.eup %7976 }
0x19e5   :  { %v7979_v1 = vpop.eup %7978  ;;  %v4952_v4 = vmul.f32 %v7977_v47, %v7975_v61  ;;  %v5156_v61 = vld [vmem:[#allocation27 + $0x70] sm:$0xff]  ;;  %v5151_v47 = vld [vmem:[#allocation27 + $0x48] sm:$0xff] }
0x19e6   :  { %v4951_v34 = vmul.f32 %v7979_v1, %v4949_v2  ;;  %v7981_v5 = vpop.eup %7980  ;;  %v5153_v2 = vld [vmem:[#allocation27 + $0x58] sm:$0xff]  ;;  %v5150_v1 = vld [vmem:[#allocation27 + $0x40] sm:$0xff] }
0x19e8   :  { %v10749_v37 = vadd.f32 %v4952_v4, %v4951_v34  ;;  %v5147_v4 = vld [vmem:[#allocation27 + $0x28] sm:$0xff]  ;;  %v5149_v34 = vld [vmem:[#allocation27 + $0x38] sm:$0xff] }
0x19ea   :  { %7982 = vtanh.f32 %v10749_v37 }
0x19f7   :  { %v7983_v36 = vpop.eup %7982 }
0x19f8   :  { %v4955_v26 = vmul.f32 %v7983_v36, %v7981_v5  ;;  %v5146_v5 = vld [vmem:[#allocation27 + $0x20] sm:$0xff]  ;;  %v5148_v36 = vld [vmem:[#allocation27 + $0x30] sm:$0xff] }
0x19fa   :  { %4956 = vst [vmem:[#allocation3 + $0x10] sm:$0xc] %v4955_v26  ;;  %v4962_v6 = vrot.slane %v4955_v26, 2  ;;  %v5143_v26 = vld [vmem:[#allocation27 + $0x8] sm:$0xff] }
0x19fc   :  { %5029 = vmatmul.mubr.f32.vlgmr.msra.gmra.mxu0 %v4962_v6  ;;  %5100 = vmatmul.mubr.f32.vlgmr.msra.gmra.mxu1 %v4962_v6  ;;  %v5145_v6 = vld [vmem:[#allocation27 + $0x18] sm:$0xff] }
0x19fd   :  { %5293 = vmatpush1.msra.mxu0 %v5202_v9  ;;  %5370 = vmatpush1.msra.mxu1 %v5204_v63  ;;  %v5267_v9 = vld [vmem:[#allocation27 + $0x3e8] sm:$0xff]  ;;  %v5269_v63 = vld [vmem:[#allocation27 + $0x3f8] sm:$0xff] }
0x19fe   :  { %5294 = vmatprep.subr.mxu0 %v5199_v7  ;;  %5371 = vmatprep.subr.mxu1 %v5201_v62  ;;  %v5266_v7 = vld [vmem:[#allocation27 + $0x3e0] sm:$0xff]  ;;  %v5268_v62 = vld [vmem:[#allocation27 + $0x3f0] sm:$0xff] }
0x19ff   :  { %5295 = vmatpush1.msra.mxu0 %v5198_v35  ;;  %5372 = vmatpush1.msra.mxu1 %v5200_v22  ;;  %v5263_v35 = vld [vmem:[#allocation27 + $0x3c8] sm:$0xff]  ;;  %v5265_v22 = vld [vmem:[#allocation27 + $0x3d8] sm:$0xff] }
0x1a00   :  { %5296 = vmatprep.subr.mxu0 %v5195_v44  ;;  %5373 = vmatprep.subr.mxu1 %v5197_v24  ;;  %v5262_v44 = vld [vmem:[#allocation27 + $0x3c0] sm:$0xff]  ;;  %v5264_v24 = vld [vmem:[#allocation27 + $0x3d0] sm:$0xff] }
0x1a01   :  { %5297 = vmatpush1.msra.mxu0 %v5194_v27  ;;  %5374 = vmatpush1.msra.mxu1 %v5196_v52  ;;  %v5259_v27 = vld [vmem:[#allocation27 + $0x3a8] sm:$0xff]  ;;  %v5261_v52 = vld [vmem:[#allocation27 + $0x3b8] sm:$0xff] }
0x1a02   :  { %5298 = vmatprep.subr.mxu0 %v5191_v28  ;;  %5375 = vmatprep.subr.mxu1 %v5193_v29  ;;  %v5258_v28 = vld [vmem:[#allocation27 + $0x3a0] sm:$0xff]  ;;  %v5260_v29 = vld [vmem:[#allocation27 + $0x3b0] sm:$0xff] }
0x1a03   :  { %5299 = vmatpush1.msra.mxu0 %v5190_v53  ;;  %5376 = vmatpush1.msra.mxu1 %v5192_v30  ;;  %v5255_v53 = vld [vmem:[#allocation27 + $0x388] sm:$0xff]  ;;  %v5257_v30 = vld [vmem:[#allocation27 + $0x398] sm:$0xff] }
0x1a04   :  { %5300 = vmatprep.subr.mxu0 %v5187_v31  ;;  %5377 = vmatprep.subr.mxu1 %v5189_v10  ;;  %v5254_v31 = vld [vmem:[#allocation27 + $0x380] sm:$0xff]  ;;  %v5256_v10 = vld [vmem:[#allocation27 + $0x390] sm:$0xff] }
0x1a05   :  { %5301 = vmatpush1.msra.mxu0 %v5186_v16  ;;  %5378 = vmatpush1.msra.mxu1 %v5188_v49  ;;  %v5251_v16 = vld [vmem:[#allocation27 + $0x368] sm:$0xff]  ;;  %v5253_v49 = vld [vmem:[#allocation27 + $0x378] sm:$0xff] }
0x1a06   :  { %5302 = vmatprep.subr.mxu0 %v5183_v17  ;;  %5379 = vmatprep.subr.mxu1 %v5185_v42  ;;  %v5250_v17 = vld [vmem:[#allocation27 + $0x360] sm:$0xff]  ;;  %v5252_v42 = vld [vmem:[#allocation27 + $0x370] sm:$0xff] }
0x1a07   :  { %5303 = vmatpush1.msra.mxu0 %v5182_v20  ;;  %5380 = vmatpush1.msra.mxu1 %v5184_v54  ;;  %v5247_v20 = vld [vmem:[#allocation27 + $0x348] sm:$0xff]  ;;  %v5249_v54 = vld [vmem:[#allocation27 + $0x358] sm:$0xff] }
0x1a08   :  { %5304 = vmatprep.subr.mxu0 %v5179_v38  ;;  %5381 = vmatprep.subr.mxu1 %v5181_v13  ;;  %v5246_v38 = vld [vmem:[#allocation27 + $0x340] sm:$0xff]  ;;  %v5248_v13 = vld [vmem:[#allocation27 + $0x350] sm:$0xff] }
0x1a09   :  { %5305 = vmatpush1.msra.mxu0 %v5178_v21  ;;  %5382 = vmatpush1.msra.mxu1 %v5180_v51  ;;  %v5243_v21 = vld [vmem:[#allocation27 + $0x328] sm:$0xff]  ;;  %v5245_v51 = vld [vmem:[#allocation27 + $0x338] sm:$0xff] }
0x1a0a   :  { %5306 = vmatprep.subr.mxu0 %v5175_v18  ;;  %5383 = vmatprep.subr.mxu1 %v5177_v43  ;;  %v5242_v18 = vld [vmem:[#allocation27 + $0x320] sm:$0xff]  ;;  %v5244_v43 = vld [vmem:[#allocation27 + $0x330] sm:$0xff] }
0x1a0b   :  { %5307 = vmatpush1.msra.mxu0 %v5174_v45  ;;  %5384 = vmatpush1.msra.mxu1 %v5176_v15  ;;  %v5239_v45 = vld [vmem:[#allocation27 + $0x308] sm:$0xff]  ;;  %v5241_v15 = vld [vmem:[#allocation27 + $0x318] sm:$0xff] }
0x1a0c   :  { %5308 = vmatprep.subr.mxu0 %v5171_v58  ;;  %5385 = vmatprep.subr.mxu1 %v5173_v50  ;;  %v5238_v58 = vld [vmem:[#allocation27 + $0x300] sm:$0xff]  ;;  %v5240_v50 = vld [vmem:[#allocation27 + $0x310] sm:$0xff] }
0x1a0d   :  { %5309 = vmatpush1.msra.mxu0 %v5170_v55  ;;  %5386 = vmatpush1.msra.mxu1 %v5172_v56  ;;  %v5235_v55 = vld [vmem:[#allocation27 + $0x2e8] sm:$0xff]  ;;  %v5237_v56 = vld [vmem:[#allocation27 + $0x2f8] sm:$0xff] }
0x1a0e   :  { %5310 = vmatprep.subr.mxu0 %v5167_v11  ;;  %5387 = vmatprep.subr.mxu1 %v5169_v12  ;;  %v5234_v11 = vld [vmem:[#allocation27 + $0x2e0] sm:$0xff]  ;;  %v5236_v12 = vld [vmem:[#allocation27 + $0x2f0] sm:$0xff] }
0x1a0f   :  { %5311 = vmatpush1.msra.mxu0 %v5166_v14  ;;  %5388 = vmatpush1.msra.mxu1 %v5168_v19  ;;  %v5231_v14 = vld [vmem:[#allocation27 + $0x2c8] sm:$0xff]  ;;  %v5233_v19 = vld [vmem:[#allocation27 + $0x2d8] sm:$0xff] }
0x1a10   :  { %5312 = vmatprep.subr.mxu0 %v5163_v59  ;;  %5389 = vmatprep.subr.mxu1 %v5165_v39  ;;  %v5230_v59 = vld [vmem:[#allocation27 + $0x2c0] sm:$0xff]  ;;  %v5232_v39 = vld [vmem:[#allocation27 + $0x2d0] sm:$0xff] }
0x1a11   :  { %5313 = vmatpush1.msra.mxu0 %v5162_v41  ;;  %5390 = vmatpush1.msra.mxu1 %v5164_v40  ;;  %v5227_v41 = vld [vmem:[#allocation27 + $0x2a8] sm:$0xff]  ;;  %v5229_v40 = vld [vmem:[#allocation27 + $0x2b8] sm:$0xff] }
0x1a12   :  { %5314 = vmatprep.subr.mxu0 %v5159_v3  ;;  %5391 = vmatprep.subr.mxu1 %v5161_v46  ;;  %v5226_v3 = vld [vmem:[#allocation27 + $0x2a0] sm:$0xff]  ;;  %v5228_v46 = vld [vmem:[#allocation27 + $0x2b0] sm:$0xff] }
0x1a13   :  { %5315 = vmatpush1.msra.mxu0 %v5158_v48  ;;  %5392 = vmatpush1.msra.mxu1 %v5160_v57  ;;  %v5223_v48 = vld [vmem:[#allocation27 + $0x288] sm:$0xff]  ;;  %v5225_v57 = vld [vmem:[#allocation27 + $0x298] sm:$0xff] }
0x1a14   :  { %5316 = vmatprep.subr.mxu0 %v5155_v0  ;;  %5393 = vmatprep.subr.mxu1 %v5157_v32  ;;  %v5222_v0 = vld [vmem:[#allocation27 + $0x280] sm:$0xff]  ;;  %v5224_v32 = vld [vmem:[#allocation27 + $0x290] sm:$0xff] }
0x1a15   :  { %5317 = vmatpush1.msra.mxu0 %v5154_v33  ;;  %5394 = vmatpush1.msra.mxu1 %v5156_v61  ;;  %v5219_v33 = vld [vmem:[#allocation27 + $0x268] sm:$0xff]  ;;  %v5221_v61 = vld [vmem:[#allocation27 + $0x278] sm:$0xff] }
0x1a16   :  { %5318 = vmatprep.subr.mxu0 %v5151_v47  ;;  %5395 = vmatprep.subr.mxu1 %v5153_v2  ;;  %v5218_v47 = vld [vmem:[#allocation27 + $0x260] sm:$0xff]  ;;  %v5220_v2 = vld [vmem:[#allocation27 + $0x270] sm:$0xff] }
0x1a17   :  { %5319 = vmatpush1.msra.mxu0 %v5150_v1  ;;  %5396 = vmatpush1.msra.mxu1 %v5152_v25  ;;  %v5215_v1 = vld [vmem:[#allocation27 + $0x248] sm:$0xff]  ;;  %v5217_v25 = vld [vmem:[#allocation27 + $0x258] sm:$0xff] }
0x1a18   :  { %5320 = vmatprep.subr.mxu0 %v5147_v4  ;;  %5397 = vmatprep.subr.mxu1 %v5149_v34  ;;  %v5214_v4 = vld [vmem:[#allocation27 + $0x240] sm:$0xff]  ;;  %v5216_v34 = vld [vmem:[#allocation27 + $0x250] sm:$0xff] }
0x1a19   :  { %5321 = vmatpush1.msra.mxu0 %v5146_v5  ;;  %5398 = vmatpush1.msra.mxu1 %v5148_v36  ;;  %v5211_v5 = vld [vmem:[#allocation27 + $0x228] sm:$0xff]  ;;  %v5213_v36 = vld [vmem:[#allocation27 + $0x238] sm:$0xff] }
0x1a1a   :  { %5322 = vmatprep.subr.mxu0 %v5143_v26  ;;  %5399 = vmatprep.subr.mxu1 %v5145_v6  ;;  %v5210_v26 = vld [vmem:[#allocation27 + $0x220] sm:$0xff]  ;;  %v5212_v6 = vld [vmem:[#allocation27 + $0x230] sm:$0xff] }
0x1a1b   :  { %5323 = vmatpush1.msra.mxu0 %v5142_v8  ;;  %5400 = vmatpush1.msra.mxu1 %v5144_v23  ;;  %v5207_v8 = vld [vmem:[#allocation27 + $0x208] sm:$0xff]  ;;  %v5209_v23 = vld [vmem:[#allocation27 + $0x218] sm:$0xff] }
0x1a1c   :  { %5324 = vmatprep.subr.mxu0 %v5267_v9  ;;  %5401 = vmatprep.subr.mxu1 %v5269_v63  ;;  %v5206_v9 = vld [vmem:[#allocation27 + $0x200] sm:$0xff]  ;;  %v5208_v63 = vld [vmem:[#allocation27 + $0x210] sm:$0xff] }
0x1a1d   :  { %5325 = vmatpush2.msra.mxu0 %v5266_v7  ;;  %5402 = vmatpush2.msra.mxu1 %v5268_v62  ;;  %v10752_v7 = vld [vmem:[#allocation28 + $0x1e8] sm:$0xff]  ;;  %v10754_v62 = vld [vmem:[#allocation28 + $0x1f8] sm:$0xff] }
0x1a1e   :  { %5326 = vmatprep.subr.mxu0 %v5263_v35  ;;  %5403 = vmatprep.subr.mxu1 %v5265_v22  ;;  %12230 = vst [vmem:[#allocation68_spill] sm:$0xff] %v10752_v7  ;;  %12231 = vst [vmem:[#allocation69_spill] sm:$0xff] %v10754_v62  ;;  %v4957_v35 = vld [vmem:[#allocation2 + $0x30] sm:$0x3] }
0x1a1f   :  { %5327 = vmatpush2.msra.mxu0 %v5262_v44  ;;  %5404 = vmatpush2.msra.mxu1 %v5264_v24  ;;  %v4958_v24 = vld [vmem:[#allocation2] sm:$0x3] }
0x1a20   :  { %5328 = vmatprep.subr.mxu0 %v5259_v27  ;;  %5405 = vmatprep.subr.mxu1 %v5261_v52 }
0x1a21   :  { %5329 = vmatpush2.msra.mxu0 %v5258_v28  ;;  %5406 = vmatpush2.msra.mxu1 %v5260_v29 }
0x1a22   :  { %5330 = vmatprep.subr.mxu0 %v5255_v53  ;;  %5407 = vmatprep.subr.mxu1 %v5257_v30 }
0x1a23   :  { %5331 = vmatpush2.msra.mxu0 %v5254_v31  ;;  %5408 = vmatpush2.msra.mxu1 %v5256_v10  ;;  %v4960_v31 = vld [vmem:[#allocation2 + $0x10] sm:$0x3] }
0x1a24   :  { %5332 = vmatprep.subr.mxu0 %v5251_v16  ;;  %5409 = vmatprep.subr.mxu1 %v5253_v49  ;;  %v4959_v49 = vld [vmem:[#allocation2 + $0x18] sm:$0x3] }
0x1a25   :  { %5333 = vmatpush2.msra.mxu0 %v5250_v17  ;;  %5410 = vmatpush2.msra.mxu1 %v5252_v42 }
0x1a26   :  { %5334 = vmatprep.subr.mxu0 %v5247_v20  ;;  %5411 = vmatprep.subr.mxu1 %v5249_v54 }
0x1a27   :  { %5335 = vmatpush2.msra.mxu0 %v5246_v38  ;;  %5412 = vmatpush2.msra.mxu1 %v5248_v13 }
0x1a28   :  { %5336 = vmatprep.subr.mxu0 %v5243_v21  ;;  %5413 = vmatprep.subr.mxu1 %v5245_v51 }
0x1a29   :  { %5337 = vmatpush2.msra.mxu0 %v5242_v18  ;;  %5414 = vmatpush2.msra.mxu1 %v5244_v43  ;;  %v5130_v18 = vrot.slane %v10749_v37, 2  ;;  %v10763_v37 = vld [vmem:[#allocation28 + $0x1c8] sm:$0xff] }
0x1a2a   :  { %5338 = vmatprep.subr.mxu0 %v5239_v45  ;;  %5415 = vmatprep.subr.mxu1 %v5241_v15 }
0x1a2b   :  { %5339 = vmatpush2.msra.mxu0 %v5238_v58  ;;  %5416 = vmatpush2.msra.mxu1 %v5240_v50 }
0x1a2c   :  { %5340 = vmatprep.subr.mxu0 %v5235_v55  ;;  %5417 = vmatprep.subr.mxu1 %v5237_v56 }
0x1a2d   :  { %5341 = vmatpush2.msra.mxu0 %v5234_v11  ;;  %5418 = vmatpush2.msra.mxu1 %v5236_v12 }
0x1a2e   :  { %5342 = vmatprep.subr.mxu0 %v5231_v14  ;;  %5419 = vmatprep.subr.mxu1 %v5233_v19  ;;  %v10759_v14 = vld [vmem:[#allocation28 + $0x1e0] sm:$0xff]  ;;  %v10761_v19 = vld [vmem:[#allocation28 + $0x1f0] sm:$0xff] }
0x1a2f   :  { %5343 = vmatpush2.msra.mxu0 %v5230_v59  ;;  %5420 = vmatpush2.msra.mxu1 %v5232_v39  ;;  %v5138_v59 = vld [vmem:[#allocation3] sm:$0xff]  ;;  %v10765_v39 = vld [vmem:[#allocation28 + $0x1d8] sm:$0xff] }
0x1a30   :  { %5344 = vmatprep.subr.mxu0 %v5227_v41  ;;  %5421 = vmatprep.subr.mxu1 %v5229_v40  ;;  %v5141_v41 = vld [vmem:[#allocation3 + $0x18] sm:$0xff] }
0x1a31   :  { %5345 = vmatpush2.msra.mxu0 %v5226_v3  ;;  %5422 = vmatpush2.msra.mxu1 %v5228_v46  ;;  %v10769_v40 = vld [vmem:[#allocation28 + $0x1c0] sm:$0xff]  ;;  %v10771_v3 = vld [vmem:[#allocation28 + $0x1d0] sm:$0xff]  ;;  %v10773_v46 = vld [vmem:[#allocation28 + $0x1a8] sm:$0xff] }
0x1a32   :  { %5346 = vmatprep.subr.mxu0 %v5223_v48  ;;  %5423 = vmatprep.subr.mxu1 %v5225_v57  ;;  %v10775_v48 = vld [vmem:[#allocation28 + $0x1b8] sm:$0xff]  ;;  %v10781_v57 = vld [vmem:[#allocation28 + $0x1a0] sm:$0xff] }
0x1a33   :  { %5347 = vmatpush2.msra.mxu0 %v5222_v0  ;;  %5424 = vmatpush2.msra.mxu1 %v5224_v32  ;;  %v10783_v0 = vld [vmem:[#allocation28 + $0x1b0] sm:$0xff] }
0x1a34   :  { %5348 = vmatprep.subr.mxu0 %v5219_v33  ;;  %5425 = vmatprep.subr.mxu1 %v5221_v61  ;;  %v5140_v32 = vld [vmem:[#allocation3 + $0x8] sm:$0xff]  ;;  %v10789_v61 = vld [vmem:[#allocation28 + $0x198] sm:$0xff] }
0x1a35   :  { %5349 = vmatpush2.msra.mxu0 %v5218_v47  ;;  %5426 = vmatpush2.msra.mxu1 %v5220_v2  ;;  %v10787_v33 = vld [vmem:[#allocation28 + $0x188] sm:$0xff]  ;;  %v10791_v47 = vld [vmem:[#allocation28 + $0x180] sm:$0xff]  ;;  %v10793_v2 = vld [vmem:[#allocation28 + $0x190] sm:$0xff] }
0x1a36   :  { %5350 = vmatprep.subr.mxu0 %v5215_v1  ;;  %5427 = vmatprep.subr.mxu1 %v5217_v25  ;;  %v10797_v1 = vld [vmem:[#allocation28 + $0x168] sm:$0xff]  ;;  %v10799_v25 = vld [vmem:[#allocation28 + $0x178] sm:$0xff] }
0x1a37   :  { %5351 = vmatpush2.msra.mxu0 %v5214_v4  ;;  %5428 = vmatpush2.msra.mxu1 %v5216_v34  ;;  %v10803_v4 = vld [vmem:[#allocation28 + $0x160] sm:$0xff]  ;;  %v10805_v34 = vld [vmem:[#allocation28 + $0x170] sm:$0xff] }
0x1a38   :  { %5352 = vmatprep.subr.mxu0 %v5211_v5  ;;  %5429 = vmatprep.subr.mxu1 %v5213_v36  ;;  %v10809_v5 = vld [vmem:[#allocation28 + $0x148] sm:$0xff]  ;;  %v10811_v36 = vld [vmem:[#allocation28 + $0x158] sm:$0xff] }
0x1a39   :  { %5353 = vmatpush2.msra.mxu0 %v5210_v26  ;;  %5430 = vmatpush2.msra.mxu1 %v5212_v6  ;;  %v10815_v26 = vld [vmem:[#allocation28 + $0x140] sm:$0xff]  ;;  %v10817_v6 = vld [vmem:[#allocation28 + $0x150] sm:$0xff] }
0x1a3a   :  { %5354 = vmatprep.subr.mxu0 %v5207_v8  ;;  %5431 = vmatprep.subr.mxu1 %v5209_v23  ;;  %v10821_v8 = vld [vmem:[#allocation28 + $0x128] sm:$0xff]  ;;  %v10823_v23 = vld [vmem:[#allocation28 + $0x138] sm:$0xff] }
0x1a3b   :  { %5355 = vmatpush2.msra.mxu0 %v5206_v9  ;;  %5432 = vmatpush2.msra.mxu1 %v5208_v63  ;;  %v10827_v9 = vld [vmem:[#allocation28 + $0x120] sm:$0xff]  ;;  %v10829_v63 = vld [vmem:[#allocation28 + $0x130] sm:$0xff] }
0x1a3c   :  { %5522 = vmatprep.subr.mxu0 %v10752_v7  ;;  %5593 = vmatprep.subr.mxu1 %v10754_v62 }
0x1abc   :  { %v5030_v22 = vpop.f32.mrf.mxu0  ;;  %v5101_v29 = vpop.f32.mrf.mxu1 }
0x1abd   :  { %v5106_v44 = vadd.f32 %v5030_v22, %v4957_v35  ;;  %v5108_v42 = vadd.f32 %v5101_v29, %v4959_v49  ;;  %v10833_v35 = vld [vmem:[#allocation28 + $0x108] sm:$0xff]  ;;  %v10835_v22 = vld [vmem:[#allocation28 + $0x118] sm:$0xff]  ;;  %v10853_v29 = vld [vmem:[#allocation28 + $0xf0] sm:$0xff] }
0x1abe   :  { %v5032_v27 = vpop.f32.mrf.mxu0  ;;  %v5103_v30 = vpop.f32.mrf.mxu1  ;;  %v10871_v49 = vld [vmem:[#allocation28 + $0xb8] sm:$0xff] }
0x1abf   :  { %v7468_v52 = vmul.f32 -1.442695, %v5106_v44  ;;  %v5107_v28 = vadd.f32 %v5032_v27, %v4958_v24  ;;  %v5109_v10 = vadd.f32 %v5103_v30, %v4960_v31  ;;  %v10839_v44 = vld [vmem:[#allocation28 + $0x100] sm:$0xff]  ;;  %v10841_v24 = vld [vmem:[#allocation28 + $0x110] sm:$0xff]  ;;  %v10845_v27 = vld [vmem:[#allocation28 + $0xe8] sm:$0xff] }
0x1ac0   :  { %v10859_v30 = vld [vmem:[#allocation28 + $0xd8] sm:$0xff]  ;;  %v10863_v31 = vld [vmem:[#allocation28 + $0xc0] sm:$0xff] }
0x1ac1   :  { %7984 = vpow2.f32 %v7468_v52  ;;  %v7469_v53 = vmul.f32 -1.442695, %v5107_v28  ;;  %v7470_v16 = vmul.f32 -1.442695, %v5109_v10  ;;  %v10847_v52 = vld [vmem:[#allocation28 + $0xf8] sm:$0xff]  ;;  %v10851_v28 = vld [vmem:[#allocation28 + $0xe0] sm:$0xff] }
0x1ac2   :  { %v10865_v10 = vld [vmem:[#allocation28 + $0xd0] sm:$0xff] }
0x1ac3   :  { %7986 = vpow2.f32 %v7469_v53  ;;  %v10857_v53 = vld [vmem:[#allocation28 + $0xc8] sm:$0xff] }
0x1ac4   :  { %7988 = vpow2.f32 %v7470_v16  ;;  %v10869_v16 = vld [vmem:[#allocation28 + $0xa8] sm:$0xff] }
0x1ace   :  { %v7985_v17 = vpop.eup %7984 }
0x1acf   :  { %v5113_v20 = vadd.f32 1.0, %v7985_v17  ;;  %v10875_v17 = vld [vmem:[#allocation28 + $0xa0] sm:$0xff] }
0x1ad0   :  { %v7987_v54 = vpop.eup %7986  ;;  %12232 = vst [vmem:[#allocation70_spill] sm:$0xff] %v10875_v17 }
0x1ad1   :  { %7990 = vrcp.f32 %v5113_v20  ;;  %v5119_v38 = vadd.f32 1.0, %v7987_v54  ;;  %v7989_v13 = vpop.eup %7988  ;;  %v10881_v20 = vld [vmem:[#allocation28 + $0x88] sm:$0xff]  ;;  %v10883_v54 = vld [vmem:[#allocation28 + $0x98] sm:$0xff] }
0x1ad2   :  { %7992 = vtanh.f32 %v5108_v42  ;;  %v5126_v45 = vadd.f32 1.0, %v7989_v13  ;;  %v10877_v42 = vld [vmem:[#allocation28 + $0xb0] sm:$0xff]  ;;  %12233 = vst [vmem:[#allocation41_spill] sm:$0xff] %v10881_v20  ;;  %12234 = vst [vmem:[#allocation44_spill] sm:$0xff] %v10883_v54 }
0x1ad3   :  { %7994 = vrcp.f32 %v5119_v38  ;;  %v10887_v38 = vld [vmem:[#allocation28 + $0x80] sm:$0xff]  ;;  %v10889_v13 = vld [vmem:[#allocation28 + $0x90] sm:$0xff] }
0x1ad4   :  { %7996 = vrcp.f32 %v5126_v45  ;;  %12235 = vst [vmem:[#allocation40_spill] sm:$0xff] %v10887_v38  ;;  %12236 = vst [vmem:[#allocation45_spill] sm:$0xff] %v10889_v13  ;;  %v10905_v45 = vld [vmem:[#allocation28 + $0x48] sm:$0xff] }
0x1ad5   :  { %12241 = vst [vmem:[#allocation50_spill] sm:$0xff] %v10905_v45 }
0x1ade   :  { %v7991_v21 = vpop.eup %7990 }
0x1adf   :  { %v7993_v51 = vpop.eup %7992 }
0x1ae0   :  { %v7995_v43 = vpop.eup %7994  ;;  %v5133_v15 = vmul.f32 %v7993_v51, %v7991_v21  ;;  %v10893_v21 = vld [vmem:[#allocation28 + $0x68] sm:$0xff]  ;;  %v10895_v51 = vld [vmem:[#allocation28 + $0x78] sm:$0xff] }
0x1ae1   :  { %v5132_v58 = vmul.f32 %v7995_v43, %v5130_v18  ;;  %v7997_v55 = vpop.eup %7996  ;;  %12237 = vst [vmem:[#allocation46_spill] sm:$0xff] %v10893_v21  ;;  %12238 = vst [vmem:[#allocation47_spill] sm:$0xff] %v10895_v51  ;;  %v10899_v18 = vld [vmem:[#allocation28 + $0x60] sm:$0xff]  ;;  %v10901_v43 = vld [vmem:[#allocation28 + $0x70] sm:$0xff] }
0x1ae2   :  { %12239 = vst [vmem:[#allocation48_spill] sm:$0xff] %v10899_v18  ;;  %12240 = vst [vmem:[#allocation49_spill] sm:$0xff] %v10901_v43 }
0x1ae3   :  { %v5134_v50 = vadd.f32 %v5133_v15, %v5132_v58  ;;  %v10907_v15 = vld [vmem:[#allocation28 + $0x58] sm:$0xff]  ;;  %v10911_v58 = vld [vmem:[#allocation28 + $0x40] sm:$0xff] }
0x1ae4   :  { %12242 = vst [vmem:[#allocation51_spill] sm:$0xff] %v10907_v15  ;;  %12243 = vst [vmem:[#allocation52_spill] sm:$0xff] %v10911_v58 }
0x1ae5   :  { %7998 = vtanh.f32 %v5134_v50  ;;  %v10913_v50 = vld [vmem:[#allocation28 + $0x50] sm:$0xff] }
0x1ae6   :  { %12244 = vst [vmem:[#allocation53_spill] sm:$0xff] %v10913_v50 }
0x1af2   :  { %v7999_v56 = vpop.eup %7998 }
0x1af3   :  { %v5136_v11 = vmul.f32 %v7999_v56, %v7997_v55  ;;  %v10917_v55 = vld [vmem:[#allocation28 + $0x28] sm:$0xff]  ;;  %v10919_v56 = vld [vmem:[#allocation28 + $0x38] sm:$0xff] }
0x1af4   :  { %12245 = vst [vmem:[#allocation54_spill] sm:$0xff] %v10917_v55  ;;  %12246 = vst [vmem:[#allocation55_spill] sm:$0xff] %v10919_v56 }
0x1af5   :  { %5137 = vst [vmem:[#allocation3 + $0x10] sm:$0x3] %v5136_v11  ;;  %v10923_v11 = vld [vmem:[#allocation28 + $0x20] sm:$0xff] }
0x1af6   :  { %12247 = vst [vmem:[#allocation56_spill] sm:$0xff] %v10923_v11 }
0x1afc   :  { %v5139_v12 = vld [vmem:[#allocation3 + $0x10] sm:$0xff] }
0x1afd   :  { %5356 = vmatprep.mubr.f32.mxu0 %v5139_v12  ;;  %5433 = vmatprep.mubr.f32.mxu1 %v5139_v12  ;;  %v10925_v12 = vld [vmem:[#allocation28 + $0x30] sm:$0xff] }
0x1afe   :  { %5357 = vmatmul.mubr.f32.vlgmr.msra.gmra.mxu0 %v5138_v59  ;;  %5434 = vmatmul.mubr.f32.vlgmr.msra.gmra.mxu1 %v5138_v59  ;;  %12248 = vst [vmem:[#allocation57_spill] sm:$0xff] %v10925_v12  ;;  %v10929_v59 = vld [vmem:[#allocation28 + $0x8] sm:$0xff] }
0x1aff   :  { %5523 = vmatpush1.msra.mxu0 %v10759_v14  ;;  %5594 = vmatpush1.msra.mxu1 %v10761_v19  ;;  %12249 = vst [vmem:[#allocation58_spill] sm:$0xff] %v10929_v59 }
0x1b00   :  { %5362 = vmatprep.mubr.f32.mxu0 %v5141_v41  ;;  %5439 = vmatprep.mubr.f32.mxu1 %v5141_v41  ;;  %v10931_v41 = vld [vmem:[#allocation28 + $0x18] sm:$0xff] }
0x1b01   :  { %5524 = vmatprep.subr.mxu0 %v10763_v37  ;;  %5595 = vmatprep.subr.mxu1 %v10765_v39  ;;  %12250 = vst [vmem:[#allocation59_spill] sm:$0xff] %v10931_v41 }
0x1b02   :  { %5525 = vmatpush1.msra.mxu0 %v10769_v40  ;;  %5596 = vmatpush1.msra.mxu1 %v10771_v3 }
0x1b03   :  { %5526 = vmatprep.subr.mxu0 %v10773_v46  ;;  %5597 = vmatprep.subr.mxu1 %v10775_v48 }
0x1b04   :  { %5363 = vmatmul.mubr.f32.gmra.mxu0 %v5140_v32  ;;  %5440 = vmatmul.mubr.f32.gmra.mxu1 %v5140_v32  ;;  %v10935_v32 = vld [vmem:[#allocation28] sm:$0xff] }
0x1b05   :  { %5527 = vmatpush1.msra.mxu0 %v10781_v57  ;;  %5598 = vmatpush1.msra.mxu1 %v10783_v0  ;;  %12251 = vst [vmem:[#allocation60_spill] sm:$0xff] %v10935_v32 }
0x1b06   :  { %5528 = vmatprep.subr.mxu0 %v10787_v33  ;;  %5599 = vmatprep.subr.mxu1 %v10789_v61 }
0x1b07   :  { %5529 = vmatpush1.msra.mxu0 %v10791_v47  ;;  %5600 = vmatpush1.msra.mxu1 %v10793_v2 }
0x1b08   :  { %5530 = vmatprep.subr.mxu0 %v10797_v1  ;;  %5601 = vmatprep.subr.mxu1 %v10799_v25 }
0x1b09   :  { %5531 = vmatpush1.msra.mxu0 %v10803_v4  ;;  %5602 = vmatpush1.msra.mxu1 %v10805_v34 }
0x1b0a   :  { %5532 = vmatprep.subr.mxu0 %v10809_v5  ;;  %5603 = vmatprep.subr.mxu1 %v10811_v36 }
0x1b0b   :  { %5533 = vmatpush1.msra.mxu0 %v10815_v26  ;;  %5604 = vmatpush1.msra.mxu1 %v10817_v6 }
0x1b0c   :  { %5534 = vmatprep.subr.mxu0 %v10821_v8  ;;  %5605 = vmatprep.subr.mxu1 %v10823_v23 }
0x1b0d   :  { %5535 = vmatpush1.msra.mxu0 %v10827_v9  ;;  %5606 = vmatpush1.msra.mxu1 %v10829_v63 }
0x1b0e   :  { %5536 = vmatprep.subr.mxu0 %v10833_v35  ;;  %5607 = vmatprep.subr.mxu1 %v10835_v22 }
0x1b0f   :  { %5537 = vmatpush1.msra.mxu0 %v10839_v44  ;;  %5608 = vmatpush1.msra.mxu1 %v10841_v24 }
0x1b10   :  { %5538 = vmatprep.subr.mxu0 %v10845_v27  ;;  %5609 = vmatprep.subr.mxu1 %v10847_v52 }
0x1b11   :  { %5539 = vmatpush1.msra.mxu0 %v10851_v28  ;;  %5610 = vmatpush1.msra.mxu1 %v10853_v29 }
0x1b12   :  { %5540 = vmatprep.subr.mxu0 %v10857_v53  ;;  %5611 = vmatprep.subr.mxu1 %v10859_v30 }
0x1b13   :  { %5541 = vmatpush1.msra.mxu0 %v10863_v31  ;;  %5612 = vmatpush1.msra.mxu1 %v10865_v10 }
0x1b14   :  { %5542 = vmatprep.subr.mxu0 %v10869_v16  ;;  %5613 = vmatprep.subr.mxu1 %v10871_v49 }
0x1b15   :  { %5543 = vmatpush1.msra.mxu0 %v10875_v17  ;;  %5614 = vmatpush1.msra.mxu1 %v10877_v42 }
0x1b16   :  { %5544 = vmatprep.subr.mxu0 %v10881_v20  ;;  %5615 = vmatprep.subr.mxu1 %v10883_v54 }
0x1b17   :  { %5545 = vmatpush1.msra.mxu0 %v10887_v38  ;;  %5616 = vmatpush1.msra.mxu1 %v10889_v13 }
0x1b18   :  { %5546 = vmatprep.subr.mxu0 %v10893_v21  ;;  %5617 = vmatprep.subr.mxu1 %v10895_v51 }
0x1b19   :  { %5547 = vmatpush1.msra.mxu0 %v10899_v18  ;;  %5618 = vmatpush1.msra.mxu1 %v10901_v43 }
0x1b1a   :  { %5548 = vmatprep.subr.mxu0 %v10905_v45  ;;  %5619 = vmatprep.subr.mxu1 %v10907_v15  ;;  %v10939_v15 = vld [vmem:[#allocation28 + $0x10] sm:$0xff] }
0x1b1b   :  { %5549 = vmatpush1.msra.mxu0 %v10911_v58  ;;  %5620 = vmatpush1.msra.mxu1 %v10913_v50  ;;  %12252 = vst [vmem:[#allocation61_spill] sm:$0xff] %v10939_v15 }
0x1b1c   :  { %5550 = vmatprep.subr.mxu0 %v10917_v55  ;;  %5621 = vmatprep.subr.mxu1 %v10919_v56 }
0x1b1d   :  { %5551 = vmatpush1.msra.mxu0 %v10923_v11  ;;  %5622 = vmatpush1.msra.mxu1 %v10925_v12 }
0x1b1e   :  { %5552 = vmatprep.subr.mxu0 %v10929_v59  ;;  %5623 = vmatprep.subr.mxu1 %v10931_v41 }
0x1b1f   :  { %5553 = vmatpush1.msra.mxu0 %v10935_v32  ;;  %5586 = vmatprep.mubr.f32.mxu0 %v12228_v60 }
0x1b20   :  { %5624 = vmatpush1.msra.mxu1 %v10939_v15  ;;  %5657 = vmatprep.mubr.f32.mxu1 %v12228_v60 }
0x1b21   :  { %5587 = vmatmul.mubr.f32.vlgmr.msra.gmra.mxu0 %v12228_v60  ;;  %5658 = vmatmul.mubr.f32.vlgmr.msra.gmra.mxu1 %v12228_v60 }
0x1b22   :  { %5696 = vmatprep.subr.mxu0 %v10752_v7  ;;  %5767 = vmatprep.subr.mxu1 %v10754_v62 }
0x1b23   :  { %5697 = vmatpush1.msra.mxu0 %v10759_v14  ;;  %5768 = vmatpush1.msra.mxu1 %v10761_v19 }
0x1b24   :  { %5698 = vmatprep.subr.mxu0 %v10763_v37  ;;  %5769 = vmatprep.subr.mxu1 %v10765_v39 }
0x1b25   :  { %5699 = vmatpush1.msra.mxu0 %v10769_v40  ;;  %5770 = vmatpush1.msra.mxu1 %v10771_v3 }
0x1b26   :  { %5700 = vmatprep.subr.mxu0 %v10773_v46  ;;  %5771 = vmatprep.subr.mxu1 %v10775_v48 }
0x1b27   :  { %5701 = vmatpush1.msra.mxu0 %v10781_v57  ;;  %5772 = vmatpush1.msra.mxu1 %v10783_v0 }
0x1b28   :  { %5702 = vmatprep.subr.mxu0 %v10787_v33  ;;  %5773 = vmatprep.subr.mxu1 %v10789_v61 }
0x1b29   :  { %5703 = vmatpush1.msra.mxu0 %v10791_v47  ;;  %5774 = vmatpush1.msra.mxu1 %v10793_v2 }
0x1b2a   :  { %5704 = vmatprep.subr.mxu0 %v10797_v1  ;;  %5775 = vmatprep.subr.mxu1 %v10799_v25 }
0x1b2b   :  { %5705 = vmatpush1.msra.mxu0 %v10803_v4  ;;  %5776 = vmatpush1.msra.mxu1 %v10805_v34 }
0x1b2c   :  { %5706 = vmatprep.subr.mxu0 %v10809_v5  ;;  %5777 = vmatprep.subr.mxu1 %v10811_v36 }
0x1b2d   :  { %5707 = vmatpush1.msra.mxu0 %v10815_v26  ;;  %5778 = vmatpush1.msra.mxu1 %v10817_v6 }
0x1b2e   :  { %5708 = vmatprep.subr.mxu0 %v10821_v8  ;;  %5779 = vmatprep.subr.mxu1 %v10823_v23 }
0x1b2f   :  { %5709 = vmatpush1.msra.mxu0 %v10827_v9  ;;  %5780 = vmatpush1.msra.mxu1 %v10829_v63 }
0x1b30   :  { %5710 = vmatprep.subr.mxu0 %v10833_v35  ;;  %5781 = vmatprep.subr.mxu1 %v10835_v22 }
0x1b31   :  { %5711 = vmatpush1.msra.mxu0 %v10839_v44  ;;  %5782 = vmatpush1.msra.mxu1 %v10841_v24 }
0x1b32   :  { %5712 = vmatprep.subr.mxu0 %v10845_v27  ;;  %5783 = vmatprep.subr.mxu1 %v10847_v52 }
0x1b33   :  { %5713 = vmatpush1.msra.mxu0 %v10851_v28  ;;  %5784 = vmatpush1.msra.mxu1 %v10853_v29 }
0x1b34   :  { %5714 = vmatprep.subr.mxu0 %v10857_v53  ;;  %5785 = vmatprep.subr.mxu1 %v10859_v30 }
0x1b35   :  { %5715 = vmatpush1.msra.mxu0 %v10863_v31  ;;  %5786 = vmatpush1.msra.mxu1 %v10865_v10 }
0x1b36   :  { %5716 = vmatprep.subr.mxu0 %v10869_v16  ;;  %5787 = vmatprep.subr.mxu1 %v10871_v49 }
0x1b37   :  { %5717 = vmatpush1.msra.mxu0 %v10875_v17  ;;  %5788 = vmatpush1.msra.mxu1 %v10877_v42  ;;  %v12253_v17 = vld [vmem:[#allocation51_spill] sm:$0xff] }
0x1b38   :  { %5718 = vmatprep.subr.mxu0 %v10881_v20  ;;  %5789 = vmatprep.subr.mxu1 %v10883_v54 }
0x1b39   :  { %5719 = vmatpush1.msra.mxu0 %v10887_v38  ;;  %5790 = vmatpush1.msra.mxu1 %v10889_v13 }
0x1b3a   :  { %5720 = vmatprep.subr.mxu0 %v10893_v21  ;;  %5791 = vmatprep.subr.mxu1 %v10895_v51 }
0x1b3b   :  { %5721 = vmatpush1.msra.mxu0 %v10899_v18  ;;  %5792 = vmatpush1.msra.mxu1 %v10901_v43 }
0x1b3c   :  { %5722 = vmatprep.subr.mxu0 %v10905_v45  ;;  %5793 = vmatprep.subr.mxu1 %v12253_v17 }
0x1b3d   :  { %5723 = vmatpush1.msra.mxu0 %v10911_v58  ;;  %5794 = vmatpush1.msra.mxu1 %v10913_v50  ;;  %v12257_v50 = vld [vmem:[#allocation67_spill] sm:$0xff] }
0x1b3e   :  { %5724 = vmatprep.subr.mxu0 %v10917_v55  ;;  %5795 = vmatprep.subr.mxu1 %v10919_v56  ;;  %v12255_v56 = vld [vmem:[#allocation65_spill] sm:$0xff]  ;;  %v12256_v55 = vld [vmem:[#allocation66_spill] sm:$0xff] }
0x1b3f   :  { %5725 = vmatpush1.msra.mxu0 %v10923_v11  ;;  %5796 = vmatpush1.msra.mxu1 %v10925_v12  ;;  %v5270_v12 = vld [vmem:[%s11607_s18] sm:$0xf] }
0x1b40   :  { %5726 = vmatprep.subr.mxu0 %v10929_v59  ;;  %5797 = vmatprep.subr.mxu1 %v10931_v41  ;;  %v12254_v11 = vld [vmem:[#allocation64_spill] sm:$0xff]  ;;  %v5283_v41 = vrot.slane %v5270_v12, %v12255_v56  ;;  %v5287_v58 = vrot.slane %v5270_v12, %v12257_v50 }
0x1b41   :  { %5727 = vmatpush1.msra.mxu0 %v10935_v32  ;;  %5760 = vmatprep.mubr.f32.mxu0 %v12228_v60  ;;  %v5275_v59 = vrot.slane %v5270_v12, %v12254_v11  ;;  %v5279_v32 = vrot.slane %v5270_v12, %v12256_v55 }
0x1b42   :  { %5798 = vmatpush1.msra.mxu1 %v10939_v15  ;;  %5831 = vmatprep.mubr.f32.mxu1 %v12228_v60 }
0x1b43   :  { %5888 = vmatprep.subr.mxu0 %v10752_v7  ;;  %5959 = vmatprep.subr.mxu1 %v10754_v62 }
0x1bbe   :  { %v5358_v17 = vpop.f32.mrf.mxu0  ;;  %v5435_v15 = vpop.f32.mrf.mxu1 }
0x1bbf   :  { %v5359_v45 = vadd.f32 %v5358_v17, %v5275_v59  ;;  %v5436_v60 = vadd.f32 %v5435_v15, %v5283_v41 }
0x1bc0   :  { %v5360_v43 = vpop.f32.mrf.mxu0  ;;  %v5437_v7 = vpop.f32.mrf.mxu1 }
0x1bc1   :  { %5446 = vst [vmem:[#allocation2 + $0x30] sm:$0xff] %v5359_v45  ;;  %5448 = vst [vmem:[#allocation2 + $0x18] sm:$0xff] %v5436_v60  ;;  %v5361_v62 = vadd.f32 %v5360_v43, %v5279_v32  ;;  %v5438_v18 = vadd.f32 %v5437_v7, %v5287_v58 }
0x1bc3   :  { %5447 = vst [vmem:[#allocation2] sm:$0xff] %v5361_v62  ;;  %5449 = vst [vmem:[#allocation2 + $0x10] sm:$0xff] %v5438_v18 }
0x1bc4   :  { %v5364_v51 = vpop.f32.mrf.mxu0  ;;  %v5441_v11 = vpop.f32.mrf.mxu1 }
0x1bc5   :  { %v5365_v21 = vadd.f32 %v5364_v51, %v5275_v59  ;;  %v5442_v56 = vadd.f32 %v5441_v11, %v5283_v41 }
0x1bc6   :  { %v5366_v13 = vpop.f32.mrf.mxu0  ;;  %v5443_v55 = vpop.f32.mrf.mxu1 }
0x1bc7   :  { %5450 = vst [vmem:[#allocation2 + $0x8] sm:$0xff] %v5365_v21  ;;  %5452 = vst [vmem:[#allocation2 + $0x28] sm:$0xff] %v5442_v56  ;;  %v5367_v12 = vadd.f32 %v5366_v13, %v5279_v32  ;;  %v5444_v50 = vadd.f32 %v5443_v55, %v5287_v58 }
0x1bc8   :  { %v5518_v17 = vld [vmem:[#allocation2 + $0x30] sm:$0x3]  ;;  %v5520_v56 = vld [vmem:[#allocation2 + $0x18] sm:$0x3] }
0x1bc9   :  { %5451 = vst [vmem:[#allocation2 + $0x20] sm:$0xff] %v5367_v12  ;;  %5453 = vst [vmem:[#allocation2 + $0x38] sm:$0xff] %v5444_v50 }
0x1bca   :  { %v5519_v60 = vld [vmem:[#allocation2] sm:$0x3]  ;;  %v5521_v11 = vld [vmem:[#allocation2 + $0x10] sm:$0x3] }
0x1be1   :  { %v5588_v15 = vpop.f32.mrf.mxu0  ;;  %v5659_v18 = vpop.f32.mrf.mxu1 }
0x1be2   :  { %v5664_v45 = vadd.f32 %v5588_v15, %v5518_v17  ;;  %v5666_v58 = vadd.f32 %v5659_v18, %v5520_v56  ;;  %v12262_v56 = vld [vmem:[#allocation47_spill] sm:$0xff] }
0x1be3   :  { %v5590_v43 = vpop.f32.mrf.mxu0  ;;  %v5661_v51 = vpop.f32.mrf.mxu1 }
0x1be4   :  { %v7471_v7 = vmul.f32 -1.442695, %v5664_v45  ;;  %v5665_v62 = vadd.f32 %v5590_v43, %v5519_v60  ;;  %v5667_v59 = vadd.f32 %v5661_v51, %v5521_v11  ;;  %v12258_v51 = vld [vmem:[#allocation70_spill] sm:$0xff]  ;;  %v12259_v11 = vld [vmem:[#allocation40_spill] sm:$0xff] }
0x1be6   :  { %8000 = vpow2.f32 %v7471_v7  ;;  %v7472_v38 = vmul.f32 -1.442695, %v5665_v62  ;;  %v7473_v21 = vmul.f32 -1.442695, %v5667_v59  ;;  %v12260_v59 = vld [vmem:[#allocation45_spill] sm:$0xff] }
0x1be8   :  { %8002 = vpow2.f32 %v7472_v38 }
0x1be9   :  { %8004 = vpow2.f32 %v7473_v21  ;;  %v12261_v21 = vld [vmem:[#allocation46_spill] sm:$0xff] }
0x1bf3   :  { %v8001_v13 = vpop.eup %8000 }
0x1bf4   :  { %v5671_v55 = vadd.f32 1.0, %v8001_v13  ;;  %v12263_v13 = vld [vmem:[#allocation48_spill] sm:$0xff] }
0x1bf5   :  { %v8003_v50 = vpop.eup %8002 }
0x1bf6   :  { %8006 = vrcp.f32 %v5671_v55  ;;  %v5677_v41 = vadd.f32 1.0, %v8003_v50  ;;  %v8005_v32 = vpop.eup %8004  ;;  %v12265_v55 = vld [vmem:[#allocation50_spill] sm:$0xff]  ;;  %v12266_v50 = vld [vmem:[#allocation51_spill] sm:$0xff] }
0x1bf7   :  { %8008 = vtanh.f32 %v5666_v58  ;;  %v5684_v45 = vadd.f32 1.0, %v8005_v32  ;;  %v12264_v58 = vld [vmem:[#allocation49_spill] sm:$0xff] }
0x1bf8   :  { %8010 = vrcp.f32 %v5677_v41  ;;  %v12267_v41 = vld [vmem:[#allocation52_spill] sm:$0xff]  ;;  %v12268_v32 = vld [vmem:[#allocation53_spill] sm:$0xff] }
0x1bf9   :  { %8012 = vrcp.f32 %v5684_v45  ;;  %v12272_v45 = vld [vmem:[#allocation57_spill] sm:$0xff] }
0x1c03   :  { %v8007_v12 = vpop.eup %8006 }
0x1c04   :  { %v8009_v17 = vpop.eup %8008 }
0x1c05   :  { %v8011_v15 = vpop.eup %8010  ;;  %v5688_v60 = vmul.f32 %v8009_v17, %v8007_v12  ;;  %v12269_v12 = vld [vmem:[#allocation54_spill] sm:$0xff]  ;;  %v12270_v17 = vld [vmem:[#allocation55_spill] sm:$0xff] }
0x1c06   :  { %v5687_v38 = vmul.f32 0.0, %v8011_v15  ;;  %v8013_v7 = vpop.eup %8012  ;;  %v12271_v15 = vld [vmem:[#allocation56_spill] sm:$0xff] }
0x1c08   :  { %v11024_v43 = vadd.f32 %v5688_v60, %v5687_v38  ;;  %v12273_v38 = vld [vmem:[#allocation58_spill] sm:$0xff]  ;;  %v12274_v60 = vld [vmem:[#allocation59_spill] sm:$0xff] }
0x1c0a   :  { %8014 = vtanh.f32 %v11024_v43 }
0x1c17   :  { %v8015_v62 = vpop.eup %8014 }
0x1c18   :  { %v5691_v18 = vmul.f32 %v8015_v62, %v8013_v7  ;;  %v12275_v7 = vld [vmem:[#allocation60_spill] sm:$0xff]  ;;  %v12276_v62 = vmov 0.0  }
0x1c1a   :  { %5761 = vmatmul.mubr.f32.vlgmr.msra.gmra.mxu0 %v5691_v18  ;;  %5832 = vmatmul.mubr.f32.vlgmr.msra.gmra.mxu1 %v5691_v18  ;;  %v12277_v18 = vld [vmem:[#allocation61_spill] sm:$0xff] }
0x1c1b   :  { %5889 = vmatpush1.msra.mxu0 %v10759_v14  ;;  %5960 = vmatpush1.msra.mxu1 %v10761_v19 }
0x1c1c   :  { %5890 = vmatprep.subr.mxu0 %v10763_v37  ;;  %5961 = vmatprep.subr.mxu1 %v10765_v39 }
0x1c1d   :  { %5891 = vmatpush1.msra.mxu0 %v10769_v40  ;;  %5962 = vmatpush1.msra.mxu1 %v10771_v3 }
0x1c1e   :  { %5892 = vmatprep.subr.mxu0 %v10773_v46  ;;  %5963 = vmatprep.subr.mxu1 %v10775_v48 }
0x1c1f   :  { %5893 = vmatpush1.msra.mxu0 %v10781_v57  ;;  %5964 = vmatpush1.msra.mxu1 %v10783_v0 }
0x1c20   :  { %5894 = vmatprep.subr.mxu0 %v10787_v33  ;;  %5965 = vmatprep.subr.mxu1 %v10789_v61 }
0x1c21   :  { %5895 = vmatpush1.msra.mxu0 %v10791_v47  ;;  %5966 = vmatpush1.msra.mxu1 %v10793_v2 }
0x1c22   :  { %5896 = vmatprep.subr.mxu0 %v10797_v1  ;;  %5967 = vmatprep.subr.mxu1 %v10799_v25 }
0x1c23   :  { %5897 = vmatpush1.msra.mxu0 %v10803_v4  ;;  %5968 = vmatpush1.msra.mxu1 %v10805_v34 }
0x1c24   :  { %5898 = vmatprep.subr.mxu0 %v10809_v5  ;;  %5969 = vmatprep.subr.mxu1 %v10811_v36 }
0x1c25   :  { %5899 = vmatpush1.msra.mxu0 %v10815_v26  ;;  %5970 = vmatpush1.msra.mxu1 %v10817_v6 }
0x1c26   :  { %5900 = vmatprep.subr.mxu0 %v10821_v8  ;;  %5971 = vmatprep.subr.mxu1 %v10823_v23 }
0x1c27   :  { %5901 = vmatpush1.msra.mxu0 %v10827_v9  ;;  %5972 = vmatpush1.msra.mxu1 %v10829_v63 }
0x1c28   :  { %5902 = vmatprep.subr.mxu0 %v10833_v35  ;;  %5973 = vmatprep.subr.mxu1 %v10835_v22 }
0x1c29   :  { %5903 = vmatpush1.msra.mxu0 %v10839_v44  ;;  %5974 = vmatpush1.msra.mxu1 %v10841_v24 }
0x1c2a   :  { %5904 = vmatprep.subr.mxu0 %v10845_v27  ;;  %5975 = vmatprep.subr.mxu1 %v10847_v52 }
0x1c2b   :  { %5905 = vmatpush1.msra.mxu0 %v10851_v28  ;;  %5976 = vmatpush1.msra.mxu1 %v10853_v29 }
0x1c2c   :  { %5906 = vmatprep.subr.mxu0 %v10857_v53  ;;  %5977 = vmatprep.subr.mxu1 %v10859_v30 }
0x1c2d   :  { %5907 = vmatpush1.msra.mxu0 %v10863_v31  ;;  %5978 = vmatpush1.msra.mxu1 %v10865_v10 }
0x1c2e   :  { %5908 = vmatprep.subr.mxu0 %v10869_v16  ;;  %5979 = vmatprep.subr.mxu1 %v10871_v49 }
0x1c2f   :  { %5909 = vmatpush1.msra.mxu0 %v12258_v51  ;;  %5980 = vmatpush1.msra.mxu1 %v10877_v42 }
0x1c30   :  { %5910 = vmatprep.subr.mxu0 %v10881_v20  ;;  %5981 = vmatprep.subr.mxu1 %v10883_v54 }
0x1c31   :  { %5911 = vmatpush1.msra.mxu0 %v12259_v11  ;;  %5982 = vmatpush1.msra.mxu1 %v12260_v59 }
0x1c32   :  { %5912 = vmatprep.subr.mxu0 %v12261_v21  ;;  %5983 = vmatprep.subr.mxu1 %v12262_v56 }
0x1c33   :  { %5913 = vmatpush1.msra.mxu0 %v12263_v13  ;;  %5984 = vmatpush1.msra.mxu1 %v12264_v58 }
0x1c34   :  { %5914 = vmatprep.subr.mxu0 %v12265_v55  ;;  %5985 = vmatprep.subr.mxu1 %v12266_v50 }
0x1c35   :  { %5915 = vmatpush1.msra.mxu0 %v12267_v41  ;;  %5986 = vmatpush1.msra.mxu1 %v12268_v32  ;;  %v12278_v32 = vld [vmem:[#allocation68_spill] sm:$0xff]  ;;  %v5692_v41 = vld [vmem:[#allocation2 + $0x30] sm:$0xc] }
0x1c36   :  { %5916 = vmatprep.subr.mxu0 %v12269_v12  ;;  %5987 = vmatprep.subr.mxu1 %v12270_v17  ;;  %v12279_v12 = vld [vmem:[#allocation69_spill] sm:$0xff] }
0x1c37   :  { %5917 = vmatpush1.msra.mxu0 %v12271_v15  ;;  %5988 = vmatpush1.msra.mxu1 %v12272_v45 }
0x1c38   :  { %5918 = vmatprep.subr.mxu0 %v12273_v38  ;;  %5989 = vmatprep.subr.mxu1 %v12274_v60  ;;  %v5693_v60 = vld [vmem:[#allocation2] sm:$0xc] }
0x1c39   :  { %5919 = vmatpush1.msra.mxu0 %v12275_v7  ;;  %5952 = vmatprep.mubr.f32.mxu0 %v12276_v62 }
0x1c3a   :  { %5990 = vmatpush1.msra.mxu1 %v12277_v18  ;;  %6023 = vmatprep.mubr.f32.mxu1 %v12276_v62  ;;  %v5695_v62 = vld [vmem:[#allocation2 + $0x10] sm:$0xc] }
0x1c3b   :  { %6080 = vmatprep.subr.mxu0 %v12278_v32  ;;  %6151 = vmatprep.subr.mxu1 %v12279_v12  ;;  %v5694_v12 = vld [vmem:[#allocation2 + $0x18] sm:$0xc] }
0x1cda   :  { %v5762_v17 = vpop.f32.mrf.mxu0  ;;  %v5833_v38 = vpop.f32.mrf.mxu1 }
0x1cdb   :  { %v5842_v15 = vrot.slane %v5762_v17, 6  ;;  %v5844_v32 = vrot.slane %v5833_v38, 6 }
0x1cdc   :  { %v5764_v45 = vpop.f32.mrf.mxu0  ;;  %v5835_v56 = vpop.f32.mrf.mxu1 }
0x1cdd   :  { %v5850_v50 = vadd.f32 %v5842_v15, %v5692_v41  ;;  %v5843_v55 = vrot.slane %v5764_v45, 6  ;;  %v5845_v18 = vrot.slane %v5835_v56, 6  ;;  %v5852_v17 = vadd.f32 %v5844_v32, %v5694_v12  ;;  %v12281_v32 = vld [vmem:[#allocation44_spill] sm:$0xff] }
0x1cde   :  { %v12282_v12 = vld [vmem:[#allocation40_spill] sm:$0xff] }
0x1cdf   :  { %v7474_v58 = vmul.f32 -1.442695, %v5850_v50  ;;  %v5851_v7 = vadd.f32 %v5843_v55, %v5693_v60  ;;  %v5853_v21 = vadd.f32 %v5845_v18, %v5695_v62  ;;  %v12283_v60 = vld [vmem:[#allocation45_spill] sm:$0xff]  ;;  %v12285_v62 = vld [vmem:[#allocation47_spill] sm:$0xff]  ;;  %v12286_v18 = vld [vmem:[#allocation48_spill] sm:$0xff] }
0x1ce1   :  { %8016 = vpow2.f32 %v7474_v58  ;;  %v7475_v13 = vmul.f32 -1.442695, %v5851_v7  ;;  %v7476_v59 = vmul.f32 -1.442695, %v5853_v21  ;;  %v12284_v7 = vld [vmem:[#allocation46_spill] sm:$0xff] }
0x1ce3   :  { %8018 = vpow2.f32 %v7475_v13  ;;  %v5874_v13 = vrot.slane %v11024_v43, 6  ;;  %v12280_v43 = vld [vmem:[#allocation41_spill] sm:$0xff] }
0x1ce4   :  { %8020 = vpow2.f32 %v7476_v59 }
0x1cee   :  { %v8017_v11 = vpop.eup %8016 }
0x1cef   :  { %v5857_v54 = vadd.f32 1.0, %v8017_v11 }
0x1cf0   :  { %v8019_v20 = vpop.eup %8018 }
0x1cf1   :  { %8022 = vrcp.f32 %v5857_v54  ;;  %v5863_v41 = vadd.f32 1.0, %v8019_v20  ;;  %v8021_v55 = vpop.eup %8020 }
0x1cf2   :  { %8024 = vtanh.f32 %v5852_v17  ;;  %v5870_v15 = vadd.f32 1.0, %v8021_v55  ;;  %v12287_v17 = vld [vmem:[#allocation49_spill] sm:$0xff]  ;;  %v12289_v55 = vld [vmem:[#allocation51_spill] sm:$0xff] }
0x1cf3   :  { %8026 = vrcp.f32 %v5863_v41  ;;  %v12288_v41 = vld [vmem:[#allocation50_spill] sm:$0xff] }
0x1cf4   :  { %8028 = vrcp.f32 %v5870_v15  ;;  %v12294_v15 = vld [vmem:[#allocation56_spill] sm:$0xff] }
0x1cfe   :  { %v8023_v58 = vpop.eup %8022 }
0x1cff   :  { %v8025_v50 = vpop.eup %8024 }
0x1d00   :  { %v8027_v56 = vpop.eup %8026  ;;  %v5877_v45 = vmul.f32 %v8025_v50, %v8023_v58  ;;  %v12290_v58 = vld [vmem:[#allocation52_spill] sm:$0xff]  ;;  %v12291_v50 = vld [vmem:[#allocation53_spill] sm:$0xff] }
0x1d01   :  { %v5876_v38 = vmul.f32 %v8027_v56, %v5874_v13  ;;  %v8029_v11 = vpop.eup %8028  ;;  %v12292_v13 = vld [vmem:[#allocation54_spill] sm:$0xff]  ;;  %v12293_v56 = vld [vmem:[#allocation55_spill] sm:$0xff] }
0x1d03   :  { %v11094_v21 = vadd.f32 %v5877_v45, %v5876_v38  ;;  %v12295_v45 = vld [vmem:[#allocation57_spill] sm:$0xff]  ;;  %v12296_v38 = vld [vmem:[#allocation58_spill] sm:$0xff] }
0x1d05   :  { %8030 = vtanh.f32 %v11094_v21 }
0x1d12   :  { %v8031_v59 = vpop.eup %8030 }
0x1d13   :  { %v5880_v54 = vmul.f32 %v8031_v59, %v8029_v11  ;;  %v12297_v11 = vld [vmem:[#allocation59_spill] sm:$0xff]  ;;  %v12298_v59 = vld [vmem:[#allocation60_spill] sm:$0xff] }
0x1d15   :  { %v5886_v20 = vrot.slane %v5880_v54, 2  ;;  %v12299_v54 = vmov 0.0  }
0x1d17   :  { %5953 = vmatmul.mubr.f32.vlgmr.msra.gmra.mxu0 %v5886_v20  ;;  %6024 = vmatmul.mubr.f32.vlgmr.msra.gmra.mxu1 %v5886_v20  ;;  %v12300_v20 = vld [vmem:[#allocation61_spill] sm:$0xff] }
0x1d18   :  { %6081 = vmatpush1.msra.mxu0 %v10759_v14  ;;  %6152 = vmatpush1.msra.mxu1 %v10761_v19 }
0x1d19   :  { %6082 = vmatprep.subr.mxu0 %v10763_v37  ;;  %6153 = vmatprep.subr.mxu1 %v10765_v39 }
0x1d1a   :  { %6083 = vmatpush1.msra.mxu0 %v10769_v40  ;;  %6154 = vmatpush1.msra.mxu1 %v10771_v3 }
0x1d1b   :  { %6084 = vmatprep.subr.mxu0 %v10773_v46  ;;  %6155 = vmatprep.subr.mxu1 %v10775_v48 }
0x1d1c   :  { %6085 = vmatpush1.msra.mxu0 %v10781_v57  ;;  %6156 = vmatpush1.msra.mxu1 %v10783_v0 }
0x1d1d   :  { %6086 = vmatprep.subr.mxu0 %v10787_v33  ;;  %6157 = vmatprep.subr.mxu1 %v10789_v61 }
0x1d1e   :  { %6087 = vmatpush1.msra.mxu0 %v10791_v47  ;;  %6158 = vmatpush1.msra.mxu1 %v10793_v2 }
0x1d1f   :  { %6088 = vmatprep.subr.mxu0 %v10797_v1  ;;  %6159 = vmatprep.subr.mxu1 %v10799_v25 }
0x1d20   :  { %6089 = vmatpush1.msra.mxu0 %v10803_v4  ;;  %6160 = vmatpush1.msra.mxu1 %v10805_v34 }
0x1d21   :  { %6090 = vmatprep.subr.mxu0 %v10809_v5  ;;  %6161 = vmatprep.subr.mxu1 %v10811_v36 }
0x1d22   :  { %6091 = vmatpush1.msra.mxu0 %v10815_v26  ;;  %6162 = vmatpush1.msra.mxu1 %v10817_v6 }
0x1d23   :  { %6092 = vmatprep.subr.mxu0 %v10821_v8  ;;  %6163 = vmatprep.subr.mxu1 %v10823_v23 }
0x1d24   :  { %6093 = vmatpush1.msra.mxu0 %v10827_v9  ;;  %6164 = vmatpush1.msra.mxu1 %v10829_v63 }
0x1d25   :  { %6094 = vmatprep.subr.mxu0 %v10833_v35  ;;  %6165 = vmatprep.subr.mxu1 %v10835_v22 }
0x1d26   :  { %6095 = vmatpush1.msra.mxu0 %v10839_v44  ;;  %6166 = vmatpush1.msra.mxu1 %v10841_v24 }
0x1d27   :  { %6096 = vmatprep.subr.mxu0 %v10845_v27  ;;  %6167 = vmatprep.subr.mxu1 %v10847_v52 }
0x1d28   :  { %6097 = vmatpush1.msra.mxu0 %v10851_v28  ;;  %6168 = vmatpush1.msra.mxu1 %v10853_v29 }
0x1d29   :  { %6098 = vmatprep.subr.mxu0 %v10857_v53  ;;  %6169 = vmatprep.subr.mxu1 %v10859_v30 }
0x1d2a   :  { %6099 = vmatpush1.msra.mxu0 %v10863_v31  ;;  %6170 = vmatpush1.msra.mxu1 %v10865_v10 }
0x1d2b   :  { %6100 = vmatprep.subr.mxu0 %v10869_v16  ;;  %6171 = vmatprep.subr.mxu1 %v10871_v49 }
0x1d2c   :  { %6101 = vmatpush1.msra.mxu0 %v12258_v51  ;;  %6172 = vmatpush1.msra.mxu1 %v10877_v42 }
0x1d2d   :  { %6102 = vmatprep.subr.mxu0 %v12280_v43  ;;  %6173 = vmatprep.subr.mxu1 %v12281_v32 }
0x1d2e   :  { %6103 = vmatpush1.msra.mxu0 %v12282_v12  ;;  %6174 = vmatpush1.msra.mxu1 %v12283_v60 }
0x1d2f   :  { %6104 = vmatprep.subr.mxu0 %v12284_v7  ;;  %6175 = vmatprep.subr.mxu1 %v12285_v62 }
0x1d30   :  { %6105 = vmatpush1.msra.mxu0 %v12286_v18  ;;  %6176 = vmatpush1.msra.mxu1 %v12287_v17 }
0x1d31   :  { %6106 = vmatprep.subr.mxu0 %v12288_v41  ;;  %6177 = vmatprep.subr.mxu1 %v12289_v55 }
0x1d32   :  { %6107 = vmatpush1.msra.mxu0 %v12290_v58  ;;  %6178 = vmatpush1.msra.mxu1 %v12291_v50  ;;  %v12301_v50 = vld [vmem:[#allocation68_spill] sm:$0xff]  ;;  %v5881_v58 = vld [vmem:[#allocation2 + $0x30] sm:$0x30] }
0x1d33   :  { %6108 = vmatprep.subr.mxu0 %v12292_v13  ;;  %6179 = vmatprep.subr.mxu1 %v12293_v56  ;;  %v12302_v13 = vld [vmem:[#allocation69_spill] sm:$0xff] }
0x1d34   :  { %6109 = vmatpush1.msra.mxu0 %v12294_v15  ;;  %6180 = vmatpush1.msra.mxu1 %v12295_v45 }
0x1d35   :  { %6110 = vmatprep.subr.mxu0 %v12296_v38  ;;  %6181 = vmatprep.subr.mxu1 %v12297_v11  ;;  %v5882_v11 = vld [vmem:[#allocation2] sm:$0x30] }
0x1d36   :  { %6111 = vmatpush1.msra.mxu0 %v12298_v59  ;;  %6144 = vmatprep.mubr.f32.mxu0 %v12299_v54 }
0x1d37   :  { %6182 = vmatpush1.msra.mxu1 %v12300_v20  ;;  %6215 = vmatprep.mubr.f32.mxu1 %v12299_v54  ;;  %v5884_v54 = vld [vmem:[#allocation2 + $0x10] sm:$0x30] }
0x1d38   :  { %6272 = vmatprep.subr.mxu0 %v12301_v50  ;;  %6343 = vmatprep.subr.mxu1 %v12302_v13  ;;  %v5883_v13 = vld [vmem:[#allocation2 + $0x18] sm:$0x30] }
0x1dd7   :  { %v5954_v56 = vpop.f32.mrf.mxu0  ;;  %v6025_v38 = vpop.f32.mrf.mxu1 }
0x1dd8   :  { %v6034_v15 = vrot.slane %v5954_v56, 4  ;;  %v6036_v50 = vrot.slane %v6025_v38, 4 }
0x1dd9   :  { %v5956_v45 = vpop.f32.mrf.mxu0  ;;  %v6027_v62 = vpop.f32.mrf.mxu1 }
0x1dda   :  { %v6042_v55 = vadd.f32 %v6034_v15, %v5881_v58  ;;  %v6035_v41 = vrot.slane %v5956_v45, 4  ;;  %v6037_v20 = vrot.slane %v6027_v62, 4  ;;  %v6044_v56 = vadd.f32 %v6036_v50, %v5883_v13 }
0x1ddc   :  { %v7477_v17 = vmul.f32 -1.442695, %v6042_v55  ;;  %v6043_v59 = vadd.f32 %v6035_v41, %v5882_v11  ;;  %v6045_v7 = vadd.f32 %v6037_v20, %v5884_v54 }
0x1dde   :  { %8032 = vpow2.f32 %v7477_v17  ;;  %v7478_v18 = vmul.f32 -1.442695, %v6043_v59  ;;  %v7479_v60 = vmul.f32 -1.442695, %v6045_v7 }
0x1de0   :  { %8034 = vpow2.f32 %v7478_v18  ;;  %v6066_v18 = vrot.slane %v11094_v21, 6 }
0x1de1   :  { %8036 = vpow2.f32 %v7479_v60 }
0x1deb   :  { %v8033_v12 = vpop.eup %8032 }
0x1dec   :  { %v6049_v32 = vadd.f32 1.0, %v8033_v12 }
0x1ded   :  { %v8035_v43 = vpop.eup %8034 }
0x1dee   :  { %8038 = vrcp.f32 %v6049_v32  ;;  %v6055_v58 = vadd.f32 1.0, %v8035_v43  ;;  %v8037_v41 = vpop.eup %8036 }
0x1def   :  { %8040 = vtanh.f32 %v6044_v56  ;;  %v6062_v15 = vadd.f32 1.0, %v8037_v41 }
0x1df0   :  { %8042 = vrcp.f32 %v6055_v58 }
0x1df1   :  { %8044 = vrcp.f32 %v6062_v15 }
0x1dfb   :  { %v8039_v17 = vpop.eup %8038 }
0x1dfc   :  { %v8041_v55 = vpop.eup %8040 }
0x1dfd   :  { %v8043_v62 = vpop.eup %8042  ;;  %v6069_v45 = vmul.f32 %v8041_v55, %v8039_v17 }
0x1dfe   :  { %v6068_v38 = vmul.f32 %v8043_v62, %v6066_v18  ;;  %v8045_v12 = vpop.eup %8044 }
0x1e00   :  { %v11164_v7 = vadd.f32 %v6069_v45, %v6068_v38 }
0x1e02   :  { %8046 = vtanh.f32 %v11164_v7  ;;  %v6258_v56 = vrot.slane %v11164_v7, 6  ;;  %v11244_v7 = vld [vmem:[#allocation28 + $0x1f0] sm:$0xff] }
0x1e0f   :  { %v8047_v60 = vpop.eup %8046 }
0x1e10   :  { %v6072_v32 = vmul.f32 %v8047_v60, %v8045_v12  ;;  %v11241_v12 = vld [vmem:[#allocation28 + $0x1e0] sm:$0xff]  ;;  %v11247_v60 = vld [vmem:[#allocation28 + $0x1c8] sm:$0xff] }
0x1e12   :  { %v6078_v43 = vrot.slane %v6072_v32, 4  ;;  %v11250_v32 = vld [vmem:[#allocation28 + $0x1d8] sm:$0xff] }
0x1e14   :  { %6145 = vmatmul.mubr.f32.vlgmr.msra.gmra.mxu0 %v6078_v43  ;;  %6216 = vmatmul.mubr.f32.vlgmr.msra.gmra.mxu1 %v6078_v43  ;;  %v11253_v43 = vld [vmem:[#allocation28 + $0x1c0] sm:$0xff] }
0x1e15   :  { %6273 = vmatpush1.msra.mxu0 %v10759_v14  ;;  %6344 = vmatpush1.msra.mxu1 %v10761_v19  ;;  %v12303_v14 = vld [vmem:[#allocation41_spill] sm:$0xff]  ;;  %v12304_v19 = vld [vmem:[#allocation44_spill] sm:$0xff] }
0x1e16   :  { %6274 = vmatprep.subr.mxu0 %v10763_v37  ;;  %6345 = vmatprep.subr.mxu1 %v10765_v39  ;;  %v12305_v37 = vld [vmem:[#allocation40_spill] sm:$0xff]  ;;  %v12306_v39 = vld [vmem:[#allocation45_spill] sm:$0xff] }
0x1e17   :  { %6275 = vmatpush1.msra.mxu0 %v10769_v40  ;;  %6346 = vmatpush1.msra.mxu1 %v10771_v3  ;;  %v12307_v40 = vld [vmem:[#allocation46_spill] sm:$0xff]  ;;  %v12308_v3 = vld [vmem:[#allocation47_spill] sm:$0xff] }
0x1e18   :  { %6276 = vmatprep.subr.mxu0 %v10773_v46  ;;  %6347 = vmatprep.subr.mxu1 %v10775_v48  ;;  %v12309_v46 = vld [vmem:[#allocation48_spill] sm:$0xff]  ;;  %v12310_v48 = vld [vmem:[#allocation49_spill] sm:$0xff] }
0x1e19   :  { %6277 = vmatpush1.msra.mxu0 %v10781_v57  ;;  %6348 = vmatpush1.msra.mxu1 %v10783_v0  ;;  %v12311_v57 = vld [vmem:[#allocation50_spill] sm:$0xff]  ;;  %v12312_v0 = vld [vmem:[#allocation51_spill] sm:$0xff] }
0x1e1a   :  { %6278 = vmatprep.subr.mxu0 %v10787_v33  ;;  %6349 = vmatprep.subr.mxu1 %v10789_v61  ;;  %v12313_v33 = vld [vmem:[#allocation52_spill] sm:$0xff]  ;;  %v12314_v61 = vld [vmem:[#allocation53_spill] sm:$0xff] }
0x1e1b   :  { %6279 = vmatpush1.msra.mxu0 %v10791_v47  ;;  %6350 = vmatpush1.msra.mxu1 %v10793_v2  ;;  %v12315_v47 = vld [vmem:[#allocation54_spill] sm:$0xff]  ;;  %v12316_v2 = vld [vmem:[#allocation55_spill] sm:$0xff] }
0x1e1c   :  { %6280 = vmatprep.subr.mxu0 %v10797_v1  ;;  %6351 = vmatprep.subr.mxu1 %v10799_v25  ;;  %v12317_v1 = vld [vmem:[#allocation56_spill] sm:$0xff]  ;;  %v12318_v25 = vld [vmem:[#allocation57_spill] sm:$0xff] }
0x1e1d   :  { %6281 = vmatpush1.msra.mxu0 %v10803_v4  ;;  %6352 = vmatpush1.msra.mxu1 %v10805_v34  ;;  %v12319_v4 = vld [vmem:[#allocation58_spill] sm:$0xff]  ;;  %v12320_v34 = vld [vmem:[#allocation59_spill] sm:$0xff] }
0x1e1e   :  { %6282 = vmatprep.subr.mxu0 %v10809_v5  ;;  %6353 = vmatprep.subr.mxu1 %v10811_v36  ;;  %v12321_v5 = vld [vmem:[#allocation60_spill] sm:$0xff]  ;;  %v12322_v36 = vmov 0.0  }
0x1e1f   :  { %6283 = vmatpush1.msra.mxu0 %v10815_v26  ;;  %6354 = vmatpush1.msra.mxu1 %v10817_v6  ;;  %v12323_v26 = vld [vmem:[#allocation61_spill] sm:$0xff] }
0x1e20   :  { %6284 = vmatprep.subr.mxu0 %v10821_v8  ;;  %6355 = vmatprep.subr.mxu1 %v10823_v23  ;;  %v11231_v6 = vld [vmem:[#allocation28 + $0x1e8] sm:$0xff]  ;;  %v11234_v8 = vld [vmem:[#allocation28 + $0x1f8] sm:$0xff] }
0x1e21   :  { %6285 = vmatpush1.msra.mxu0 %v10827_v9  ;;  %6356 = vmatpush1.msra.mxu1 %v10829_v63  ;;  %12324 = vst [vmem:[#allocation62_spill] sm:$0xff] %v11231_v6  ;;  %12325 = vst [vmem:[#allocation63_spill] sm:$0xff] %v11234_v8  ;;  %v6073_v63 = vld [vmem:[#allocation2 + $0x30] sm:$0xc0] }
0x1e22   :  { %6286 = vmatprep.subr.mxu0 %v10833_v35  ;;  %6357 = vmatprep.subr.mxu1 %v10835_v22 }
0x1e23   :  { %6287 = vmatpush1.msra.mxu0 %v10839_v44  ;;  %6358 = vmatpush1.msra.mxu1 %v10841_v24 }
0x1e24   :  { %6288 = vmatprep.subr.mxu0 %v10845_v27  ;;  %6359 = vmatprep.subr.mxu1 %v10847_v52  ;;  %v6074_v27 = vld [vmem:[#allocation2] sm:$0xc0] }
0x1e25   :  { %6289 = vmatpush1.msra.mxu0 %v10851_v28  ;;  %6360 = vmatpush1.msra.mxu1 %v10853_v29 }
0x1e26   :  { %6290 = vmatprep.subr.mxu0 %v10857_v53  ;;  %6361 = vmatprep.subr.mxu1 %v10859_v30 }
0x1e27   :  { %6291 = vmatpush1.msra.mxu0 %v10863_v31  ;;  %6362 = vmatpush1.msra.mxu1 %v10865_v10  ;;  %v6076_v31 = vld [vmem:[#allocation2 + $0x10] sm:$0xc0] }
0x1e28   :  { %6292 = vmatprep.subr.mxu0 %v10869_v16  ;;  %6363 = vmatprep.subr.mxu1 %v10871_v49 }
0x1e29   :  { %6293 = vmatpush1.msra.mxu0 %v12258_v51  ;;  %6364 = vmatpush1.msra.mxu1 %v10877_v42  ;;  %v6075_v42 = vld [vmem:[#allocation2 + $0x18] sm:$0xc0] }
0x1e2a   :  { %6294 = vmatprep.subr.mxu0 %v12303_v14  ;;  %6365 = vmatprep.subr.mxu1 %v12304_v19  ;;  %v11256_v14 = vld [vmem:[#allocation28 + $0x1d0] sm:$0xff]  ;;  %v11259_v19 = vld [vmem:[#allocation28 + $0x1a8] sm:$0xff] }
0x1e2b   :  { %6295 = vmatpush1.msra.mxu0 %v12305_v37  ;;  %6366 = vmatpush1.msra.mxu1 %v12306_v39  ;;  %v11262_v37 = vld [vmem:[#allocation28 + $0x1b8] sm:$0xff]  ;;  %v11265_v39 = vld [vmem:[#allocation28 + $0x1a0] sm:$0xff] }
0x1e2c   :  { %6296 = vmatprep.subr.mxu0 %v12307_v40  ;;  %6367 = vmatprep.subr.mxu1 %v12308_v3  ;;  %v11268_v40 = vld [vmem:[#allocation28 + $0x1b0] sm:$0xff]  ;;  %v11271_v3 = vld [vmem:[#allocation28 + $0x188] sm:$0xff] }
0x1e2d   :  { %6297 = vmatpush1.msra.mxu0 %v12309_v46  ;;  %6368 = vmatpush1.msra.mxu1 %v12310_v48  ;;  %v11274_v46 = vld [vmem:[#allocation28 + $0x198] sm:$0xff]  ;;  %v11277_v48 = vld [vmem:[#allocation28 + $0x180] sm:$0xff] }
0x1e2e   :  { %6298 = vmatprep.subr.mxu0 %v12311_v57  ;;  %6369 = vmatprep.subr.mxu1 %v12312_v0  ;;  %v11280_v57 = vld [vmem:[#allocation28 + $0x190] sm:$0xff]  ;;  %v11283_v0 = vld [vmem:[#allocation28 + $0x168] sm:$0xff] }
0x1e2f   :  { %6299 = vmatpush1.msra.mxu0 %v12313_v33  ;;  %6370 = vmatpush1.msra.mxu1 %v12314_v61  ;;  %v11286_v33 = vld [vmem:[#allocation28 + $0x178] sm:$0xff]  ;;  %v11289_v61 = vld [vmem:[#allocation28 + $0x160] sm:$0xff] }
0x1e30   :  { %6300 = vmatprep.subr.mxu0 %v12315_v47  ;;  %6371 = vmatprep.subr.mxu1 %v12316_v2  ;;  %v11292_v47 = vld [vmem:[#allocation28 + $0x170] sm:$0xff]  ;;  %v11295_v2 = vld [vmem:[#allocation28 + $0x148] sm:$0xff] }
0x1e31   :  { %6301 = vmatpush1.msra.mxu0 %v12317_v1  ;;  %6372 = vmatpush1.msra.mxu1 %v12318_v25  ;;  %v11298_v1 = vld [vmem:[#allocation28 + $0x158] sm:$0xff]  ;;  %v11301_v25 = vld [vmem:[#allocation28 + $0x140] sm:$0xff] }
0x1e32   :  { %6302 = vmatprep.subr.mxu0 %v12319_v4  ;;  %6373 = vmatprep.subr.mxu1 %v12320_v34  ;;  %v11304_v4 = vld [vmem:[#allocation28 + $0x150] sm:$0xff]  ;;  %v11307_v34 = vld [vmem:[#allocation28 + $0x128] sm:$0xff] }
0x1e33   :  { %6303 = vmatpush1.msra.mxu0 %v12321_v5  ;;  %6336 = vmatprep.mubr.f32.mxu0 %v12322_v36  ;;  %v11310_v5 = vld [vmem:[#allocation28 + $0x138] sm:$0xff] }
0x1e34   :  { %6374 = vmatpush1.msra.mxu1 %v12323_v26  ;;  %6407 = vmatprep.mubr.f32.mxu1 %v12322_v36  ;;  %v11313_v26 = vld [vmem:[#allocation28 + $0x120] sm:$0xff] }
0x1e35   :  { %6449 = vmatprep.subr.mxu0 %v11231_v6  ;;  %6520 = vmatprep.subr.mxu1 %v11234_v8 }
0x1ed4   :  { %v6146_v23 = vpop.f32.mrf.mxu0  ;;  %v6217_v44 = vpop.f32.mrf.mxu1 }
0x1ed5   :  { %v6226_v9 = vrot.slane %v6146_v23, 2  ;;  %v6228_v16 = vrot.slane %v6217_v44, 2  ;;  %v11316_v23 = vld [vmem:[#allocation28 + $0x130] sm:$0xff]  ;;  %v11331_v44 = vld [vmem:[#allocation28 + $0xe8] sm:$0xff] }
0x1ed6   :  { %v6148_v35 = vpop.f32.mrf.mxu0  ;;  %v6219_v53 = vpop.f32.mrf.mxu1 }
0x1ed7   :  { %v6234_v22 = vadd.f32 %v6226_v9, %v6073_v63  ;;  %v6227_v24 = vrot.slane %v6148_v35, 2  ;;  %v6229_v30 = vrot.slane %v6219_v53, 2  ;;  %v6236_v21 = vadd.f32 %v6228_v16, %v6075_v42  ;;  %v11319_v9 = vld [vmem:[#allocation28 + $0x108] sm:$0xff]  ;;  %v11322_v63 = vld [vmem:[#allocation28 + $0x118] sm:$0xff]  ;;  %v11325_v35 = vld [vmem:[#allocation28 + $0x100] sm:$0xff] }
0x1ed8   :  { %v11349_v53 = vld [vmem:[#allocation28 + $0xc0] sm:$0xff]  ;;  %v11367_v42 = vld [vmem:[#allocation28 + $0x88] sm:$0xff] }
0x1ed9   :  { %v7480_v52 = vmul.f32 -1.442695, %v6234_v22  ;;  %v6235_v28 = vadd.f32 %v6227_v24, %v6074_v27  ;;  %v6237_v10 = vadd.f32 %v6229_v30, %v6076_v31  ;;  %v11328_v22 = vld [vmem:[#allocation28 + $0x110] sm:$0xff]  ;;  %v11334_v24 = vld [vmem:[#allocation28 + $0xf8] sm:$0xff]  ;;  %v11337_v27 = vld [vmem:[#allocation28 + $0xe0] sm:$0xff]  ;;  %12326 = vst [vmem:[#allocation42_spill] sm:$0xff] %v11367_v42 }
0x1eda   :  { %v11352_v30 = vld [vmem:[#allocation28 + $0xd0] sm:$0xff]  ;;  %v11355_v31 = vld [vmem:[#allocation28 + $0xa8] sm:$0xff]  ;;  %v11361_v16 = vld [vmem:[#allocation28 + $0xa0] sm:$0xff] }
0x1edb   :  { %8048 = vpow2.f32 %v7480_v52  ;;  %v7481_v29 = vmul.f32 -1.442695, %v6235_v28  ;;  %v7482_v49 = vmul.f32 -1.442695, %v6237_v10  ;;  %v11340_v52 = vld [vmem:[#allocation28 + $0xf0] sm:$0xff]  ;;  %v11343_v28 = vld [vmem:[#allocation28 + $0xc8] sm:$0xff] }
0x1edc   :  { %v11358_v10 = vld [vmem:[#allocation28 + $0xb8] sm:$0xff] }
0x1edd   :  { %8050 = vpow2.f32 %v7481_v29  ;;  %v11346_v29 = vld [vmem:[#allocation28 + $0xd8] sm:$0xff] }
0x1ede   :  { %8052 = vpow2.f32 %v7482_v49  ;;  %v11364_v49 = vld [vmem:[#allocation28 + $0xb0] sm:$0xff] }
0x1ee8   :  { %v8049_v51 = vpop.eup %8048 }
0x1ee9   :  { %v6241_v11 = vadd.f32 1.0, %v8049_v51  ;;  %v11370_v51 = vld [vmem:[#allocation28 + $0x98] sm:$0xff] }
0x1eea   :  { %v8051_v59 = vpop.eup %8050  ;;  %12327 = vst [vmem:[#allocation43_spill] sm:$0xff] %v11370_v51 }
0x1eeb   :  { %8054 = vrcp.f32 %v6241_v11  ;;  %v6247_v54 = vadd.f32 1.0, %v8051_v59  ;;  %v8053_v20 = vpop.eup %8052  ;;  %v11376_v11 = vld [vmem:[#allocation28 + $0x90] sm:$0xff]  ;;  %v11379_v59 = vld [vmem:[#allocation28 + $0x68] sm:$0xff] }
0x1eec   :  { %8056 = vtanh.f32 %v6236_v21  ;;  %v6254_v41 = vadd.f32 1.0, %v8053_v20  ;;  %v11373_v21 = vld [vmem:[#allocation28 + $0x80] sm:$0xff]  ;;  %12329 = vst [vmem:[#allocation68_spill] sm:$0xff] %v11376_v11  ;;  %12330 = vst [vmem:[#allocation69_spill] sm:$0xff] %v11379_v59 }
0x1eed   :  { %8058 = vrcp.f32 %v6247_v54  ;;  %12328 = vst [vmem:[#allocation70_spill] sm:$0xff] %v11373_v21  ;;  %v11382_v54 = vld [vmem:[#allocation28 + $0x78] sm:$0xff]  ;;  %v11385_v20 = vld [vmem:[#allocation28 + $0x60] sm:$0xff] }
0x1eee   :  { %8060 = vrcp.f32 %v6254_v41  ;;  %12331 = vst [vmem:[#allocation41_spill] sm:$0xff] %v11382_v54  ;;  %12332 = vst [vmem:[#allocation44_spill] sm:$0xff] %v11385_v20  ;;  %v11400_v41 = vld [vmem:[#allocation28 + $0x50] sm:$0xff] }
0x1eef   :  { %12337 = vst [vmem:[#allocation48_spill] sm:$0xff] %v11400_v41 }
0x1ef8   :  { %v8055_v50 = vpop.eup %8054 }
0x1ef9   :  { %v8057_v13 = vpop.eup %8056 }
0x1efa   :  { %v8059_v58 = vpop.eup %8058  ;;  %v6261_v17 = vmul.f32 %v8057_v13, %v8055_v50  ;;  %v11388_v50 = vld [vmem:[#allocation28 + $0x70] sm:$0xff]  ;;  %v11391_v13 = vld [vmem:[#allocation28 + $0x48] sm:$0xff] }
0x1efb   :  { %v6260_v55 = vmul.f32 %v8059_v58, %v6258_v56  ;;  %v8061_v62 = vpop.eup %8060  ;;  %12333 = vst [vmem:[#allocation40_spill] sm:$0xff] %v11388_v50  ;;  %12334 = vst [vmem:[#allocation45_spill] sm:$0xff] %v11391_v13  ;;  %v11394_v56 = vld [vmem:[#allocation28 + $0x58] sm:$0xff]  ;;  %v11397_v58 = vld [vmem:[#allocation28 + $0x40] sm:$0xff] }
0x1efc   :  { %12335 = vst [vmem:[#allocation46_spill] sm:$0xff] %v11394_v56  ;;  %12336 = vst [vmem:[#allocation47_spill] sm:$0xff] %v11397_v58 }
0x1efd   :  { %v11238_v18 = vadd.f32 %v6261_v17, %v6260_v55  ;;  %v11403_v17 = vld [vmem:[#allocation28 + $0x28] sm:$0xff]  ;;  %v11406_v55 = vld [vmem:[#allocation28 + $0x38] sm:$0xff] }
0x1efe   :  { %12338 = vst [vmem:[#allocation49_spill] sm:$0xff] %v11403_v17  ;;  %12339 = vst [vmem:[#allocation50_spill] sm:$0xff] %v11406_v55 }
0x1eff   :  { %8062 = vtanh.f32 %v11238_v18 }
0x1f0c   :  { %v8063_v15 = vpop.eup %8062 }
0x1f0d   :  { %v6264_v45 = vmul.f32 %v8063_v15, %v8061_v62  ;;  %v11409_v62 = vld [vmem:[#allocation28 + $0x20] sm:$0xff]  ;;  %v11412_v15 = vld [vmem:[#allocation28 + $0x30] sm:$0xff] }
0x1f0e   :  { %12340 = vst [vmem:[#allocation51_spill] sm:$0xff] %v11409_v62  ;;  %12341 = vst [vmem:[#allocation52_spill] sm:$0xff] %v11412_v15 }
0x1f0f   :  { %v6270_v38 = vrot.slane %v6264_v45, 6  ;;  %v11415_v45 = vld [vmem:[#allocation28 + $0x8] sm:$0xff] }
0x1f10   :  { %12342 = vst [vmem:[#allocation53_spill] sm:$0xff] %v11415_v45 }
0x1f11   :  { %6337 = vmatmul.mubr.f32.vlgmr.msra.gmra.mxu0 %v6270_v38  ;;  %6408 = vmatmul.mubr.f32.vlgmr.msra.gmra.mxu1 %v6270_v38  ;;  %v11418_v38 = vld [vmem:[#allocation28 + $0x18] sm:$0xff] }
0x1f12   :  { %6450 = vmatpush1.msra.mxu0 %v11241_v12  ;;  %6521 = vmatpush1.msra.mxu1 %v11244_v7  ;;  %12343 = vst [vmem:[#allocation54_spill] sm:$0xff] %v11418_v38 }
0x1f13   :  { %6451 = vmatprep.subr.mxu0 %v11247_v60  ;;  %6522 = vmatprep.subr.mxu1 %v11250_v32 }
0x1f14   :  { %6452 = vmatpush1.msra.mxu0 %v11253_v43  ;;  %6523 = vmatpush1.msra.mxu1 %v11256_v14 }
0x1f15   :  { %6453 = vmatprep.subr.mxu0 %v11259_v19  ;;  %6524 = vmatprep.subr.mxu1 %v11262_v37 }
0x1f16   :  { %6454 = vmatpush1.msra.mxu0 %v11265_v39  ;;  %6525 = vmatpush1.msra.mxu1 %v11268_v40 }
0x1f17   :  { %6455 = vmatprep.subr.mxu0 %v11271_v3  ;;  %6526 = vmatprep.subr.mxu1 %v11274_v46 }
0x1f18   :  { %6456 = vmatpush1.msra.mxu0 %v11277_v48  ;;  %6527 = vmatpush1.msra.mxu1 %v11280_v57 }
0x1f19   :  { %6457 = vmatprep.subr.mxu0 %v11283_v0  ;;  %6528 = vmatprep.subr.mxu1 %v11286_v33 }
0x1f1a   :  { %6458 = vmatpush1.msra.mxu0 %v11289_v61  ;;  %6529 = vmatpush1.msra.mxu1 %v11292_v47 }
0x1f1b   :  { %6459 = vmatprep.subr.mxu0 %v11295_v2  ;;  %6530 = vmatprep.subr.mxu1 %v11298_v1 }
0x1f1c   :  { %6460 = vmatpush1.msra.mxu0 %v11301_v25  ;;  %6531 = vmatpush1.msra.mxu1 %v11304_v4 }
0x1f1d   :  { %6461 = vmatprep.subr.mxu0 %v11307_v34  ;;  %6532 = vmatprep.subr.mxu1 %v11310_v5 }
0x1f1e   :  { %6462 = vmatpush1.msra.mxu0 %v11313_v26  ;;  %6533 = vmatpush1.msra.mxu1 %v11316_v23 }
0x1f1f   :  { %6463 = vmatprep.subr.mxu0 %v11319_v9  ;;  %6534 = vmatprep.subr.mxu1 %v11322_v63 }
0x1f20   :  { %6464 = vmatpush1.msra.mxu0 %v11325_v35  ;;  %6535 = vmatpush1.msra.mxu1 %v11328_v22 }
0x1f21   :  { %6465 = vmatprep.subr.mxu0 %v11331_v44  ;;  %6536 = vmatprep.subr.mxu1 %v11334_v24 }
0x1f22   :  { %6466 = vmatpush1.msra.mxu0 %v11337_v27  ;;  %6537 = vmatpush1.msra.mxu1 %v11340_v52 }
0x1f23   :  { %6467 = vmatprep.subr.mxu0 %v11343_v28  ;;  %6538 = vmatprep.subr.mxu1 %v11346_v29 }
0x1f24   :  { %6468 = vmatpush1.msra.mxu0 %v11349_v53  ;;  %6539 = vmatpush1.msra.mxu1 %v11352_v30 }
0x1f25   :  { %6469 = vmatprep.subr.mxu0 %v11355_v31  ;;  %6540 = vmatprep.subr.mxu1 %v11358_v10 }
0x1f26   :  { %6470 = vmatpush1.msra.mxu0 %v11361_v16  ;;  %6541 = vmatpush1.msra.mxu1 %v11364_v49 }
0x1f27   :  { %6471 = vmatprep.subr.mxu0 %v11367_v42  ;;  %6542 = vmatprep.subr.mxu1 %v11370_v51 }
0x1f28   :  { %6472 = vmatpush1.msra.mxu0 %v11373_v21  ;;  %6543 = vmatpush1.msra.mxu1 %v11376_v11 }
0x1f29   :  { %6473 = vmatprep.subr.mxu0 %v11379_v59  ;;  %6544 = vmatprep.subr.mxu1 %v11382_v54 }
0x1f2a   :  { %6474 = vmatpush1.msra.mxu0 %v11385_v20  ;;  %6545 = vmatpush1.msra.mxu1 %v11388_v50  ;;  %v6268_v20 = vld [vmem:[#allocation2 + $0x38] sm:$0x3] }
0x1f2b   :  { %6475 = vmatprep.subr.mxu0 %v11391_v13  ;;  %6546 = vmatprep.subr.mxu1 %v11394_v56 }
0x1f2c   :  { %6476 = vmatpush1.msra.mxu0 %v11397_v58  ;;  %6547 = vmatpush1.msra.mxu1 %v11400_v41 }
0x1f2d   :  { %6477 = vmatprep.subr.mxu0 %v11403_v17  ;;  %6548 = vmatprep.subr.mxu1 %v11406_v55  ;;  %v11421_v17 = vld [vmem:[#allocation28] sm:$0xff]  ;;  %v11425_v55 = vld [vmem:[#allocation28 + $0x10] sm:$0xff] }
0x1f2e   :  { %6478 = vmatpush1.msra.mxu0 %v11409_v62  ;;  %6549 = vmatpush1.msra.mxu1 %v11412_v15  ;;  %12344 = vst [vmem:[#allocation55_spill] sm:$0xff] %v11421_v17  ;;  %12345 = vst [vmem:[#allocation56_spill] sm:$0xff] %v11425_v55 }
0x1f2f   :  { %6479 = vmatprep.subr.mxu0 %v11415_v45  ;;  %6550 = vmatprep.subr.mxu1 %v11418_v38  ;;  %v6265_v45 = vld [vmem:[#allocation2 + $0x8] sm:$0x3]  ;;  %v6266_v38 = vld [vmem:[#allocation2 + $0x20] sm:$0x3] }
0x1f30   :  { %6480 = vmatpush1.msra.mxu0 %v11421_v17  ;;  %6513 = vmatprep.mubr.f32.mxu0 %v12322_v36 }
0x1f31   :  { %6551 = vmatpush1.msra.mxu1 %v11425_v55  ;;  %6584 = vmatprep.mubr.f32.mxu1 %v12322_v36  ;;  %v6267_v36 = vld [vmem:[#allocation2 + $0x28] sm:$0x3] }
0x1f32   :  { %6641 = vmatprep.subr.mxu0 %v11231_v6  ;;  %6712 = vmatprep.subr.mxu1 %v11234_v8 }
0x1fd1   :  { %v6338_v15 = vpop.f32.mrf.mxu0  ;;  %v6409_v17 = vpop.f32.mrf.mxu1 }
0x1fd2   :  { %v6414_v62 = vadd.f32 %v6338_v15, %v6265_v45  ;;  %v6416_v6 = vadd.f32 %v6409_v17, %v6267_v36  ;;  %v12350_v17 = vld [vmem:[#allocation40_spill] sm:$0xff] }
0x1fd3   :  { %v6340_v41 = vpop.f32.mrf.mxu0  ;;  %v6411_v50 = vpop.f32.mrf.mxu1 }
0x1fd4   :  { %v7483_v58 = vmul.f32 -1.442695, %v6414_v62  ;;  %v6415_v56 = vadd.f32 %v6340_v41, %v6266_v38  ;;  %v6417_v55 = vadd.f32 %v6411_v50, %v6268_v20 }
0x1fd6   :  { %8064 = vpow2.f32 %v7483_v58  ;;  %v7484_v13 = vmul.f32 -1.442695, %v6415_v56  ;;  %v7485_v54 = vmul.f32 -1.442695, %v6417_v55  ;;  %v6438_v56 = vrot.slane %v11238_v18, 6  ;;  %v12348_v18 = vld [vmem:[#allocation41_spill] sm:$0xff] }
0x1fd7   :  { %v12351_v55 = vld [vmem:[#allocation45_spill] sm:$0xff] }
0x1fd8   :  { %8066 = vpow2.f32 %v7484_v13 }
0x1fd9   :  { %8068 = vpow2.f32 %v7485_v54  ;;  %v12349_v54 = vld [vmem:[#allocation44_spill] sm:$0xff] }
0x1fe3   :  { %v8065_v59 = vpop.eup %8064 }
0x1fe4   :  { %v6421_v11 = vadd.f32 1.0, %v8065_v59 }
0x1fe5   :  { %v8067_v8 = vpop.eup %8066 }
0x1fe6   :  { %8070 = vrcp.f32 %v6421_v11  ;;  %v6427_v15 = vadd.f32 1.0, %v8067_v8  ;;  %v8069_v62 = vpop.eup %8068  ;;  %v12347_v8 = vld [vmem:[#allocation69_spill] sm:$0xff] }
0x1fe7   :  { %8072 = vtanh.f32 %v6416_v6  ;;  %v6434_v45 = vadd.f32 1.0, %v8069_v62  ;;  %v12346_v6 = vld [vmem:[#allocation68_spill] sm:$0xff]  ;;  %v12353_v62 = vld [vmem:[#allocation47_spill] sm:$0xff] }
0x1fe8   :  { %8074 = vrcp.f32 %v6427_v15  ;;  %v12352_v15 = vld [vmem:[#allocation46_spill] sm:$0xff] }
0x1fe9   :  { %8076 = vrcp.f32 %v6434_v45  ;;  %v12358_v45 = vld [vmem:[#allocation52_spill] sm:$0xff] }
0x1ff3   :  { %v8071_v41 = vpop.eup %8070 }
0x1ff4   :  { %v8073_v58 = vpop.eup %8072 }
0x1ff5   :  { %v8075_v13 = vpop.eup %8074  ;;  %v6441_v38 = vmul.f32 %v8073_v58, %v8071_v41  ;;  %v12354_v41 = vld [vmem:[#allocation48_spill] sm:$0xff]  ;;  %v12355_v58 = vld [vmem:[#allocation49_spill] sm:$0xff] }
0x1ff6   :  { %v6440_v20 = vmul.f32 %v8075_v13, %v6438_v56  ;;  %v8077_v36 = vpop.eup %8076  ;;  %v12356_v56 = vld [vmem:[#allocation50_spill] sm:$0xff]  ;;  %v12357_v13 = vld [vmem:[#allocation51_spill] sm:$0xff] }
0x1ff8   :  { %v11432_v50 = vadd.f32 %v6441_v38, %v6440_v20  ;;  %v12359_v38 = vld [vmem:[#allocation53_spill] sm:$0xff]  ;;  %v12360_v20 = vld [vmem:[#allocation54_spill] sm:$0xff] }
0x1ffa   :  { %8078 = vtanh.f32 %v11432_v50 }
0x2007   :  { %v8079_v59 = vpop.eup %8078 }
0x2008   :  { %v6444_v11 = vmul.f32 %v8079_v59, %v8077_v36  ;;  %v12361_v36 = vld [vmem:[#allocation55_spill] sm:$0xff]  ;;  %v12362_v59 = vmov 0.0  }
0x200a   :  { %6514 = vmatmul.mubr.f32.vlgmr.msra.gmra.mxu0 %v6444_v11  ;;  %6585 = vmatmul.mubr.f32.vlgmr.msra.gmra.mxu1 %v6444_v11  ;;  %v12363_v11 = vld [vmem:[#allocation56_spill] sm:$0xff] }
0x200b   :  { %6642 = vmatpush1.msra.mxu0 %v11241_v12  ;;  %6713 = vmatpush1.msra.mxu1 %v11244_v7 }
0x200c   :  { %6643 = vmatprep.subr.mxu0 %v11247_v60  ;;  %6714 = vmatprep.subr.mxu1 %v11250_v32 }
0x200d   :  { %6644 = vmatpush1.msra.mxu0 %v11253_v43  ;;  %6715 = vmatpush1.msra.mxu1 %v11256_v14 }
0x200e   :  { %6645 = vmatprep.subr.mxu0 %v11259_v19  ;;  %6716 = vmatprep.subr.mxu1 %v11262_v37 }
0x200f   :  { %6646 = vmatpush1.msra.mxu0 %v11265_v39  ;;  %6717 = vmatpush1.msra.mxu1 %v11268_v40 }
0x2010   :  { %6647 = vmatprep.subr.mxu0 %v11271_v3  ;;  %6718 = vmatprep.subr.mxu1 %v11274_v46 }
0x2011   :  { %6648 = vmatpush1.msra.mxu0 %v11277_v48  ;;  %6719 = vmatpush1.msra.mxu1 %v11280_v57 }
0x2012   :  { %6649 = vmatprep.subr.mxu0 %v11283_v0  ;;  %6720 = vmatprep.subr.mxu1 %v11286_v33 }
0x2013   :  { %6650 = vmatpush1.msra.mxu0 %v11289_v61  ;;  %6721 = vmatpush1.msra.mxu1 %v11292_v47 }
0x2014   :  { %6651 = vmatprep.subr.mxu0 %v11295_v2  ;;  %6722 = vmatprep.subr.mxu1 %v11298_v1 }
0x2015   :  { %6652 = vmatpush1.msra.mxu0 %v11301_v25  ;;  %6723 = vmatpush1.msra.mxu1 %v11304_v4 }
0x2016   :  { %6653 = vmatprep.subr.mxu0 %v11307_v34  ;;  %6724 = vmatprep.subr.mxu1 %v11310_v5 }
0x2017   :  { %6654 = vmatpush1.msra.mxu0 %v11313_v26  ;;  %6725 = vmatpush1.msra.mxu1 %v11316_v23 }
0x2018   :  { %6655 = vmatprep.subr.mxu0 %v11319_v9  ;;  %6726 = vmatprep.subr.mxu1 %v11322_v63 }
0x2019   :  { %6656 = vmatpush1.msra.mxu0 %v11325_v35  ;;  %6727 = vmatpush1.msra.mxu1 %v11328_v22 }
0x201a   :  { %6657 = vmatprep.subr.mxu0 %v11331_v44  ;;  %6728 = vmatprep.subr.mxu1 %v11334_v24 }
0x201b   :  { %6658 = vmatpush1.msra.mxu0 %v11337_v27  ;;  %6729 = vmatpush1.msra.mxu1 %v11340_v52 }
0x201c   :  { %6659 = vmatprep.subr.mxu0 %v11343_v28  ;;  %6730 = vmatprep.subr.mxu1 %v11346_v29 }
0x201d   :  { %6660 = vmatpush1.msra.mxu0 %v11349_v53  ;;  %6731 = vmatpush1.msra.mxu1 %v11352_v30 }
0x201e   :  { %6661 = vmatprep.subr.mxu0 %v11355_v31  ;;  %6732 = vmatprep.subr.mxu1 %v11358_v10 }
0x201f   :  { %6662 = vmatpush1.msra.mxu0 %v11361_v16  ;;  %6733 = vmatpush1.msra.mxu1 %v11364_v49 }
0x2020   :  { %6663 = vmatprep.subr.mxu0 %v11367_v42  ;;  %6734 = vmatprep.subr.mxu1 %v11370_v51 }
0x2021   :  { %6664 = vmatpush1.msra.mxu0 %v11373_v21  ;;  %6735 = vmatpush1.msra.mxu1 %v12346_v6 }
0x2022   :  { %6665 = vmatprep.subr.mxu0 %v12347_v8  ;;  %6736 = vmatprep.subr.mxu1 %v12348_v18 }
0x2023   :  { %6666 = vmatpush1.msra.mxu0 %v12349_v54  ;;  %6737 = vmatpush1.msra.mxu1 %v12350_v17 }
0x2024   :  { %6667 = vmatprep.subr.mxu0 %v12351_v55  ;;  %6738 = vmatprep.subr.mxu1 %v12352_v15 }
0x2025   :  { %6668 = vmatpush1.msra.mxu0 %v12353_v62  ;;  %6739 = vmatpush1.msra.mxu1 %v12354_v41  ;;  %v12364_v41 = vld [vmem:[#allocation62_spill] sm:$0xff] }
0x2026   :  { %6669 = vmatprep.subr.mxu0 %v12355_v58  ;;  %6740 = vmatprep.subr.mxu1 %v12356_v56  ;;  %v12365_v58 = vld [vmem:[#allocation63_spill] sm:$0xff]  ;;  %v6445_v62 = vld [vmem:[#allocation2 + $0x8] sm:$0xc] }
0x2027   :  { %6670 = vmatpush1.msra.mxu0 %v12357_v13  ;;  %6741 = vmatpush1.msra.mxu1 %v12358_v45 }
0x2028   :  { %6671 = vmatprep.subr.mxu0 %v12359_v38  ;;  %6742 = vmatprep.subr.mxu1 %v12360_v20  ;;  %v6446_v20 = vld [vmem:[#allocation2 + $0x20] sm:$0xc] }
0x2029   :  { %6672 = vmatpush1.msra.mxu0 %v12361_v36  ;;  %6705 = vmatprep.mubr.f32.mxu0 %v12362_v59 }
0x202a   :  { %6743 = vmatpush1.msra.mxu1 %v12363_v11  ;;  %6776 = vmatprep.mubr.f32.mxu1 %v12362_v59  ;;  %v6448_v59 = vld [vmem:[#allocation2 + $0x38] sm:$0xc] }
0x202b   :  { %6833 = vmatprep.subr.mxu0 %v12364_v41  ;;  %6904 = vmatprep.subr.mxu1 %v12365_v58  ;;  %v6447_v58 = vld [vmem:[#allocation2 + $0x28] sm:$0xc] }
0x20ca   :  { %v6515_v56 = vpop.f32.mrf.mxu0  ;;  %v6586_v38 = vpop.f32.mrf.mxu1 }
0x20cb   :  { %v6595_v13 = vrot.slane %v6515_v56, 6  ;;  %v6597_v41 = vrot.slane %v6586_v38, 6 }
0x20cc   :  { %v6517_v45 = vpop.f32.mrf.mxu0  ;;  %v6588_v18 = vpop.f32.mrf.mxu1 }
0x20cd   :  { %v6603_v15 = vadd.f32 %v6595_v13, %v6445_v62  ;;  %v6596_v55 = vrot.slane %v6517_v45, 6  ;;  %v6598_v11 = vrot.slane %v6588_v18, 6  ;;  %v6605_v56 = vadd.f32 %v6597_v41, %v6447_v58 }
0x20cf   :  { %v7486_v17 = vmul.f32 -1.442695, %v6603_v15  ;;  %v6604_v36 = vadd.f32 %v6596_v55, %v6446_v20  ;;  %v6606_v8 = vadd.f32 %v6598_v11, %v6448_v59 }
0x20d1   :  { %8080 = vpow2.f32 %v7486_v17  ;;  %v7487_v54 = vmul.f32 -1.442695, %v6604_v36  ;;  %v7488_v6 = vmul.f32 -1.442695, %v6606_v8 }
0x20d3   :  { %8082 = vpow2.f32 %v7487_v54  ;;  %v6627_v54 = vrot.slane %v11432_v50, 6 }
0x20d4   :  { %8084 = vpow2.f32 %v7488_v6 }
0x20de   :  { %v8081_v21 = vpop.eup %8080 }
0x20df   :  { %v6610_v51 = vadd.f32 1.0, %v8081_v21 }
0x20e0   :  { %v8083_v42 = vpop.eup %8082 }
0x20e1   :  { %8086 = vrcp.f32 %v6610_v51  ;;  %v6616_v62 = vadd.f32 1.0, %v8083_v42  ;;  %v8085_v55 = vpop.eup %8084 }
0x20e2   :  { %8088 = vtanh.f32 %v6605_v56  ;;  %v6623_v13 = vadd.f32 1.0, %v8085_v55 }
0x20e3   :  { %8090 = vrcp.f32 %v6616_v62 }
0x20e4   :  { %8092 = vrcp.f32 %v6623_v13 }
0x20ee   :  { %v8087_v17 = vpop.eup %8086 }
0x20ef   :  { %v8089_v15 = vpop.eup %8088 }
0x20f0   :  { %v8091_v18 = vpop.eup %8090  ;;  %v6630_v45 = vmul.f32 %v8089_v15, %v8087_v17 }
0x20f1   :  { %v6629_v38 = vmul.f32 %v8091_v18, %v6627_v54  ;;  %v8093_v21 = vpop.eup %8092 }
0x20f3   :  { %v11502_v8 = vadd.f32 %v6630_v45, %v6629_v38 }
0x20f5   :  { %8094 = vtanh.f32 %v11502_v8  ;;  %v6819_v56 = vrot.slane %v11502_v8, 6 }
0x2102   :  { %v8095_v6 = vpop.eup %8094 }
0x2103   :  { %v6633_v51 = vmul.f32 %v8095_v6, %v8093_v21  ;;  %v7078_v21 = vld [vmem:[#allocation30 + $0x1e0] sm:$0xff]  ;;  %v7080_v6 = vld [vmem:[#allocation30 + $0x1f0] sm:$0xff] }
0x2105   :  { %v6639_v42 = vrot.slane %v6633_v51, 2  ;;  %v7075_v51 = vld [vmem:[#allocation30 + $0x1c8] sm:$0xff] }
0x2107   :  { %6706 = vmatmul.mubr.f32.vlgmr.msra.gmra.mxu0 %v6639_v42  ;;  %6777 = vmatmul.mubr.f32.vlgmr.msra.gmra.mxu1 %v6639_v42  ;;  %v8336_v42 = vld [vmem:[#allocation3 + $0x18] sm:$0xff] }
0x2108   :  { %6834 = vmatpush1.msra.mxu0 %v11241_v12  ;;  %6905 = vmatpush1.msra.mxu1 %v11244_v7  ;;  %v12366_v12 = vld [vmem:[#allocation42_spill] sm:$0xff]  ;;  %v12367_v7 = vld [vmem:[#allocation43_spill] sm:$0xff]  ;;  %v7171_v8 = vrot.slane %v8336_v42, 6  ;;  %v7142_v42 = vld [vmem:[#allocation30 + $0x3e0] sm:$0xff] }
0x2109   :  { %6835 = vmatprep.subr.mxu0 %v11247_v60  ;;  %6906 = vmatprep.subr.mxu1 %v11250_v32  ;;  %v12368_v60 = vld [vmem:[#allocation70_spill] sm:$0xff]  ;;  %v12369_v32 = vld [vmem:[#allocation68_spill] sm:$0xff] }
0x210a   :  { %6836 = vmatpush1.msra.mxu0 %v11253_v43  ;;  %6907 = vmatpush1.msra.mxu1 %v11256_v14  ;;  %v12370_v43 = vld [vmem:[#allocation69_spill] sm:$0xff] }
0x210b   :  { %6837 = vmatprep.subr.mxu0 %v11259_v19  ;;  %6908 = vmatprep.subr.mxu1 %v11262_v37  ;;  %v12371_v14 = vld [vmem:[#allocation41_spill] sm:$0xff]  ;;  %v12372_v19 = vld [vmem:[#allocation44_spill] sm:$0xff] }
0x210c   :  { %6838 = vmatpush1.msra.mxu0 %v11265_v39  ;;  %6909 = vmatpush1.msra.mxu1 %v11268_v40  ;;  %v12373_v37 = vld [vmem:[#allocation40_spill] sm:$0xff]  ;;  %v12374_v39 = vld [vmem:[#allocation45_spill] sm:$0xff]  ;;  %v12375_v40 = vld [vmem:[#allocation46_spill] sm:$0xff] }
0x210d   :  { %6839 = vmatprep.subr.mxu0 %v11271_v3  ;;  %6910 = vmatprep.subr.mxu1 %v11274_v46  ;;  %v12376_v3 = vld [vmem:[#allocation47_spill] sm:$0xff]  ;;  %v12377_v46 = vld [vmem:[#allocation48_spill] sm:$0xff] }
0x210e   :  { %6840 = vmatpush1.msra.mxu0 %v11277_v48  ;;  %6911 = vmatpush1.msra.mxu1 %v11280_v57  ;;  %v12378_v48 = vld [vmem:[#allocation49_spill] sm:$0xff]  ;;  %v12379_v57 = vld [vmem:[#allocation50_spill] sm:$0xff] }
0x210f   :  { %6841 = vmatprep.subr.mxu0 %v11283_v0  ;;  %6912 = vmatprep.subr.mxu1 %v11286_v33  ;;  %v12380_v0 = vld [vmem:[#allocation51_spill] sm:$0xff]  ;;  %v12381_v33 = vld [vmem:[#allocation52_spill] sm:$0xff] }
0x2110   :  { %6842 = vmatpush1.msra.mxu0 %v11289_v61  ;;  %6913 = vmatpush1.msra.mxu1 %v11292_v47  ;;  %v12382_v61 = vld [vmem:[#allocation53_spill] sm:$0xff]  ;;  %v12383_v47 = vld [vmem:[#allocation54_spill] sm:$0xff] }
0x2111   :  { %6843 = vmatprep.subr.mxu0 %v11295_v2  ;;  %6914 = vmatprep.subr.mxu1 %v11298_v1  ;;  %v12384_v2 = vld [vmem:[#allocation55_spill] sm:$0xff]  ;;  %v12385_v1 = vld [vmem:[#allocation56_spill] sm:$0xff] }
0x2112   :  { %6844 = vmatpush1.msra.mxu0 %v11301_v25  ;;  %6915 = vmatpush1.msra.mxu1 %v11304_v4  ;;  %v12386_v25 = vmov 0.0   ;;  %v7079_v4 = vld [vmem:[#allocation30 + $0x1e8] sm:$0xff] }
0x2113   :  { %6845 = vmatprep.subr.mxu0 %v11307_v34  ;;  %6916 = vmatprep.subr.mxu1 %v11310_v5  ;;  %v7081_v34 = vld [vmem:[#allocation30 + $0x1f8] sm:$0xff] }
0x2114   :  { %6846 = vmatpush1.msra.mxu0 %v11313_v26  ;;  %6917 = vmatpush1.msra.mxu1 %v11316_v23  ;;  %v6634_v23 = vld [vmem:[#allocation2 + $0x8] sm:$0x30] }
0x2115   :  { %6847 = vmatprep.subr.mxu0 %v11319_v9  ;;  %6918 = vmatprep.subr.mxu1 %v11322_v63 }
0x2116   :  { %6848 = vmatpush1.msra.mxu0 %v11325_v35  ;;  %6919 = vmatpush1.msra.mxu1 %v11328_v22 }
0x2117   :  { %6849 = vmatprep.subr.mxu0 %v11331_v44  ;;  %6920 = vmatprep.subr.mxu1 %v11334_v24  ;;  %v6635_v44 = vld [vmem:[#allocation2 + $0x20] sm:$0x30] }
0x2118   :  { %6850 = vmatpush1.msra.mxu0 %v11337_v27  ;;  %6921 = vmatpush1.msra.mxu1 %v11340_v52 }
0x2119   :  { %6851 = vmatprep.subr.mxu0 %v11343_v28  ;;  %6922 = vmatprep.subr.mxu1 %v11346_v29 }
0x211a   :  { %6852 = vmatpush1.msra.mxu0 %v11349_v53  ;;  %6923 = vmatpush1.msra.mxu1 %v11352_v30  ;;  %v6637_v53 = vld [vmem:[#allocation2 + $0x38] sm:$0x30] }
0x211b   :  { %6853 = vmatprep.subr.mxu0 %v11355_v31  ;;  %6924 = vmatprep.subr.mxu1 %v11358_v10 }
0x211c   :  { %6854 = vmatpush1.msra.mxu0 %v11361_v16  ;;  %6925 = vmatpush1.msra.mxu1 %v11364_v49  ;;  %v6636_v16 = vld [vmem:[#allocation2 + $0x28] sm:$0x30] }
0x211d   :  { %6855 = vmatprep.subr.mxu0 %v12366_v12  ;;  %6926 = vmatprep.subr.mxu1 %v12367_v7  ;;  %v7077_v12 = vld [vmem:[#allocation30 + $0x1d8] sm:$0xff]  ;;  %v7074_v7 = vld [vmem:[#allocation30 + $0x1c0] sm:$0xff] }
0x211e   :  { %6856 = vmatpush1.msra.mxu0 %v12368_v60  ;;  %6927 = vmatpush1.msra.mxu1 %v12369_v32  ;;  %v7076_v60 = vld [vmem:[#allocation30 + $0x1d0] sm:$0xff]  ;;  %v7071_v32 = vld [vmem:[#allocation30 + $0x1a8] sm:$0xff] }
0x211f   :  { %6857 = vmatprep.subr.mxu0 %v12370_v43  ;;  %6928 = vmatprep.subr.mxu1 %v12371_v14  ;;  %v7073_v43 = vld [vmem:[#allocation30 + $0x1b8] sm:$0xff]  ;;  %v7070_v14 = vld [vmem:[#allocation30 + $0x1a0] sm:$0xff] }
0x2120   :  { %6858 = vmatpush1.msra.mxu0 %v12372_v19  ;;  %6929 = vmatpush1.msra.mxu1 %v12373_v37  ;;  %v7072_v19 = vld [vmem:[#allocation30 + $0x1b0] sm:$0xff]  ;;  %v7067_v37 = vld [vmem:[#allocation30 + $0x188] sm:$0xff] }
0x2121   :  { %6859 = vmatprep.subr.mxu0 %v12374_v39  ;;  %6930 = vmatprep.subr.mxu1 %v12375_v40  ;;  %v7069_v39 = vld [vmem:[#allocation30 + $0x198] sm:$0xff]  ;;  %v7066_v40 = vld [vmem:[#allocation30 + $0x180] sm:$0xff] }
0x2122   :  { %6860 = vmatpush1.msra.mxu0 %v12376_v3  ;;  %6931 = vmatpush1.msra.mxu1 %v12377_v46  ;;  %v7068_v3 = vld [vmem:[#allocation30 + $0x190] sm:$0xff]  ;;  %v7063_v46 = vld [vmem:[#allocation30 + $0x168] sm:$0xff] }
0x2123   :  { %6861 = vmatprep.subr.mxu0 %v12378_v48  ;;  %6932 = vmatprep.subr.mxu1 %v12379_v57  ;;  %v7065_v48 = vld [vmem:[#allocation30 + $0x178] sm:$0xff]  ;;  %v7062_v57 = vld [vmem:[#allocation30 + $0x160] sm:$0xff] }
0x2124   :  { %6862 = vmatpush1.msra.mxu0 %v12380_v0  ;;  %6933 = vmatpush1.msra.mxu1 %v12381_v33  ;;  %v7064_v0 = vld [vmem:[#allocation30 + $0x170] sm:$0xff]  ;;  %v7059_v33 = vld [vmem:[#allocation30 + $0x148] sm:$0xff] }
0x2125   :  { %6863 = vmatprep.subr.mxu0 %v12382_v61  ;;  %6934 = vmatprep.subr.mxu1 %v12383_v47  ;;  %v7061_v61 = vld [vmem:[#allocation30 + $0x158] sm:$0xff]  ;;  %v7058_v47 = vld [vmem:[#allocation30 + $0x140] sm:$0xff] }
0x2126   :  { %6864 = vmatpush1.msra.mxu0 %v12384_v2  ;;  %6935 = vmatpush1.msra.mxu1 %v12385_v1  ;;  %v7060_v2 = vld [vmem:[#allocation30 + $0x150] sm:$0xff]  ;;  %v7055_v1 = vld [vmem:[#allocation30 + $0x128] sm:$0xff] }
0x2127   :  { %6897 = vmatprep.mubr.f32.mxu0 %v12386_v25  ;;  %6968 = vmatprep.mubr.f32.mxu1 %v12386_v25  ;;  %v7057_v25 = vld [vmem:[#allocation30 + $0x138] sm:$0xff] }
0x2128   :  { %7174 = vmatprep.subr.mxu0 %v7079_v4  ;;  %7245 = vmatprep.subr.mxu1 %v7081_v34  ;;  %v7054_v4 = vld [vmem:[#allocation30 + $0x120] sm:$0xff]  ;;  %v7056_v34 = vld [vmem:[#allocation30 + $0x130] sm:$0xff] }
0x21c7   :  { %v6707_v5 = vpop.f32.mrf.mxu0  ;;  %v6778_v35 = vpop.f32.mrf.mxu1 }
0x21c8   :  { %v6787_v26 = vrot.slane %v6707_v5, 4  ;;  %v6789_v31 = vrot.slane %v6778_v35, 4  ;;  %v7051_v5 = vld [vmem:[#allocation30 + $0x108] sm:$0xff]  ;;  %v7049_v35 = vld [vmem:[#allocation30 + $0xf8] sm:$0xff] }
0x21c9   :  { %v6709_v9 = vpop.f32.mrf.mxu0  ;;  %v6780_v28 = vpop.f32.mrf.mxu1 }
0x21ca   :  { %v6795_v63 = vadd.f32 %v6787_v26, %v6634_v23  ;;  %v6788_v22 = vrot.slane %v6709_v9, 4  ;;  %v6790_v29 = vrot.slane %v6780_v28, 4  ;;  %v6797_v50 = vadd.f32 %v6789_v31, %v6636_v16  ;;  %v7053_v26 = vld [vmem:[#allocation30 + $0x118] sm:$0xff]  ;;  %v7050_v23 = vld [vmem:[#allocation30 + $0x100] sm:$0xff]  ;;  %v7052_v9 = vld [vmem:[#allocation30 + $0x110] sm:$0xff] }
0x21cb   :  { %v7044_v28 = vld [vmem:[#allocation30 + $0xd0] sm:$0xff]  ;;  %v7037_v16 = vld [vmem:[#allocation30 + $0x98] sm:$0xff] }
0x21cc   :  { %v7489_v24 = vmul.f32 -1.442695, %v6795_v63  ;;  %v6796_v27 = vadd.f32 %v6788_v22, %v6635_v44  ;;  %v6798_v30 = vadd.f32 %v6790_v29, %v6637_v53  ;;  %v7047_v63 = vld [vmem:[#allocation30 + $0xe8] sm:$0xff]  ;;  %v7046_v22 = vld [vmem:[#allocation30 + $0xe0] sm:$0xff]  ;;  %v7048_v44 = vld [vmem:[#allocation30 + $0xf0] sm:$0xff] }
0x21cd   :  { %v7039_v29 = vld [vmem:[#allocation30 + $0xa8] sm:$0xff]  ;;  %v7041_v53 = vld [vmem:[#allocation30 + $0xb8] sm:$0xff]  ;;  %v7040_v31 = vld [vmem:[#allocation30 + $0xb0] sm:$0xff] }
0x21ce   :  { %8096 = vpow2.f32 %v7489_v24  ;;  %v7490_v52 = vmul.f32 -1.442695, %v6796_v27  ;;  %v7491_v10 = vmul.f32 -1.442695, %v6798_v30  ;;  %v7043_v24 = vld [vmem:[#allocation30 + $0xc8] sm:$0xff]  ;;  %v7045_v27 = vld [vmem:[#allocation30 + $0xd8] sm:$0xff] }
0x21cf   :  { %v7038_v30 = vld [vmem:[#allocation30 + $0xa0] sm:$0xff] }
0x21d0   :  { %8098 = vpow2.f32 %v7490_v52  ;;  %v7042_v52 = vld [vmem:[#allocation30 + $0xc0] sm:$0xff] }
0x21d1   :  { %8100 = vpow2.f32 %v7491_v10  ;;  %v7035_v10 = vld [vmem:[#allocation30 + $0x88] sm:$0xff] }
0x21db   :  { %v8097_v49 = vpop.eup %8096 }
0x21dc   :  { %v6802_v20 = vadd.f32 1.0, %v8097_v49  ;;  %v7034_v49 = vld [vmem:[#allocation30 + $0x80] sm:$0xff] }
0x21dd   :  { %v8099_v36 = vpop.eup %8098 }
0x21de   :  { %8102 = vrcp.f32 %v6802_v20  ;;  %v6808_v59 = vadd.f32 1.0, %v8099_v36  ;;  %v8101_v11 = vpop.eup %8100  ;;  %v7031_v20 = vld [vmem:[#allocation30 + $0x68] sm:$0xff]  ;;  %v7033_v36 = vld [vmem:[#allocation30 + $0x78] sm:$0xff] }
0x21df   :  { %8104 = vtanh.f32 %v6797_v50  ;;  %v6815_v55 = vadd.f32 1.0, %v8101_v11  ;;  %v7036_v50 = vld [vmem:[#allocation30 + $0x90] sm:$0xff] }
0x21e0   :  { %8106 = vrcp.f32 %v6808_v59  ;;  %v7030_v59 = vld [vmem:[#allocation30 + $0x60] sm:$0xff]  ;;  %v7032_v11 = vld [vmem:[#allocation30 + $0x70] sm:$0xff] }
0x21e1   :  { %8108 = vrcp.f32 %v6815_v55  ;;  %v7023_v55 = vld [vmem:[#allocation30 + $0x28] sm:$0xff] }
0x21eb   :  { %v8103_v41 = vpop.eup %8102 }
0x21ec   :  { %v8105_v58 = vpop.eup %8104 }
0x21ed   :  { %v8107_v62 = vpop.eup %8106  ;;  %v6822_v17 = vmul.f32 %v8105_v58, %v8103_v41  ;;  %v7027_v41 = vld [vmem:[#allocation30 + $0x48] sm:$0xff]  ;;  %v7029_v58 = vld [vmem:[#allocation30 + $0x58] sm:$0xff] }
0x21ee   :  { %v6821_v15 = vmul.f32 %v8107_v62, %v6819_v56  ;;  %v8109_v18 = vpop.eup %8108  ;;  %v7026_v56 = vld [vmem:[#allocation30 + $0x40] sm:$0xff]  ;;  %v7028_v62 = vld [vmem:[#allocation30 + $0x50] sm:$0xff] }
0x21f0   :  { %v11570_v54 = vadd.f32 %v6822_v17, %v6821_v15  ;;  %v7025_v17 = vld [vmem:[#allocation30 + $0x38] sm:$0xff]  ;;  %v7022_v15 = vld [vmem:[#allocation30 + $0x20] sm:$0xff] }
0x21f2   :  { %8110 = vtanh.f32 %v11570_v54 }
0x21ff   :  { %v8111_v13 = vpop.eup %8110 }
0x2200   :  { %v6825_v45 = vmul.f32 %v8111_v13, %v8109_v18  ;;  %v7024_v18 = vld [vmem:[#allocation30 + $0x30] sm:$0xff]  ;;  %v7019_v13 = vld [vmem:[#allocation30 + $0x8] sm:$0xff] }
0x2202   :  { %v6831_v38 = vrot.slane %v6825_v45, 4  ;;  %v7021_v45 = vld [vmem:[#allocation30 + $0x18] sm:$0xff] }
0x2204   :  { %6898 = vmatmul.mubr.f32.vlgmr.msra.gmra.mxu0 %v6831_v38  ;;  %6969 = vmatmul.mubr.f32.vlgmr.msra.gmra.mxu1 %v6831_v38  ;;  %v7018_v38 = vld [vmem:[#allocation30] sm:$0xff] }
0x2205   :  { %7175 = vmatpush1.msra.mxu0 %v7078_v21  ;;  %7246 = vmatpush1.msra.mxu1 %v7080_v6  ;;  %v7020_v21 = vld [vmem:[#allocation30 + $0x10] sm:$0xff]  ;;  %v7143_v6 = vld [vmem:[#allocation30 + $0x3e8] sm:$0xff] }
0x2206   :  { %7176 = vmatprep.subr.mxu0 %v7075_v51  ;;  %7238 = vmatprep.mubr.f32.mxu0 %v7171_v8  ;;  %v7145_v51 = vld [vmem:[#allocation30 + $0x3f8] sm:$0xff] }
0x2207   :  { %7247 = vmatprep.subr.mxu1 %v7077_v12  ;;  %7309 = vmatprep.mubr.f32.mxu1 %v7171_v8  ;;  %v7144_v8 = vld [vmem:[#allocation30 + $0x3f0] sm:$0xff]  ;;  %v7139_v12 = vld [vmem:[#allocation30 + $0x3c8] sm:$0xff] }
0x2208   :  { %7177 = vmatpush1.msra.mxu0 %v7074_v7  ;;  %7248 = vmatpush1.msra.mxu1 %v7076_v60  ;;  %v7141_v7 = vld [vmem:[#allocation30 + $0x3d8] sm:$0xff]  ;;  %v7138_v60 = vld [vmem:[#allocation30 + $0x3c0] sm:$0xff] }
0x2209   :  { %7178 = vmatprep.subr.mxu0 %v7071_v32  ;;  %7249 = vmatprep.subr.mxu1 %v7073_v43  ;;  %v7140_v32 = vld [vmem:[#allocation30 + $0x3d0] sm:$0xff]  ;;  %v7135_v43 = vld [vmem:[#allocation30 + $0x3a8] sm:$0xff] }
0x220a   :  { %7179 = vmatpush1.msra.mxu0 %v7070_v14  ;;  %7250 = vmatpush1.msra.mxu1 %v7072_v19  ;;  %v7137_v14 = vld [vmem:[#allocation30 + $0x3b8] sm:$0xff]  ;;  %v7134_v19 = vld [vmem:[#allocation30 + $0x3a0] sm:$0xff] }
0x220b   :  { %7180 = vmatprep.subr.mxu0 %v7067_v37  ;;  %7251 = vmatprep.subr.mxu1 %v7069_v39  ;;  %v7136_v37 = vld [vmem:[#allocation30 + $0x3b0] sm:$0xff]  ;;  %v7131_v39 = vld [vmem:[#allocation30 + $0x388] sm:$0xff] }
0x220c   :  { %7181 = vmatpush1.msra.mxu0 %v7066_v40  ;;  %7252 = vmatpush1.msra.mxu1 %v7068_v3  ;;  %v7133_v40 = vld [vmem:[#allocation30 + $0x398] sm:$0xff]  ;;  %v7130_v3 = vld [vmem:[#allocation30 + $0x380] sm:$0xff] }
0x220d   :  { %7182 = vmatprep.subr.mxu0 %v7063_v46  ;;  %7253 = vmatprep.subr.mxu1 %v7065_v48  ;;  %v7132_v46 = vld [vmem:[#allocation30 + $0x390] sm:$0xff]  ;;  %v7127_v48 = vld [vmem:[#allocation30 + $0x368] sm:$0xff] }
0x220e   :  { %7183 = vmatpush1.msra.mxu0 %v7062_v57  ;;  %7254 = vmatpush1.msra.mxu1 %v7064_v0  ;;  %v7129_v57 = vld [vmem:[#allocation30 + $0x378] sm:$0xff]  ;;  %v7126_v0 = vld [vmem:[#allocation30 + $0x360] sm:$0xff] }
0x220f   :  { %7184 = vmatprep.subr.mxu0 %v7059_v33  ;;  %7255 = vmatprep.subr.mxu1 %v7061_v61  ;;  %v7128_v33 = vld [vmem:[#allocation30 + $0x370] sm:$0xff]  ;;  %v7123_v61 = vld [vmem:[#allocation30 + $0x348] sm:$0xff] }
0x2210   :  { %7185 = vmatpush1.msra.mxu0 %v7058_v47  ;;  %7256 = vmatpush1.msra.mxu1 %v7060_v2  ;;  %v7125_v47 = vld [vmem:[#allocation30 + $0x358] sm:$0xff]  ;;  %v7122_v2 = vld [vmem:[#allocation30 + $0x340] sm:$0xff] }
0x2211   :  { %7186 = vmatprep.subr.mxu0 %v7055_v1  ;;  %7257 = vmatprep.subr.mxu1 %v7057_v25  ;;  %v7124_v1 = vld [vmem:[#allocation30 + $0x350] sm:$0xff]  ;;  %v7119_v25 = vld [vmem:[#allocation30 + $0x328] sm:$0xff] }
0x2212   :  { %7187 = vmatpush1.msra.mxu0 %v7054_v4  ;;  %7258 = vmatpush1.msra.mxu1 %v7056_v34  ;;  %v7121_v4 = vld [vmem:[#allocation30 + $0x338] sm:$0xff]  ;;  %v7118_v34 = vld [vmem:[#allocation30 + $0x320] sm:$0xff] }
0x2213   :  { %7188 = vmatprep.subr.mxu0 %v7051_v5  ;;  %7259 = vmatprep.subr.mxu1 %v7053_v26  ;;  %v7120_v5 = vld [vmem:[#allocation30 + $0x330] sm:$0xff]  ;;  %v7115_v26 = vld [vmem:[#allocation30 + $0x308] sm:$0xff] }
0x2214   :  { %7189 = vmatpush1.msra.mxu0 %v7050_v23  ;;  %7260 = vmatpush1.msra.mxu1 %v7052_v9  ;;  %v7117_v23 = vld [vmem:[#allocation30 + $0x318] sm:$0xff]  ;;  %v7114_v9 = vld [vmem:[#allocation30 + $0x300] sm:$0xff] }
0x2215   :  { %7190 = vmatprep.subr.mxu0 %v7047_v63  ;;  %7261 = vmatprep.subr.mxu1 %v7049_v35  ;;  %v7116_v63 = vld [vmem:[#allocation30 + $0x310] sm:$0xff]  ;;  %v7111_v35 = vld [vmem:[#allocation30 + $0x2e8] sm:$0xff] }
0x2216   :  { %7191 = vmatpush1.msra.mxu0 %v7046_v22  ;;  %7262 = vmatpush1.msra.mxu1 %v7048_v44  ;;  %v7113_v22 = vld [vmem:[#allocation30 + $0x2f8] sm:$0xff]  ;;  %v7110_v44 = vld [vmem:[#allocation30 + $0x2e0] sm:$0xff] }
0x2217   :  { %7192 = vmatprep.subr.mxu0 %v7043_v24  ;;  %7263 = vmatprep.subr.mxu1 %v7045_v27  ;;  %v7112_v24 = vld [vmem:[#allocation30 + $0x2f0] sm:$0xff]  ;;  %v7107_v27 = vld [vmem:[#allocation30 + $0x2c8] sm:$0xff] }
0x2218   :  { %7193 = vmatpush1.msra.mxu0 %v7042_v52  ;;  %7264 = vmatpush1.msra.mxu1 %v7044_v28  ;;  %v7109_v52 = vld [vmem:[#allocation30 + $0x2d8] sm:$0xff]  ;;  %v7106_v28 = vld [vmem:[#allocation30 + $0x2c0] sm:$0xff] }
0x2219   :  { %7194 = vmatprep.subr.mxu0 %v7039_v29  ;;  %7265 = vmatprep.subr.mxu1 %v7041_v53  ;;  %v7108_v29 = vld [vmem:[#allocation30 + $0x2d0] sm:$0xff]  ;;  %v7103_v53 = vld [vmem:[#allocation30 + $0x2a8] sm:$0xff] }
0x221a   :  { %7195 = vmatpush1.msra.mxu0 %v7038_v30  ;;  %7266 = vmatpush1.msra.mxu1 %v7040_v31  ;;  %v7105_v30 = vld [vmem:[#allocation30 + $0x2b8] sm:$0xff]  ;;  %v7102_v31 = vld [vmem:[#allocation30 + $0x2a0] sm:$0xff] }
0x221b   :  { %7196 = vmatprep.subr.mxu0 %v7035_v10  ;;  %7267 = vmatprep.subr.mxu1 %v7037_v16  ;;  %v7104_v10 = vld [vmem:[#allocation30 + $0x2b0] sm:$0xff]  ;;  %v7099_v16 = vld [vmem:[#allocation30 + $0x288] sm:$0xff] }
0x221c   :  { %7197 = vmatpush1.msra.mxu0 %v7034_v49  ;;  %7268 = vmatpush1.msra.mxu1 %v7036_v50  ;;  %v7101_v49 = vld [vmem:[#allocation30 + $0x298] sm:$0xff]  ;;  %v7098_v50 = vld [vmem:[#allocation30 + $0x280] sm:$0xff] }
0x221d   :  { %7198 = vmatprep.subr.mxu0 %v7031_v20  ;;  %7269 = vmatprep.subr.mxu1 %v7033_v36  ;;  %v7100_v20 = vld [vmem:[#allocation30 + $0x290] sm:$0xff]  ;;  %v7095_v36 = vld [vmem:[#allocation30 + $0x268] sm:$0xff] }
0x221e   :  { %7199 = vmatpush1.msra.mxu0 %v7030_v59  ;;  %7270 = vmatpush1.msra.mxu1 %v7032_v11  ;;  %v7097_v59 = vld [vmem:[#allocation30 + $0x278] sm:$0xff]  ;;  %v7094_v11 = vld [vmem:[#allocation30 + $0x260] sm:$0xff] }
0x221f   :  { %7200 = vmatprep.subr.mxu0 %v7027_v41  ;;  %7271 = vmatprep.subr.mxu1 %v7029_v58  ;;  %v7096_v41 = vld [vmem:[#allocation30 + $0x270] sm:$0xff]  ;;  %v7091_v58 = vld [vmem:[#allocation30 + $0x248] sm:$0xff] }
0x2220   :  { %7201 = vmatpush1.msra.mxu0 %v7026_v56  ;;  %7272 = vmatpush1.msra.mxu1 %v7028_v62  ;;  %v7093_v56 = vld [vmem:[#allocation30 + $0x258] sm:$0xff]  ;;  %v7090_v62 = vld [vmem:[#allocation30 + $0x240] sm:$0xff] }
0x2221   :  { %7202 = vmatprep.subr.mxu0 %v7023_v55  ;;  %7273 = vmatprep.subr.mxu1 %v7025_v17  ;;  %v7092_v55 = vld [vmem:[#allocation30 + $0x250] sm:$0xff]  ;;  %v7087_v17 = vld [vmem:[#allocation30 + $0x228] sm:$0xff] }
0x2222   :  { %7203 = vmatpush1.msra.mxu0 %v7022_v15  ;;  %7274 = vmatpush1.msra.mxu1 %v7024_v18  ;;  %v7089_v15 = vld [vmem:[#allocation30 + $0x238] sm:$0xff]  ;;  %v7086_v18 = vld [vmem:[#allocation30 + $0x220] sm:$0xff] }
0x2223   :  { %7204 = vmatprep.subr.mxu0 %v7019_v13  ;;  %7275 = vmatprep.subr.mxu1 %v7021_v45  ;;  %v7088_v13 = vld [vmem:[#allocation30 + $0x230] sm:$0xff]  ;;  %v7083_v45 = vld [vmem:[#allocation30 + $0x208] sm:$0xff] }
0x2224   :  { %7205 = vmatpush1.msra.mxu0 %v7018_v38  ;;  %7276 = vmatpush1.msra.mxu1 %v7020_v21  ;;  %v7085_v38 = vld [vmem:[#allocation30 + $0x218] sm:$0xff]  ;;  %v7082_v21 = vld [vmem:[#allocation30 + $0x200] sm:$0xff] }
0x2225   :  { %7206 = vmatprep.subr.mxu0 %v7143_v6  ;;  %7277 = vmatprep.subr.mxu1 %v7145_v51  ;;  %v7084_v6 = vld [vmem:[#allocation30 + $0x210] sm:$0xff] }
0x2226   :  { %7207 = vmatpush2.msra.mxu0 %v7142_v42  ;;  %7278 = vmatpush2.msra.mxu1 %v7144_v8  ;;  %v8337_v51 = vld [vmem:[#allocation3 + $0x8] sm:$0xff] }
0x2227   :  { %7208 = vmatprep.subr.mxu0 %v7139_v12  ;;  %7279 = vmatprep.subr.mxu1 %v7141_v7  ;;  %v7170_v42 = vrot.slane %v8337_v51, 6 }
0x2228   :  { %7209 = vmatpush2.msra.mxu0 %v7138_v60  ;;  %7280 = vmatpush2.msra.mxu1 %v7140_v32  ;;  %v6827_v32 = vld [vmem:[#allocation2 + $0x20] sm:$0xc0] }
0x2229   :  { %7210 = vmatprep.subr.mxu0 %v7135_v43  ;;  %7281 = vmatprep.subr.mxu1 %v7137_v14  ;;  %v6826_v14 = vld [vmem:[#allocation2 + $0x8] sm:$0xc0] }
0x222a   :  { %7211 = vmatpush2.msra.mxu0 %v7134_v19  ;;  %7282 = vmatpush2.msra.mxu1 %v7136_v37 }
0x222b   :  { %7212 = vmatprep.subr.mxu0 %v7131_v39  ;;  %7283 = vmatprep.subr.mxu1 %v7133_v40  ;;  %v7146_v40 = vld [vmem:[%s11609_s20] sm:$0xf] }
0x222c   :  { %7213 = vmatpush2.msra.mxu0 %v7130_v3  ;;  %7284 = vmatpush2.msra.mxu1 %v7132_v46  ;;  %v12387_v3 = vld [vmem:[#allocation64_spill] sm:$0xff] }
0x222d   :  { %7214 = vmatprep.subr.mxu0 %v7127_v48  ;;  %7285 = vmatprep.subr.mxu1 %v7129_v57  ;;  %v7151_v46 = vrot.slane %v7146_v40, %v12387_v3  ;;  %v12388_v57 = vld [vmem:[#allocation66_spill] sm:$0xff] }
0x222e   :  { %7215 = vmatpush2.msra.mxu0 %v7126_v0  ;;  %7286 = vmatpush2.msra.mxu1 %v7128_v33  ;;  %v7155_v0 = vrot.slane %v7146_v40, %v12388_v57 }
0x222f   :  { %7216 = vmatprep.subr.mxu0 %v7123_v61  ;;  %7287 = vmatprep.subr.mxu1 %v7125_v47 }
0x2230   :  { %7217 = vmatpush2.msra.mxu0 %v7122_v2  ;;  %7288 = vmatpush2.msra.mxu1 %v7124_v1 }
0x2231   :  { %7218 = vmatprep.subr.mxu0 %v7119_v25  ;;  %7289 = vmatprep.subr.mxu1 %v7121_v4 }
0x2232   :  { %7219 = vmatpush2.msra.mxu0 %v7118_v34  ;;  %7290 = vmatpush2.msra.mxu1 %v7120_v5 }
0x2233   :  { %7220 = vmatprep.subr.mxu0 %v7115_v26  ;;  %7291 = vmatprep.subr.mxu1 %v7117_v23 }
0x2234   :  { %7221 = vmatpush2.msra.mxu0 %v7114_v9  ;;  %7292 = vmatpush2.msra.mxu1 %v7116_v63  ;;  %v12389_v9 = vld [vmem:[#allocation67_spill] sm:$0xff] }
0x2235   :  { %7222 = vmatprep.subr.mxu0 %v7111_v35  ;;  %7293 = vmatprep.subr.mxu1 %v7113_v22  ;;  %v7163_v63 = vrot.slane %v7146_v40, %v12389_v9 }
0x2236   :  { %7223 = vmatpush2.msra.mxu0 %v7110_v44  ;;  %7294 = vmatpush2.msra.mxu1 %v7112_v24  ;;  %v6829_v24 = vld [vmem:[#allocation2 + $0x38] sm:$0xc0] }
0x2237   :  { %7224 = vmatprep.subr.mxu0 %v7107_v27  ;;  %7295 = vmatprep.subr.mxu1 %v7109_v52 }
0x2238   :  { %7225 = vmatpush2.msra.mxu0 %v7106_v28  ;;  %7296 = vmatpush2.msra.mxu1 %v7108_v29  ;;  %v6828_v28 = vld [vmem:[#allocation2 + $0x28] sm:$0xc0] }
0x2239   :  { %7226 = vmatprep.subr.mxu0 %v7103_v53  ;;  %7297 = vmatprep.subr.mxu1 %v7105_v30  ;;  %v12390_v30 = vld [vmem:[#allocation65_spill] sm:$0xff] }
0x223a   :  { %7227 = vmatpush2.msra.mxu0 %v7102_v31  ;;  %7298 = vmatpush2.msra.mxu1 %v7104_v10  ;;  %v7159_v31 = vrot.slane %v7146_v40, %v12390_v30 }
0x223b   :  { %7228 = vmatprep.subr.mxu0 %v7099_v16  ;;  %7299 = vmatprep.subr.mxu1 %v7101_v49 }
0x223c   :  { %7229 = vmatpush2.msra.mxu0 %v7098_v50  ;;  %7300 = vmatpush2.msra.mxu1 %v7100_v20 }
0x223d   :  { %7230 = vmatprep.subr.mxu0 %v7095_v36  ;;  %7301 = vmatprep.subr.mxu1 %v7097_v59 }
0x223e   :  { %7231 = vmatpush2.msra.mxu0 %v7094_v11  ;;  %7302 = vmatpush2.msra.mxu1 %v7096_v41  ;;  %v7011_v41 = vrot.slane %v11570_v54, 6 }
0x223f   :  { %7232 = vmatprep.subr.mxu0 %v7091_v58  ;;  %7303 = vmatprep.subr.mxu1 %v7093_v56 }
0x2240   :  { %7233 = vmatpush2.msra.mxu0 %v7090_v62  ;;  %7304 = vmatpush2.msra.mxu1 %v7092_v55 }
0x2241   :  { %7234 = vmatprep.subr.mxu0 %v7087_v17  ;;  %7305 = vmatprep.subr.mxu1 %v7089_v15 }
0x2242   :  { %7235 = vmatpush2.msra.mxu0 %v7086_v18  ;;  %7306 = vmatpush2.msra.mxu1 %v7088_v13 }
0x2243   :  { %7236 = vmatprep.subr.mxu0 %v7083_v45  ;;  %7307 = vmatprep.subr.mxu1 %v7085_v38 }
0x2244   :  { %7237 = vmatpush2.msra.mxu0 %v7082_v21  ;;  %7308 = vmatpush2.msra.mxu1 %v7084_v6 }
0x2245   :  { %7239 = vmatmul.mubr.f32.vlgmr.msra.gmra.mxu0 %v7170_v42  ;;  %7310 = vmatmul.mubr.f32.vlgmr.msra.gmra.mxu1 %v7170_v42 }
0x22c4   :  { %v6899_v8 = vpop.f32.mrf.mxu0  ;;  %v6970_v48 = vpop.f32.mrf.mxu1 }
0x22c5   :  { %v6979_v60 = vrot.slane %v6899_v8, 2  ;;  %v6981_v35 = vrot.slane %v6970_v48, 2 }
0x22c6   :  { %v6901_v12 = vpop.f32.mrf.mxu0  ;;  %v6972_v2 = vpop.f32.mrf.mxu1 }
0x22c7   :  { %v6980_v7 = vrot.slane %v6901_v12, 2  ;;  %v6987_v19 = vadd.f32 %v6979_v60, %v6826_v14  ;;  %v6982_v26 = vrot.slane %v6972_v2, 2  ;;  %v6989_v53 = vadd.f32 %v6981_v35, %v6828_v28  ;;  %v7343_v12 = vld [vmem:[%s11610_s21] sm:$0x3] }
0x22c9   :  { %v6988_v43 = vadd.f32 %v6980_v7, %v6827_v32  ;;  %v7492_v39 = vmul.f32 -1.442695, %v6987_v19  ;;  %v6990_v52 = vadd.f32 %v6982_v26, %v6829_v24 }
0x22cb   :  { %v7493_v37 = vmul.f32 -1.442695, %v6988_v43  ;;  %v7494_v10 = vmul.f32 -1.442695, %v6990_v52  ;;  %v7348_v43 = vrot.slane %v7343_v12, %v12387_v3 }
0x22cd   :  { %8112 = vpow2.f32 %v7493_v37  ;;  %v7352_v37 = vrot.slane %v7343_v12, %v12388_v57 }
0x22ce   :  { %8114 = vpow2.f32 %v7492_v39 }
0x22da   :  { %v8113_v5 = vpop.eup %8112 }
0x22db   :  { %v8115_v23 = vpop.eup %8114  ;;  %v7000_v22 = vadd.f32 1.0, %v8113_v5 }
0x22dc   :  { %v6994_v27 = vadd.f32 1.0, %v8115_v23 }
0x2305   :  { %v7240_v33 = vpop.f32.mrf.mxu0  ;;  %v7311_v4 = vpop.f32.mrf.mxu1 }
0x2306   :  { %v7241_v61 = vadd.f32 %v7240_v33, %v7151_v46  ;;  %v7312_v50 = vadd.f32 %v7311_v4, %v7159_v31 }
0x2307   :  { %v7242_v47 = vpop.f32.mrf.mxu0  ;;  %v7313_v44 = vpop.f32.mrf.mxu1 }
0x2308   :  { %v7495_v1 = vmul.f32 -1.442695, %v7241_v61  ;;  %v7243_v25 = vadd.f32 %v7242_v47, %v7155_v0  ;;  %v7314_v29 = vadd.f32 %v7313_v44, %v7163_v63  ;;  %v7498_v61 = vld [vmem:[#allocation4] ss:$0 sm:$0xff] }
0x230a   :  { %8116 = vpow2.f32 %v7495_v1  ;;  %v7496_v34 = vmul.f32 -1.442695, %v7243_v25  ;;  %v7497_v16 = vmul.f32 -1.442695, %v7314_v29 }
0x230c   :  { %8118 = vpow2.f32 %v7496_v34 }
0x230d   :  { %8120 = vrcp.f32 %v7000_v22 }
0x230e   :  { %8122 = vrcp.f32 %v6994_v27 }
0x230f   :  { %8124 = vtanh.f32 %v6989_v53 }
0x2310   :  { %8126 = vpow2.f32 %v7494_v10 }
0x2311   :  { %8128 = vpow2.f32 %v7497_v16 }
0x2317   :  { %v8117_v49 = vpop.eup %8116 }
0x2318   :  { %v7319_v20 = vadd.f32 1.0, %v8117_v49 }
0x2319   :  { %v8119_v36 = vpop.eup %8118 }
0x231a   :  { %8130 = vrcp.f32 %v7319_v20  ;;  %v7325_v59 = vadd.f32 1.0, %v8119_v36  ;;  %v8121_v11 = vpop.eup %8120 }
0x231b   :  { %8132 = vtanh.f32 %v7312_v50  ;;  %v8123_v58 = vpop.eup %8122  ;;  %v7013_v56 = vmul.f32 %v8121_v11, %v7011_v41 }
0x231c   :  { %8134 = vrcp.f32 %v7325_v59  ;;  %v8125_v62 = vpop.eup %8124 }
0x231d   :  { %v7014_v55 = vmul.f32 %v8125_v62, %v8123_v58  ;;  %v8127_v17 = vpop.eup %8126 }
0x231e   :  { %v8129_v15 = vpop.eup %8128  ;;  %v7007_v38 = vadd.f32 1.0, %v8127_v17 }
0x231f   :  { %v7015_v18 = vadd.f32 %v7014_v55, %v7013_v56  ;;  %v7332_v6 = vadd.f32 1.0, %v8129_v15 }
0x2321   :  { %8136 = vtanh.f32 %v7015_v18 }
0x2322   :  { %8138 = vrcp.f32 %v7007_v38 }
0x2323   :  { %8140 = vrcp.f32 %v7332_v6 }
0x2327   :  { %v8131_v13 = vpop.eup %8130 }
0x2328   :  { %v8133_v45 = vpop.eup %8132 }
0x2329   :  { %v8135_v21 = vpop.eup %8134  ;;  %v7336_v42 = vmul.f32 %v8133_v45, %v8131_v13 }
0x232a   :  { %v7335_v51 = vmul.f32 0.0, %v8135_v21 }
0x232c   :  { %v7337_v8 = vadd.f32 %v7336_v42, %v7335_v51 }
0x232e   :  { %8142 = vtanh.f32 %v7337_v8  ;;  %v8137_v54 = vpop.eup %8136 }
0x232f   :  { %v8139_v7 = vpop.eup %8138 }
0x2330   :  { %v8141_v60 = vpop.eup %8140  ;;  %v7017_v32 = vmul.f32 %v8139_v7, %v8137_v54 }
0x2332   :  { %v7355_v40 = vmul.f32 %v7348_v43, %v7017_v32 }
0x2334   :  { %v7358_v48 = vsel %vm7357_vm6, %v7355_v40, 0.0 }
0x233b   :  { %v8143_v14 = vpop.eup %8142 }
0x233c   :  { %v7339_v19 = vmul.f32 %v8143_v14, %v8141_v60 }
0x233e   :  { %v7341_v39 = vrot.slane %v7339_v19, 2 }
0x2340   :  { %v7356_v46 = vmul.f32 %v7352_v37, %v7341_v39 }
0x2342   :  { %v7359_v0 = vsel %vm7357_vm6, %v7356_v46, 0.0 }
0x2343   :  { %v7360_v33 = vadd.f32 %v7359_v0, %v7358_v48 }
0x2345   :  { %7361 = vadd.xlane.f32.xlu1 %v7360_v33 }
0x23ce   :  { %v7362_v47 = vpop.xlane.xlu1 %7361 }
0x23cf   :  { %v7370_v2 = vadd.f32 %v7498_v61, %v7362_v47 }
0x23d1   :  { %7372 = vst.msk [vmem:[%s11612_s23 - $0x6] sm:$0xc0] %vm7371_vm7, %v7370_v2 }
0x23d2   :  { %7377 = vsyncpa [#allocation6], 1 }
0x23d3   :  { %7378 = vsyncpa [#allocation8], 1 }
0x23d4   :  { %7379 = vsyncpa [#allocation11], 1 }
0x23d5   :  { %7380 = vsyncpa [#allocation14], 1 }
0x23d6   :  { %7381 = vsyncpa [#allocation17], 1 }
0x23d7   :  { %7382 = vsyncpa [#allocation20], 1 }
0x23d8   :  { %7383 = vsyncpa [#allocation23], 1 }
0x23d9   :  { %7384 = vsyncpa [#allocation26], 1 }
0x23da   :  { %7385 = vsyncpa [#allocation29], 1 }

</bundles_post_ra>
